<compile_context>
chip_gen: v7x
topology: tpu7x:2x2x1
jax: 0.10.0
libtpu: 0.0.40
codegen_flags: <defaults>
</compile_context>

<pallas_src>
import jax
import jax.numpy as jnp
import numpy as np
from jax.experimental import pallas as pl
from jax.experimental.pallas import tpu as pltpu

# ----------------------------- config -----------------------------
IN_CH = 1
NUM_CLASSES = 2
BASE = 8
DEPTH = 2
HW = 16
BATCH = 2

_VMEM = pl.BlockSpec(memory_space=pltpu.MemorySpace.VMEM)
_BN_FOLD = float((1.0 + 1e-5) ** -0.5)   # eval-mode BN with default running stats


# ------------------- host-side precomputed constants -------------------

def _tap_masks(N, H, W):
    """(9, M) {0,1} validity masks for the 9 conv taps (roll path)."""
    M = N * H * W
    m = np.arange(M)
    i = (m // W) % H
    j = m % W
    rows = []
    for dy in (-1, 0, 1):
        for dx in (-1, 0, 1):
            ok = (i + dy >= 0) & (i + dy < H) & (j + dx >= 0) & (j + dx < W)
            rows.append(ok.astype(np.float32))
    return jnp.asarray(np.stack(rows, 0))                       # (9, M) f32


def _tap_sel(N, H, W):
    """(9, M, M) shift+mask selection matrices for tiny levels (M % 128 != 0)."""
    M = N * H * W
    m = np.arange(M)
    n = m // (H * W)
    i = (m // W) % H
    j = m % W
    mats = []
    for dy in (-1, 0, 1):
        for dx in (-1, 0, 1):
            S = np.zeros((M, M), np.float32)
            ok = (i + dy >= 0) & (i + dy < H) & (j + dx >= 0) & (j + dx < W)
            src = n * (H * W) + (i + dy) * W + (j + dx)
            S[src[ok], m[ok]] = 1.0
            mats.append(S)
    return jnp.asarray(np.stack(mats, 0), dtype=jnp.bfloat16)   # (9, M, M)


def _pool_sel(N, H, W):
    """(M, M/4) selector of the top-left element of every 2x2 window."""
    Mi = N * H * W
    Ho, Wo = H // 2, W // 2
    Mo = N * Ho * Wo
    mo = np.arange(Mo)
    n = mo // (Ho * Wo)
    io = (mo // Wo) % Ho
    jo = mo % Wo
    S = np.zeros((Mi, Mo), np.float32)
    S[n * H * W + 2 * io * W + 2 * jo, mo] = 1.0
    return jnp.asarray(S, dtype=jnp.bfloat16)


def _up_sel(N, h, w):
    """(m, 4m) nearest-neighbour 2x upsample selector."""
    Mi = N * h * w
    H, W = 2 * h, 2 * w
    Mo = N * H * W
    mo = np.arange(Mo)
    n = mo // (H * W)
    i = (mo // W) % H
    j = mo % W
    S = np.zeros((Mi, Mo), np.float32)
    S[n * h * w + (i // 2) * w + (j // 2), mo] = 1.0
    return jnp.asarray(S, dtype=jnp.bfloat16)


def _bilin_1d(si, so):
    """1-D bilinear (half-pixel) interpolation matrix (si, so)."""
    B = np.zeros((si, so), np.float32)
    for o in range(so):
        src = (o + 0.5) * si / so - 0.5
        src = min(max(src, 0.0), si - 1.0)
        f0 = int(np.floor(src))
        f1 = min(f0 + 1, si - 1)
        fr = src - f0
        B[f0, o] += 1.0 - fr
        B[f1, o] += fr
    return B


def _resize_mat(N, hi, wi, ho, wo):
    """(N*hi*wi, N*ho*wo) bilinear resize matrix (block-diag over batch).

    torchvision Resize ~ bilinear, half-pixel centres; antialias is irrelevant
    for upscaling.  Weights are dyadic fractions -> exact in bf16.
    """
    R = np.kron(_bilin_1d(hi, ho), _bilin_1d(wi, wo))
    full = np.kron(np.eye(N, dtype=np.float32), R)
    return jnp.asarray(full, dtype=jnp.bfloat16)


def _se_mats(N, H, W):
    """GAP matrix (M, N) with 1/HW entries and expand matrix (N, M) with 1s."""
    hw = H * W
    M = N * hw
    E = np.zeros((N, M), np.float32)
    for n in range(N):
        E[n, n * hw:(n + 1) * hw] = 1.0
    return (jnp.asarray(E.T / hw, dtype=jnp.bfloat16),
            jnp.asarray(E, dtype=jnp.bfloat16))


def build_consts(N, hw, depth):
    tap, gap, ex = [], [], []
    pool, upsel, rsmat = [], [], []
    for lvl in range(depth + 1):
        H = hw >> lvl
        M = N * H * H
        tap.append(_tap_masks(N, H, H) if M % 128 == 0 else _tap_sel(N, H, H))
        g, e = _se_mats(N, H, H)
        gap.append(g)
        ex.append(e)
    for lvl in range(depth):
        H = hw >> lvl
        pool.append(_pool_sel(N, H, H))                    # level lvl   -> lvl+1
        upsel.append(_up_sel(N, H // 2, H // 2))           # level lvl+1 -> lvl
        rsmat.append(_resize_mat(N, H // 2, H // 2, H, H))  # level lvl+1 -> lvl
    return {"tap": tap, "gap": gap, "ex": ex,
            "pool": pool, "upsel": upsel, "rsmat": rsmat}


# ----------------------------- fused Pallas kernel -----------------------------

def _make_kernel(treedef, hw, depth):
    Hs = [hw >> l for l in range(depth + 1)]

    def kernel(*refs):
        o_ref = refs[-1]
        d = jax.tree_util.tree_unflatten(treedef, refs[:-1])
        c, p = d["c"], d["p"]

        def dotf(a, b):
            return jnp.dot(a, b, preferred_element_type=jnp.float32)

        def im2col(x, lvl):
            """(Cin, M) f32 -> (9*Cin, M) bf16 stack of the 9 shifted taps."""
            W = Hs[lvl]
            M = x.shape[1]
            if M % 128 == 0:                       # roll (XLU) + precomputed mask
                masks = c["tap"][lvl][...]         # (9, M) f32
                taps = []
                t = 0
                for dy in (-1, 0, 1):
                    for dx in (-1, 0, 1):
                        off = dy * W + dx
                        if off == 0:
                            taps.append(x)
                        else:
                            taps.append(pltpu.roll(x, shift=(-off) % M, axis=1)
                                        * masks[t:t + 1, :])
                        t += 1
            else:                                  # tiny level: selection matmuls
                sel = c["tap"][lvl]                # (9, M, M) bf16 ref
                xb = x.astype(jnp.bfloat16)
                taps = [dotf(xb, sel[t]) for t in range(9)]
            return jnp.concatenate(taps, axis=0).astype(jnp.bfloat16)

        def pool(x, lvl):
            """2x2 max pool (stride 2): level lvl -> lvl+1."""
            W = Hs[lvl]
            M = x.shape[1]
            if M % 128 == 0:
                a = jnp.maximum(x, pltpu.roll(x, shift=(M - 1) % M, axis=1))
                t = jnp.maximum(a, pltpu.roll(a, shift=(M - W) % M, axis=1))
            else:                                  # unused at this config
                sel = c["tap"][lvl]
                a = jnp.maximum(x, dotf(x.astype(jnp.bfloat16), sel[5]))
                t = jnp.maximum(a, dotf(a.astype(jnp.bfloat16), sel[7]))
            # The rolls wrap across row/image boundaries, but the stride-2
            # selector never picks a wrapped position (requires even H, W).
            return dotf(t.astype(jnp.bfloat16), c["pool"][lvl][...])

        def se(h, pp, lvl):
            """SE channel attention via GAP / expand matmuls (O(1) in batch)."""
            g = dotf(h.astype(jnp.bfloat16), c["gap"][lvl][...])          # (C, N)
            z = dotf(pp["f1w"][...], g.astype(jnp.bfloat16)) + pp["f1b"][...]
            z = jnp.maximum(z, 0.0)
            s = dotf(pp["f2w"][...], z.astype(jnp.bfloat16)) + pp["f2b"][...]
            s = 1.0 / (1.0 + jnp.exp(-s))                                  # (C, N)
            return h * dotf(s.astype(jnp.bfloat16), c["ex"][lvl][...])     # (C, M)

        def at_block(pp, firsts, lvl):
            """conv3x3+BN+ReLU x2 + SE.  `firsts` = [(w_ref, tap_stack), ...] so
            the decoder skip-concat becomes a split-weight accumulation."""
            h = None
            for wref, st in firsts:
                y = dotf(wref[...], st)
                h = y if h is None else h + y
            h = jnp.maximum(h + pp["b1"][...], 0.0)
            h = jnp.maximum(dotf(pp["w2"][...], im2col(h, lvl)) + pp["b2"][...], 0.0)
            return se(h, pp, lvl)

        # ------------------------------ encoder ------------------------------
        x = d["x"][...]
        feats, skips = [], []
        for idx in range(depth):
            pp = p["down"][idx]
            f = at_block(pp, [(pp["w1"], im2col(x, idx))], idx)
            feats.append(f)
            if idx == 0:                                   # nn.MaxPool2d(2)
                x = pool(f, idx)
            else:                                          # FeatureAggregation
                pf = p["fams"][idx - 1]
                prev = pool(feats[idx - 1], idx - 1)
                proj = jnp.maximum(
                    dotf(pf["w"][...], im2col(prev, idx)) + pf["b"][...], 0.0)
                x = pool(proj + f, idx)
            skips.append(x)                                # lives at level idx+1

        # ----------------------------- bottleneck -----------------------------
        pp = p["bneck"]
        x = at_block(pp, [(pp["w1"], im2col(x, depth))], depth)

        # ------------------------------ decoder -------------------------------
        for lvl in reversed(range(depth)):
            x = dotf(x.astype(jnp.bfloat16), c["upsel"][lvl][...])   # nearest 2x up
            x = dotf(p["upconv"][lvl][...], im2col(x, lvl))          # conv3x3, no bias
            skip = dotf(skips[lvl].astype(jnp.bfloat16), c["rsmat"][lvl][...])
            pp = p["upblk"][lvl]
            x = at_block(pp, [(pp["w1a"], im2col(skip, lvl)),
                              (pp["w1b"], im2col(x, lvl))], lvl)

        # ---------------------------- final 1x1 conv --------------------------
        o_ref[...] = dotf(p["finw"][...], x.astype(jnp.bfloat16)) + p["finb"][...]

    return kernel


# ----------------------------- wrapper -----------------------------

def ufanet_forward(params, consts, x_nchw):
    nb, cin, H, W = x_nchw.shape
    # NCHW -> (C, N*H*W): the 128-lane axis carries the flattened spatial dim.
    x = jnp.transpose(x_nchw, (1, 0, 2, 3)).reshape(cin, nb * H * W)
    inputs = {"x": x, "c": consts, "p": params}
    leaves, treedef = jax.tree_util.tree_flatten(inputs)
    kernel = _make_kernel(treedef, H, DEPTH)
    out = pl.pallas_call(
        kernel,
        out_shape=jax.ShapeDtypeStruct((NUM_CLASSES, nb * H * W), jnp.float32),
        in_specs=[_VMEM] * len(leaves),
        out_specs=_VMEM,
    )(*leaves)
    return jnp.transpose(out.reshape(NUM_CLASSES, nb, H, W), (1, 0, 2, 3))


# ----------------------------- parameter init -----------------------------

def _conv_w(key, cin, cout, bn_fold=True):
    """3x3 conv weight in im2col layout (Cout, 9*Cin), tap-major columns, bf16."""
    std = (2.0 / (9 * cin)) ** 0.5
    w = jax.random.normal(key, (cout, 9 * cin), jnp.float32) * std
    if bn_fold:
        w = w * _BN_FOLD
    return w.astype(jnp.bfloat16)


def init_params(key):
    keys = iter(jax.random.split(key, 256))
    nk = lambda: next(keys)

    def at_params(cin, cout, split=None):
        hidden = max(cout // 4, 1)
        d = {}
        if split is None:
            d["w1"] = _conv_w(nk(), cin, cout)
        else:
            cs, cx = split          # first-conv weight split: [skip ; upsampled x]
            d["w1a"] = _conv_w(nk(), cs, cout)
            d["w1b"] = _conv_w(nk(), cx, cout)
        d["b1"] = jnp.zeros((cout, 1), jnp.float32)
        d["w2"] = _conv_w(nk(), cout, cout)
        d["b2"] = jnp.zeros((cout, 1), jnp.float32)
        d["f1w"] = (jax.random.normal(nk(), (hidden, cout), jnp.float32)
                    * cout ** -0.5).astype(jnp.bfloat16)
        d["f1b"] = jnp.zeros((hidden, 1), jnp.float32)
        d["f2w"] = (jax.random.normal(nk(), (cout, hidden), jnp.float32)
                    * hidden ** -0.5).astype(jnp.bfloat16)
        d["f2b"] = jnp.zeros((cout, 1), jnp.float32)
        return d

    params = {
        "down": [at_params(IN_CH if l == 0 else BASE * 2 ** (l - 1), BASE * 2 ** l)
                 for l in range(DEPTH)],
        "fams": [{"w": _conv_w(nk(), BASE * 2 ** l, BASE * 2 ** (l + 1)),
                  "b": jnp.zeros((BASE * 2 ** (l + 1), 1), jnp.float32)}
                 for l in range(DEPTH - 1)],
        "bneck": at_params(BASE * 2 ** (DEPTH - 1), BASE * 2 ** DEPTH),
        "upblk": [at_params(BASE * 2 ** (l + 1), BASE * 2 ** l,
                            split=(BASE * 2 ** l, BASE * 2 ** l))
                  for l in range(DEPTH)],
        "upconv": [_conv_w(nk(), BASE * 2 ** (l + 1), BASE * 2 ** l, bn_fold=False)
                   for l in range(DEPTH)],
        "finw": (jax.random.normal(nk(), (NUM_CLASSES, BASE), jnp.float32)
                 * (2.0 / BASE) ** 0.5).astype(jnp.bfloat16),
        "finb": jax.random.normal(nk(), (NUM_CLASSES, 1), jnp.float32) * 0.01,
    }
    return params


# ----------------------------- main -----------------------------

if __name__ == "__main__":
    key = jax.random.PRNGKey(0)
    pkey, xkey = jax.random.split(key)
    params = init_params(pkey)
    consts = build_consts(BATCH, HW, DEPTH)
    x = jax.random.normal(xkey, (BATCH, IN_CH, HW, HW), jnp.float32)

    fwd = jax.jit(ufanet_forward)
    y = jax.block_until_ready(fwd(params, consts, x))
    assert y.shape == (BATCH, NUM_CLASSES, HW, HW), y.shape
    assert bool(jnp.all(jnp.isfinite(y)))
    print("KERNEL_OK")
</pallas_src>

<mosaic_0001>
module attributes {stable_mosaic.version = 11 : i64} {
  func.func @kernel(%arg0: memref<2x512xbf16, #tpu.memory_space<vmem>>, %arg1: memref<2x128xbf16, #tpu.memory_space<vmem>>, %arg2: memref<2x32xbf16, #tpu.memory_space<vmem>>, %arg3: memref<512x2xbf16, #tpu.memory_space<vmem>>, %arg4: memref<128x2xbf16, #tpu.memory_space<vmem>>, %arg5: memref<32x2xbf16, #tpu.memory_space<vmem>>, %arg6: memref<512x128xbf16, #tpu.memory_space<vmem>>, %arg7: memref<128x32xbf16, #tpu.memory_space<vmem>>, %arg8: memref<128x512xbf16, #tpu.memory_space<vmem>>, %arg9: memref<32x128xbf16, #tpu.memory_space<vmem>>, %arg10: memref<9x512xf32, #tpu.memory_space<vmem>>, %arg11: memref<9x128xf32, #tpu.memory_space<vmem>>, %arg12: memref<9x32x32xbf16, #tpu.memory_space<vmem>>, %arg13: memref<128x512xbf16, #tpu.memory_space<vmem>>, %arg14: memref<32x128xbf16, #tpu.memory_space<vmem>>, %arg15: memref<32x1xf32, #tpu.memory_space<vmem>>, %arg16: memref<32x1xf32, #tpu.memory_space<vmem>>, %arg17: memref<8x1xf32, #tpu.memory_space<vmem>>, %arg18: memref<8x32xbf16, #tpu.memory_space<vmem>>, %arg19: memref<32x1xf32, #tpu.memory_space<vmem>>, %arg20: memref<32x8xbf16, #tpu.memory_space<vmem>>, %arg21: memref<32x144xbf16, #tpu.memory_space<vmem>>, %arg22: memref<32x288xbf16, #tpu.memory_space<vmem>>, %arg23: memref<8x1xf32, #tpu.memory_space<vmem>>, %arg24: memref<8x1xf32, #tpu.memory_space<vmem>>, %arg25: memref<2x1xf32, #tpu.memory_space<vmem>>, %arg26: memref<2x8xbf16, #tpu.memory_space<vmem>>, %arg27: memref<8x1xf32, #tpu.memory_space<vmem>>, %arg28: memref<8x2xbf16, #tpu.memory_space<vmem>>, %arg29: memref<8x9xbf16, #tpu.memory_space<vmem>>, %arg30: memref<8x72xbf16, #tpu.memory_space<vmem>>, %arg31: memref<16x1xf32, #tpu.memory_space<vmem>>, %arg32: memref<16x1xf32, #tpu.memory_space<vmem>>, %arg33: memref<4x1xf32, #tpu.memory_space<vmem>>, %arg34: memref<4x16xbf16, #tpu.memory_space<vmem>>, %arg35: memref<16x1xf32, #tpu.memory_space<vmem>>, %arg36: memref<16x4xbf16, #tpu.memory_space<vmem>>, %arg37: memref<16x72xbf16, #tpu.memory_space<vmem>>, %arg38: memref<16x144xbf16, #tpu.memory_space<vmem>>, %arg39: memref<16x1xf32, #tpu.memory_space<vmem>>, %arg40: memref<16x72xbf16, #tpu.memory_space<vmem>>, %arg41: memref<2x1xf32, #tpu.memory_space<vmem>>, %arg42: memref<2x8xbf16, #tpu.memory_space<vmem>>, %arg43: memref<8x1xf32, #tpu.memory_space<vmem>>, %arg44: memref<8x1xf32, #tpu.memory_space<vmem>>, %arg45: memref<2x1xf32, #tpu.memory_space<vmem>>, %arg46: memref<2x8xbf16, #tpu.memory_space<vmem>>, %arg47: memref<8x1xf32, #tpu.memory_space<vmem>>, %arg48: memref<8x2xbf16, #tpu.memory_space<vmem>>, %arg49: memref<8x72xbf16, #tpu.memory_space<vmem>>, %arg50: memref<8x72xbf16, #tpu.memory_space<vmem>>, %arg51: memref<8x72xbf16, #tpu.memory_space<vmem>>, %arg52: memref<16x1xf32, #tpu.memory_space<vmem>>, %arg53: memref<16x1xf32, #tpu.memory_space<vmem>>, %arg54: memref<4x1xf32, #tpu.memory_space<vmem>>, %arg55: memref<4x16xbf16, #tpu.memory_space<vmem>>, %arg56: memref<16x1xf32, #tpu.memory_space<vmem>>, %arg57: memref<16x4xbf16, #tpu.memory_space<vmem>>, %arg58: memref<16x144xbf16, #tpu.memory_space<vmem>>, %arg59: memref<16x144xbf16, #tpu.memory_space<vmem>>, %arg60: memref<16x144xbf16, #tpu.memory_space<vmem>>, %arg61: memref<8x144xbf16, #tpu.memory_space<vmem>>, %arg62: memref<16x288xbf16, #tpu.memory_space<vmem>>, %arg63: memref<1x512xf32, #tpu.memory_space<vmem>>, %arg64: memref<2x512xf32, #tpu.memory_space<vmem>>) attributes {dimension_semantics = [], scalar_prefetch = 0 : i64, scratch_operands = 0 : i64, tpu.core_type = #tpu.core_type<tc>} {
    %c0 = arith.constant 0 : index
    %c0_0 = arith.constant 0 : index
    %0 = vector.load %arg63[%c0, %c0_0] : memref<1x512xf32, #tpu.memory_space<vmem>>, vector<1x512xf32>
    %c0_1 = arith.constant 0 : index
    %c0_2 = arith.constant 0 : index
    %1 = vector.load %arg10[%c0_1, %c0_2] : memref<9x512xf32, #tpu.memory_space<vmem>>, vector<9x512xf32>
    %c17_i32 = arith.constant 17 : i32
    %2 = tpu.dynamic_rotate %0 by %c17_i32 dim 1 : vector<1x512xf32>, i32 -> vector<1x512xf32>
    %3 = vector.extract_strided_slice %1 {offsets = [0, 0], sizes = [1, 512], strides = [1, 1]} : vector<9x512xf32> to vector<1x512xf32>
    %4 = arith.mulf %2, %3 : vector<1x512xf32>
    %c16_i32 = arith.constant 16 : i32
    %5 = tpu.dynamic_rotate %0 by %c16_i32 dim 1 : vector<1x512xf32>, i32 -> vector<1x512xf32>
    %6 = vector.extract_strided_slice %1 {offsets = [1, 0], sizes = [1, 512], strides = [1, 1]} : vector<9x512xf32> to vector<1x512xf32>
    %7 = arith.mulf %5, %6 : vector<1x512xf32>
    %c15_i32 = arith.constant 15 : i32
    %8 = tpu.dynamic_rotate %0 by %c15_i32 dim 1 : vector<1x512xf32>, i32 -> vector<1x512xf32>
    %9 = vector.extract_strided_slice %1 {offsets = [2, 0], sizes = [1, 512], strides = [1, 1]} : vector<9x512xf32> to vector<1x512xf32>
    %10 = arith.mulf %8, %9 : vector<1x512xf32>
    %c1_i32 = arith.constant 1 : i32
    %11 = tpu.dynamic_rotate %0 by %c1_i32 dim 1 : vector<1x512xf32>, i32 -> vector<1x512xf32>
    %12 = vector.extract_strided_slice %1 {offsets = [3, 0], sizes = [1, 512], strides = [1, 1]} : vector<9x512xf32> to vector<1x512xf32>
    %13 = arith.mulf %11, %12 : vector<1x512xf32>
    %c511_i32 = arith.constant 511 : i32
    %14 = tpu.dynamic_rotate %0 by %c511_i32 dim 1 : vector<1x512xf32>, i32 -> vector<1x512xf32>
    %15 = vector.extract_strided_slice %1 {offsets = [5, 0], sizes = [1, 512], strides = [1, 1]} : vector<9x512xf32> to vector<1x512xf32>
    %16 = arith.mulf %14, %15 : vector<1x512xf32>
    %c497_i32 = arith.constant 497 : i32
    %17 = tpu.dynamic_rotate %0 by %c497_i32 dim 1 : vector<1x512xf32>, i32 -> vector<1x512xf32>
    %18 = vector.extract_strided_slice %1 {offsets = [6, 0], sizes = [1, 512], strides = [1, 1]} : vector<9x512xf32> to vector<1x512xf32>
    %19 = arith.mulf %17, %18 : vector<1x512xf32>
    %c496_i32 = arith.constant 496 : i32
    %20 = tpu.dynamic_rotate %0 by %c496_i32 dim 1 : vector<1x512xf32>, i32 -> vector<1x512xf32>
    %21 = vector.extract_strided_slice %1 {offsets = [7, 0], sizes = [1, 512], strides = [1, 1]} : vector<9x512xf32> to vector<1x512xf32>
    %22 = arith.mulf %20, %21 : vector<1x512xf32>
    %c495_i32 = arith.constant 495 : i32
    %23 = tpu.dynamic_rotate %0 by %c495_i32 dim 1 : vector<1x512xf32>, i32 -> vector<1x512xf32>
    %24 = vector.extract_strided_slice %1 {offsets = [8, 0], sizes = [1, 512], strides = [1, 1]} : vector<9x512xf32> to vector<1x512xf32>
    %25 = arith.mulf %23, %24 : vector<1x512xf32>
    %26 = tpu.concatenate %4, %7, %10, %13, %0, %16, %19, %22, %25 in 0 : vector<1x512xf32>, vector<1x512xf32>, vector<1x512xf32>, vector<1x512xf32>, vector<1x512xf32>, vector<1x512xf32>, vector<1x512xf32>, vector<1x512xf32>, vector<1x512xf32> -> vector<9x512xf32>
    %27 = arith.truncf %26 : vector<9x512xf32> to vector<9x512xbf16>
    %c0_3 = arith.constant 0 : index
    %c0_4 = arith.constant 0 : index
    %28 = vector.load %arg29[%c0_3, %c0_4] : memref<8x9xbf16, #tpu.memory_space<vmem>>, vector<8x9xbf16>
    %cst = arith.constant dense<0.000000e+00> : vector<8x512xf32>
    %29 = tpu.matmul %28, %27, %cst {dimension_numbers = #tpu.dot_dimension_numbers<[1], [0], [0], [1], [0, 0, 1, 1], [], []>} : vector<8x9xbf16>, vector<9x512xbf16>, vector<8x512xf32> -> vector<8x512xf32>
    %c0_5 = arith.constant 0 : index
    %c0_6 = arith.constant 0 : index
    %30 = vector.load %arg23[%c0_5, %c0_6] : memref<8x1xf32, #tpu.memory_space<vmem>>, vector<8x1xf32>
    %31 = vector.broadcast %30 : vector<8x1xf32> to vector<8x512xf32>
    %32 = arith.addf %29, %31 : vector<8x512xf32>
    %cst_7 = arith.constant 0.000000e+00 : f32
    %33 = vector.broadcast %cst_7 : f32 to vector<8x512xf32>
    %34 = arith.maximumf %32, %33 : vector<8x512xf32>
    %c0_8 = arith.constant 0 : index
    %c0_9 = arith.constant 0 : index
    %35 = vector.load %arg30[%c0_8, %c0_9] : memref<8x72xbf16, #tpu.memory_space<vmem>>, vector<8x72xbf16>
    %c0_10 = arith.constant 0 : index
    %c0_11 = arith.constant 0 : index
    %36 = vector.load %arg10[%c0_10, %c0_11] : memref<9x512xf32, #tpu.memory_space<vmem>>, vector<9x512xf32>
    %c17_i32_12 = arith.constant 17 : i32
    %37 = tpu.dynamic_rotate %34 by %c17_i32_12 dim 1 : vector<8x512xf32>, i32 -> vector<8x512xf32>
    %38 = vector.extract_strided_slice %36 {offsets = [0, 0], sizes = [1, 512], strides = [1, 1]} : vector<9x512xf32> to vector<1x512xf32>
    %39 = vector.broadcast %38 : vector<1x512xf32> to vector<8x512xf32>
    %40 = arith.mulf %37, %39 : vector<8x512xf32>
    %c16_i32_13 = arith.constant 16 : i32
    %41 = tpu.dynamic_rotate %34 by %c16_i32_13 dim 1 : vector<8x512xf32>, i32 -> vector<8x512xf32>
    %42 = vector.extract_strided_slice %36 {offsets = [1, 0], sizes = [1, 512], strides = [1, 1]} : vector<9x512xf32> to vector<1x512xf32>
    %43 = vector.broadcast %42 : vector<1x512xf32> to vector<8x512xf32>
    %44 = arith.mulf %41, %43 : vector<8x512xf32>
    %c15_i32_14 = arith.constant 15 : i32
    %45 = tpu.dynamic_rotate %34 by %c15_i32_14 dim 1 : vector<8x512xf32>, i32 -> vector<8x512xf32>
    %46 = vector.extract_strided_slice %36 {offsets = [2, 0], sizes = [1, 512], strides = [1, 1]} : vector<9x512xf32> to vector<1x512xf32>
    %47 = vector.broadcast %46 : vector<1x512xf32> to vector<8x512xf32>
    %48 = arith.mulf %45, %47 : vector<8x512xf32>
    %c1_i32_15 = arith.constant 1 : i32
    %49 = tpu.dynamic_rotate %34 by %c1_i32_15 dim 1 : vector<8x512xf32>, i32 -> vector<8x512xf32>
    %50 = vector.extract_strided_slice %36 {offsets = [3, 0], sizes = [1, 512], strides = [1, 1]} : vector<9x512xf32> to vector<1x512xf32>
    %51 = vector.broadcast %50 : vector<1x512xf32> to vector<8x512xf32>
    %52 = arith.mulf %49, %51 : vector<8x512xf32>
    %c511_i32_16 = arith.constant 511 : i32
    %53 = tpu.dynamic_rotate %34 by %c511_i32_16 dim 1 : vector<8x512xf32>, i32 -> vector<8x512xf32>
    %54 = vector.extract_strided_slice %36 {offsets = [5, 0], sizes = [1, 512], strides = [1, 1]} : vector<9x512xf32> to vector<1x512xf32>
    %55 = vector.broadcast %54 : vector<1x512xf32> to vector<8x512xf32>
    %56 = arith.mulf %53, %55 : vector<8x512xf32>
    %c497_i32_17 = arith.constant 497 : i32
    %57 = tpu.dynamic_rotate %34 by %c497_i32_17 dim 1 : vector<8x512xf32>, i32 -> vector<8x512xf32>
    %58 = vector.extract_strided_slice %36 {offsets = [6, 0], sizes = [1, 512], strides = [1, 1]} : vector<9x512xf32> to vector<1x512xf32>
    %59 = vector.broadcast %58 : vector<1x512xf32> to vector<8x512xf32>
    %60 = arith.mulf %57, %59 : vector<8x512xf32>
    %c496_i32_18 = arith.constant 496 : i32
    %61 = tpu.dynamic_rotate %34 by %c496_i32_18 dim 1 : vector<8x512xf32>, i32 -> vector<8x512xf32>
    %62 = vector.extract_strided_slice %36 {offsets = [7, 0], sizes = [1, 512], strides = [1, 1]} : vector<9x512xf32> to vector<1x512xf32>
    %63 = vector.broadcast %62 : vector<1x512xf32> to vector<8x512xf32>
    %64 = arith.mulf %61, %63 : vector<8x512xf32>
    %c495_i32_19 = arith.constant 495 : i32
    %65 = tpu.dynamic_rotate %34 by %c495_i32_19 dim 1 : vector<8x512xf32>, i32 -> vector<8x512xf32>
    %66 = vector.extract_strided_slice %36 {offsets = [8, 0], sizes = [1, 512], strides = [1, 1]} : vector<9x512xf32> to vector<1x512xf32>
    %67 = vector.broadcast %66 : vector<1x512xf32> to vector<8x512xf32>
    %68 = arith.mulf %65, %67 : vector<8x512xf32>
    %69 = tpu.concatenate %40, %44, %48, %52, %34, %56, %60, %64, %68 in 0 : vector<8x512xf32>, vector<8x512xf32>, vector<8x512xf32>, vector<8x512xf32>, vector<8x512xf32>, vector<8x512xf32>, vector<8x512xf32>, vector<8x512xf32>, vector<8x512xf32> -> vector<72x512xf32>
    %70 = arith.truncf %69 : vector<72x512xf32> to vector<72x512xbf16>
    %cst_20 = arith.constant dense<0.000000e+00> : vector<8x512xf32>
    %71 = tpu.matmul %35, %70, %cst_20 {dimension_numbers = #tpu.dot_dimension_numbers<[1], [0], [0], [1], [0, 0, 1, 1], [], []>} : vector<8x72xbf16>, vector<72x512xbf16>, vector<8x512xf32> -> vector<8x512xf32>
    %c0_21 = arith.constant 0 : index
    %c0_22 = arith.constant 0 : index
    %72 = vector.load %arg24[%c0_21, %c0_22] : memref<8x1xf32, #tpu.memory_space<vmem>>, vector<8x1xf32>
    %73 = vector.broadcast %72 : vector<8x1xf32> to vector<8x512xf32>
    %74 = arith.addf %71, %73 : vector<8x512xf32>
    %cst_23 = arith.constant 0.000000e+00 : f32
    %75 = vector.broadcast %cst_23 : f32 to vector<8x512xf32>
    %76 = arith.maximumf %74, %75 : vector<8x512xf32>
    %77 = arith.truncf %76 : vector<8x512xf32> to vector<8x512xbf16>
    %c0_24 = arith.constant 0 : index
    %c0_25 = arith.constant 0 : index
    %78 = vector.load %arg3[%c0_24, %c0_25] : memref<512x2xbf16, #tpu.memory_space<vmem>>, vector<512x2xbf16>
    %cst_26 = arith.constant dense<0.000000e+00> : vector<8x2xf32>
    %79 = tpu.matmul %77, %78, %cst_26 {dimension_numbers = #tpu.dot_dimension_numbers<[1], [0], [0], [1], [0, 0, 1, 1], [], []>} : vector<8x512xbf16>, vector<512x2xbf16>, vector<8x2xf32> -> vector<8x2xf32>
    %c0_27 = arith.constant 0 : index
    %c0_28 = arith.constant 0 : index
    %80 = vector.load %arg26[%c0_27, %c0_28] : memref<2x8xbf16, #tpu.memory_space<vmem>>, vector<2x8xbf16>
    %81 = arith.truncf %79 : vector<8x2xf32> to vector<8x2xbf16>
    %cst_29 = arith.constant dense<0.000000e+00> : vector<2x2xf32>
    %82 = tpu.matmul %80, %81, %cst_29 {dimension_numbers = #tpu.dot_dimension_numbers<[1], [0], [0], [1], [0, 0, 1, 1], [], []>} : vector<2x8xbf16>, vector<8x2xbf16>, vector<2x2xf32> -> vector<2x2xf32>
    %c0_30 = arith.constant 0 : index
    %c0_31 = arith.constant 0 : index
    %83 = vector.load %arg25[%c0_30, %c0_31] : memref<2x1xf32, #tpu.memory_space<vmem>>, vector<2x1xf32>
    %84 = vector.broadcast %83 : vector<2x1xf32> to vector<2x2xf32>
    %85 = arith.addf %82, %84 : vector<2x2xf32>
    %cst_32 = arith.constant 0.000000e+00 : f32
    %86 = vector.broadcast %cst_32 : f32 to vector<2x2xf32>
    %87 = arith.maximumf %85, %86 : vector<2x2xf32>
    %c0_33 = arith.constant 0 : index
    %c0_34 = arith.constant 0 : index
    %88 = vector.load %arg28[%c0_33, %c0_34] : memref<8x2xbf16, #tpu.memory_space<vmem>>, vector<8x2xbf16>
    %89 = arith.truncf %87 : vector<2x2xf32> to vector<2x2xbf16>
    %cst_35 = arith.constant dense<0.000000e+00> : vector<8x2xf32>
    %90 = tpu.matmul %88, %89, %cst_35 {dimension_numbers = #tpu.dot_dimension_numbers<[1], [0], [0], [1], [0, 0, 1, 1], [], []>} : vector<8x2xbf16>, vector<2x2xbf16>, vector<8x2xf32> -> vector<8x2xf32>
    %c0_36 = arith.constant 0 : index
    %c0_37 = arith.constant 0 : index
    %91 = vector.load %arg27[%c0_36, %c0_37] : memref<8x1xf32, #tpu.memory_space<vmem>>, vector<8x1xf32>
    %92 = vector.broadcast %91 : vector<8x1xf32> to vector<8x2xf32>
    %93 = arith.addf %90, %92 : vector<8x2xf32>
    %cst_38 = arith.constant 0.000000e+00 : f32
    %94 = vector.broadcast %cst_38 : f32 to vector<8x2xf32>
    %95 = arith.subf %94, %93 : vector<8x2xf32>
    %96 = math.exp %95 : vector<8x2xf32>
    %cst_39 = arith.constant 1.000000e+00 : f32
    %97 = vector.broadcast %cst_39 : f32 to vector<8x2xf32>
    %98 = arith.addf %97, %96 : vector<8x2xf32>
    %cst_40 = arith.constant 1.000000e+00 : f32
    %99 = vector.broadcast %cst_40 : f32 to vector<8x2xf32>
    %100 = arith.divf %99, %98 : vector<8x2xf32>
    %101 = arith.truncf %100 : vector<8x2xf32> to vector<8x2xbf16>
    %c0_41 = arith.constant 0 : index
    %c0_42 = arith.constant 0 : index
    %102 = vector.load %arg0[%c0_41, %c0_42] : memref<2x512xbf16, #tpu.memory_space<vmem>>, vector<2x512xbf16>
    %cst_43 = arith.constant dense<0.000000e+00> : vector<8x512xf32>
    %103 = tpu.matmul %101, %102, %cst_43 {dimension_numbers = #tpu.dot_dimension_numbers<[1], [0], [0], [1], [0, 0, 1, 1], [], []>} : vector<8x2xbf16>, vector<2x512xbf16>, vector<8x512xf32> -> vector<8x512xf32>
    %104 = arith.mulf %76, %103 : vector<8x512xf32>
    %c511_i32_44 = arith.constant 511 : i32
    %105 = tpu.dynamic_rotate %104 by %c511_i32_44 dim 1 : vector<8x512xf32>, i32 -> vector<8x512xf32>
    %106 = arith.maximumf %104, %105 : vector<8x512xf32>
    %c496_i32_45 = arith.constant 496 : i32
    %107 = tpu.dynamic_rotate %106 by %c496_i32_45 dim 1 : vector<8x512xf32>, i32 -> vector<8x512xf32>
    %108 = arith.maximumf %106, %107 : vector<8x512xf32>
    %109 = arith.truncf %108 : vector<8x512xf32> to vector<8x512xbf16>
    %c0_46 = arith.constant 0 : index
    %c0_47 = arith.constant 0 : index
    %110 = vector.load %arg6[%c0_46, %c0_47] : memref<512x128xbf16, #tpu.memory_space<vmem>>, vector<512x128xbf16>
    %cst_48 = arith.constant dense<0.000000e+00> : vector<8x128xf32>
    %111 = tpu.matmul %109, %110, %cst_48 {dimension_numbers = #tpu.dot_dimension_numbers<[1], [0], [0], [1], [0, 0, 1, 1], [], []>} : vector<8x512xbf16>, vector<512x128xbf16>, vector<8x128xf32> -> vector<8x128xf32>
    %c0_49 = arith.constant 0 : index
    %c0_50 = arith.constant 0 : index
    %112 = vector.load %arg11[%c0_49, %c0_50] : memref<9x128xf32, #tpu.memory_space<vmem>>, vector<9x128xf32>
    %c9_i32 = arith.constant 9 : i32
    %113 = tpu.dynamic_rotate %111 by %c9_i32 dim 1 : vector<8x128xf32>, i32 -> vector<8x128xf32>
    %114 = vector.extract_strided_slice %112 {offsets = [0, 0], sizes = [1, 128], strides = [1, 1]} : vector<9x128xf32> to vector<1x128xf32>
    %115 = vector.broadcast %114 : vector<1x128xf32> to vector<8x128xf32>
    %116 = arith.mulf %113, %115 : vector<8x128xf32>
    %c8_i32 = arith.constant 8 : i32
    %117 = tpu.dynamic_rotate %111 by %c8_i32 dim 1 : vector<8x128xf32>, i32 -> vector<8x128xf32>
    %118 = vector.extract_strided_slice %112 {offsets = [1, 0], sizes = [1, 128], strides = [1, 1]} : vector<9x128xf32> to vector<1x128xf32>
    %119 = vector.broadcast %118 : vector<1x128xf32> to vector<8x128xf32>
    %120 = arith.mulf %117, %119 : vector<8x128xf32>
    %c7_i32 = arith.constant 7 : i32
    %121 = tpu.dynamic_rotate %111 by %c7_i32 dim 1 : vector<8x128xf32>, i32 -> vector<8x128xf32>
    %122 = vector.extract_strided_slice %112 {offsets = [2, 0], sizes = [1, 128], strides = [1, 1]} : vector<9x128xf32> to vector<1x128xf32>
    %123 = vector.broadcast %122 : vector<1x128xf32> to vector<8x128xf32>
    %124 = arith.mulf %121, %123 : vector<8x128xf32>
    %c1_i32_51 = arith.constant 1 : i32
    %125 = tpu.dynamic_rotate %111 by %c1_i32_51 dim 1 : vector<8x128xf32>, i32 -> vector<8x128xf32>
    %126 = vector.extract_strided_slice %112 {offsets = [3, 0], sizes = [1, 128], strides = [1, 1]} : vector<9x128xf32> to vector<1x128xf32>
    %127 = vector.broadcast %126 : vector<1x128xf32> to vector<8x128xf32>
    %128 = arith.mulf %125, %127 : vector<8x128xf32>
    %c127_i32 = arith.constant 127 : i32
    %129 = tpu.dynamic_rotate %111 by %c127_i32 dim 1 : vector<8x128xf32>, i32 -> vector<8x128xf32>
    %130 = vector.extract_strided_slice %112 {offsets = [5, 0], sizes = [1, 128], strides = [1, 1]} : vector<9x128xf32> to vector<1x128xf32>
    %131 = vector.broadcast %130 : vector<1x128xf32> to vector<8x128xf32>
    %132 = arith.mulf %129, %131 : vector<8x128xf32>
    %c121_i32 = arith.constant 121 : i32
    %133 = tpu.dynamic_rotate %111 by %c121_i32 dim 1 : vector<8x128xf32>, i32 -> vector<8x128xf32>
    %134 = vector.extract_strided_slice %112 {offsets = [6, 0], sizes = [1, 128], strides = [1, 1]} : vector<9x128xf32> to vector<1x128xf32>
    %135 = vector.broadcast %134 : vector<1x128xf32> to vector<8x128xf32>
    %136 = arith.mulf %133, %135 : vector<8x128xf32>
    %c120_i32 = arith.constant 120 : i32
    %137 = tpu.dynamic_rotate %111 by %c120_i32 dim 1 : vector<8x128xf32>, i32 -> vector<8x128xf32>
    %138 = vector.extract_strided_slice %112 {offsets = [7, 0], sizes = [1, 128], strides = [1, 1]} : vector<9x128xf32> to vector<1x128xf32>
    %139 = vector.broadcast %138 : vector<1x128xf32> to vector<8x128xf32>
    %140 = arith.mulf %137, %139 : vector<8x128xf32>
    %c119_i32 = arith.constant 119 : i32
    %141 = tpu.dynamic_rotate %111 by %c119_i32 dim 1 : vector<8x128xf32>, i32 -> vector<8x128xf32>
    %142 = vector.extract_strided_slice %112 {offsets = [8, 0], sizes = [1, 128], strides = [1, 1]} : vector<9x128xf32> to vector<1x128xf32>
    %143 = vector.broadcast %142 : vector<1x128xf32> to vector<8x128xf32>
    %144 = arith.mulf %141, %143 : vector<8x128xf32>
    %145 = tpu.concatenate %116, %120, %124, %128, %111, %132, %136, %140, %144 in 0 : vector<8x128xf32>, vector<8x128xf32>, vector<8x128xf32>, vector<8x128xf32>, vector<8x128xf32>, vector<8x128xf32>, vector<8x128xf32>, vector<8x128xf32>, vector<8x128xf32> -> vector<72x128xf32>
    %146 = arith.truncf %145 : vector<72x128xf32> to vector<72x128xbf16>
    %c0_52 = arith.constant 0 : index
    %c0_53 = arith.constant 0 : index
    %147 = vector.load %arg37[%c0_52, %c0_53] : memref<16x72xbf16, #tpu.memory_space<vmem>>, vector<16x72xbf16>
    %cst_54 = arith.constant dense<0.000000e+00> : vector<16x128xf32>
    %148 = tpu.matmul %147, %146, %cst_54 {dimension_numbers = #tpu.dot_dimension_numbers<[1], [0], [0], [1], [0, 0, 1, 1], [], []>} : vector<16x72xbf16>, vector<72x128xbf16>, vector<16x128xf32> -> vector<16x128xf32>
    %c0_55 = arith.constant 0 : index
    %c0_56 = arith.constant 0 : index
    %149 = vector.load %arg31[%c0_55, %c0_56] : memref<16x1xf32, #tpu.memory_space<vmem>>, vector<16x1xf32>
    %150 = vector.broadcast %149 : vector<16x1xf32> to vector<16x128xf32>
    %151 = arith.addf %148, %150 : vector<16x128xf32>
    %cst_57 = arith.constant 0.000000e+00 : f32
    %152 = vector.broadcast %cst_57 : f32 to vector<16x128xf32>
    %153 = arith.maximumf %151, %152 : vector<16x128xf32>
    %c0_58 = arith.constant 0 : index
    %c0_59 = arith.constant 0 : index
    %154 = vector.load %arg38[%c0_58, %c0_59] : memref<16x144xbf16, #tpu.memory_space<vmem>>, vector<16x144xbf16>
    %c0_60 = arith.constant 0 : index
    %c0_61 = arith.constant 0 : index
    %155 = vector.load %arg11[%c0_60, %c0_61] : memref<9x128xf32, #tpu.memory_space<vmem>>, vector<9x128xf32>
    %c9_i32_62 = arith.constant 9 : i32
    %156 = tpu.dynamic_rotate %153 by %c9_i32_62 dim 1 : vector<16x128xf32>, i32 -> vector<16x128xf32>
    %157 = vector.extract_strided_slice %155 {offsets = [0, 0], sizes = [1, 128], strides = [1, 1]} : vector<9x128xf32> to vector<1x128xf32>
    %158 = vector.broadcast %157 : vector<1x128xf32> to vector<16x128xf32>
    %159 = arith.mulf %156, %158 : vector<16x128xf32>
    %c8_i32_63 = arith.constant 8 : i32
    %160 = tpu.dynamic_rotate %153 by %c8_i32_63 dim 1 : vector<16x128xf32>, i32 -> vector<16x128xf32>
    %161 = vector.extract_strided_slice %155 {offsets = [1, 0], sizes = [1, 128], strides = [1, 1]} : vector<9x128xf32> to vector<1x128xf32>
    %162 = vector.broadcast %161 : vector<1x128xf32> to vector<16x128xf32>
    %163 = arith.mulf %160, %162 : vector<16x128xf32>
    %c7_i32_64 = arith.constant 7 : i32
    %164 = tpu.dynamic_rotate %153 by %c7_i32_64 dim 1 : vector<16x128xf32>, i32 -> vector<16x128xf32>
    %165 = vector.extract_strided_slice %155 {offsets = [2, 0], sizes = [1, 128], strides = [1, 1]} : vector<9x128xf32> to vector<1x128xf32>
    %166 = vector.broadcast %165 : vector<1x128xf32> to vector<16x128xf32>
    %167 = arith.mulf %164, %166 : vector<16x128xf32>
    %c1_i32_65 = arith.constant 1 : i32
    %168 = tpu.dynamic_rotate %153 by %c1_i32_65 dim 1 : vector<16x128xf32>, i32 -> vector<16x128xf32>
    %169 = vector.extract_strided_slice %155 {offsets = [3, 0], sizes = [1, 128], strides = [1, 1]} : vector<9x128xf32> to vector<1x128xf32>
    %170 = vector.broadcast %169 : vector<1x128xf32> to vector<16x128xf32>
    %171 = arith.mulf %168, %170 : vector<16x128xf32>
    %c127_i32_66 = arith.constant 127 : i32
    %172 = tpu.dynamic_rotate %153 by %c127_i32_66 dim 1 : vector<16x128xf32>, i32 -> vector<16x128xf32>
    %173 = vector.extract_strided_slice %155 {offsets = [5, 0], sizes = [1, 128], strides = [1, 1]} : vector<9x128xf32> to vector<1x128xf32>
    %174 = vector.broadcast %173 : vector<1x128xf32> to vector<16x128xf32>
    %175 = arith.mulf %172, %174 : vector<16x128xf32>
    %c121_i32_67 = arith.constant 121 : i32
    %176 = tpu.dynamic_rotate %153 by %c121_i32_67 dim 1 : vector<16x128xf32>, i32 -> vector<16x128xf32>
    %177 = vector.extract_strided_slice %155 {offsets = [6, 0], sizes = [1, 128], strides = [1, 1]} : vector<9x128xf32> to vector<1x128xf32>
    %178 = vector.broadcast %177 : vector<1x128xf32> to vector<16x128xf32>
    %179 = arith.mulf %176, %178 : vector<16x128xf32>
    %c120_i32_68 = arith.constant 120 : i32
    %180 = tpu.dynamic_rotate %153 by %c120_i32_68 dim 1 : vector<16x128xf32>, i32 -> vector<16x128xf32>
    %181 = vector.extract_strided_slice %155 {offsets = [7, 0], sizes = [1, 128], strides = [1, 1]} : vector<9x128xf32> to vector<1x128xf32>
    %182 = vector.broadcast %181 : vector<1x128xf32> to vector<16x128xf32>
    %183 = arith.mulf %180, %182 : vector<16x128xf32>
    %c119_i32_69 = arith.constant 119 : i32
    %184 = tpu.dynamic_rotate %153 by %c119_i32_69 dim 1 : vector<16x128xf32>, i32 -> vector<16x128xf32>
    %185 = vector.extract_strided_slice %155 {offsets = [8, 0], sizes = [1, 128], strides = [1, 1]} : vector<9x128xf32> to vector<1x128xf32>
    %186 = vector.broadcast %185 : vector<1x128xf32> to vector<16x128xf32>
    %187 = arith.mulf %184, %186 : vector<16x128xf32>
    %188 = tpu.concatenate %159, %163, %167, %171, %153, %175, %179, %183, %187 in 0 : vector<16x128xf32>, vector<16x128xf32>, vector<16x128xf32>, vector<16x128xf32>, vector<16x128xf32>, vector<16x128xf32>, vector<16x128xf32>, vector<16x128xf32>, vector<16x128xf32> -> vector<144x128xf32>
    %189 = arith.truncf %188 : vector<144x128xf32> to vector<144x128xbf16>
    %cst_70 = arith.constant dense<0.000000e+00> : vector<16x128xf32>
    %190 = tpu.matmul %154, %189, %cst_70 {dimension_numbers = #tpu.dot_dimension_numbers<[1], [0], [0], [1], [0, 0, 1, 1], [], []>} : vector<16x144xbf16>, vector<144x128xbf16>, vector<16x128xf32> -> vector<16x128xf32>
    %c0_71 = arith.constant 0 : index
    %c0_72 = arith.constant 0 : index
    %191 = vector.load %arg32[%c0_71, %c0_72] : memref<16x1xf32, #tpu.memory_space<vmem>>, vector<16x1xf32>
    %192 = vector.broadcast %191 : vector<16x1xf32> to vector<16x128xf32>
    %193 = arith.addf %190, %192 : vector<16x128xf32>
    %cst_73 = arith.constant 0.000000e+00 : f32
    %194 = vector.broadcast %cst_73 : f32 to vector<16x128xf32>
    %195 = arith.maximumf %193, %194 : vector<16x128xf32>
    %196 = arith.truncf %195 : vector<16x128xf32> to vector<16x128xbf16>
    %c0_74 = arith.constant 0 : index
    %c0_75 = arith.constant 0 : index
    %197 = vector.load %arg4[%c0_74, %c0_75] : memref<128x2xbf16, #tpu.memory_space<vmem>>, vector<128x2xbf16>
    %cst_76 = arith.constant dense<0.000000e+00> : vector<16x2xf32>
    %198 = tpu.matmul %196, %197, %cst_76 {dimension_numbers = #tpu.dot_dimension_numbers<[1], [0], [0], [1], [0, 0, 1, 1], [], []>} : vector<16x128xbf16>, vector<128x2xbf16>, vector<16x2xf32> -> vector<16x2xf32>
    %c0_77 = arith.constant 0 : index
    %c0_78 = arith.constant 0 : index
    %199 = vector.load %arg34[%c0_77, %c0_78] : memref<4x16xbf16, #tpu.memory_space<vmem>>, vector<4x16xbf16>
    %200 = arith.truncf %198 : vector<16x2xf32> to vector<16x2xbf16>
    %cst_79 = arith.constant dense<0.000000e+00> : vector<4x2xf32>
    %201 = tpu.matmul %199, %200, %cst_79 {dimension_numbers = #tpu.dot_dimension_numbers<[1], [0], [0], [1], [0, 0, 1, 1], [], []>} : vector<4x16xbf16>, vector<16x2xbf16>, vector<4x2xf32> -> vector<4x2xf32>
    %c0_80 = arith.constant 0 : index
    %c0_81 = arith.constant 0 : index
    %202 = vector.load %arg33[%c0_80, %c0_81] : memref<4x1xf32, #tpu.memory_space<vmem>>, vector<4x1xf32>
    %203 = vector.broadcast %202 : vector<4x1xf32> to vector<4x2xf32>
    %204 = arith.addf %201, %203 : vector<4x2xf32>
    %cst_82 = arith.constant 0.000000e+00 : f32
    %205 = vector.broadcast %cst_82 : f32 to vector<4x2xf32>
    %206 = arith.maximumf %204, %205 : vector<4x2xf32>
    %c0_83 = arith.constant 0 : index
    %c0_84 = arith.constant 0 : index
    %207 = vector.load %arg36[%c0_83, %c0_84] : memref<16x4xbf16, #tpu.memory_space<vmem>>, vector<16x4xbf16>
    %208 = arith.truncf %206 : vector<4x2xf32> to vector<4x2xbf16>
    %cst_85 = arith.constant dense<0.000000e+00> : vector<16x2xf32>
    %209 = tpu.matmul %207, %208, %cst_85 {dimension_numbers = #tpu.dot_dimension_numbers<[1], [0], [0], [1], [0, 0, 1, 1], [], []>} : vector<16x4xbf16>, vector<4x2xbf16>, vector<16x2xf32> -> vector<16x2xf32>
    %c0_86 = arith.constant 0 : index
    %c0_87 = arith.constant 0 : index
    %210 = vector.load %arg35[%c0_86, %c0_87] : memref<16x1xf32, #tpu.memory_space<vmem>>, vector<16x1xf32>
    %211 = vector.broadcast %210 : vector<16x1xf32> to vector<16x2xf32>
    %212 = arith.addf %209, %211 : vector<16x2xf32>
    %cst_88 = arith.constant 0.000000e+00 : f32
    %213 = vector.broadcast %cst_88 : f32 to vector<16x2xf32>
    %214 = arith.subf %213, %212 : vector<16x2xf32>
    %215 = math.exp %214 : vector<16x2xf32>
    %cst_89 = arith.constant 1.000000e+00 : f32
    %216 = vector.broadcast %cst_89 : f32 to vector<16x2xf32>
    %217 = arith.addf %216, %215 : vector<16x2xf32>
    %cst_90 = arith.constant 1.000000e+00 : f32
    %218 = vector.broadcast %cst_90 : f32 to vector<16x2xf32>
    %219 = arith.divf %218, %217 : vector<16x2xf32>
    %220 = arith.truncf %219 : vector<16x2xf32> to vector<16x2xbf16>
    %c0_91 = arith.constant 0 : index
    %c0_92 = arith.constant 0 : index
    %221 = vector.load %arg1[%c0_91, %c0_92] : memref<2x128xbf16, #tpu.memory_space<vmem>>, vector<2x128xbf16>
    %cst_93 = arith.constant dense<0.000000e+00> : vector<16x128xf32>
    %222 = tpu.matmul %220, %221, %cst_93 {dimension_numbers = #tpu.dot_dimension_numbers<[1], [0], [0], [1], [0, 0, 1, 1], [], []>} : vector<16x2xbf16>, vector<2x128xbf16>, vector<16x128xf32> -> vector<16x128xf32>
    %223 = arith.mulf %195, %222 : vector<16x128xf32>
    %c511_i32_94 = arith.constant 511 : i32
    %224 = tpu.dynamic_rotate %104 by %c511_i32_94 dim 1 : vector<8x512xf32>, i32 -> vector<8x512xf32>
    %225 = arith.maximumf %104, %224 : vector<8x512xf32>
    %c496_i32_95 = arith.constant 496 : i32
    %226 = tpu.dynamic_rotate %225 by %c496_i32_95 dim 1 : vector<8x512xf32>, i32 -> vector<8x512xf32>
    %227 = arith.maximumf %225, %226 : vector<8x512xf32>
    %228 = arith.truncf %227 : vector<8x512xf32> to vector<8x512xbf16>
    %c0_96 = arith.constant 0 : index
    %c0_97 = arith.constant 0 : index
    %229 = vector.load %arg6[%c0_96, %c0_97] : memref<512x128xbf16, #tpu.memory_space<vmem>>, vector<512x128xbf16>
    %cst_98 = arith.constant dense<0.000000e+00> : vector<8x128xf32>
    %230 = tpu.matmul %228, %229, %cst_98 {dimension_numbers = #tpu.dot_dimension_numbers<[1], [0], [0], [1], [0, 0, 1, 1], [], []>} : vector<8x512xbf16>, vector<512x128xbf16>, vector<8x128xf32> -> vector<8x128xf32>
    %c0_99 = arith.constant 0 : index
    %c0_100 = arith.constant 0 : index
    %231 = vector.load %arg40[%c0_99, %c0_100] : memref<16x72xbf16, #tpu.memory_space<vmem>>, vector<16x72xbf16>
    %c0_101 = arith.constant 0 : index
    %c0_102 = arith.constant 0 : index
    %232 = vector.load %arg11[%c0_101, %c0_102] : memref<9x128xf32, #tpu.memory_space<vmem>>, vector<9x128xf32>
    %c9_i32_103 = arith.constant 9 : i32
    %233 = tpu.dynamic_rotate %230 by %c9_i32_103 dim 1 : vector<8x128xf32>, i32 -> vector<8x128xf32>
    %234 = vector.extract_strided_slice %232 {offsets = [0, 0], sizes = [1, 128], strides = [1, 1]} : vector<9x128xf32> to vector<1x128xf32>
    %235 = vector.broadcast %234 : vector<1x128xf32> to vector<8x128xf32>
    %236 = arith.mulf %233, %235 : vector<8x128xf32>
    %c8_i32_104 = arith.constant 8 : i32
    %237 = tpu.dynamic_rotate %230 by %c8_i32_104 dim 1 : vector<8x128xf32>, i32 -> vector<8x128xf32>
    %238 = vector.extract_strided_slice %232 {offsets = [1, 0], sizes = [1, 128], strides = [1, 1]} : vector<9x128xf32> to vector<1x128xf32>
    %239 = vector.broadcast %238 : vector<1x128xf32> to vector<8x128xf32>
    %240 = arith.mulf %237, %239 : vector<8x128xf32>
    %c7_i32_105 = arith.constant 7 : i32
    %241 = tpu.dynamic_rotate %230 by %c7_i32_105 dim 1 : vector<8x128xf32>, i32 -> vector<8x128xf32>
    %242 = vector.extract_strided_slice %232 {offsets = [2, 0], sizes = [1, 128], strides = [1, 1]} : vector<9x128xf32> to vector<1x128xf32>
    %243 = vector.broadcast %242 : vector<1x128xf32> to vector<8x128xf32>
    %244 = arith.mulf %241, %243 : vector<8x128xf32>
    %c1_i32_106 = arith.constant 1 : i32
    %245 = tpu.dynamic_rotate %230 by %c1_i32_106 dim 1 : vector<8x128xf32>, i32 -> vector<8x128xf32>
    %246 = vector.extract_strided_slice %232 {offsets = [3, 0], sizes = [1, 128], strides = [1, 1]} : vector<9x128xf32> to vector<1x128xf32>
    %247 = vector.broadcast %246 : vector<1x128xf32> to vector<8x128xf32>
    %248 = arith.mulf %245, %247 : vector<8x128xf32>
    %c127_i32_107 = arith.constant 127 : i32
    %249 = tpu.dynamic_rotate %230 by %c127_i32_107 dim 1 : vector<8x128xf32>, i32 -> vector<8x128xf32>
    %250 = vector.extract_strided_slice %232 {offsets = [5, 0], sizes = [1, 128], strides = [1, 1]} : vector<9x128xf32> to vector<1x128xf32>
    %251 = vector.broadcast %250 : vector<1x128xf32> to vector<8x128xf32>
    %252 = arith.mulf %249, %251 : vector<8x128xf32>
    %c121_i32_108 = arith.constant 121 : i32
    %253 = tpu.dynamic_rotate %230 by %c121_i32_108 dim 1 : vector<8x128xf32>, i32 -> vector<8x128xf32>
    %254 = vector.extract_strided_slice %232 {offsets = [6, 0], sizes = [1, 128], strides = [1, 1]} : vector<9x128xf32> to vector<1x128xf32>
    %255 = vector.broadcast %254 : vector<1x128xf32> to vector<8x128xf32>
    %256 = arith.mulf %253, %255 : vector<8x128xf32>
    %c120_i32_109 = arith.constant 120 : i32
    %257 = tpu.dynamic_rotate %230 by %c120_i32_109 dim 1 : vector<8x128xf32>, i32 -> vector<8x128xf32>
    %258 = vector.extract_strided_slice %232 {offsets = [7, 0], sizes = [1, 128], strides = [1, 1]} : vector<9x128xf32> to vector<1x128xf32>
    %259 = vector.broadcast %258 : vector<1x128xf32> to vector<8x128xf32>
    %260 = arith.mulf %257, %259 : vector<8x128xf32>
    %c119_i32_110 = arith.constant 119 : i32
    %261 = tpu.dynamic_rotate %230 by %c119_i32_110 dim 1 : vector<8x128xf32>, i32 -> vector<8x128xf32>
    %262 = vector.extract_strided_slice %232 {offsets = [8, 0], sizes = [1, 128], strides = [1, 1]} : vector<9x128xf32> to vector<1x128xf32>
    %263 = vector.broadcast %262 : vector<1x128xf32> to vector<8x128xf32>
    %264 = arith.mulf %261, %263 : vector<8x128xf32>
    %265 = tpu.concatenate %236, %240, %244, %248, %230, %252, %256, %260, %264 in 0 : vector<8x128xf32>, vector<8x128xf32>, vector<8x128xf32>, vector<8x128xf32>, vector<8x128xf32>, vector<8x128xf32>, vector<8x128xf32>, vector<8x128xf32>, vector<8x128xf32> -> vector<72x128xf32>
    %266 = arith.truncf %265 : vector<72x128xf32> to vector<72x128xbf16>
    %cst_111 = arith.constant dense<0.000000e+00> : vector<16x128xf32>
    %267 = tpu.matmul %231, %266, %cst_111 {dimension_numbers = #tpu.dot_dimension_numbers<[1], [0], [0], [1], [0, 0, 1, 1], [], []>} : vector<16x72xbf16>, vector<72x128xbf16>, vector<16x128xf32> -> vector<16x128xf32>
    %c0_112 = arith.constant 0 : index
    %c0_113 = arith.constant 0 : index
    %268 = vector.load %arg39[%c0_112, %c0_113] : memref<16x1xf32, #tpu.memory_space<vmem>>, vector<16x1xf32>
    %269 = vector.broadcast %268 : vector<16x1xf32> to vector<16x128xf32>
    %270 = arith.addf %267, %269 : vector<16x128xf32>
    %cst_114 = arith.constant 0.000000e+00 : f32
    %271 = vector.broadcast %cst_114 : f32 to vector<16x128xf32>
    %272 = arith.maximumf %270, %271 : vector<16x128xf32>
    %273 = arith.addf %272, %223 : vector<16x128xf32>
    %c127_i32_115 = arith.constant 127 : i32
    %274 = tpu.dynamic_rotate %273 by %c127_i32_115 dim 1 : vector<16x128xf32>, i32 -> vector<16x128xf32>
    %275 = arith.maximumf %273, %274 : vector<16x128xf32>
    %c120_i32_116 = arith.constant 120 : i32
    %276 = tpu.dynamic_rotate %275 by %c120_i32_116 dim 1 : vector<16x128xf32>, i32 -> vector<16x128xf32>
    %277 = arith.maximumf %275, %276 : vector<16x128xf32>
    %278 = arith.truncf %277 : vector<16x128xf32> to vector<16x128xbf16>
    %c0_117 = arith.constant 0 : index
    %c0_118 = arith.constant 0 : index
    %279 = vector.load %arg7[%c0_117, %c0_118] : memref<128x32xbf16, #tpu.memory_space<vmem>>, vector<128x32xbf16>
    %cst_119 = arith.constant dense<0.000000e+00> : vector<16x32xf32>
    %280 = tpu.matmul %278, %279, %cst_119 {dimension_numbers = #tpu.dot_dimension_numbers<[1], [0], [0], [1], [0, 0, 1, 1], [], []>} : vector<16x128xbf16>, vector<128x32xbf16>, vector<16x32xf32> -> vector<16x32xf32>
    %281 = arith.truncf %280 : vector<16x32xf32> to vector<16x32xbf16>
    %c0_120 = arith.constant 0 : index
    %c0_121 = arith.constant 0 : index
    %c0_122 = arith.constant 0 : index
    %282 = vector.load %arg12[%c0_120, %c0_121, %c0_122] : memref<9x32x32xbf16, #tpu.memory_space<vmem>>, vector<1x32x32xbf16>
    %283 = vector.shape_cast %282 : vector<1x32x32xbf16> to vector<32x32xbf16>
    %cst_123 = arith.constant dense<0.000000e+00> : vector<16x32xf32>
    %284 = tpu.matmul %281, %283, %cst_123 {dimension_numbers = #tpu.dot_dimension_numbers<[1], [0], [0], [1], [0, 0, 1, 1], [], []>} : vector<16x32xbf16>, vector<32x32xbf16>, vector<16x32xf32> -> vector<16x32xf32>
    %c1 = arith.constant 1 : index
    %c0_124 = arith.constant 0 : index
    %c0_125 = arith.constant 0 : index
    %285 = vector.load %arg12[%c1, %c0_124, %c0_125] : memref<9x32x32xbf16, #tpu.memory_space<vmem>>, vector<1x32x32xbf16>
    %286 = vector.shape_cast %285 : vector<1x32x32xbf16> to vector<32x32xbf16>
    %cst_126 = arith.constant dense<0.000000e+00> : vector<16x32xf32>
    %287 = tpu.matmul %281, %286, %cst_126 {dimension_numbers = #tpu.dot_dimension_numbers<[1], [0], [0], [1], [0, 0, 1, 1], [], []>} : vector<16x32xbf16>, vector<32x32xbf16>, vector<16x32xf32> -> vector<16x32xf32>
    %c2 = arith.constant 2 : index
    %c0_127 = arith.constant 0 : index
    %c0_128 = arith.constant 0 : index
    %288 = vector.load %arg12[%c2, %c0_127, %c0_128] : memref<9x32x32xbf16, #tpu.memory_space<vmem>>, vector<1x32x32xbf16>
    %289 = vector.shape_cast %288 : vector<1x32x32xbf16> to vector<32x32xbf16>
    %cst_129 = arith.constant dense<0.000000e+00> : vector<16x32xf32>
    %290 = tpu.matmul %281, %289, %cst_129 {dimension_numbers = #tpu.dot_dimension_numbers<[1], [0], [0], [1], [0, 0, 1, 1], [], []>} : vector<16x32xbf16>, vector<32x32xbf16>, vector<16x32xf32> -> vector<16x32xf32>
    %c3 = arith.constant 3 : index
    %c0_130 = arith.constant 0 : index
    %c0_131 = arith.constant 0 : index
    %291 = vector.load %arg12[%c3, %c0_130, %c0_131] : memref<9x32x32xbf16, #tpu.memory_space<vmem>>, vector<1x32x32xbf16>
    %292 = vector.shape_cast %291 : vector<1x32x32xbf16> to vector<32x32xbf16>
    %cst_132 = arith.constant dense<0.000000e+00> : vector<16x32xf32>
    %293 = tpu.matmul %281, %292, %cst_132 {dimension_numbers = #tpu.dot_dimension_numbers<[1], [0], [0], [1], [0, 0, 1, 1], [], []>} : vector<16x32xbf16>, vector<32x32xbf16>, vector<16x32xf32> -> vector<16x32xf32>
    %c4 = arith.constant 4 : index
    %c0_133 = arith.constant 0 : index
    %c0_134 = arith.constant 0 : index
    %294 = vector.load %arg12[%c4, %c0_133, %c0_134] : memref<9x32x32xbf16, #tpu.memory_space<vmem>>, vector<1x32x32xbf16>
    %295 = vector.shape_cast %294 : vector<1x32x32xbf16> to vector<32x32xbf16>
    %cst_135 = arith.constant dense<0.000000e+00> : vector<16x32xf32>
    %296 = tpu.matmul %281, %295, %cst_135 {dimension_numbers = #tpu.dot_dimension_numbers<[1], [0], [0], [1], [0, 0, 1, 1], [], []>} : vector<16x32xbf16>, vector<32x32xbf16>, vector<16x32xf32> -> vector<16x32xf32>
    %c5 = arith.constant 5 : index
    %c0_136 = arith.constant 0 : index
    %c0_137 = arith.constant 0 : index
    %297 = vector.load %arg12[%c5, %c0_136, %c0_137] : memref<9x32x32xbf16, #tpu.memory_space<vmem>>, vector<1x32x32xbf16>
    %298 = vector.shape_cast %297 : vector<1x32x32xbf16> to vector<32x32xbf16>
    %cst_138 = arith.constant dense<0.000000e+00> : vector<16x32xf32>
    %299 = tpu.matmul %281, %298, %cst_138 {dimension_numbers = #tpu.dot_dimension_numbers<[1], [0], [0], [1], [0, 0, 1, 1], [], []>} : vector<16x32xbf16>, vector<32x32xbf16>, vector<16x32xf32> -> vector<16x32xf32>
    %c6 = arith.constant 6 : index
    %c0_139 = arith.constant 0 : index
    %c0_140 = arith.constant 0 : index
    %300 = vector.load %arg12[%c6, %c0_139, %c0_140] : memref<9x32x32xbf16, #tpu.memory_space<vmem>>, vector<1x32x32xbf16>
    %301 = vector.shape_cast %300 : vector<1x32x32xbf16> to vector<32x32xbf16>
    %cst_141 = arith.constant dense<0.000000e+00> : vector<16x32xf32>
    %302 = tpu.matmul %281, %301, %cst_141 {dimension_numbers = #tpu.dot_dimension_numbers<[1], [0], [0], [1], [0, 0, 1, 1], [], []>} : vector<16x32xbf16>, vector<32x32xbf16>, vector<16x32xf32> -> vector<16x32xf32>
    %c7 = arith.constant 7 : index
    %c0_142 = arith.constant 0 : index
    %c0_143 = arith.constant 0 : index
    %303 = vector.load %arg12[%c7, %c0_142, %c0_143] : memref<9x32x32xbf16, #tpu.memory_space<vmem>>, vector<1x32x32xbf16>
    %304 = vector.shape_cast %303 : vector<1x32x32xbf16> to vector<32x32xbf16>
    %cst_144 = arith.constant dense<0.000000e+00> : vector<16x32xf32>
    %305 = tpu.matmul %281, %304, %cst_144 {dimension_numbers = #tpu.dot_dimension_numbers<[1], [0], [0], [1], [0, 0, 1, 1], [], []>} : vector<16x32xbf16>, vector<32x32xbf16>, vector<16x32xf32> -> vector<16x32xf32>
    %c8 = arith.constant 8 : index
    %c0_145 = arith.constant 0 : index
    %c0_146 = arith.constant 0 : index
    %306 = vector.load %arg12[%c8, %c0_145, %c0_146] : memref<9x32x32xbf16, #tpu.memory_space<vmem>>, vector<1x32x32xbf16>
    %307 = vector.shape_cast %306 : vector<1x32x32xbf16> to vector<32x32xbf16>
    %cst_147 = arith.constant dense<0.000000e+00> : vector<16x32xf32>
    %308 = tpu.matmul %281, %307, %cst_147 {dimension_numbers = #tpu.dot_dimension_numbers<[1], [0], [0], [1], [0, 0, 1, 1], [], []>} : vector<16x32xbf16>, vector<32x32xbf16>, vector<16x32xf32> -> vector<16x32xf32>
    %309 = tpu.concatenate %284, %287, %290, %293, %296, %299, %302, %305, %308 in 0 : vector<16x32xf32>, vector<16x32xf32>, vector<16x32xf32>, vector<16x32xf32>, vector<16x32xf32>, vector<16x32xf32>, vector<16x32xf32>, vector<16x32xf32>, vector<16x32xf32> -> vector<144x32xf32>
    %310 = arith.truncf %309 : vector<144x32xf32> to vector<144x32xbf16>
    %c0_148 = arith.constant 0 : index
    %c0_149 = arith.constant 0 : index
    %311 = vector.load %arg21[%c0_148, %c0_149] : memref<32x144xbf16, #tpu.memory_space<vmem>>, vector<32x144xbf16>
    %cst_150 = arith.constant dense<0.000000e+00> : vector<32x32xf32>
    %312 = tpu.matmul %311, %310, %cst_150 {dimension_numbers = #tpu.dot_dimension_numbers<[1], [0], [0], [1], [0, 0, 1, 1], [], []>} : vector<32x144xbf16>, vector<144x32xbf16>, vector<32x32xf32> -> vector<32x32xf32>
    %c0_151 = arith.constant 0 : index
    %c0_152 = arith.constant 0 : index
    %313 = vector.load %arg15[%c0_151, %c0_152] : memref<32x1xf32, #tpu.memory_space<vmem>>, vector<32x1xf32>
    %314 = vector.broadcast %313 : vector<32x1xf32> to vector<32x32xf32>
    %315 = arith.addf %312, %314 : vector<32x32xf32>
    %cst_153 = arith.constant 0.000000e+00 : f32
    %316 = vector.broadcast %cst_153 : f32 to vector<32x32xf32>
    %317 = arith.maximumf %315, %316 : vector<32x32xf32>
    %c0_154 = arith.constant 0 : index
    %c0_155 = arith.constant 0 : index
    %318 = vector.load %arg22[%c0_154, %c0_155] : memref<32x288xbf16, #tpu.memory_space<vmem>>, vector<32x288xbf16>
    %319 = arith.truncf %317 : vector<32x32xf32> to vector<32x32xbf16>
    %c0_156 = arith.constant 0 : index
    %c0_157 = arith.constant 0 : index
    %c0_158 = arith.constant 0 : index
    %320 = vector.load %arg12[%c0_156, %c0_157, %c0_158] : memref<9x32x32xbf16, #tpu.memory_space<vmem>>, vector<1x32x32xbf16>
    %321 = vector.shape_cast %320 : vector<1x32x32xbf16> to vector<32x32xbf16>
    %cst_159 = arith.constant dense<0.000000e+00> : vector<32x32xf32>
    %322 = tpu.matmul %319, %321, %cst_159 {dimension_numbers = #tpu.dot_dimension_numbers<[1], [0], [0], [1], [0, 0, 1, 1], [], []>} : vector<32x32xbf16>, vector<32x32xbf16>, vector<32x32xf32> -> vector<32x32xf32>
    %c1_160 = arith.constant 1 : index
    %c0_161 = arith.constant 0 : index
    %c0_162 = arith.constant 0 : index
    %323 = vector.load %arg12[%c1_160, %c0_161, %c0_162] : memref<9x32x32xbf16, #tpu.memory_space<vmem>>, vector<1x32x32xbf16>
    %324 = vector.shape_cast %323 : vector<1x32x32xbf16> to vector<32x32xbf16>
    %cst_163 = arith.constant dense<0.000000e+00> : vector<32x32xf32>
    %325 = tpu.matmul %319, %324, %cst_163 {dimension_numbers = #tpu.dot_dimension_numbers<[1], [0], [0], [1], [0, 0, 1, 1], [], []>} : vector<32x32xbf16>, vector<32x32xbf16>, vector<32x32xf32> -> vector<32x32xf32>
    %c2_164 = arith.constant 2 : index
    %c0_165 = arith.constant 0 : index
    %c0_166 = arith.constant 0 : index
    %326 = vector.load %arg12[%c2_164, %c0_165, %c0_166] : memref<9x32x32xbf16, #tpu.memory_space<vmem>>, vector<1x32x32xbf16>
    %327 = vector.shape_cast %326 : vector<1x32x32xbf16> to vector<32x32xbf16>
    %cst_167 = arith.constant dense<0.000000e+00> : vector<32x32xf32>
    %328 = tpu.matmul %319, %327, %cst_167 {dimension_numbers = #tpu.dot_dimension_numbers<[1], [0], [0], [1], [0, 0, 1, 1], [], []>} : vector<32x32xbf16>, vector<32x32xbf16>, vector<32x32xf32> -> vector<32x32xf32>
    %c3_168 = arith.constant 3 : index
    %c0_169 = arith.constant 0 : index
    %c0_170 = arith.constant 0 : index
    %329 = vector.load %arg12[%c3_168, %c0_169, %c0_170] : memref<9x32x32xbf16, #tpu.memory_space<vmem>>, vector<1x32x32xbf16>
    %330 = vector.shape_cast %329 : vector<1x32x32xbf16> to vector<32x32xbf16>
    %cst_171 = arith.constant dense<0.000000e+00> : vector<32x32xf32>
    %331 = tpu.matmul %319, %330, %cst_171 {dimension_numbers = #tpu.dot_dimension_numbers<[1], [0], [0], [1], [0, 0, 1, 1], [], []>} : vector<32x32xbf16>, vector<32x32xbf16>, vector<32x32xf32> -> vector<32x32xf32>
    %c4_172 = arith.constant 4 : index
    %c0_173 = arith.constant 0 : index
    %c0_174 = arith.constant 0 : index
    %332 = vector.load %arg12[%c4_172, %c0_173, %c0_174] : memref<9x32x32xbf16, #tpu.memory_space<vmem>>, vector<1x32x32xbf16>
    %333 = vector.shape_cast %332 : vector<1x32x32xbf16> to vector<32x32xbf16>
    %cst_175 = arith.constant dense<0.000000e+00> : vector<32x32xf32>
    %334 = tpu.matmul %319, %333, %cst_175 {dimension_numbers = #tpu.dot_dimension_numbers<[1], [0], [0], [1], [0, 0, 1, 1], [], []>} : vector<32x32xbf16>, vector<32x32xbf16>, vector<32x32xf32> -> vector<32x32xf32>
    %c5_176 = arith.constant 5 : index
    %c0_177 = arith.constant 0 : index
    %c0_178 = arith.constant 0 : index
    %335 = vector.load %arg12[%c5_176, %c0_177, %c0_178] : memref<9x32x32xbf16, #tpu.memory_space<vmem>>, vector<1x32x32xbf16>
    %336 = vector.shape_cast %335 : vector<1x32x32xbf16> to vector<32x32xbf16>
    %cst_179 = arith.constant dense<0.000000e+00> : vector<32x32xf32>
    %337 = tpu.matmul %319, %336, %cst_179 {dimension_numbers = #tpu.dot_dimension_numbers<[1], [0], [0], [1], [0, 0, 1, 1], [], []>} : vector<32x32xbf16>, vector<32x32xbf16>, vector<32x32xf32> -> vector<32x32xf32>
    %c6_180 = arith.constant 6 : index
    %c0_181 = arith.constant 0 : index
    %c0_182 = arith.constant 0 : index
    %338 = vector.load %arg12[%c6_180, %c0_181, %c0_182] : memref<9x32x32xbf16, #tpu.memory_space<vmem>>, vector<1x32x32xbf16>
    %339 = vector.shape_cast %338 : vector<1x32x32xbf16> to vector<32x32xbf16>
    %cst_183 = arith.constant dense<0.000000e+00> : vector<32x32xf32>
    %340 = tpu.matmul %319, %339, %cst_183 {dimension_numbers = #tpu.dot_dimension_numbers<[1], [0], [0], [1], [0, 0, 1, 1], [], []>} : vector<32x32xbf16>, vector<32x32xbf16>, vector<32x32xf32> -> vector<32x32xf32>
    %c7_184 = arith.constant 7 : index
    %c0_185 = arith.constant 0 : index
    %c0_186 = arith.constant 0 : index
    %341 = vector.load %arg12[%c7_184, %c0_185, %c0_186] : memref<9x32x32xbf16, #tpu.memory_space<vmem>>, vector<1x32x32xbf16>
    %342 = vector.shape_cast %341 : vector<1x32x32xbf16> to vector<32x32xbf16>
    %cst_187 = arith.constant dense<0.000000e+00> : vector<32x32xf32>
    %343 = tpu.matmul %319, %342, %cst_187 {dimension_numbers = #tpu.dot_dimension_numbers<[1], [0], [0], [1], [0, 0, 1, 1], [], []>} : vector<32x32xbf16>, vector<32x32xbf16>, vector<32x32xf32> -> vector<32x32xf32>
    %c8_188 = arith.constant 8 : index
    %c0_189 = arith.constant 0 : index
    %c0_190 = arith.constant 0 : index
    %344 = vector.load %arg12[%c8_188, %c0_189, %c0_190] : memref<9x32x32xbf16, #tpu.memory_space<vmem>>, vector<1x32x32xbf16>
    %345 = vector.shape_cast %344 : vector<1x32x32xbf16> to vector<32x32xbf16>
    %cst_191 = arith.constant dense<0.000000e+00> : vector<32x32xf32>
    %346 = tpu.matmul %319, %345, %cst_191 {dimension_numbers = #tpu.dot_dimension_numbers<[1], [0], [0], [1], [0, 0, 1, 1], [], []>} : vector<32x32xbf16>, vector<32x32xbf16>, vector<32x32xf32> -> vector<32x32xf32>
    %347 = tpu.concatenate %322, %325, %328, %331, %334, %337, %340, %343, %346 in 0 : vector<32x32xf32>, vector<32x32xf32>, vector<32x32xf32>, vector<32x32xf32>, vector<32x32xf32>, vector<32x32xf32>, vector<32x32xf32>, vector<32x32xf32>, vector<32x32xf32> -> vector<288x32xf32>
    %348 = arith.truncf %347 : vector<288x32xf32> to vector<288x32xbf16>
    %cst_192 = arith.constant dense<0.000000e+00> : vector<32x32xf32>
    %349 = tpu.matmul %318, %348, %cst_192 {dimension_numbers = #tpu.dot_dimension_numbers<[1], [0], [0], [1], [0, 0, 1, 1], [], []>} : vector<32x288xbf16>, vector<288x32xbf16>, vector<32x32xf32> -> vector<32x32xf32>
    %c0_193 = arith.constant 0 : index
    %c0_194 = arith.constant 0 : index
    %350 = vector.load %arg16[%c0_193, %c0_194] : memref<32x1xf32, #tpu.memory_space<vmem>>, vector<32x1xf32>
    %351 = vector.broadcast %350 : vector<32x1xf32> to vector<32x32xf32>
    %352 = arith.addf %349, %351 : vector<32x32xf32>
    %cst_195 = arith.constant 0.000000e+00 : f32
    %353 = vector.broadcast %cst_195 : f32 to vector<32x32xf32>
    %354 = arith.maximumf %352, %353 : vector<32x32xf32>
    %355 = arith.truncf %354 : vector<32x32xf32> to vector<32x32xbf16>
    %c0_196 = arith.constant 0 : index
    %c0_197 = arith.constant 0 : index
    %356 = vector.load %arg5[%c0_196, %c0_197] : memref<32x2xbf16, #tpu.memory_space<vmem>>, vector<32x2xbf16>
    %cst_198 = arith.constant dense<0.000000e+00> : vector<32x2xf32>
    %357 = tpu.matmul %355, %356, %cst_198 {dimension_numbers = #tpu.dot_dimension_numbers<[1], [0], [0], [1], [0, 0, 1, 1], [], []>} : vector<32x32xbf16>, vector<32x2xbf16>, vector<32x2xf32> -> vector<32x2xf32>
    %c0_199 = arith.constant 0 : index
    %c0_200 = arith.constant 0 : index
    %358 = vector.load %arg18[%c0_199, %c0_200] : memref<8x32xbf16, #tpu.memory_space<vmem>>, vector<8x32xbf16>
    %359 = arith.truncf %357 : vector<32x2xf32> to vector<32x2xbf16>
    %cst_201 = arith.constant dense<0.000000e+00> : vector<8x2xf32>
    %360 = tpu.matmul %358, %359, %cst_201 {dimension_numbers = #tpu.dot_dimension_numbers<[1], [0], [0], [1], [0, 0, 1, 1], [], []>} : vector<8x32xbf16>, vector<32x2xbf16>, vector<8x2xf32> -> vector<8x2xf32>
    %c0_202 = arith.constant 0 : index
    %c0_203 = arith.constant 0 : index
    %361 = vector.load %arg17[%c0_202, %c0_203] : memref<8x1xf32, #tpu.memory_space<vmem>>, vector<8x1xf32>
    %362 = vector.broadcast %361 : vector<8x1xf32> to vector<8x2xf32>
    %363 = arith.addf %360, %362 : vector<8x2xf32>
    %cst_204 = arith.constant 0.000000e+00 : f32
    %364 = vector.broadcast %cst_204 : f32 to vector<8x2xf32>
    %365 = arith.maximumf %363, %364 : vector<8x2xf32>
    %c0_205 = arith.constant 0 : index
    %c0_206 = arith.constant 0 : index
    %366 = vector.load %arg20[%c0_205, %c0_206] : memref<32x8xbf16, #tpu.memory_space<vmem>>, vector<32x8xbf16>
    %367 = arith.truncf %365 : vector<8x2xf32> to vector<8x2xbf16>
    %cst_207 = arith.constant dense<0.000000e+00> : vector<32x2xf32>
    %368 = tpu.matmul %366, %367, %cst_207 {dimension_numbers = #tpu.dot_dimension_numbers<[1], [0], [0], [1], [0, 0, 1, 1], [], []>} : vector<32x8xbf16>, vector<8x2xbf16>, vector<32x2xf32> -> vector<32x2xf32>
    %c0_208 = arith.constant 0 : index
    %c0_209 = arith.constant 0 : index
    %369 = vector.load %arg19[%c0_208, %c0_209] : memref<32x1xf32, #tpu.memory_space<vmem>>, vector<32x1xf32>
    %370 = vector.broadcast %369 : vector<32x1xf32> to vector<32x2xf32>
    %371 = arith.addf %368, %370 : vector<32x2xf32>
    %cst_210 = arith.constant 0.000000e+00 : f32
    %372 = vector.broadcast %cst_210 : f32 to vector<32x2xf32>
    %373 = arith.subf %372, %371 : vector<32x2xf32>
    %374 = math.exp %373 : vector<32x2xf32>
    %cst_211 = arith.constant 1.000000e+00 : f32
    %375 = vector.broadcast %cst_211 : f32 to vector<32x2xf32>
    %376 = arith.addf %375, %374 : vector<32x2xf32>
    %cst_212 = arith.constant 1.000000e+00 : f32
    %377 = vector.broadcast %cst_212 : f32 to vector<32x2xf32>
    %378 = arith.divf %377, %376 : vector<32x2xf32>
    %379 = arith.truncf %378 : vector<32x2xf32> to vector<32x2xbf16>
    %c0_213 = arith.constant 0 : index
    %c0_214 = arith.constant 0 : index
    %380 = vector.load %arg2[%c0_213, %c0_214] : memref<2x32xbf16, #tpu.memory_space<vmem>>, vector<2x32xbf16>
    %cst_215 = arith.constant dense<0.000000e+00> : vector<32x32xf32>
    %381 = tpu.matmul %379, %380, %cst_215 {dimension_numbers = #tpu.dot_dimension_numbers<[1], [0], [0], [1], [0, 0, 1, 1], [], []>} : vector<32x2xbf16>, vector<2x32xbf16>, vector<32x32xf32> -> vector<32x32xf32>
    %382 = arith.mulf %354, %381 : vector<32x32xf32>
    %383 = arith.truncf %382 : vector<32x32xf32> to vector<32x32xbf16>
    %c0_216 = arith.constant 0 : index
    %c0_217 = arith.constant 0 : index
    %384 = vector.load %arg14[%c0_216, %c0_217] : memref<32x128xbf16, #tpu.memory_space<vmem>>, vector<32x128xbf16>
    %cst_218 = arith.constant dense<0.000000e+00> : vector<32x128xf32>
    %385 = tpu.matmul %383, %384, %cst_218 {dimension_numbers = #tpu.dot_dimension_numbers<[1], [0], [0], [1], [0, 0, 1, 1], [], []>} : vector<32x32xbf16>, vector<32x128xbf16>, vector<32x128xf32> -> vector<32x128xf32>
    %c0_219 = arith.constant 0 : index
    %c0_220 = arith.constant 0 : index
    %386 = vector.load %arg62[%c0_219, %c0_220] : memref<16x288xbf16, #tpu.memory_space<vmem>>, vector<16x288xbf16>
    %c0_221 = arith.constant 0 : index
    %c0_222 = arith.constant 0 : index
    %387 = vector.load %arg11[%c0_221, %c0_222] : memref<9x128xf32, #tpu.memory_space<vmem>>, vector<9x128xf32>
    %c9_i32_223 = arith.constant 9 : i32
    %388 = tpu.dynamic_rotate %385 by %c9_i32_223 dim 1 : vector<32x128xf32>, i32 -> vector<32x128xf32>
    %389 = vector.extract_strided_slice %387 {offsets = [0, 0], sizes = [1, 128], strides = [1, 1]} : vector<9x128xf32> to vector<1x128xf32>
    %390 = vector.broadcast %389 : vector<1x128xf32> to vector<32x128xf32>
    %391 = arith.mulf %388, %390 : vector<32x128xf32>
    %c8_i32_224 = arith.constant 8 : i32
    %392 = tpu.dynamic_rotate %385 by %c8_i32_224 dim 1 : vector<32x128xf32>, i32 -> vector<32x128xf32>
    %393 = vector.extract_strided_slice %387 {offsets = [1, 0], sizes = [1, 128], strides = [1, 1]} : vector<9x128xf32> to vector<1x128xf32>
    %394 = vector.broadcast %393 : vector<1x128xf32> to vector<32x128xf32>
    %395 = arith.mulf %392, %394 : vector<32x128xf32>
    %c7_i32_225 = arith.constant 7 : i32
    %396 = tpu.dynamic_rotate %385 by %c7_i32_225 dim 1 : vector<32x128xf32>, i32 -> vector<32x128xf32>
    %397 = vector.extract_strided_slice %387 {offsets = [2, 0], sizes = [1, 128], strides = [1, 1]} : vector<9x128xf32> to vector<1x128xf32>
    %398 = vector.broadcast %397 : vector<1x128xf32> to vector<32x128xf32>
    %399 = arith.mulf %396, %398 : vector<32x128xf32>
    %c1_i32_226 = arith.constant 1 : i32
    %400 = tpu.dynamic_rotate %385 by %c1_i32_226 dim 1 : vector<32x128xf32>, i32 -> vector<32x128xf32>
    %401 = vector.extract_strided_slice %387 {offsets = [3, 0], sizes = [1, 128], strides = [1, 1]} : vector<9x128xf32> to vector<1x128xf32>
    %402 = vector.broadcast %401 : vector<1x128xf32> to vector<32x128xf32>
    %403 = arith.mulf %400, %402 : vector<32x128xf32>
    %c127_i32_227 = arith.constant 127 : i32
    %404 = tpu.dynamic_rotate %385 by %c127_i32_227 dim 1 : vector<32x128xf32>, i32 -> vector<32x128xf32>
    %405 = vector.extract_strided_slice %387 {offsets = [5, 0], sizes = [1, 128], strides = [1, 1]} : vector<9x128xf32> to vector<1x128xf32>
    %406 = vector.broadcast %405 : vector<1x128xf32> to vector<32x128xf32>
    %407 = arith.mulf %404, %406 : vector<32x128xf32>
    %c121_i32_228 = arith.constant 121 : i32
    %408 = tpu.dynamic_rotate %385 by %c121_i32_228 dim 1 : vector<32x128xf32>, i32 -> vector<32x128xf32>
    %409 = vector.extract_strided_slice %387 {offsets = [6, 0], sizes = [1, 128], strides = [1, 1]} : vector<9x128xf32> to vector<1x128xf32>
    %410 = vector.broadcast %409 : vector<1x128xf32> to vector<32x128xf32>
    %411 = arith.mulf %408, %410 : vector<32x128xf32>
    %c120_i32_229 = arith.constant 120 : i32
    %412 = tpu.dynamic_rotate %385 by %c120_i32_229 dim 1 : vector<32x128xf32>, i32 -> vector<32x128xf32>
    %413 = vector.extract_strided_slice %387 {offsets = [7, 0], sizes = [1, 128], strides = [1, 1]} : vector<9x128xf32> to vector<1x128xf32>
    %414 = vector.broadcast %413 : vector<1x128xf32> to vector<32x128xf32>
    %415 = arith.mulf %412, %414 : vector<32x128xf32>
    %c119_i32_230 = arith.constant 119 : i32
    %416 = tpu.dynamic_rotate %385 by %c119_i32_230 dim 1 : vector<32x128xf32>, i32 -> vector<32x128xf32>
    %417 = vector.extract_strided_slice %387 {offsets = [8, 0], sizes = [1, 128], strides = [1, 1]} : vector<9x128xf32> to vector<1x128xf32>
    %418 = vector.broadcast %417 : vector<1x128xf32> to vector<32x128xf32>
    %419 = arith.mulf %416, %418 : vector<32x128xf32>
    %420 = tpu.concatenate %391, %395, %399, %403, %385, %407, %411, %415, %419 in 0 : vector<32x128xf32>, vector<32x128xf32>, vector<32x128xf32>, vector<32x128xf32>, vector<32x128xf32>, vector<32x128xf32>, vector<32x128xf32>, vector<32x128xf32>, vector<32x128xf32> -> vector<288x128xf32>
    %421 = arith.truncf %420 : vector<288x128xf32> to vector<288x128xbf16>
    %cst_231 = arith.constant dense<0.000000e+00> : vector<16x128xf32>
    %422 = tpu.matmul %386, %421, %cst_231 {dimension_numbers = #tpu.dot_dimension_numbers<[1], [0], [0], [1], [0, 0, 1, 1], [], []>} : vector<16x288xbf16>, vector<288x128xbf16>, vector<16x128xf32> -> vector<16x128xf32>
    %423 = arith.truncf %280 : vector<16x32xf32> to vector<16x32xbf16>
    %c0_232 = arith.constant 0 : index
    %c0_233 = arith.constant 0 : index
    %424 = vector.load %arg9[%c0_232, %c0_233] : memref<32x128xbf16, #tpu.memory_space<vmem>>, vector<32x128xbf16>
    %cst_234 = arith.constant dense<0.000000e+00> : vector<16x128xf32>
    %425 = tpu.matmul %423, %424, %cst_234 {dimension_numbers = #tpu.dot_dimension_numbers<[1], [0], [0], [1], [0, 0, 1, 1], [], []>} : vector<16x32xbf16>, vector<32x128xbf16>, vector<16x128xf32> -> vector<16x128xf32>
    %c0_235 = arith.constant 0 : index
    %c0_236 = arith.constant 0 : index
    %426 = vector.load %arg11[%c0_235, %c0_236] : memref<9x128xf32, #tpu.memory_space<vmem>>, vector<9x128xf32>
    %c9_i32_237 = arith.constant 9 : i32
    %427 = tpu.dynamic_rotate %425 by %c9_i32_237 dim 1 : vector<16x128xf32>, i32 -> vector<16x128xf32>
    %428 = vector.extract_strided_slice %426 {offsets = [0, 0], sizes = [1, 128], strides = [1, 1]} : vector<9x128xf32> to vector<1x128xf32>
    %429 = vector.broadcast %428 : vector<1x128xf32> to vector<16x128xf32>
    %430 = arith.mulf %427, %429 : vector<16x128xf32>
    %c8_i32_238 = arith.constant 8 : i32
    %431 = tpu.dynamic_rotate %425 by %c8_i32_238 dim 1 : vector<16x128xf32>, i32 -> vector<16x128xf32>
    %432 = vector.extract_strided_slice %426 {offsets = [1, 0], sizes = [1, 128], strides = [1, 1]} : vector<9x128xf32> to vector<1x128xf32>
    %433 = vector.broadcast %432 : vector<1x128xf32> to vector<16x128xf32>
    %434 = arith.mulf %431, %433 : vector<16x128xf32>
    %c7_i32_239 = arith.constant 7 : i32
    %435 = tpu.dynamic_rotate %425 by %c7_i32_239 dim 1 : vector<16x128xf32>, i32 -> vector<16x128xf32>
    %436 = vector.extract_strided_slice %426 {offsets = [2, 0], sizes = [1, 128], strides = [1, 1]} : vector<9x128xf32> to vector<1x128xf32>
    %437 = vector.broadcast %436 : vector<1x128xf32> to vector<16x128xf32>
    %438 = arith.mulf %435, %437 : vector<16x128xf32>
    %c1_i32_240 = arith.constant 1 : i32
    %439 = tpu.dynamic_rotate %425 by %c1_i32_240 dim 1 : vector<16x128xf32>, i32 -> vector<16x128xf32>
    %440 = vector.extract_strided_slice %426 {offsets = [3, 0], sizes = [1, 128], strides = [1, 1]} : vector<9x128xf32> to vector<1x128xf32>
    %441 = vector.broadcast %440 : vector<1x128xf32> to vector<16x128xf32>
    %442 = arith.mulf %439, %441 : vector<16x128xf32>
    %c127_i32_241 = arith.constant 127 : i32
    %443 = tpu.dynamic_rotate %425 by %c127_i32_241 dim 1 : vector<16x128xf32>, i32 -> vector<16x128xf32>
    %444 = vector.extract_strided_slice %426 {offsets = [5, 0], sizes = [1, 128], strides = [1, 1]} : vector<9x128xf32> to vector<1x128xf32>
    %445 = vector.broadcast %444 : vector<1x128xf32> to vector<16x128xf32>
    %446 = arith.mulf %443, %445 : vector<16x128xf32>
    %c121_i32_242 = arith.constant 121 : i32
    %447 = tpu.dynamic_rotate %425 by %c121_i32_242 dim 1 : vector<16x128xf32>, i32 -> vector<16x128xf32>
    %448 = vector.extract_strided_slice %426 {offsets = [6, 0], sizes = [1, 128], strides = [1, 1]} : vector<9x128xf32> to vector<1x128xf32>
    %449 = vector.broadcast %448 : vector<1x128xf32> to vector<16x128xf32>
    %450 = arith.mulf %447, %449 : vector<16x128xf32>
    %c120_i32_243 = arith.constant 120 : i32
    %451 = tpu.dynamic_rotate %425 by %c120_i32_243 dim 1 : vector<16x128xf32>, i32 -> vector<16x128xf32>
    %452 = vector.extract_strided_slice %426 {offsets = [7, 0], sizes = [1, 128], strides = [1, 1]} : vector<9x128xf32> to vector<1x128xf32>
    %453 = vector.broadcast %452 : vector<1x128xf32> to vector<16x128xf32>
    %454 = arith.mulf %451, %453 : vector<16x128xf32>
    %c119_i32_244 = arith.constant 119 : i32
    %455 = tpu.dynamic_rotate %425 by %c119_i32_244 dim 1 : vector<16x128xf32>, i32 -> vector<16x128xf32>
    %456 = vector.extract_strided_slice %426 {offsets = [8, 0], sizes = [1, 128], strides = [1, 1]} : vector<9x128xf32> to vector<1x128xf32>
    %457 = vector.broadcast %456 : vector<1x128xf32> to vector<16x128xf32>
    %458 = arith.mulf %455, %457 : vector<16x128xf32>
    %459 = tpu.concatenate %430, %434, %438, %442, %425, %446, %450, %454, %458 in 0 : vector<16x128xf32>, vector<16x128xf32>, vector<16x128xf32>, vector<16x128xf32>, vector<16x128xf32>, vector<16x128xf32>, vector<16x128xf32>, vector<16x128xf32>, vector<16x128xf32> -> vector<144x128xf32>
    %460 = arith.truncf %459 : vector<144x128xf32> to vector<144x128xbf16>
    %c0_245 = arith.constant 0 : index
    %c0_246 = arith.constant 0 : index
    %461 = vector.load %arg11[%c0_245, %c0_246] : memref<9x128xf32, #tpu.memory_space<vmem>>, vector<9x128xf32>
    %c9_i32_247 = arith.constant 9 : i32
    %462 = tpu.dynamic_rotate %422 by %c9_i32_247 dim 1 : vector<16x128xf32>, i32 -> vector<16x128xf32>
    %463 = vector.extract_strided_slice %461 {offsets = [0, 0], sizes = [1, 128], strides = [1, 1]} : vector<9x128xf32> to vector<1x128xf32>
    %464 = vector.broadcast %463 : vector<1x128xf32> to vector<16x128xf32>
    %465 = arith.mulf %462, %464 : vector<16x128xf32>
    %c8_i32_248 = arith.constant 8 : i32
    %466 = tpu.dynamic_rotate %422 by %c8_i32_248 dim 1 : vector<16x128xf32>, i32 -> vector<16x128xf32>
    %467 = vector.extract_strided_slice %461 {offsets = [1, 0], sizes = [1, 128], strides = [1, 1]} : vector<9x128xf32> to vector<1x128xf32>
    %468 = vector.broadcast %467 : vector<1x128xf32> to vector<16x128xf32>
    %469 = arith.mulf %466, %468 : vector<16x128xf32>
    %c7_i32_249 = arith.constant 7 : i32
    %470 = tpu.dynamic_rotate %422 by %c7_i32_249 dim 1 : vector<16x128xf32>, i32 -> vector<16x128xf32>
    %471 = vector.extract_strided_slice %461 {offsets = [2, 0], sizes = [1, 128], strides = [1, 1]} : vector<9x128xf32> to vector<1x128xf32>
    %472 = vector.broadcast %471 : vector<1x128xf32> to vector<16x128xf32>
    %473 = arith.mulf %470, %472 : vector<16x128xf32>
    %c1_i32_250 = arith.constant 1 : i32
    %474 = tpu.dynamic_rotate %422 by %c1_i32_250 dim 1 : vector<16x128xf32>, i32 -> vector<16x128xf32>
    %475 = vector.extract_strided_slice %461 {offsets = [3, 0], sizes = [1, 128], strides = [1, 1]} : vector<9x128xf32> to vector<1x128xf32>
    %476 = vector.broadcast %475 : vector<1x128xf32> to vector<16x128xf32>
    %477 = arith.mulf %474, %476 : vector<16x128xf32>
    %c127_i32_251 = arith.constant 127 : i32
    %478 = tpu.dynamic_rotate %422 by %c127_i32_251 dim 1 : vector<16x128xf32>, i32 -> vector<16x128xf32>
    %479 = vector.extract_strided_slice %461 {offsets = [5, 0], sizes = [1, 128], strides = [1, 1]} : vector<9x128xf32> to vector<1x128xf32>
    %480 = vector.broadcast %479 : vector<1x128xf32> to vector<16x128xf32>
    %481 = arith.mulf %478, %480 : vector<16x128xf32>
    %c121_i32_252 = arith.constant 121 : i32
    %482 = tpu.dynamic_rotate %422 by %c121_i32_252 dim 1 : vector<16x128xf32>, i32 -> vector<16x128xf32>
    %483 = vector.extract_strided_slice %461 {offsets = [6, 0], sizes = [1, 128], strides = [1, 1]} : vector<9x128xf32> to vector<1x128xf32>
    %484 = vector.broadcast %483 : vector<1x128xf32> to vector<16x128xf32>
    %485 = arith.mulf %482, %484 : vector<16x128xf32>
    %c120_i32_253 = arith.constant 120 : i32
    %486 = tpu.dynamic_rotate %422 by %c120_i32_253 dim 1 : vector<16x128xf32>, i32 -> vector<16x128xf32>
    %487 = vector.extract_strided_slice %461 {offsets = [7, 0], sizes = [1, 128], strides = [1, 1]} : vector<9x128xf32> to vector<1x128xf32>
    %488 = vector.broadcast %487 : vector<1x128xf32> to vector<16x128xf32>
    %489 = arith.mulf %486, %488 : vector<16x128xf32>
    %c119_i32_254 = arith.constant 119 : i32
    %490 = tpu.dynamic_rotate %422 by %c119_i32_254 dim 1 : vector<16x128xf32>, i32 -> vector<16x128xf32>
    %491 = vector.extract_strided_slice %461 {offsets = [8, 0], sizes = [1, 128], strides = [1, 1]} : vector<9x128xf32> to vector<1x128xf32>
    %492 = vector.broadcast %491 : vector<1x128xf32> to vector<16x128xf32>
    %493 = arith.mulf %490, %492 : vector<16x128xf32>
    %494 = tpu.concatenate %465, %469, %473, %477, %422, %481, %485, %489, %493 in 0 : vector<16x128xf32>, vector<16x128xf32>, vector<16x128xf32>, vector<16x128xf32>, vector<16x128xf32>, vector<16x128xf32>, vector<16x128xf32>, vector<16x128xf32>, vector<16x128xf32> -> vector<144x128xf32>
    %495 = arith.truncf %494 : vector<144x128xf32> to vector<144x128xbf16>
    %c0_255 = arith.constant 0 : index
    %c0_256 = arith.constant 0 : index
    %496 = vector.load %arg58[%c0_255, %c0_256] : memref<16x144xbf16, #tpu.memory_space<vmem>>, vector<16x144xbf16>
    %cst_257 = arith.constant dense<0.000000e+00> : vector<16x128xf32>
    %497 = tpu.matmul %496, %460, %cst_257 {dimension_numbers = #tpu.dot_dimension_numbers<[1], [0], [0], [1], [0, 0, 1, 1], [], []>} : vector<16x144xbf16>, vector<144x128xbf16>, vector<16x128xf32> -> vector<16x128xf32>
    %c0_258 = arith.constant 0 : index
    %c0_259 = arith.constant 0 : index
    %498 = vector.load %arg59[%c0_258, %c0_259] : memref<16x144xbf16, #tpu.memory_space<vmem>>, vector<16x144xbf16>
    %cst_260 = arith.constant dense<0.000000e+00> : vector<16x128xf32>
    %499 = tpu.matmul %498, %495, %cst_260 {dimension_numbers = #tpu.dot_dimension_numbers<[1], [0], [0], [1], [0, 0, 1, 1], [], []>} : vector<16x144xbf16>, vector<144x128xbf16>, vector<16x128xf32> -> vector<16x128xf32>
    %500 = arith.addf %497, %499 : vector<16x128xf32>
    %c0_261 = arith.constant 0 : index
    %c0_262 = arith.constant 0 : index
    %501 = vector.load %arg52[%c0_261, %c0_262] : memref<16x1xf32, #tpu.memory_space<vmem>>, vector<16x1xf32>
    %502 = vector.broadcast %501 : vector<16x1xf32> to vector<16x128xf32>
    %503 = arith.addf %500, %502 : vector<16x128xf32>
    %cst_263 = arith.constant 0.000000e+00 : f32
    %504 = vector.broadcast %cst_263 : f32 to vector<16x128xf32>
    %505 = arith.maximumf %503, %504 : vector<16x128xf32>
    %c0_264 = arith.constant 0 : index
    %c0_265 = arith.constant 0 : index
    %506 = vector.load %arg60[%c0_264, %c0_265] : memref<16x144xbf16, #tpu.memory_space<vmem>>, vector<16x144xbf16>
    %c0_266 = arith.constant 0 : index
    %c0_267 = arith.constant 0 : index
    %507 = vector.load %arg11[%c0_266, %c0_267] : memref<9x128xf32, #tpu.memory_space<vmem>>, vector<9x128xf32>
    %c9_i32_268 = arith.constant 9 : i32
    %508 = tpu.dynamic_rotate %505 by %c9_i32_268 dim 1 : vector<16x128xf32>, i32 -> vector<16x128xf32>
    %509 = vector.extract_strided_slice %507 {offsets = [0, 0], sizes = [1, 128], strides = [1, 1]} : vector<9x128xf32> to vector<1x128xf32>
    %510 = vector.broadcast %509 : vector<1x128xf32> to vector<16x128xf32>
    %511 = arith.mulf %508, %510 : vector<16x128xf32>
    %c8_i32_269 = arith.constant 8 : i32
    %512 = tpu.dynamic_rotate %505 by %c8_i32_269 dim 1 : vector<16x128xf32>, i32 -> vector<16x128xf32>
    %513 = vector.extract_strided_slice %507 {offsets = [1, 0], sizes = [1, 128], strides = [1, 1]} : vector<9x128xf32> to vector<1x128xf32>
    %514 = vector.broadcast %513 : vector<1x128xf32> to vector<16x128xf32>
    %515 = arith.mulf %512, %514 : vector<16x128xf32>
    %c7_i32_270 = arith.constant 7 : i32
    %516 = tpu.dynamic_rotate %505 by %c7_i32_270 dim 1 : vector<16x128xf32>, i32 -> vector<16x128xf32>
    %517 = vector.extract_strided_slice %507 {offsets = [2, 0], sizes = [1, 128], strides = [1, 1]} : vector<9x128xf32> to vector<1x128xf32>
    %518 = vector.broadcast %517 : vector<1x128xf32> to vector<16x128xf32>
    %519 = arith.mulf %516, %518 : vector<16x128xf32>
    %c1_i32_271 = arith.constant 1 : i32
    %520 = tpu.dynamic_rotate %505 by %c1_i32_271 dim 1 : vector<16x128xf32>, i32 -> vector<16x128xf32>
    %521 = vector.extract_strided_slice %507 {offsets = [3, 0], sizes = [1, 128], strides = [1, 1]} : vector<9x128xf32> to vector<1x128xf32>
    %522 = vector.broadcast %521 : vector<1x128xf32> to vector<16x128xf32>
    %523 = arith.mulf %520, %522 : vector<16x128xf32>
    %c127_i32_272 = arith.constant 127 : i32
    %524 = tpu.dynamic_rotate %505 by %c127_i32_272 dim 1 : vector<16x128xf32>, i32 -> vector<16x128xf32>
    %525 = vector.extract_strided_slice %507 {offsets = [5, 0], sizes = [1, 128], strides = [1, 1]} : vector<9x128xf32> to vector<1x128xf32>
    %526 = vector.broadcast %525 : vector<1x128xf32> to vector<16x128xf32>
    %527 = arith.mulf %524, %526 : vector<16x128xf32>
    %c121_i32_273 = arith.constant 121 : i32
    %528 = tpu.dynamic_rotate %505 by %c121_i32_273 dim 1 : vector<16x128xf32>, i32 -> vector<16x128xf32>
    %529 = vector.extract_strided_slice %507 {offsets = [6, 0], sizes = [1, 128], strides = [1, 1]} : vector<9x128xf32> to vector<1x128xf32>
    %530 = vector.broadcast %529 : vector<1x128xf32> to vector<16x128xf32>
    %531 = arith.mulf %528, %530 : vector<16x128xf32>
    %c120_i32_274 = arith.constant 120 : i32
    %532 = tpu.dynamic_rotate %505 by %c120_i32_274 dim 1 : vector<16x128xf32>, i32 -> vector<16x128xf32>
    %533 = vector.extract_strided_slice %507 {offsets = [7, 0], sizes = [1, 128], strides = [1, 1]} : vector<9x128xf32> to vector<1x128xf32>
    %534 = vector.broadcast %533 : vector<1x128xf32> to vector<16x128xf32>
    %535 = arith.mulf %532, %534 : vector<16x128xf32>
    %c119_i32_275 = arith.constant 119 : i32
    %536 = tpu.dynamic_rotate %505 by %c119_i32_275 dim 1 : vector<16x128xf32>, i32 -> vector<16x128xf32>
    %537 = vector.extract_strided_slice %507 {offsets = [8, 0], sizes = [1, 128], strides = [1, 1]} : vector<9x128xf32> to vector<1x128xf32>
    %538 = vector.broadcast %537 : vector<1x128xf32> to vector<16x128xf32>
    %539 = arith.mulf %536, %538 : vector<16x128xf32>
    %540 = tpu.concatenate %511, %515, %519, %523, %505, %527, %531, %535, %539 in 0 : vector<16x128xf32>, vector<16x128xf32>, vector<16x128xf32>, vector<16x128xf32>, vector<16x128xf32>, vector<16x128xf32>, vector<16x128xf32>, vector<16x128xf32>, vector<16x128xf32> -> vector<144x128xf32>
    %541 = arith.truncf %540 : vector<144x128xf32> to vector<144x128xbf16>
    %cst_276 = arith.constant dense<0.000000e+00> : vector<16x128xf32>
    %542 = tpu.matmul %506, %541, %cst_276 {dimension_numbers = #tpu.dot_dimension_numbers<[1], [0], [0], [1], [0, 0, 1, 1], [], []>} : vector<16x144xbf16>, vector<144x128xbf16>, vector<16x128xf32> -> vector<16x128xf32>
    %c0_277 = arith.constant 0 : index
    %c0_278 = arith.constant 0 : index
    %543 = vector.load %arg53[%c0_277, %c0_278] : memref<16x1xf32, #tpu.memory_space<vmem>>, vector<16x1xf32>
    %544 = vector.broadcast %543 : vector<16x1xf32> to vector<16x128xf32>
    %545 = arith.addf %542, %544 : vector<16x128xf32>
    %cst_279 = arith.constant 0.000000e+00 : f32
    %546 = vector.broadcast %cst_279 : f32 to vector<16x128xf32>
    %547 = arith.maximumf %545, %546 : vector<16x128xf32>
    %548 = arith.truncf %547 : vector<16x128xf32> to vector<16x128xbf16>
    %c0_280 = arith.constant 0 : index
    %c0_281 = arith.constant 0 : index
    %549 = vector.load %arg4[%c0_280, %c0_281] : memref<128x2xbf16, #tpu.memory_space<vmem>>, vector<128x2xbf16>
    %cst_282 = arith.constant dense<0.000000e+00> : vector<16x2xf32>
    %550 = tpu.matmul %548, %549, %cst_282 {dimension_numbers = #tpu.dot_dimension_numbers<[1], [0], [0], [1], [0, 0, 1, 1], [], []>} : vector<16x128xbf16>, vector<128x2xbf16>, vector<16x2xf32> -> vector<16x2xf32>
    %c0_283 = arith.constant 0 : index
    %c0_284 = arith.constant 0 : index
    %551 = vector.load %arg55[%c0_283, %c0_284] : memref<4x16xbf16, #tpu.memory_space<vmem>>, vector<4x16xbf16>
    %552 = arith.truncf %550 : vector<16x2xf32> to vector<16x2xbf16>
    %cst_285 = arith.constant dense<0.000000e+00> : vector<4x2xf32>
    %553 = tpu.matmul %551, %552, %cst_285 {dimension_numbers = #tpu.dot_dimension_numbers<[1], [0], [0], [1], [0, 0, 1, 1], [], []>} : vector<4x16xbf16>, vector<16x2xbf16>, vector<4x2xf32> -> vector<4x2xf32>
    %c0_286 = arith.constant 0 : index
    %c0_287 = arith.constant 0 : index
    %554 = vector.load %arg54[%c0_286, %c0_287] : memref<4x1xf32, #tpu.memory_space<vmem>>, vector<4x1xf32>
    %555 = vector.broadcast %554 : vector<4x1xf32> to vector<4x2xf32>
    %556 = arith.addf %553, %555 : vector<4x2xf32>
    %cst_288 = arith.constant 0.000000e+00 : f32
    %557 = vector.broadcast %cst_288 : f32 to vector<4x2xf32>
    %558 = arith.maximumf %556, %557 : vector<4x2xf32>
    %c0_289 = arith.constant 0 : index
    %c0_290 = arith.constant 0 : index
    %559 = vector.load %arg57[%c0_289, %c0_290] : memref<16x4xbf16, #tpu.memory_space<vmem>>, vector<16x4xbf16>
    %560 = arith.truncf %558 : vector<4x2xf32> to vector<4x2xbf16>
    %cst_291 = arith.constant dense<0.000000e+00> : vector<16x2xf32>
    %561 = tpu.matmul %559, %560, %cst_291 {dimension_numbers = #tpu.dot_dimension_numbers<[1], [0], [0], [1], [0, 0, 1, 1], [], []>} : vector<16x4xbf16>, vector<4x2xbf16>, vector<16x2xf32> -> vector<16x2xf32>
    %c0_292 = arith.constant 0 : index
    %c0_293 = arith.constant 0 : index
    %562 = vector.load %arg56[%c0_292, %c0_293] : memref<16x1xf32, #tpu.memory_space<vmem>>, vector<16x1xf32>
    %563 = vector.broadcast %562 : vector<16x1xf32> to vector<16x2xf32>
    %564 = arith.addf %561, %563 : vector<16x2xf32>
    %cst_294 = arith.constant 0.000000e+00 : f32
    %565 = vector.broadcast %cst_294 : f32 to vector<16x2xf32>
    %566 = arith.subf %565, %564 : vector<16x2xf32>
    %567 = math.exp %566 : vector<16x2xf32>
    %cst_295 = arith.constant 1.000000e+00 : f32
    %568 = vector.broadcast %cst_295 : f32 to vector<16x2xf32>
    %569 = arith.addf %568, %567 : vector<16x2xf32>
    %cst_296 = arith.constant 1.000000e+00 : f32
    %570 = vector.broadcast %cst_296 : f32 to vector<16x2xf32>
    %571 = arith.divf %570, %569 : vector<16x2xf32>
    %572 = arith.truncf %571 : vector<16x2xf32> to vector<16x2xbf16>
    %c0_297 = arith.constant 0 : index
    %c0_298 = arith.constant 0 : index
    %573 = vector.load %arg1[%c0_297, %c0_298] : memref<2x128xbf16, #tpu.memory_space<vmem>>, vector<2x128xbf16>
    %cst_299 = arith.constant dense<0.000000e+00> : vector<16x128xf32>
    %574 = tpu.matmul %572, %573, %cst_299 {dimension_numbers = #tpu.dot_dimension_numbers<[1], [0], [0], [1], [0, 0, 1, 1], [], []>} : vector<16x2xbf16>, vector<2x128xbf16>, vector<16x128xf32> -> vector<16x128xf32>
    %575 = arith.mulf %547, %574 : vector<16x128xf32>
    %576 = arith.truncf %575 : vector<16x128xf32> to vector<16x128xbf16>
    %c0_300 = arith.constant 0 : index
    %c0_301 = arith.constant 0 : index
    %577 = vector.load %arg13[%c0_300, %c0_301] : memref<128x512xbf16, #tpu.memory_space<vmem>>, vector<128x512xbf16>
    %cst_302 = arith.constant dense<0.000000e+00> : vector<16x512xf32>
    %578 = tpu.matmul %576, %577, %cst_302 {dimension_numbers = #tpu.dot_dimension_numbers<[1], [0], [0], [1], [0, 0, 1, 1], [], []>} : vector<16x128xbf16>, vector<128x512xbf16>, vector<16x512xf32> -> vector<16x512xf32>
    %c0_303 = arith.constant 0 : index
    %c0_304 = arith.constant 0 : index
    %579 = vector.load %arg61[%c0_303, %c0_304] : memref<8x144xbf16, #tpu.memory_space<vmem>>, vector<8x144xbf16>
    %c0_305 = arith.constant 0 : index
    %c0_306 = arith.constant 0 : index
    %580 = vector.load %arg10[%c0_305, %c0_306] : memref<9x512xf32, #tpu.memory_space<vmem>>, vector<9x512xf32>
    %c17_i32_307 = arith.constant 17 : i32
    %581 = tpu.dynamic_rotate %578 by %c17_i32_307 dim 1 : vector<16x512xf32>, i32 -> vector<16x512xf32>
    %582 = vector.extract_strided_slice %580 {offsets = [0, 0], sizes = [1, 512], strides = [1, 1]} : vector<9x512xf32> to vector<1x512xf32>
    %583 = vector.broadcast %582 : vector<1x512xf32> to vector<16x512xf32>
    %584 = arith.mulf %581, %583 : vector<16x512xf32>
    %c16_i32_308 = arith.constant 16 : i32
    %585 = tpu.dynamic_rotate %578 by %c16_i32_308 dim 1 : vector<16x512xf32>, i32 -> vector<16x512xf32>
    %586 = vector.extract_strided_slice %580 {offsets = [1, 0], sizes = [1, 512], strides = [1, 1]} : vector<9x512xf32> to vector<1x512xf32>
    %587 = vector.broadcast %586 : vector<1x512xf32> to vector<16x512xf32>
    %588 = arith.mulf %585, %587 : vector<16x512xf32>
    %c15_i32_309 = arith.constant 15 : i32
    %589 = tpu.dynamic_rotate %578 by %c15_i32_309 dim 1 : vector<16x512xf32>, i32 -> vector<16x512xf32>
    %590 = vector.extract_strided_slice %580 {offsets = [2, 0], sizes = [1, 512], strides = [1, 1]} : vector<9x512xf32> to vector<1x512xf32>
    %591 = vector.broadcast %590 : vector<1x512xf32> to vector<16x512xf32>
    %592 = arith.mulf %589, %591 : vector<16x512xf32>
    %c1_i32_310 = arith.constant 1 : i32
    %593 = tpu.dynamic_rotate %578 by %c1_i32_310 dim 1 : vector<16x512xf32>, i32 -> vector<16x512xf32>
    %594 = vector.extract_strided_slice %580 {offsets = [3, 0], sizes = [1, 512], strides = [1, 1]} : vector<9x512xf32> to vector<1x512xf32>
    %595 = vector.broadcast %594 : vector<1x512xf32> to vector<16x512xf32>
    %596 = arith.mulf %593, %595 : vector<16x512xf32>
    %c511_i32_311 = arith.constant 511 : i32
    %597 = tpu.dynamic_rotate %578 by %c511_i32_311 dim 1 : vector<16x512xf32>, i32 -> vector<16x512xf32>
    %598 = vector.extract_strided_slice %580 {offsets = [5, 0], sizes = [1, 512], strides = [1, 1]} : vector<9x512xf32> to vector<1x512xf32>
    %599 = vector.broadcast %598 : vector<1x512xf32> to vector<16x512xf32>
    %600 = arith.mulf %597, %599 : vector<16x512xf32>
    %c497_i32_312 = arith.constant 497 : i32
    %601 = tpu.dynamic_rotate %578 by %c497_i32_312 dim 1 : vector<16x512xf32>, i32 -> vector<16x512xf32>
    %602 = vector.extract_strided_slice %580 {offsets = [6, 0], sizes = [1, 512], strides = [1, 1]} : vector<9x512xf32> to vector<1x512xf32>
    %603 = vector.broadcast %602 : vector<1x512xf32> to vector<16x512xf32>
    %604 = arith.mulf %601, %603 : vector<16x512xf32>
    %c496_i32_313 = arith.constant 496 : i32
    %605 = tpu.dynamic_rotate %578 by %c496_i32_313 dim 1 : vector<16x512xf32>, i32 -> vector<16x512xf32>
    %606 = vector.extract_strided_slice %580 {offsets = [7, 0], sizes = [1, 512], strides = [1, 1]} : vector<9x512xf32> to vector<1x512xf32>
    %607 = vector.broadcast %606 : vector<1x512xf32> to vector<16x512xf32>
    %608 = arith.mulf %605, %607 : vector<16x512xf32>
    %c495_i32_314 = arith.constant 495 : i32
    %609 = tpu.dynamic_rotate %578 by %c495_i32_314 dim 1 : vector<16x512xf32>, i32 -> vector<16x512xf32>
    %610 = vector.extract_strided_slice %580 {offsets = [8, 0], sizes = [1, 512], strides = [1, 1]} : vector<9x512xf32> to vector<1x512xf32>
    %611 = vector.broadcast %610 : vector<1x512xf32> to vector<16x512xf32>
    %612 = arith.mulf %609, %611 : vector<16x512xf32>
    %613 = tpu.concatenate %584, %588, %592, %596, %578, %600, %604, %608, %612 in 0 : vector<16x512xf32>, vector<16x512xf32>, vector<16x512xf32>, vector<16x512xf32>, vector<16x512xf32>, vector<16x512xf32>, vector<16x512xf32>, vector<16x512xf32>, vector<16x512xf32> -> vector<144x512xf32>
    %614 = arith.truncf %613 : vector<144x512xf32> to vector<144x512xbf16>
    %cst_315 = arith.constant dense<0.000000e+00> : vector<8x512xf32>
    %615 = tpu.matmul %579, %614, %cst_315 {dimension_numbers = #tpu.dot_dimension_numbers<[1], [0], [0], [1], [0, 0, 1, 1], [], []>} : vector<8x144xbf16>, vector<144x512xbf16>, vector<8x512xf32> -> vector<8x512xf32>
    %616 = arith.truncf %111 : vector<8x128xf32> to vector<8x128xbf16>
    %c0_316 = arith.constant 0 : index
    %c0_317 = arith.constant 0 : index
    %617 = vector.load %arg8[%c0_316, %c0_317] : memref<128x512xbf16, #tpu.memory_space<vmem>>, vector<128x512xbf16>
    %cst_318 = arith.constant dense<0.000000e+00> : vector<8x512xf32>
    %618 = tpu.matmul %616, %617, %cst_318 {dimension_numbers = #tpu.dot_dimension_numbers<[1], [0], [0], [1], [0, 0, 1, 1], [], []>} : vector<8x128xbf16>, vector<128x512xbf16>, vector<8x512xf32> -> vector<8x512xf32>
    %c0_319 = arith.constant 0 : index
    %c0_320 = arith.constant 0 : index
    %619 = vector.load %arg10[%c0_319, %c0_320] : memref<9x512xf32, #tpu.memory_space<vmem>>, vector<9x512xf32>
    %c17_i32_321 = arith.constant 17 : i32
    %620 = tpu.dynamic_rotate %618 by %c17_i32_321 dim 1 : vector<8x512xf32>, i32 -> vector<8x512xf32>
    %621 = vector.extract_strided_slice %619 {offsets = [0, 0], sizes = [1, 512], strides = [1, 1]} : vector<9x512xf32> to vector<1x512xf32>
    %622 = vector.broadcast %621 : vector<1x512xf32> to vector<8x512xf32>
    %623 = arith.mulf %620, %622 : vector<8x512xf32>
    %c16_i32_322 = arith.constant 16 : i32
    %624 = tpu.dynamic_rotate %618 by %c16_i32_322 dim 1 : vector<8x512xf32>, i32 -> vector<8x512xf32>
    %625 = vector.extract_strided_slice %619 {offsets = [1, 0], sizes = [1, 512], strides = [1, 1]} : vector<9x512xf32> to vector<1x512xf32>
    %626 = vector.broadcast %625 : vector<1x512xf32> to vector<8x512xf32>
    %627 = arith.mulf %624, %626 : vector<8x512xf32>
    %c15_i32_323 = arith.constant 15 : i32
    %628 = tpu.dynamic_rotate %618 by %c15_i32_323 dim 1 : vector<8x512xf32>, i32 -> vector<8x512xf32>
    %629 = vector.extract_strided_slice %619 {offsets = [2, 0], sizes = [1, 512], strides = [1, 1]} : vector<9x512xf32> to vector<1x512xf32>
    %630 = vector.broadcast %629 : vector<1x512xf32> to vector<8x512xf32>
    %631 = arith.mulf %628, %630 : vector<8x512xf32>
    %c1_i32_324 = arith.constant 1 : i32
    %632 = tpu.dynamic_rotate %618 by %c1_i32_324 dim 1 : vector<8x512xf32>, i32 -> vector<8x512xf32>
    %633 = vector.extract_strided_slice %619 {offsets = [3, 0], sizes = [1, 512], strides = [1, 1]} : vector<9x512xf32> to vector<1x512xf32>
    %634 = vector.broadcast %633 : vector<1x512xf32> to vector<8x512xf32>
    %635 = arith.mulf %632, %634 : vector<8x512xf32>
    %c511_i32_325 = arith.constant 511 : i32
    %636 = tpu.dynamic_rotate %618 by %c511_i32_325 dim 1 : vector<8x512xf32>, i32 -> vector<8x512xf32>
    %637 = vector.extract_strided_slice %619 {offsets = [5, 0], sizes = [1, 512], strides = [1, 1]} : vector<9x512xf32> to vector<1x512xf32>
    %638 = vector.broadcast %637 : vector<1x512xf32> to vector<8x512xf32>
    %639 = arith.mulf %636, %638 : vector<8x512xf32>
    %c497_i32_326 = arith.constant 497 : i32
    %640 = tpu.dynamic_rotate %618 by %c497_i32_326 dim 1 : vector<8x512xf32>, i32 -> vector<8x512xf32>
    %641 = vector.extract_strided_slice %619 {offsets = [6, 0], sizes = [1, 512], strides = [1, 1]} : vector<9x512xf32> to vector<1x512xf32>
    %642 = vector.broadcast %641 : vector<1x512xf32> to vector<8x512xf32>
    %643 = arith.mulf %640, %642 : vector<8x512xf32>
    %c496_i32_327 = arith.constant 496 : i32
    %644 = tpu.dynamic_rotate %618 by %c496_i32_327 dim 1 : vector<8x512xf32>, i32 -> vector<8x512xf32>
    %645 = vector.extract_strided_slice %619 {offsets = [7, 0], sizes = [1, 512], strides = [1, 1]} : vector<9x512xf32> to vector<1x512xf32>
    %646 = vector.broadcast %645 : vector<1x512xf32> to vector<8x512xf32>
    %647 = arith.mulf %644, %646 : vector<8x512xf32>
    %c495_i32_328 = arith.constant 495 : i32
    %648 = tpu.dynamic_rotate %618 by %c495_i32_328 dim 1 : vector<8x512xf32>, i32 -> vector<8x512xf32>
    %649 = vector.extract_strided_slice %619 {offsets = [8, 0], sizes = [1, 512], strides = [1, 1]} : vector<9x512xf32> to vector<1x512xf32>
    %650 = vector.broadcast %649 : vector<1x512xf32> to vector<8x512xf32>
    %651 = arith.mulf %648, %650 : vector<8x512xf32>
    %652 = tpu.concatenate %623, %627, %631, %635, %618, %639, %643, %647, %651 in 0 : vector<8x512xf32>, vector<8x512xf32>, vector<8x512xf32>, vector<8x512xf32>, vector<8x512xf32>, vector<8x512xf32>, vector<8x512xf32>, vector<8x512xf32>, vector<8x512xf32> -> vector<72x512xf32>
    %653 = arith.truncf %652 : vector<72x512xf32> to vector<72x512xbf16>
    %c0_329 = arith.constant 0 : index
    %c0_330 = arith.constant 0 : index
    %654 = vector.load %arg10[%c0_329, %c0_330] : memref<9x512xf32, #tpu.memory_space<vmem>>, vector<9x512xf32>
    %c17_i32_331 = arith.constant 17 : i32
    %655 = tpu.dynamic_rotate %615 by %c17_i32_331 dim 1 : vector<8x512xf32>, i32 -> vector<8x512xf32>
    %656 = vector.extract_strided_slice %654 {offsets = [0, 0], sizes = [1, 512], strides = [1, 1]} : vector<9x512xf32> to vector<1x512xf32>
    %657 = vector.broadcast %656 : vector<1x512xf32> to vector<8x512xf32>
    %658 = arith.mulf %655, %657 : vector<8x512xf32>
    %c16_i32_332 = arith.constant 16 : i32
    %659 = tpu.dynamic_rotate %615 by %c16_i32_332 dim 1 : vector<8x512xf32>, i32 -> vector<8x512xf32>
    %660 = vector.extract_strided_slice %654 {offsets = [1, 0], sizes = [1, 512], strides = [1, 1]} : vector<9x512xf32> to vector<1x512xf32>
    %661 = vector.broadcast %660 : vector<1x512xf32> to vector<8x512xf32>
    %662 = arith.mulf %659, %661 : vector<8x512xf32>
    %c15_i32_333 = arith.constant 15 : i32
    %663 = tpu.dynamic_rotate %615 by %c15_i32_333 dim 1 : vector<8x512xf32>, i32 -> vector<8x512xf32>
    %664 = vector.extract_strided_slice %654 {offsets = [2, 0], sizes = [1, 512], strides = [1, 1]} : vector<9x512xf32> to vector<1x512xf32>
    %665 = vector.broadcast %664 : vector<1x512xf32> to vector<8x512xf32>
    %666 = arith.mulf %663, %665 : vector<8x512xf32>
    %c1_i32_334 = arith.constant 1 : i32
    %667 = tpu.dynamic_rotate %615 by %c1_i32_334 dim 1 : vector<8x512xf32>, i32 -> vector<8x512xf32>
    %668 = vector.extract_strided_slice %654 {offsets = [3, 0], sizes = [1, 512], strides = [1, 1]} : vector<9x512xf32> to vector<1x512xf32>
    %669 = vector.broadcast %668 : vector<1x512xf32> to vector<8x512xf32>
    %670 = arith.mulf %667, %669 : vector<8x512xf32>
    %c511_i32_335 = arith.constant 511 : i32
    %671 = tpu.dynamic_rotate %615 by %c511_i32_335 dim 1 : vector<8x512xf32>, i32 -> vector<8x512xf32>
    %672 = vector.extract_strided_slice %654 {offsets = [5, 0], sizes = [1, 512], strides = [1, 1]} : vector<9x512xf32> to vector<1x512xf32>
    %673 = vector.broadcast %672 : vector<1x512xf32> to vector<8x512xf32>
    %674 = arith.mulf %671, %673 : vector<8x512xf32>
    %c497_i32_336 = arith.constant 497 : i32
    %675 = tpu.dynamic_rotate %615 by %c497_i32_336 dim 1 : vector<8x512xf32>, i32 -> vector<8x512xf32>
    %676 = vector.extract_strided_slice %654 {offsets = [6, 0], sizes = [1, 512], strides = [1, 1]} : vector<9x512xf32> to vector<1x512xf32>
    %677 = vector.broadcast %676 : vector<1x512xf32> to vector<8x512xf32>
    %678 = arith.mulf %675, %677 : vector<8x512xf32>
    %c496_i32_337 = arith.constant 496 : i32
    %679 = tpu.dynamic_rotate %615 by %c496_i32_337 dim 1 : vector<8x512xf32>, i32 -> vector<8x512xf32>
    %680 = vector.extract_strided_slice %654 {offsets = [7, 0], sizes = [1, 512], strides = [1, 1]} : vector<9x512xf32> to vector<1x512xf32>
    %681 = vector.broadcast %680 : vector<1x512xf32> to vector<8x512xf32>
    %682 = arith.mulf %679, %681 : vector<8x512xf32>
    %c495_i32_338 = arith.constant 495 : i32
    %683 = tpu.dynamic_rotate %615 by %c495_i32_338 dim 1 : vector<8x512xf32>, i32 -> vector<8x512xf32>
    %684 = vector.extract_strided_slice %654 {offsets = [8, 0], sizes = [1, 512], strides = [1, 1]} : vector<9x512xf32> to vector<1x512xf32>
    %685 = vector.broadcast %684 : vector<1x512xf32> to vector<8x512xf32>
    %686 = arith.mulf %683, %685 : vector<8x512xf32>
    %687 = tpu.concatenate %658, %662, %666, %670, %615, %674, %678, %682, %686 in 0 : vector<8x512xf32>, vector<8x512xf32>, vector<8x512xf32>, vector<8x512xf32>, vector<8x512xf32>, vector<8x512xf32>, vector<8x512xf32>, vector<8x512xf32>, vector<8x512xf32> -> vector<72x512xf32>
    %688 = arith.truncf %687 : vector<72x512xf32> to vector<72x512xbf16>
    %c0_339 = arith.constant 0 : index
    %c0_340 = arith.constant 0 : index
    %689 = vector.load %arg49[%c0_339, %c0_340] : memref<8x72xbf16, #tpu.memory_space<vmem>>, vector<8x72xbf16>
    %cst_341 = arith.constant dense<0.000000e+00> : vector<8x512xf32>
    %690 = tpu.matmul %689, %653, %cst_341 {dimension_numbers = #tpu.dot_dimension_numbers<[1], [0], [0], [1], [0, 0, 1, 1], [], []>} : vector<8x72xbf16>, vector<72x512xbf16>, vector<8x512xf32> -> vector<8x512xf32>
    %c0_342 = arith.constant 0 : index
    %c0_343 = arith.constant 0 : index
    %691 = vector.load %arg50[%c0_342, %c0_343] : memref<8x72xbf16, #tpu.memory_space<vmem>>, vector<8x72xbf16>
    %cst_344 = arith.constant dense<0.000000e+00> : vector<8x512xf32>
    %692 = tpu.matmul %691, %688, %cst_344 {dimension_numbers = #tpu.dot_dimension_numbers<[1], [0], [0], [1], [0, 0, 1, 1], [], []>} : vector<8x72xbf16>, vector<72x512xbf16>, vector<8x512xf32> -> vector<8x512xf32>
    %693 = arith.addf %690, %692 : vector<8x512xf32>
    %c0_345 = arith.constant 0 : index
    %c0_346 = arith.constant 0 : index
    %694 = vector.load %arg43[%c0_345, %c0_346] : memref<8x1xf32, #tpu.memory_space<vmem>>, vector<8x1xf32>
    %695 = vector.broadcast %694 : vector<8x1xf32> to vector<8x512xf32>
    %696 = arith.addf %693, %695 : vector<8x512xf32>
    %cst_347 = arith.constant 0.000000e+00 : f32
    %697 = vector.broadcast %cst_347 : f32 to vector<8x512xf32>
    %698 = arith.maximumf %696, %697 : vector<8x512xf32>
    %c0_348 = arith.constant 0 : index
    %c0_349 = arith.constant 0 : index
    %699 = vector.load %arg51[%c0_348, %c0_349] : memref<8x72xbf16, #tpu.memory_space<vmem>>, vector<8x72xbf16>
    %c0_350 = arith.constant 0 : index
    %c0_351 = arith.constant 0 : index
    %700 = vector.load %arg10[%c0_350, %c0_351] : memref<9x512xf32, #tpu.memory_space<vmem>>, vector<9x512xf32>
    %c17_i32_352 = arith.constant 17 : i32
    %701 = tpu.dynamic_rotate %698 by %c17_i32_352 dim 1 : vector<8x512xf32>, i32 -> vector<8x512xf32>
    %702 = vector.extract_strided_slice %700 {offsets = [0, 0], sizes = [1, 512], strides = [1, 1]} : vector<9x512xf32> to vector<1x512xf32>
    %703 = vector.broadcast %702 : vector<1x512xf32> to vector<8x512xf32>
    %704 = arith.mulf %701, %703 : vector<8x512xf32>
    %c16_i32_353 = arith.constant 16 : i32
    %705 = tpu.dynamic_rotate %698 by %c16_i32_353 dim 1 : vector<8x512xf32>, i32 -> vector<8x512xf32>
    %706 = vector.extract_strided_slice %700 {offsets = [1, 0], sizes = [1, 512], strides = [1, 1]} : vector<9x512xf32> to vector<1x512xf32>
    %707 = vector.broadcast %706 : vector<1x512xf32> to vector<8x512xf32>
    %708 = arith.mulf %705, %707 : vector<8x512xf32>
    %c15_i32_354 = arith.constant 15 : i32
    %709 = tpu.dynamic_rotate %698 by %c15_i32_354 dim 1 : vector<8x512xf32>, i32 -> vector<8x512xf32>
    %710 = vector.extract_strided_slice %700 {offsets = [2, 0], sizes = [1, 512], strides = [1, 1]} : vector<9x512xf32> to vector<1x512xf32>
    %711 = vector.broadcast %710 : vector<1x512xf32> to vector<8x512xf32>
    %712 = arith.mulf %709, %711 : vector<8x512xf32>
    %c1_i32_355 = arith.constant 1 : i32
    %713 = tpu.dynamic_rotate %698 by %c1_i32_355 dim 1 : vector<8x512xf32>, i32 -> vector<8x512xf32>
    %714 = vector.extract_strided_slice %700 {offsets = [3, 0], sizes = [1, 512], strides = [1, 1]} : vector<9x512xf32> to vector<1x512xf32>
    %715 = vector.broadcast %714 : vector<1x512xf32> to vector<8x512xf32>
    %716 = arith.mulf %713, %715 : vector<8x512xf32>
    %c511_i32_356 = arith.constant 511 : i32
    %717 = tpu.dynamic_rotate %698 by %c511_i32_356 dim 1 : vector<8x512xf32>, i32 -> vector<8x512xf32>
    %718 = vector.extract_strided_slice %700 {offsets = [5, 0], sizes = [1, 512], strides = [1, 1]} : vector<9x512xf32> to vector<1x512xf32>
    %719 = vector.broadcast %718 : vector<1x512xf32> to vector<8x512xf32>
    %720 = arith.mulf %717, %719 : vector<8x512xf32>
    %c497_i32_357 = arith.constant 497 : i32
    %721 = tpu.dynamic_rotate %698 by %c497_i32_357 dim 1 : vector<8x512xf32>, i32 -> vector<8x512xf32>
    %722 = vector.extract_strided_slice %700 {offsets = [6, 0], sizes = [1, 512], strides = [1, 1]} : vector<9x512xf32> to vector<1x512xf32>
    %723 = vector.broadcast %722 : vector<1x512xf32> to vector<8x512xf32>
    %724 = arith.mulf %721, %723 : vector<8x512xf32>
    %c496_i32_358 = arith.constant 496 : i32
    %725 = tpu.dynamic_rotate %698 by %c496_i32_358 dim 1 : vector<8x512xf32>, i32 -> vector<8x512xf32>
    %726 = vector.extract_strided_slice %700 {offsets = [7, 0], sizes = [1, 512], strides = [1, 1]} : vector<9x512xf32> to vector<1x512xf32>
    %727 = vector.broadcast %726 : vector<1x512xf32> to vector<8x512xf32>
    %728 = arith.mulf %725, %727 : vector<8x512xf32>
    %c495_i32_359 = arith.constant 495 : i32
    %729 = tpu.dynamic_rotate %698 by %c495_i32_359 dim 1 : vector<8x512xf32>, i32 -> vector<8x512xf32>
    %730 = vector.extract_strided_slice %700 {offsets = [8, 0], sizes = [1, 512], strides = [1, 1]} : vector<9x512xf32> to vector<1x512xf32>
    %731 = vector.broadcast %730 : vector<1x512xf32> to vector<8x512xf32>
    %732 = arith.mulf %729, %731 : vector<8x512xf32>
    %733 = tpu.concatenate %704, %708, %712, %716, %698, %720, %724, %728, %732 in 0 : vector<8x512xf32>, vector<8x512xf32>, vector<8x512xf32>, vector<8x512xf32>, vector<8x512xf32>, vector<8x512xf32>, vector<8x512xf32>, vector<8x512xf32>, vector<8x512xf32> -> vector<72x512xf32>
    %734 = arith.truncf %733 : vector<72x512xf32> to vector<72x512xbf16>
    %cst_360 = arith.constant dense<0.000000e+00> : vector<8x512xf32>
    %735 = tpu.matmul %699, %734, %cst_360 {dimension_numbers = #tpu.dot_dimension_numbers<[1], [0], [0], [1], [0, 0, 1, 1], [], []>} : vector<8x72xbf16>, vector<72x512xbf16>, vector<8x512xf32> -> vector<8x512xf32>
    %c0_361 = arith.constant 0 : index
    %c0_362 = arith.constant 0 : index
    %736 = vector.load %arg44[%c0_361, %c0_362] : memref<8x1xf32, #tpu.memory_space<vmem>>, vector<8x1xf32>
    %737 = vector.broadcast %736 : vector<8x1xf32> to vector<8x512xf32>
    %738 = arith.addf %735, %737 : vector<8x512xf32>
    %cst_363 = arith.constant 0.000000e+00 : f32
    %739 = vector.broadcast %cst_363 : f32 to vector<8x512xf32>
    %740 = arith.maximumf %738, %739 : vector<8x512xf32>
    %741 = arith.truncf %740 : vector<8x512xf32> to vector<8x512xbf16>
    %c0_364 = arith.constant 0 : index
    %c0_365 = arith.constant 0 : index
    %742 = vector.load %arg3[%c0_364, %c0_365] : memref<512x2xbf16, #tpu.memory_space<vmem>>, vector<512x2xbf16>
    %cst_366 = arith.constant dense<0.000000e+00> : vector<8x2xf32>
    %743 = tpu.matmul %741, %742, %cst_366 {dimension_numbers = #tpu.dot_dimension_numbers<[1], [0], [0], [1], [0, 0, 1, 1], [], []>} : vector<8x512xbf16>, vector<512x2xbf16>, vector<8x2xf32> -> vector<8x2xf32>
    %c0_367 = arith.constant 0 : index
    %c0_368 = arith.constant 0 : index
    %744 = vector.load %arg46[%c0_367, %c0_368] : memref<2x8xbf16, #tpu.memory_space<vmem>>, vector<2x8xbf16>
    %745 = arith.truncf %743 : vector<8x2xf32> to vector<8x2xbf16>
    %cst_369 = arith.constant dense<0.000000e+00> : vector<2x2xf32>
    %746 = tpu.matmul %744, %745, %cst_369 {dimension_numbers = #tpu.dot_dimension_numbers<[1], [0], [0], [1], [0, 0, 1, 1], [], []>} : vector<2x8xbf16>, vector<8x2xbf16>, vector<2x2xf32> -> vector<2x2xf32>
    %c0_370 = arith.constant 0 : index
    %c0_371 = arith.constant 0 : index
    %747 = vector.load %arg45[%c0_370, %c0_371] : memref<2x1xf32, #tpu.memory_space<vmem>>, vector<2x1xf32>
    %748 = vector.broadcast %747 : vector<2x1xf32> to vector<2x2xf32>
    %749 = arith.addf %746, %748 : vector<2x2xf32>
    %cst_372 = arith.constant 0.000000e+00 : f32
    %750 = vector.broadcast %cst_372 : f32 to vector<2x2xf32>
    %751 = arith.maximumf %749, %750 : vector<2x2xf32>
    %c0_373 = arith.constant 0 : index
    %c0_374 = arith.constant 0 : index
    %752 = vector.load %arg48[%c0_373, %c0_374] : memref<8x2xbf16, #tpu.memory_space<vmem>>, vector<8x2xbf16>
    %753 = arith.truncf %751 : vector<2x2xf32> to vector<2x2xbf16>
    %cst_375 = arith.constant dense<0.000000e+00> : vector<8x2xf32>
    %754 = tpu.matmul %752, %753, %cst_375 {dimension_numbers = #tpu.dot_dimension_numbers<[1], [0], [0], [1], [0, 0, 1, 1], [], []>} : vector<8x2xbf16>, vector<2x2xbf16>, vector<8x2xf32> -> vector<8x2xf32>
    %c0_376 = arith.constant 0 : index
    %c0_377 = arith.constant 0 : index
    %755 = vector.load %arg47[%c0_376, %c0_377] : memref<8x1xf32, #tpu.memory_space<vmem>>, vector<8x1xf32>
    %756 = vector.broadcast %755 : vector<8x1xf32> to vector<8x2xf32>
    %757 = arith.addf %754, %756 : vector<8x2xf32>
    %cst_378 = arith.constant 0.000000e+00 : f32
    %758 = vector.broadcast %cst_378 : f32 to vector<8x2xf32>
    %759 = arith.subf %758, %757 : vector<8x2xf32>
    %760 = math.exp %759 : vector<8x2xf32>
    %cst_379 = arith.constant 1.000000e+00 : f32
    %761 = vector.broadcast %cst_379 : f32 to vector<8x2xf32>
    %762 = arith.addf %761, %760 : vector<8x2xf32>
    %cst_380 = arith.constant 1.000000e+00 : f32
    %763 = vector.broadcast %cst_380 : f32 to vector<8x2xf32>
    %764 = arith.divf %763, %762 : vector<8x2xf32>
    %765 = arith.truncf %764 : vector<8x2xf32> to vector<8x2xbf16>
    %c0_381 = arith.constant 0 : index
    %c0_382 = arith.constant 0 : index
    %766 = vector.load %arg0[%c0_381, %c0_382] : memref<2x512xbf16, #tpu.memory_space<vmem>>, vector<2x512xbf16>
    %cst_383 = arith.constant dense<0.000000e+00> : vector<8x512xf32>
    %767 = tpu.matmul %765, %766, %cst_383 {dimension_numbers = #tpu.dot_dimension_numbers<[1], [0], [0], [1], [0, 0, 1, 1], [], []>} : vector<8x2xbf16>, vector<2x512xbf16>, vector<8x512xf32> -> vector<8x512xf32>
    %768 = arith.mulf %740, %767 : vector<8x512xf32>
    %c0_384 = arith.constant 0 : index
    %c0_385 = arith.constant 0 : index
    %769 = vector.load %arg42[%c0_384, %c0_385] : memref<2x8xbf16, #tpu.memory_space<vmem>>, vector<2x8xbf16>
    %770 = arith.truncf %768 : vector<8x512xf32> to vector<8x512xbf16>
    %cst_386 = arith.constant dense<0.000000e+00> : vector<2x512xf32>
    %771 = tpu.matmul %769, %770, %cst_386 {dimension_numbers = #tpu.dot_dimension_numbers<[1], [0], [0], [1], [0, 0, 1, 1], [], []>} : vector<2x8xbf16>, vector<8x512xbf16>, vector<2x512xf32> -> vector<2x512xf32>
    %c0_387 = arith.constant 0 : index
    %c0_388 = arith.constant 0 : index
    %772 = vector.load %arg41[%c0_387, %c0_388] : memref<2x1xf32, #tpu.memory_space<vmem>>, vector<2x1xf32>
    %773 = vector.broadcast %772 : vector<2x1xf32> to vector<2x512xf32>
    %774 = arith.addf %771, %773 : vector<2x512xf32>
    %c0_389 = arith.constant 0 : index
    %c0_390 = arith.constant 0 : index
    %775 = vector.load %arg64[%c0_389, %c0_390] : memref<2x512xf32, #tpu.memory_space<vmem>>, vector<2x512xf32>
    tpu.vector_store %arg64[%c0_389, %c0_390], %774 {strides = array<i32>} : memref<2x512xf32, #tpu.memory_space<vmem>>, vector<2x512xf32>,
    return
  }
}

</mosaic_0001>

<bundles_post_ra>
// kernel: ufanet_forward.1
= control target key start
LH: loop header
LB: loop body
LE: loop exit
PB: predicated region body
PF: predicated region fallthrough
CT: control target
= control target key end

     0   :  { %s9824_s6 = smov 1   ;;  %s9825_s10 = smov 2   ;;  %s13232_s0 = inlined_call_operand.smem [shape: u32[65], index: -1, kind: input, shape index: {}] }
   0x1   :  { %s9945_s5 = sld [smem:[%s13232_s0]]   ;;  %s9826_s14 = smov 3  }
   0x2   :  { %s9950_s9 = sld [smem:[%s13232_s0 + %s9824_s6]]   ;;  %s9827_s18 = smov 4  }
   0x3   :  { %s9955_s13 = sld [smem:[%s13232_s0 + %s9825_s10]]   ;;  %s9828_s22 = smov 5  }
   0x4   :  { %s9960_s17 = sld [smem:[%s13232_s0 + %s9826_s14]]   ;;  %s9829_s26 = smov 6  }
   0x5   :  { %s9965_s21 = sld [smem:[%s13232_s0 + %s9827_s18]]   ;;  %s9830_s30 = smov 7  }
   0x6   :  { %s9970_s25 = sld [smem:[%s13232_s0 + %s9828_s22]]   ;;  %s9831_s4 = smov 8  }
   0x7   :  { %s9975_s29 = sld [smem:[%s13232_s0 + %s9829_s26]]   ;;  %s9832_s10 = smov 9  }
   0x8   :  { %13322 = sst [smem:[#allocation52_spill]] %s9950_s9  ;;  %s9833_s15 = smov 10  }
   0x9   :  { %s9980_s3 = sld [smem:[%s13232_s0 + %s9830_s30]]   ;;  %s9834_s20 = smov 11  }
   0xa   :  { %13323 = sst [smem:[#allocation53_spill]] %s9960_s17  ;;  %s9835_s26 = smov 12  }
   0xb   :  { %13324 = sst [smem:[#allocation54_spill]] %s9965_s21  ;;  %s9836_s1 = smov 13  }
   0xc   :  { %13325 = sst [smem:[#allocation55_spill]] %s9970_s25  ;;  %s9837_s7 = smov 14  }
   0xd   :  { %13326 = sst [smem:[#allocation56_spill]] %s9975_s29  ;;  %s9839_s22 = smov 16  }
   0xe   :  { %s9985_s8 = sld [smem:[%s13232_s0 + %s9831_s4]]   ;;  %s9840_s28 = smov 17  }
   0xf   :  { %13327 = sst [smem:[#allocation57_spill]] %s9980_s3 }
  0x10   :  { %s9990_s14 = sld [smem:[%s13232_s0 + %s9832_s10]]  }
  0x11   :  { %s9995_s19 = sld [smem:[%s13232_s0 + %s9833_s15]]   ;;  %s9838_s15 = smov 15  }
  0x12   :  { %s10000_s24 = sld [smem:[%s13232_s0 + %s9834_s20]]  }
  0x13   :  { %s10005_s30 = sld [smem:[%s13232_s0 + %s9835_s26]]  }
  0x14   :  { %13328 = sst [smem:[#allocation58_spill]] %s9985_s8 }
  0x15   :  { %s10010_s6 = sld [smem:[%s13232_s0 + %s9836_s1]]  }
  0x16   :  { %s10015_s12 = sld [smem:[%s13232_s0 + %s9837_s7]]   ;;  %s9841_s7 = smov 18  }
  0x17   :  { %13329 = sst [smem:[#allocation59_spill]] %s9995_s19 }
  0x18   :  { %13330 = sst [smem:[#allocation60_spill]] %s10000_s24 }
  0x19   :  { %13331 = sst [smem:[#allocation61_spill]] %s10005_s30 }
  0x1a   :  { %s10020_s20 = sld [smem:[%s13232_s0 + %s9838_s15]]   ;;  %s9842_s15 = smov 19  }
  0x1b   :  { %13332 = sst [smem:[#allocation62_spill]] %s10010_s6 }
  0x1c   :  { %13333 = sst [smem:[#allocation63_spill]] %s10015_s12 }
  0x1d   :  { %s10025_s27 = sld [smem:[%s13232_s0 + %s9839_s22]]   ;;  %s9843_s22 = smov 20  }
  0x1e   :  { %s10030_s4 = sld [smem:[%s13232_s0 + %s9840_s28]]   ;;  %s9844_s28 = smov 21  }
  0x1f   :  { %s10035_s8 = sld [smem:[%s13232_s0 + %s9841_s7]]   ;;  %s9845_s7 = smov 22  }
  0x20   :  { %13334 = sst [smem:[#allocation64_spill]] %s10020_s20 }
  0x21   :  { %s10040_s6 = sld [smem:[%s13232_s0 + %s9842_s15]]   ;;  %s9846_s15 = smov 23  }
  0x22   :  { %s10045_s12 = sld [smem:[%s13232_s0 + %s9843_s22]]   ;;  %s9847_s22 = smov 24  }
  0x23   :  { %13335 = sst [smem:[#allocation65_spill]] %s10025_s27 }
  0x24   :  { %13336 = sst [smem:[#allocation66_spill]] %s10030_s4 }
  0x25   :  { %s10050_s25 = sld [smem:[%s13232_s0 + %s9844_s28]]   ;;  %s9848_s28 = smov 25  }
  0x26   :  { %s10055_s30 = sld [smem:[%s13232_s0 + %s9845_s7]]   ;;  %s9849_s7 = smov 26  }
  0x27   :  { %13337 = sst [smem:[#allocation67_spill]] %s10040_s6 }
  0x28   :  { %13338 = sst [smem:[#allocation68_spill]] %s10045_s12 }
  0x29   :  { %s10060_s3 = sld [smem:[%s13232_s0 + %s9846_s15]]   ;;  %s9850_s15 = smov 27  }
  0x2a   :  { %s10065_s12 = sld [smem:[%s13232_s0 + %s9847_s22]]   ;;  %s9851_s22 = smov 28  }
  0x2b   :  { %s10070_s6 = sld [smem:[%s13232_s0 + %s9848_s28]]   ;;  %s9852_s28 = smov 29  }
  0x2c   :  { %s10075_s4 = sld [smem:[%s13232_s0 + %s9849_s7]]   ;;  %s9853_s7 = smov 30  }
  0x2d   :  { %s10080_s27 = sld [smem:[%s13232_s0 + %s9850_s15]]   ;;  %s9854_s15 = smov 31  }
  0x2e   :  { %s10085_s20 = sld [smem:[%s13232_s0 + %s9851_s22]]   ;;  %s9855_s22 = smov 32  }
  0x2f   :  { %13339 = sst [smem:[#allocation69_spill]] %s10060_s3 }
  0x30   :  { %13340 = sst [smem:[#allocation70_spill]] %s10065_s12 }
  0x31   :  { %13341 = sst [smem:[#allocation71_spill]] %s10070_s6 }
  0x32   :  { %13342 = sst [smem:[#allocation72_spill]] %s10075_s4 }
  0x33   :  { %13343 = sst [smem:[#allocation73_spill]] %s10080_s27 }
  0x34   :  { %13344 = sst [smem:[#allocation74_spill]] %s10085_s20 }
  0x35   :  { %s10090_s9 = sld [smem:[%s13232_s0 + %s9852_s28]]   ;;  %s9856_s28 = smov 33  }
  0x36   :  { %s10095_s21 = sld [smem:[%s13232_s0 + %s9853_s7]]   ;;  %s9857_s7 = smov 34  }
  0x37   :  { %s10100_s24 = sld [smem:[%s13232_s0 + %s9854_s15]]   ;;  %s9858_s15 = smov 35  }
  0x38   :  { %s10105_s29 = sld [smem:[%s13232_s0 + %s9855_s22]]   ;;  %s9859_s22 = smov 36  }
  0x39   :  { %s10110_s20 = sld [smem:[%s13232_s0 + %s9856_s28]]   ;;  %s9860_s28 = smov 37  }
  0x3a   :  { %s10115_s6 = sld [smem:[%s13232_s0 + %s9857_s7]]   ;;  %s9861_s7 = smov 38  }
  0x3b   :  { %s10135_s17 = sld [smem:[%s13232_s0 + %s9861_s7]]   ;;  %s9865_s7 = smov 42  }
  0x3c   :  { %13345 = sst [smem:[#allocation75_spill]] %s10095_s21 }
  0x3d   :  { %13346 = sst [smem:[#allocation76_spill]] %s10100_s24 }
  0x3e   :  { %13347 = sst [smem:[#allocation77_spill]] %s10105_s29 }
  0x3f   :  { %13348 = sst [smem:[#allocation78_spill]] %s10110_s20 }
  0x40   :  { %s10120_s24 = sld [smem:[%s13232_s0 + %s9858_s15]]   ;;  %s9862_s15 = smov 39  }
  0x41   :  { %s10125_s29 = sld [smem:[%s13232_s0 + %s9859_s22]]   ;;  %s9863_s22 = smov 40  }
  0x42   :  { %s10130_s20 = sld [smem:[%s13232_s0 + %s9860_s28]]   ;;  %s9864_s28 = smov 41  }
  0x43   :  { %s10150_s27 = sld [smem:[%s13232_s0 + %s9864_s28]]   ;;  %s9868_s28 = smov 45  }
  0x44   :  { %s10155_s12 = sld [smem:[%s13232_s0 + %s9865_s7]]   ;;  %s9869_s7 = smov 46  }
  0x45   :  { %s10175_s3 = sld [smem:[%s13232_s0 + %s9869_s7]]   ;;  %s9873_s7 = smov 50  }
  0x46   :  { %13349 = sst [smem:[#allocation79_spill]] %s10120_s24 }
  0x47   :  { %13350 = sst [smem:[#allocation80_spill]] %s10125_s29 }
  0x48   :  { %13351 = sst [smem:[#allocation81_spill]] %s10130_s20 }
  0x49   :  { %s10140_s24 = sld [smem:[%s13232_s0 + %s9862_s15]]   ;;  %s9866_s15 = smov 43  }
  0x4a   :  { %s10145_s29 = sld [smem:[%s13232_s0 + %s9863_s22]]   ;;  %s9867_s22 = smov 44  }
  0x4b   :  { %13354 = sst [smem:[#allocation84_spill]] %s10150_s27 }
  0x4c   :  { %s10165_s19 = sld [smem:[%s13232_s0 + %s9867_s22]]   ;;  %s9871_s22 = smov 48  }
  0x4d   :  { %s10170_s27 = sld [smem:[%s13232_s0 + %s9868_s28]]   ;;  %s9872_s28 = smov 49  }
  0x4e   :  { %13358 = sst [smem:[#allocation88_spill]] %s10175_s3 }
  0x4f   :  { %13352 = sst [smem:[#allocation82_spill]] %s10140_s24 }
  0x50   :  { %13353 = sst [smem:[#allocation83_spill]] %s10145_s29 }
  0x51   :  { %s10160_s24 = sld [smem:[%s13232_s0 + %s9866_s15]]   ;;  %s9870_s15 = smov 47  }
  0x52   :  { %13356 = sst [smem:[#allocation86_spill]] %s10165_s19 }
  0x53   :  { %13357 = sst [smem:[#allocation87_spill]] %s10170_s27 }
  0x54   :  { %s10185_s19 = sld [smem:[%s13232_s0 + %s9871_s22]]   ;;  %s9875_s22 = smov 52  }
  0x55   :  { %s10190_s27 = sld [smem:[%s13232_s0 + %s9872_s28]]   ;;  %s9876_s28 = smov 53  }
  0x56   :  { %s10195_s3 = sld [smem:[%s13232_s0 + %s9873_s7]]   ;;  %s9877_s7 = smov 54  }
  0x57   :  { %13355 = sst [smem:[#allocation85_spill]] %s10160_s24 }
  0x58   :  { %s10180_s24 = sld [smem:[%s13232_s0 + %s9870_s15]]   ;;  %s9874_s15 = smov 51  }
  0x59   :  { %s10210_s29 = sld [smem:[%s13232_s0 + %s9876_s28]]   ;;  %s9880_s28 = smov 57  }
  0x5a   :  { %13360 = sst [smem:[#allocation90_spill]] %s10185_s19 }
  0x5b   :  { %s10205_s19 = sld [smem:[%s13232_s0 + %s9875_s22]]   ;;  %s9879_s22 = smov 56  }
  0x5c   :  { %13361 = sst [smem:[#allocation91_spill]] %s10195_s3 }
  0x5d   :  { %s10215_s3 = sld [smem:[%s13232_s0 + %s9877_s7]]   ;;  %s9881_s7 = smov 58  }
  0x5e   :  { %13359 = sst [smem:[#allocation89_spill]] %s10180_s24 }
  0x5f   :  { %s10200_s24 = sld [smem:[%s13232_s0 + %s9874_s15]]   ;;  %s9878_s15 = smov 55  }
  0x60   :  { %13363 = sst [smem:[#allocation93_spill]] %s10210_s29 }
  0x61   :  { %13362 = sst [smem:[#allocation92_spill]] %s10205_s19 }
  0x62   :  { %s10220_s20 = sld [smem:[%s13232_s0 + %s9878_s15]]   ;;  %s9882_s15 = smov 59  }
  0x63   :  { %13364 = sst [smem:[#allocation94_spill]] %s10215_s3 }
  0x64   :  { %s10225_s19 = sld [smem:[%s13232_s0 + %s9879_s22]]   ;;  %s9883_s22 = smov 60  }
  0x65   :  { %s10230_s29 = sld [smem:[%s13232_s0 + %s9880_s28]]   ;;  %s9884_s28 = smov 61  }
  0x66   :  { %s10235_s3 = sld [smem:[%s13232_s0 + %s9881_s7]]   ;;  %s9885_s7 = smov 62  }
  0x67   :  { %s10255_s21 = sld [smem:[%s13232_s0 + %s9885_s7]]  }
  0x68   :  { %13365 = sst [smem:[#allocation95_spill]] %s10220_s20 }
  0x69   :  { %s10240_s20 = sld [smem:[%s13232_s0 + %s9882_s15]]   ;;  %s9886_s15 = smov 63  }
  0x6a   :  { %13366 = sst [smem:[#allocation96_spill]] %s10225_s19 }
  0x6b   :  { %13367 = sst [smem:[#allocation97_spill]] %s10230_s29 }
  0x6c   :  { %s10245_s19 = sld [smem:[%s13232_s0 + %s9883_s22]]   ;;  %s9887_s22 = smov 64  }
  0x6d   :  { %s10250_s29 = sld [smem:[%s13232_s0 + %s9884_s28]]  }
  0x6e   :  { %s10265_s4 = sld [smem:[%s13232_s0 + %s9887_s22]]  }
  0x6f   :  { %13368 = sst [smem:[#allocation98_spill]] %s10240_s20 }
  0x70   :  { %s10260_s20 = sld [smem:[%s13232_s0 + %s9886_s15]]  }
  0x71   :  { %134 = vsyncpa [#allocation3], 0 }
  0x72   :  { %135 = vsyncpa [#allocation5], 0 }
  0x73   :  { %136 = vsyncpa [#allocation8], 0 }
  0x74   :  { %137 = vsyncpa [#allocation11], 0 }
  0x75   :  { %138 = vsyncpa [#allocation14], 0 }
  0x76   :  { %139 = vsyncpa [#allocation17], 0 }
  0x77   :  { %140 = vsyncpa [#allocation20], 0 }
  0x78   :  { %141 = vsyncpa [#allocation23], 0 }
  0x79   :  { %142 = vsyncpa [#allocation26], 0 }
  0x7a   :  { %143 = vsyncpa [#allocation29], 0 }
  0x7b   :  { %144 = vsyncpa [#allocation32], 0 }
  0x7c   :  { %145 = vsyncpa [#allocation35], 0 }
  0x7d   :  { %146 = vsyncpa [#allocation38], 0  ;;  %s9888_s28 = smov [#allocation4]   ;;  %s9889_s0 = smov [#allocation7]  }
  0x7e   :  { %s165_s1 = sshll.u32 %s9888_s28, 4  ;;  %s215_s2 = sshll.u32 %s9889_s0, 4  ;;  %s166_s1 = int_to_ptr.vmem [resolvable:$true] %s165_s1  ;;  %s216_s2 = int_to_ptr.vmem [resolvable:$true] %s215_s2 }
  0x7f   :  { %s9270_s7 = scalar_lea.hbm %s9955_s13, 16 }
  0x80   :  { %p9271_p0 = scmp.ne.s32.totalorder %s9955_s13, %s9270_s7  ;;  %p9274_p1 = scmp.lt.u32.totalorder %s9270_s7, %s9955_s13 }
  0x82   :  { %p9276_p2 = pnand %p9274_p1, %p9271_p0 }
  0x84   :  { %9279 = shalt.err (!%p9276_p2)
}
  0x85   :  { %s9280_s10 = scalar_lea.vmem %s166_s1, 16  ;;  %s9284_s11 = scalar_lea.vmem %s166_s1, 32 }
  0x86   :  { %p9281_p3 = scmp.ne.s32.totalorder %s166_s1, %s9280_s10  ;;  %p9285_p4 = scmp.lt.s32.totalorder %s166_s1, %s166_s1 }
  0x87   :  { %p9286_p5 = scmp.lt.s32.totalorder %s9284_s11, %s9280_s10 }
  0x89   :  { %p9287_p6 = por %p9286_p5, %p9285_p4 }
  0x8b   :  { %p9288_p7 = pnand %p9287_p6, %p9281_p3 }
  0x8d   :  { %9291 = shalt.err (!%p9288_p7)
}
  0x8e   :  { %168 = dma.hbm_to_vmem [thread:$0]  %s9955_s13, 16, %s166_s1, [#allocation5]  }
  0x8f   :  { %s9292_s15 = scalar_lea.hbm %s10035_s8, 64 }
  0x90   :  { %p9293_p8 = scmp.ne.s32.totalorder %s10035_s8, %s9292_s15  ;;  %p9296_p9 = scmp.lt.u32.totalorder %s9292_s15, %s10035_s8 }
  0x92   :  { %p9298_p10 = pnand %p9296_p9, %p9293_p8 }
  0x94   :  { %9301 = shalt.err (!%p9298_p10)
}
  0x95   :  { %s9302_s16 = scalar_lea.vmem %s216_s2, 64  ;;  %p9307_p12 = scmp.lt.s32.totalorder %s216_s2, %s216_s2 }
  0x96   :  { %p9303_p11 = scmp.ne.s32.totalorder %s216_s2, %s9302_s16  ;;  %p9308_p13 = scmp.lt.s32.totalorder %s9302_s16, %s9302_s16 }
  0x98   :  { %p9309_p0 = por %p9308_p13, %p9307_p12 }
  0x9a   :  { %p9310_p1 = pnand %p9309_p0, %p9303_p11 }
  0x9c   :  { %9313 = shalt.err (!%p9310_p1)
}
  0x9d   :  { %218 = dma.hbm_to_vmem [thread:$0]  %s10035_s8, 64, %s216_s2, [#allocation8]  }
  0x9e   :  { %s9890_s18 = smov [#allocation10]   ;;  %s9314_s13 = scalar_lea.hbm %s10055_s30, 768 }
  0x9f   :  { %s240_s22 = sshll.u32 %s9890_s18, 4  ;;  %p9315_p2 = scmp.ne.s32.totalorder %s10055_s30, %s9314_s13  ;;  %s241_s22 = int_to_ptr.vmem [resolvable:$true] %s240_s22 }
  0xa0   :  { %p9318_p3 = scmp.lt.u32.totalorder %s9314_s13, %s10055_s30 }
  0xa2   :  { %p9320_p4 = pnand %p9318_p3, %p9315_p2 }
  0xa4   :  { %9323 = shalt.err (!%p9320_p4)
}
  0xa5   :  { %s9324_s23 = scalar_lea.vmem %s241_s22, 768  ;;  %p9329_p6 = scmp.lt.s32.totalorder %s241_s22, %s241_s22 }
  0xa6   :  { %p9325_p5 = scmp.ne.s32.totalorder %s241_s22, %s9324_s23  ;;  %p9330_p7 = scmp.lt.s32.totalorder %s9324_s23, %s9324_s23 }
  0xa8   :  { %p9331_p8 = por %p9330_p7, %p9329_p6 }
  0xaa   :  { %p9332_p9 = pnand %p9331_p8, %p9325_p5 }
  0xac   :  { %9335 = shalt.err (!%p9332_p9)
}
  0xad   :  { %s9891_s26 = smov 192   ;;  %s9892_s8 = smov 12  }
  0xae   :  { %246 = dma.hbm_to_vmem [thread:$0]  %s10055_s30, 768, %s241_s22, [#allocation11], %s9891_s26, %s9891_s26, %s9892_s8  }
  0xaf   :  { %s9893_s28 = smov [#allocation13]   ;;  %s9894_s0 = smov [#allocation16]  }
  0xb0   :  { %s273_s1 = sshll.u32 %s9893_s28, 4  ;;  %s299_s2 = sshll.u32 %s9894_s0, 4  ;;  %s274_s1 = int_to_ptr.vmem [resolvable:$true] %s273_s1  ;;  %s300_s2 = int_to_ptr.vmem [resolvable:$true] %s299_s2 }
  0xb1   :  { %s9336_s7 = scalar_lea.hbm %s10090_s9, 64 }
  0xb2   :  { %p9337_p10 = scmp.ne.s32.totalorder %s10090_s9, %s9336_s7  ;;  %p9340_p11 = scmp.lt.u32.totalorder %s9336_s7, %s10090_s9 }
  0xb4   :  { %p9342_p12 = pnand %p9340_p11, %p9337_p10 }
  0xb6   :  { %9345 = shalt.err (!%p9342_p12)
}
  0xb7   :  { %s9346_s10 = scalar_lea.vmem %s274_s1, 64  ;;  %p9351_p0 = scmp.lt.s32.totalorder %s274_s1, %s274_s1 }
  0xb8   :  { %p9347_p13 = scmp.ne.s32.totalorder %s274_s1, %s9346_s10  ;;  %p9352_p1 = scmp.lt.s32.totalorder %s9346_s10, %s9346_s10 }
  0xba   :  { %p9353_p2 = por %p9352_p1, %p9351_p0 }
  0xbc   :  { %p9354_p3 = pnand %p9353_p2, %p9347_p13 }
  0xbe   :  { %9357 = shalt.err (!%p9354_p3)
}
  0xbf   :  { %276 = dma.hbm_to_vmem [thread:$0]  %s10090_s9, 64, %s274_s1, [#allocation14]  }
  0xc0   :  { %s9358_s30 = scalar_lea.hbm %s10115_s6, 32 }
  0xc1   :  { %p9359_p4 = scmp.ne.s32.totalorder %s10115_s6, %s9358_s30  ;;  %p9362_p5 = scmp.lt.u32.totalorder %s9358_s30, %s10115_s6 }
  0xc3   :  { %p9364_p6 = pnand %p9362_p5, %p9359_p4 }
  0xc5   :  { %9367 = shalt.err (!%p9364_p6)
}
  0xc6   :  { %s9368_s11 = scalar_lea.vmem %s300_s2, 32  ;;  %p9373_p8 = scmp.lt.s32.totalorder %s300_s2, %s300_s2 }
  0xc7   :  { %p9369_p7 = scmp.ne.s32.totalorder %s300_s2, %s9368_s11  ;;  %p9374_p9 = scmp.lt.s32.totalorder %s9368_s11, %s9368_s11 }
  0xc9   :  { %p9375_p10 = por %p9374_p9, %p9373_p8 }
  0xcb   :  { %p9376_p11 = pnand %p9375_p10, %p9369_p7 }
  0xcd   :  { %9379 = shalt.err (!%p9376_p11)
}
  0xce   :  { %302 = dma.hbm_to_vmem [thread:$0]  %s10115_s6, 32, %s300_s2, [#allocation17]  }
  0xcf   :  { %s9895_s15 = smov [#allocation19]   ;;  %s9896_s16 = smov [#allocation22]  }
  0xd0   :  { %s324_s9 = sshll.u32 %s9895_s15, 4  ;;  %s353_s18 = sshll.u32 %s9896_s16, 4  ;;  %s325_s9 = int_to_ptr.vmem [resolvable:$true] %s324_s9  ;;  %s354_s18 = int_to_ptr.vmem [resolvable:$true] %s353_s18 }
  0xd1   :  { %s9380_s22 = scalar_lea.hbm %s10135_s17, 256 }
  0xd2   :  { %p9381_p12 = scmp.ne.s32.totalorder %s10135_s17, %s9380_s22  ;;  %p9384_p13 = scmp.lt.u32.totalorder %s9380_s22, %s10135_s17 }
  0xd4   :  { %p9386_p0 = pnand %p9384_p13, %p9381_p12 }
  0xd6   :  { %9389 = shalt.err (!%p9386_p0)
}
  0xd7   :  { %s9390_s13 = scalar_lea.vmem %s325_s9, 256  ;;  %p9395_p2 = scmp.lt.s32.totalorder %s325_s9, %s325_s9 }
  0xd8   :  { %p9391_p1 = scmp.ne.s32.totalorder %s325_s9, %s9390_s13  ;;  %p9396_p3 = scmp.lt.s32.totalorder %s9390_s13, %s9390_s13 }
  0xda   :  { %p9397_p4 = por %p9396_p3, %p9395_p2 }
  0xdc   :  { %p9398_p5 = pnand %p9397_p4, %p9391_p1 }
  0xde   :  { %9401 = shalt.err (!%p9398_p5)
}
  0xdf   :  { %s9897_s23 = smov 128   ;;  %s9898_s6 = smov 8  }
  0xe0   :  { %330 = dma.hbm_to_vmem [thread:$0]  %s10135_s17, 256, %s325_s9, [#allocation20], %s9897_s23, %s9897_s23, %s9898_s6  }
  0xe1   :  { %s9402_s28 = scalar_lea.hbm %s10155_s12, 16 }
  0xe2   :  { %p9403_p6 = scmp.ne.s32.totalorder %s10155_s12, %s9402_s28  ;;  %p9406_p7 = scmp.lt.u32.totalorder %s9402_s28, %s10155_s12 }
  0xe4   :  { %p9408_p8 = pnand %p9406_p7, %p9403_p6 }
  0xe6   :  { %9411 = shalt.err (!%p9408_p8)
}
  0xe7   :  { %s9412_s1 = scalar_lea.vmem %s354_s18, 16  ;;  %s9416_s0 = scalar_lea.vmem %s354_s18, 32 }
  0xe8   :  { %p9413_p9 = scmp.ne.s32.totalorder %s354_s18, %s9412_s1  ;;  %p9417_p10 = scmp.lt.s32.totalorder %s354_s18, %s354_s18 }
  0xe9   :  { %p9418_p11 = scmp.lt.s32.totalorder %s9416_s0, %s9412_s1 }
  0xeb   :  { %p9419_p12 = por %p9418_p11, %p9417_p10 }
  0xed   :  { %p9420_p13 = pnand %p9419_p12, %p9413_p9 }
  0xef   :  { %9423 = shalt.err (!%p9420_p13)
}
  0xf0   :  { %356 = dma.hbm_to_vmem [thread:$0]  %s10155_s12, 16, %s354_s18, [#allocation23]  }
  0xf1   :  { %s9899_s17 = smov [#allocation25]   ;;  %s9900_s7 = smov [#allocation28]  }
  0xf2   :  { %s383_s2 = sshll.u32 %s9899_s17, 4  ;;  %s403_s10 = sshll.u32 %s9900_s7, 4  ;;  %s384_s2 = int_to_ptr.vmem [resolvable:$true] %s383_s2  ;;  %s404_s10 = int_to_ptr.vmem [resolvable:$true] %s403_s10 }
  0xf3   :  { %s9424_s30 = scalar_lea.hbm %s10190_s27, 64 }
  0xf4   :  { %p9425_p0 = scmp.ne.s32.totalorder %s10190_s27, %s9424_s30  ;;  %p9428_p1 = scmp.lt.u32.totalorder %s9424_s30, %s10190_s27 }
  0xf6   :  { %p9430_p2 = pnand %p9428_p1, %p9425_p0 }
  0xf8   :  { %9433 = shalt.err (!%p9430_p2)
}
  0xf9   :  { %s9434_s11 = scalar_lea.vmem %s384_s2, 64  ;;  %p9439_p4 = scmp.lt.s32.totalorder %s384_s2, %s384_s2 }
  0xfa   :  { %p9435_p3 = scmp.ne.s32.totalorder %s384_s2, %s9434_s11  ;;  %p9440_p5 = scmp.lt.s32.totalorder %s9434_s11, %s9434_s11 }
  0xfc   :  { %p9441_p6 = por %p9440_p5, %p9439_p4 }
  0xfe   :  { %p9442_p7 = pnand %p9441_p6, %p9435_p3 }
 0x100   :  { %9445 = shalt.err (!%p9442_p7)
}
 0x101   :  { %386 = dma.hbm_to_vmem [thread:$0]  %s10190_s27, 64, %s384_s2, [#allocation26]  }
 0x102   :  { %s9446_s12 = scalar_lea.hbm %s10200_s24, 64 }
 0x103   :  { %p9447_p8 = scmp.ne.s32.totalorder %s10200_s24, %s9446_s12  ;;  %p9450_p9 = scmp.lt.u32.totalorder %s9446_s12, %s10200_s24 }
 0x105   :  { %p9452_p10 = pnand %p9450_p9, %p9447_p8 }
 0x107   :  { %9455 = shalt.err (!%p9452_p10)
}
 0x108   :  { %s9456_s15 = scalar_lea.vmem %s404_s10, 64  ;;  %p9461_p12 = scmp.lt.s32.totalorder %s404_s10, %s404_s10 }
 0x109   :  { %p9457_p11 = scmp.ne.s32.totalorder %s404_s10, %s9456_s15  ;;  %p9462_p13 = scmp.lt.s32.totalorder %s9456_s15, %s9456_s15 }
 0x10b   :  { %p9463_p0 = por %p9462_p13, %p9461_p12 }
 0x10d   :  { %p9464_p1 = pnand %p9463_p0, %p9457_p11 }
 0x10f   :  { %9467 = shalt.err (!%p9464_p1)
}
 0x110   :  { %406 = dma.hbm_to_vmem [thread:$0]  %s10200_s24, 64, %s404_s10, [#allocation29]  }
 0x111   :  { %s9901_s9 = smov [#allocation31]   ;;  %s9902_s16 = smov [#allocation34]  }
 0x112   :  { %s432_s27 = sshll.u32 %s9901_s9, 4  ;;  %s456_s18 = sshll.u32 %s9902_s16, 4  ;;  %s433_s27 = int_to_ptr.vmem [resolvable:$true] %s432_s27  ;;  %s457_s18 = int_to_ptr.vmem [resolvable:$true] %s456_s18 }
 0x113   :  { %s9468_s22 = scalar_lea.hbm %s10235_s3, 256 }
 0x114   :  { %p9469_p2 = scmp.ne.s32.totalorder %s10235_s3, %s9468_s22  ;;  %p9472_p3 = scmp.lt.u32.totalorder %s9468_s22, %s10235_s3 }
 0x116   :  { %p9474_p4 = pnand %p9472_p3, %p9469_p2 }
 0x118   :  { %9477 = shalt.err (!%p9474_p4)
}
 0x119   :  { %s9478_s13 = scalar_lea.vmem %s433_s27, 256  ;;  %p9483_p6 = scmp.lt.s32.totalorder %s433_s27, %s433_s27 }
 0x11a   :  { %p9479_p5 = scmp.ne.s32.totalorder %s433_s27, %s9478_s13  ;;  %p9484_p7 = scmp.lt.s32.totalorder %s9478_s13, %s9478_s13 }
 0x11c   :  { %p9485_p8 = por %p9484_p7, %p9483_p6 }
 0x11e   :  { %p9486_p9 = pnand %p9485_p8, %p9479_p5 }
 0x120   :  { %9489 = shalt.err (!%p9486_p9)
}
 0x121   :  { %438 = dma.hbm_to_vmem [thread:$0]  %s10235_s3, 256, %s433_s27, [#allocation32], %s9897_s23, %s9897_s23, %s9898_s6  }
 0x122   :  { %s9490_s24 = scalar_lea.hbm %s10245_s19, 256 }
 0x123   :  { %p9491_p10 = scmp.ne.s32.totalorder %s10245_s19, %s9490_s24  ;;  %p9494_p11 = scmp.lt.u32.totalorder %s9490_s24, %s10245_s19 }
 0x125   :  { %p9496_p12 = pnand %p9494_p11, %p9491_p10 }
 0x127   :  { %9499 = shalt.err (!%p9496_p12)
}
 0x128   :  { %s9500_s28 = scalar_lea.vmem %s457_s18, 256  ;;  %p9505_p0 = scmp.lt.s32.totalorder %s457_s18, %s457_s18 }
 0x129   :  { %p9501_p13 = scmp.ne.s32.totalorder %s457_s18, %s9500_s28  ;;  %p9506_p1 = scmp.lt.s32.totalorder %s9500_s28, %s9500_s28 }
 0x12b   :  { %p9507_p2 = por %p9506_p1, %p9505_p0 }
 0x12d   :  { %p9508_p3 = pnand %p9507_p2, %p9501_p13 }
 0x12f   :  { %9511 = shalt.err (!%p9508_p3)
}
 0x130   :  { %462 = dma.hbm_to_vmem [thread:$0]  %s10245_s19, 256, %s457_s18, [#allocation35], %s9897_s23, %s9897_s23, %s9898_s6  }
 0x131   :  { %s9903_s3 = smov [#allocation2]   ;;  %s9904_s0 = smov [#allocation6]  }
 0x132   :  { %s153_s1 = sshll.u32 %s9903_s3, 4  ;;  %s186_s17 = sshll.u32 %s9904_s0, 4  ;;  %s154_s1 = int_to_ptr.vmem [resolvable:$true] %s153_s1  ;;  %s187_s17 = int_to_ptr.vmem [resolvable:$true] %s186_s17 }
 0x133   :  { %s9512_s2 = scalar_lea.hbm %s9945_s5, 64 }
 0x134   :  { %p9513_p4 = scmp.ne.s32.totalorder %s9945_s5, %s9512_s2  ;;  %p9516_p5 = scmp.lt.u32.totalorder %s9512_s2, %s9945_s5 }
 0x136   :  { %p9518_p6 = pnand %p9516_p5, %p9513_p4 }
 0x138   :  { %9521 = shalt.err (!%p9518_p6)
}
 0x139   :  { %s9522_s7 = scalar_lea.vmem %s154_s1, 64  ;;  %p9527_p8 = scmp.lt.s32.totalorder %s154_s1, %s154_s1 }
 0x13a   :  { %p9523_p7 = scmp.ne.s32.totalorder %s154_s1, %s9522_s7  ;;  %p9528_p9 = scmp.lt.s32.totalorder %s9522_s7, %s9522_s7 }
 0x13c   :  { %p9529_p10 = por %p9528_p9, %p9527_p8 }
 0x13e   :  { %p9530_p11 = pnand %p9529_p10, %p9523_p7 }
 0x140   :  { %9533 = shalt.err (!%p9530_p11)
}
 0x141   :  { %156 = dma.hbm_to_vmem [thread:$0]  %s9945_s5, 64, %s154_s1, [#allocation3]  }
 0x142   :  { %s9534_s19 = scalar_lea.hbm %s9990_s14, 256 }
 0x143   :  { %p9535_p12 = scmp.ne.s32.totalorder %s9990_s14, %s9534_s19  ;;  %p9538_p13 = scmp.lt.u32.totalorder %s9534_s19, %s9990_s14 }
 0x145   :  { %p9540_p0 = pnand %p9538_p13, %p9535_p12 }
 0x147   :  { %9543 = shalt.err (!%p9540_p0)
}
 0x148   :  { %s9544_s10 = scalar_lea.vmem %s187_s17, 256  ;;  %p9549_p2 = scmp.lt.s32.totalorder %s187_s17, %s187_s17 }
 0x149   :  { %p9545_p1 = scmp.ne.s32.totalorder %s187_s17, %s9544_s10  ;;  %p9550_p3 = scmp.lt.s32.totalorder %s9544_s10, %s9544_s10 }
 0x14b   :  { %p9551_p4 = por %p9550_p3, %p9549_p2 }
 0x14d   :  { %p9552_p5 = pnand %p9551_p4, %p9545_p1 }
 0x14f   :  { %9555 = shalt.err (!%p9552_p5)
}
 0x150   :  { %s9905_s30 = smov 64   ;;  %s9906_s11 = smov 4  }
 0x151   :  { %192 = dma.hbm_to_vmem [thread:$0]  %s9990_s14, 256, %s187_s17, [#allocation5], %s9905_s30, %s9905_s30, %s9906_s11  }
 0x152   :  { %s9907_s5 = smov [#allocation9]   ;;  %s9908_s15 = smov [#allocation12]  }
 0x153   :  { %s228_s12 = sshll.u32 %s9907_s5, 4  ;;  %s259_s9 = sshll.u32 %s9908_s15, 4  ;;  %s229_s12 = int_to_ptr.vmem [resolvable:$true] %s228_s12  ;;  %s260_s9 = int_to_ptr.vmem [resolvable:$true] %s259_s9 }
 0x154   :  { %s9556_s27 = scalar_lea.hbm %s10050_s25, 512 }
 0x155   :  { %p9557_p6 = scmp.ne.s32.totalorder %s10050_s25, %s9556_s27  ;;  %p9560_p7 = scmp.lt.u32.totalorder %s9556_s27, %s10050_s25 }
 0x157   :  { %p9562_p8 = pnand %p9560_p7, %p9557_p6 }
 0x159   :  { %9565 = shalt.err (!%p9562_p8)
}
 0x15a   :  { %s9566_s16 = scalar_lea.vmem %s229_s12, 512  ;;  %p9571_p10 = scmp.lt.s32.totalorder %s229_s12, %s229_s12 }
 0x15b   :  { %p9567_p9 = scmp.ne.s32.totalorder %s229_s12, %s9566_s16  ;;  %p9572_p11 = scmp.lt.s32.totalorder %s9566_s16, %s9566_s16 }
 0x15d   :  { %p9573_p12 = por %p9572_p11, %p9571_p10 }
 0x15f   :  { %p9574_p13 = pnand %p9573_p12, %p9567_p9 }
 0x161   :  { %9577 = shalt.err (!%p9574_p13)
}
 0x162   :  { %s13369_s14 = sld [smem:[#allocation72_spill]] }
 0x163   :  { %234 = dma.hbm_to_vmem [thread:$0]  %s10050_s25, 512, %s229_s12, [#allocation8], %s9897_s23, %s9897_s23, %s9898_s6  }
 0x168   :  { %s9578_s18 = scalar_lea.hbm %s13369_s14, 16 }
 0x169   :  { %p9579_p0 = scmp.ne.s32.totalorder %s13369_s14, %s9578_s18  ;;  %p9582_p1 = scmp.lt.u32.totalorder %s9578_s18, %s13369_s14 }
 0x16b   :  { %p9584_p2 = pnand %p9582_p1, %p9579_p0 }
 0x16d   :  { %9587 = shalt.err (!%p9584_p2)
}
 0x16e   :  { %s9588_s22 = scalar_lea.vmem %s260_s9, 16  ;;  %s9592_s13 = scalar_lea.vmem %s260_s9, 32 }
 0x16f   :  { %p9589_p3 = scmp.ne.s32.totalorder %s260_s9, %s9588_s22  ;;  %p9593_p4 = scmp.lt.s32.totalorder %s260_s9, %s260_s9 }
 0x170   :  { %p9594_p5 = scmp.lt.s32.totalorder %s9592_s13, %s9588_s22 }
 0x172   :  { %p9595_p6 = por %p9594_p5, %p9593_p4 }
 0x174   :  { %p9596_p7 = pnand %p9595_p6, %p9589_p3 }
 0x176   :  { %9599 = shalt.err (!%p9596_p7)
}
 0x177   :  { %s13370_s24 = sld [smem:[#allocation75_spill]]  ;;  %s9909_s25 = smov [#allocation15]  }
 0x178   :  { %262 = dma.hbm_to_vmem [thread:$0]  %s13369_s14, 16, %s260_s9, [#allocation11]  }
 0x179   :  { %s283_s28 = sshll.u32 %s9909_s25, 4  ;;  %s9910_s3 = smov [#allocation18]   ;;  %s284_s28 = int_to_ptr.vmem [resolvable:$true] %s283_s28 }
 0x17a   :  { %s312_s1 = sshll.u32 %s9910_s3, 4  ;;  %s313_s1 = int_to_ptr.vmem [resolvable:$true] %s312_s1 }
 0x17d   :  { %s9600_s0 = scalar_lea.hbm %s13370_s24, 64 }
 0x17e   :  { %p9601_p8 = scmp.ne.s32.totalorder %s13370_s24, %s9600_s0  ;;  %p9604_p9 = scmp.lt.u32.totalorder %s9600_s0, %s13370_s24 }
 0x180   :  { %p9606_p10 = pnand %p9604_p9, %p9601_p8 }
 0x182   :  { %9609 = shalt.err (!%p9606_p10)
}
 0x183   :  { %s9610_s17 = scalar_lea.vmem %s284_s28, 64  ;;  %p9615_p12 = scmp.lt.s32.totalorder %s284_s28, %s284_s28 }
 0x184   :  { %p9611_p11 = scmp.ne.s32.totalorder %s284_s28, %s9610_s17  ;;  %p9616_p13 = scmp.lt.s32.totalorder %s9610_s17, %s9610_s17 }
 0x186   :  { %p9617_p0 = por %p9616_p13, %p9615_p12 }
 0x188   :  { %p9618_p1 = pnand %p9617_p0, %p9611_p11 }
 0x18a   :  { %9621 = shalt.err (!%p9618_p1)
}
 0x18b   :  { %s13371_s2 = sld [smem:[#allocation81_spill]] }
 0x18c   :  { %286 = dma.hbm_to_vmem [thread:$0]  %s13370_s24, 64, %s284_s28, [#allocation14]  }
 0x191   :  { %s9622_s7 = scalar_lea.hbm %s13371_s2, 128 }
 0x192   :  { %p9623_p2 = scmp.ne.s32.totalorder %s13371_s2, %s9622_s7  ;;  %p9626_p3 = scmp.lt.u32.totalorder %s9622_s7, %s13371_s2 }
 0x194   :  { %p9628_p4 = pnand %p9626_p3, %p9623_p2 }
 0x196   :  { %9631 = shalt.err (!%p9628_p4)
}
 0x197   :  { %s9632_s19 = scalar_lea.vmem %s313_s1, 128  ;;  %p9637_p6 = scmp.lt.s32.totalorder %s313_s1, %s313_s1 }
 0x198   :  { %p9633_p5 = scmp.ne.s32.totalorder %s313_s1, %s9632_s19  ;;  %p9638_p7 = scmp.lt.s32.totalorder %s9632_s19, %s9632_s19 }
 0x19a   :  { %p9639_p8 = por %p9638_p7, %p9637_p6 }
 0x19c   :  { %p9640_p9 = pnand %p9639_p8, %p9633_p5 }
 0x19e   :  { %9643 = shalt.err (!%p9640_p9)
}
 0x19f   :  { %s13372_s10 = sld [smem:[#allocation83_spill]]  ;;  %s9911_s5 = smov [#allocation21]  }
 0x1a0   :  { %318 = dma.hbm_to_vmem [thread:$0]  %s13371_s2, 128, %s313_s1, [#allocation17], %s9905_s30, %s9905_s30, %s9906_s11  }
 0x1a1   :  { %s338_s12 = sshll.u32 %s9911_s5, 4  ;;  %s9912_s15 = smov [#allocation24]   ;;  %s339_s12 = int_to_ptr.vmem [resolvable:$true] %s338_s12 }
 0x1a2   :  { %s369_s9 = sshll.u32 %s9912_s15, 4  ;;  %s370_s9 = int_to_ptr.vmem [resolvable:$true] %s369_s9 }
 0x1a5   :  { %s9644_s27 = scalar_lea.hbm %s13372_s10, 128 }
 0x1a6   :  { %p9645_p10 = scmp.ne.s32.totalorder %s13372_s10, %s9644_s27  ;;  %p9648_p11 = scmp.lt.u32.totalorder %s9644_s27, %s13372_s10 }
 0x1a8   :  { %p9650_p12 = pnand %p9648_p11, %p9645_p10 }
 0x1aa   :  { %9653 = shalt.err (!%p9650_p12)
}
 0x1ab   :  { %s9654_s16 = scalar_lea.vmem %s339_s12, 128  ;;  %p9659_p0 = scmp.lt.s32.totalorder %s339_s12, %s339_s12 }
 0x1ac   :  { %p9655_p13 = scmp.ne.s32.totalorder %s339_s12, %s9654_s16  ;;  %p9660_p1 = scmp.lt.s32.totalorder %s9654_s16, %s9654_s16 }
 0x1ae   :  { %p9661_p2 = por %p9660_p1, %p9659_p0 }
 0x1b0   :  { %p9662_p3 = pnand %p9661_p2, %p9655_p13 }
 0x1b2   :  { %9665 = shalt.err (!%p9662_p3)
}
 0x1b3   :  { %s13373_s14 = sld [smem:[#allocation88_spill]] }
 0x1b4   :  { %344 = dma.hbm_to_vmem [thread:$0]  %s13372_s10, 128, %s339_s12, [#allocation20], %s9905_s30, %s9905_s30, %s9906_s11  }
 0x1b9   :  { %s9666_s18 = scalar_lea.hbm %s13373_s14, 16 }
 0x1ba   :  { %p9667_p4 = scmp.ne.s32.totalorder %s13373_s14, %s9666_s18  ;;  %p9670_p5 = scmp.lt.u32.totalorder %s9666_s18, %s13373_s14 }
 0x1bc   :  { %p9672_p6 = pnand %p9670_p5, %p9667_p4 }
 0x1be   :  { %9675 = shalt.err (!%p9672_p6)
}
 0x1bf   :  { %s9676_s22 = scalar_lea.vmem %s370_s9, 16  ;;  %s9680_s13 = scalar_lea.vmem %s370_s9, 32 }
 0x1c0   :  { %p9677_p7 = scmp.ne.s32.totalorder %s370_s9, %s9676_s22  ;;  %p9681_p8 = scmp.lt.s32.totalorder %s370_s9, %s370_s9 }
 0x1c1   :  { %p9682_p9 = scmp.lt.s32.totalorder %s9680_s13, %s9676_s22 }
 0x1c3   :  { %p9683_p10 = por %p9682_p9, %p9681_p8 }
 0x1c5   :  { %p9684_p11 = pnand %p9683_p10, %p9677_p7 }
 0x1c7   :  { %9687 = shalt.err (!%p9684_p11)
}
 0x1c8   :  { %s13374_s24 = sld [smem:[#allocation91_spill]]  ;;  %s9913_s30 = smov [#allocation27]  }
 0x1c9   :  { %372 = dma.hbm_to_vmem [thread:$0]  %s13373_s14, 16, %s370_s9, [#allocation23]  }
 0x1ca   :  { %s393_s11 = sshll.u32 %s9913_s30, 4  ;;  %s9914_s25 = smov [#allocation30]   ;;  %s394_s11 = int_to_ptr.vmem [resolvable:$true] %s393_s11 }
 0x1cb   :  { %s419_s28 = sshll.u32 %s9914_s25, 4  ;;  %s420_s28 = int_to_ptr.vmem [resolvable:$true] %s419_s28 }
 0x1ce   :  { %s9688_s3 = scalar_lea.hbm %s13374_s24, 64 }
 0x1cf   :  { %p9689_p12 = scmp.ne.s32.totalorder %s13374_s24, %s9688_s3  ;;  %p9692_p13 = scmp.lt.u32.totalorder %s9688_s3, %s13374_s24 }
 0x1d1   :  { %p9694_p0 = pnand %p9692_p13, %p9689_p12 }
 0x1d3   :  { %9697 = shalt.err (!%p9694_p0)
}
 0x1d4   :  { %s9698_s1 = scalar_lea.vmem %s394_s11, 64  ;;  %p9703_p2 = scmp.lt.s32.totalorder %s394_s11, %s394_s11 }
 0x1d5   :  { %p9699_p1 = scmp.ne.s32.totalorder %s394_s11, %s9698_s1  ;;  %p9704_p3 = scmp.lt.s32.totalorder %s9698_s1, %s9698_s1 }
 0x1d7   :  { %p9705_p4 = por %p9704_p3, %p9703_p2 }
 0x1d9   :  { %p9706_p5 = pnand %p9705_p4, %p9699_p1 }
 0x1db   :  { %9709 = shalt.err (!%p9706_p5)
}
 0x1dc   :  { %s13375_s0 = sld [smem:[#allocation95_spill]] }
 0x1dd   :  { %396 = dma.hbm_to_vmem [thread:$0]  %s13374_s24, 64, %s394_s11, [#allocation26]  }
 0x1e2   :  { %s9710_s17 = scalar_lea.hbm %s13375_s0, 32 }
 0x1e3   :  { %p9711_p6 = scmp.ne.s32.totalorder %s13375_s0, %s9710_s17  ;;  %p9714_p7 = scmp.lt.u32.totalorder %s9710_s17, %s13375_s0 }
 0x1e5   :  { %p9716_p8 = pnand %p9714_p7, %p9711_p6 }
 0x1e7   :  { %9719 = shalt.err (!%p9716_p8)
}
 0x1e8   :  { %s9720_s2 = scalar_lea.vmem %s420_s28, 32  ;;  %p9725_p10 = scmp.lt.s32.totalorder %s420_s28, %s420_s28 }
 0x1e9   :  { %p9721_p9 = scmp.ne.s32.totalorder %s420_s28, %s9720_s2  ;;  %p9726_p11 = scmp.lt.s32.totalorder %s9720_s2, %s9720_s2 }
 0x1eb   :  { %p9727_p12 = por %p9726_p11, %p9725_p10 }
 0x1ed   :  { %p9728_p13 = pnand %p9727_p12, %p9721_p9 }
 0x1ef   :  { %9731 = shalt.err (!%p9728_p13)
}
 0x1f0   :  { %s13376_s7 = sld [smem:[#allocation98_spill]]  ;;  %s9915_s19 = smov [#allocation33]  }
 0x1f1   :  { %422 = dma.hbm_to_vmem [thread:$0]  %s13375_s0, 32, %s420_s28, [#allocation29]  }
 0x1f2   :  { %s444_s10 = sshll.u32 %s9915_s19, 4  ;;  %s9916_s5 = smov [#allocation36]   ;;  %s445_s10 = int_to_ptr.vmem [resolvable:$true] %s444_s10 }
 0x1f3   :  { %s469_s12 = sshll.u32 %s9916_s5, 4  ;;  %s470_s12 = int_to_ptr.vmem [resolvable:$true] %s469_s12 }
 0x1f6   :  { %s9732_s15 = scalar_lea.hbm %s13376_s7, 256 }
 0x1f7   :  { %p9733_p0 = scmp.ne.s32.totalorder %s13376_s7, %s9732_s15  ;;  %p9736_p1 = scmp.lt.u32.totalorder %s9732_s15, %s13376_s7 }
 0x1f9   :  { %p9738_p2 = pnand %p9736_p1, %p9733_p0 }
 0x1fb   :  { %9741 = shalt.err (!%p9738_p2)
}
 0x1fc   :  { %s9742_s9 = scalar_lea.vmem %s445_s10, 256  ;;  %p9747_p4 = scmp.lt.s32.totalorder %s445_s10, %s445_s10 }
 0x1fd   :  { %p9743_p3 = scmp.ne.s32.totalorder %s445_s10, %s9742_s9  ;;  %p9748_p5 = scmp.lt.s32.totalorder %s9742_s9, %s9742_s9 }
 0x1ff   :  { %p9749_p6 = por %p9748_p5, %p9747_p4 }
 0x201   :  { %p9750_p7 = pnand %p9749_p6, %p9743_p3 }
 0x203   :  { %9753 = shalt.err (!%p9750_p7)
}
 0x204   :  { %450 = dma.hbm_to_vmem [thread:$0]  %s13376_s7, 256, %s445_s10, [#allocation32], %s9897_s23, %s9897_s23, %s9898_s6  }
 0x205   :  { %s9754_s27 = scalar_lea.hbm %s10250_s29, 128 }
 0x206   :  { %p9755_p8 = scmp.ne.s32.totalorder %s10250_s29, %s9754_s27  ;;  %p9758_p9 = scmp.lt.u32.totalorder %s9754_s27, %s10250_s29 }
 0x208   :  { %p9760_p10 = pnand %p9758_p9, %p9755_p8 }
 0x20a   :  { %9763 = shalt.err (!%p9760_p10)
}
 0x20b   :  { %s9764_s16 = scalar_lea.vmem %s470_s12, 128  ;;  %p9769_p12 = scmp.lt.s32.totalorder %s470_s12, %s470_s12 }
 0x20c   :  { %p9765_p11 = scmp.ne.s32.totalorder %s470_s12, %s9764_s16  ;;  %p9770_p13 = scmp.lt.s32.totalorder %s9764_s16, %s9764_s16 }
 0x20e   :  { %p9771_p0 = por %p9770_p13, %p9769_p12 }
 0x210   :  { %p9772_p1 = pnand %p9771_p0, %p9765_p11 }
 0x212   :  { %9775 = shalt.err (!%p9772_p1)
}
 0x213   :  { %472 = dma.hbm_to_vmem [thread:$0]  %s10250_s29, 128, %s470_s12, [#allocation35]  }
 0x214   :  { %s9917_s14 = smov [#allocation37]   ;;  %s9776_s18 = scalar_lea.hbm %s10255_s21, 384 }
 0x215   :  { %s478_s23 = sshll.u32 %s9917_s14, 4  ;;  %p9777_p2 = scmp.ne.s32.totalorder %s10255_s21, %s9776_s18  ;;  %s479_s23 = int_to_ptr.vmem [resolvable:$true] %s478_s23 }
 0x216   :  { %p9780_p3 = scmp.lt.u32.totalorder %s9776_s18, %s10255_s21 }
 0x218   :  { %p9782_p4 = pnand %p9780_p3, %p9777_p2 }
 0x21a   :  { %9785 = shalt.err (!%p9782_p4)
}
 0x21b   :  { %s9786_s22 = scalar_lea.vmem %s479_s23, 384  ;;  %p9791_p6 = scmp.lt.s32.totalorder %s479_s23, %s479_s23 }
 0x21c   :  { %p9787_p5 = scmp.ne.s32.totalorder %s479_s23, %s9786_s22  ;;  %p9792_p7 = scmp.lt.s32.totalorder %s9786_s22, %s9786_s22 }
 0x21e   :  { %p9793_p8 = por %p9792_p7, %p9791_p6 }
 0x220   :  { %p9794_p9 = pnand %p9793_p8, %p9787_p5 }
 0x222   :  { %9797 = shalt.err (!%p9794_p9)
}
 0x223   :  { %484 = dma.hbm_to_vmem [thread:$0]  %s10255_s21, 384, %s479_s23, [#allocation38], %s9891_s26, %s9891_s26, %s9892_s8  }
 0x224   :  { %9798 = dma.done.wait [#allocation3], 64  }
 0x225   :  { %9799 = vsyncadd [#allocation3], 4294967232 }
 0x226   :  { %9800 = dma.done.wait [#allocation5], 272  }
 0x227   :  { %9801 = vsyncadd [#allocation5], 4294967024 }
 0x228   :  { %9802 = dma.done.wait [#allocation8], 576  }
 0x229   :  { %9803 = vsyncadd [#allocation8], 4294966720 }
 0x22a   :  { %9804 = dma.done.wait [#allocation11], 784  }
 0x22b   :  { %9805 = vsyncadd [#allocation11], 4294966512 }
 0x22c   :  { %9806 = dma.done.wait [#allocation14], 128  }
 0x22d   :  { %9807 = vsyncadd [#allocation14], 4294967168 }
 0x22e   :  { %9808 = dma.done.wait [#allocation17], 160  }
 0x22f   :  { %9809 = vsyncadd [#allocation17], 4294967136 }
 0x230   :  { %9810 = dma.done.wait [#allocation20], 384  }
 0x231   :  { %9811 = vsyncadd [#allocation20], 4294966912 }
 0x232   :  { %9812 = dma.done.wait [#allocation23], 32  }
 0x233   :  { %9813 = vsyncadd [#allocation23], 4294967264 }
 0x234   :  { %9814 = dma.done.wait [#allocation26], 128  }
 0x235   :  { %9815 = vsyncadd [#allocation26], 4294967168 }
 0x236   :  { %9816 = dma.done.wait [#allocation29], 96  }
 0x237   :  { %9817 = vsyncadd [#allocation29], 4294967200 }
 0x238   :  { %9818 = dma.done.wait [#allocation32], 512  }
 0x239   :  { %9819 = vsyncadd [#allocation32], 4294966784 }
 0x23a   :  { %9820 = dma.done.wait [#allocation35], 384  }
 0x23b   :  { %9821 = vsyncadd [#allocation35], 4294966912 }
 0x23c   :  { %9822 = dma.done.wait [#allocation38], 384  }
 0x23d   :  { %9823 = vsyncadd [#allocation38], 4294966912  ;;  %v570_v0 = vlaneseq  ;;  %v560_v6 = vld [vmem:[%s10260_s20] sm:$0xf]  ;;  %s9918_s21 = smov 16   ;;  %s9919_s29 = smov 15  }
 0x23e   :  { %s9920_s20 = smov 17   ;;  %s9921_s26 = smov 1   ;;  %v13263_v11 = vmov 0   ;;  %vm852_vm4 = vcmask 1040384   ;;  %vm857_vm5 = vcmask 1041408   ;;  %vm862_vm6 = vcmask 1042432  }
 0x23f   :  { %v10394_v1 = vshrl.u32 %v570_v0, 7  ;;  %s9922_s8 = smov 127   ;;  %s9923_s13 = smov 113   ;;  %948 = vmatprep.mubr.bf16.mxu0 %v13263_v11  ;;  %989 = vmatprep.mubr.bf16.mxu1 %v13263_v11  ;;  %v10507_v25 = vand.u32 127, %v570_v0  ;;  %vm867_vm7 = vcmask 1043456   ;;  %vm872_vm12 = vcmask 1044480  }
 0x240   :  { %s13378_s24 = sld [smem:[#allocation69_spill]]  ;;  %s9924_s30 = smov 112   ;;  %8919 = vset.pattern.permute.xlu0 %v13263_v11  ;;  %8920 = vset.pattern.permute.xlu1 %v13263_v11  ;;  %vm877_vm13 = vcmask 1045504   ;;  %vm882_vm14 = vcmask 1046528   ;;  %vm898_vm15 = vcmask 72704  }
 0x241   :  { %13377 = vst [vmem:[#allocation99_spill] sm:$0xff] %v10394_v1  ;;  %v10397_v2 = vsub.s32 2, %v10394_v1  ;;  %v10400_v3 = vsub.s32 0, %v10394_v1  ;;  %v10403_v4 = vsub.s32 3, %v10394_v1  ;;  %v10406_v5 = vsub.s32 1, %v10394_v1  ;;  %s9925_s11 = smov 111  }
 0x242   :  { %s13379_s25 = sld [smem:[#allocation59_spill]]  ;;  %vm600_vm0 = vcmp.lt.s32.totalorder %v10507_v25, 17  ;;  %vm617_vm1 = vcmp.lt.s32.totalorder %v10507_v25, 16  ;;  %vm646_vm2 = vcmp.lt.s32.totalorder %v10507_v25, 15  ;;  %vm671_vm3 = vcmp.lt.s32.totalorder %v10507_v25, 1  ;;  %s13385_s28 = sld [smem:[#allocation70_spill]] }
 0x243   :  { %v10410_v7 = vrot.slane %v560_v6, %v10397_v2  ;;  %v10413_v8 = vrot.slane %v560_v6, %v10400_v3  ;;  %v10420_v9 = vrot.slane %v560_v6, %v10403_v4  ;;  %v10423_v10 = vrot.slane %v560_v6, %v10406_v5  ;;  %s13386_s3 = sld [smem:[#allocation73_spill]]  ;;  %s13402_s1 = sld [smem:[#allocation53_spill]] }
 0x244   :  { %vm696_vm8 = vcmp.lt.s32.totalorder %v10507_v25, 127  ;;  %vm721_vm9 = vcmp.lt.s32.totalorder %v10507_v25, 113  ;;  %vm746_vm10 = vcmp.lt.s32.totalorder %v10507_v25, 112  ;;  %v9927_v6 = vmov 65535   ;;  %s13405_s0 = sld [smem:[#allocation71_spill]]  ;;  %s13406_s17 = sld [smem:[#allocation74_spill]] }
 0x245   :  { %613 = vrot.lane.b32.xlu1 %v10410_v7, %s9918_s21  ;;  %609 = vrot.lane.b32.xlu0 %v10413_v8, %s9918_s21  ;;  %vm13273_vm11 = vcmp.lt.s32.totalorder %v10507_v25, 111  ;;  %s13411_s2 = sld [smem:[#allocation56_spill]]  ;;  %s13413_s7 = sld [smem:[#allocation76_spill]] }
 0x246   :  { %v892_v12 = vld [vmem:[%s13378_s24] sm:$0xff]  ;;  %s9931_s19 = smov 9   ;;  %s13415_s10 = sld [smem:[#allocation60_spill]] }
 0x247   :  { %s9932_s5 = smov 7   ;;  %s9933_s12 = smov 121  }
 0x248   :  { %v10510_v26 = vld [vmem:[%s13379_s25] sm:$0xff]  ;;  %v10517_v29 = vld [vmem:[%s13379_s25 + $0x18] sm:$0xff]  ;;  %v10520_v30 = vld [vmem:[%s13379_s25 + $0x8] sm:$0xff]  ;;  %s9934_s15 = smov 119   ;;  %s9935_s9 = smov 120  }
 0x249   :  { %615 = vrot.lane.b32.xlu1 %v10420_v9, %s9918_s21  ;;  %611 = vrot.lane.b32.xlu0 %v10423_v10, %s9918_s21  ;;  %v10523_v31 = vld [vmem:[%s13379_s25 + $0x10] sm:$0xff]  ;;  %v626_v32 = vrot.slane %v10510_v26, 1  ;;  %v629_v33 = vrot.slane %v10517_v29, 1  ;;  %v627_v34 = vrot.slane %v10520_v30, 1  ;;  %v652_v38 = vrot.slane %v10520_v30, 2  ;;  %s13416_s27 = sld [smem:[#allocation77_spill]] }
 0x24a   :  { %v628_v35 = vrot.slane %v10523_v31, 1  ;;  %v651_v39 = vrot.slane %v10510_v26, 2  ;;  %v653_v40 = vrot.slane %v10523_v31, 2  ;;  %v654_v41 = vrot.slane %v10517_v29, 2  ;;  %s13417_s16 = sld [smem:[#allocation78_spill]]  ;;  %s13418_s14 = sld [smem:[#allocation79_spill]] }
 0x24b   :  { %v677_v42 = vrot.slane %v10520_v30, 3  ;;  %v676_v43 = vrot.slane %v10510_v26, 3  ;;  %v678_v44 = vrot.slane %v10523_v31, 3  ;;  %v679_v46 = vrot.slane %v10517_v29, 3  ;;  %s13419_s23 = sld [smem:[#allocation82_spill]]  ;;  %s13420_s18 = sld [smem:[#allocation54_spill]] }
 0x24c   :  { %v701_v47 = vrot.slane %v10510_v26, 5  ;;  %v704_v48 = vrot.slane %v10517_v29, 5  ;;  %v702_v51 = vrot.slane %v10520_v30, 5  ;;  %v703_v52 = vrot.slane %v10523_v31, 5  ;;  %s13422_s22 = sld [smem:[#allocation80_spill]]  ;;  %s13423_s24 = sld [smem:[#allocation52_spill]] }
 0x24d   :  { %640 = vrot.lane.b32.xlu1 %v10423_v10, %s9919_s29  ;;  %638 = vrot.lane.b32.xlu0 %v10413_v8, %s9919_s29  ;;  %v726_v53 = vrot.slane %v10510_v26, 6  ;;  %v729_v54 = vrot.slane %v10517_v29, 6  ;;  %v727_v58 = vrot.slane %v10520_v30, 6 }
 0x251   :  { %644 = vrot.lane.b32.xlu1 %v10420_v9, %s9919_s29  ;;  %642 = vrot.lane.b32.xlu0 %v10410_v7, %s9919_s29 }
 0x255   :  { %592 = vrot.lane.b32.xlu1 %v10423_v10, %s9920_s20  ;;  %590 = vrot.lane.b32.xlu0 %v10413_v8, %s9920_s20 }
 0x259   :  { %596 = vrot.lane.b32.xlu1 %v10420_v9, %s9920_s20  ;;  %594 = vrot.lane.b32.xlu0 %v10410_v7, %s9920_s20 }
 0x25d   :  { %665 = vrot.lane.b32.xlu1 %v10423_v10, %s9921_s26  ;;  %663 = vrot.lane.b32.xlu0 %v10413_v8, %s9921_s26 }
 0x261   :  { %669 = vrot.lane.b32.xlu1 %v10420_v9, %s9921_s26  ;;  %667 = vrot.lane.b32.xlu0 %v10410_v7, %s9921_s26 }
 0x265   :  { %690 = vrot.lane.b32.xlu1 %v10423_v10, %s9922_s8  ;;  %688 = vrot.lane.b32.xlu0 %v10413_v8, %s9922_s8 }
 0x269   :  { %694 = vrot.lane.b32.xlu1 %v10420_v9, %s9922_s8  ;;  %692 = vrot.lane.b32.xlu0 %v10410_v7, %s9922_s8 }
 0x26d   :  { %715 = vrot.lane.b32.xlu1 %v10423_v10, %s9923_s13  ;;  %713 = vrot.lane.b32.xlu0 %v10413_v8, %s9923_s13 }
 0x271   :  { %719 = vrot.lane.b32.xlu1 %v10420_v9, %s9923_s13  ;;  %717 = vrot.lane.b32.xlu0 %v10410_v7, %s9923_s13 }
 0x275   :  { %740 = vrot.lane.b32.xlu1 %v10423_v10, %s9924_s30  ;;  %738 = vrot.lane.b32.xlu0 %v10413_v8, %s9924_s30 }
 0x279   :  { %744 = vrot.lane.b32.xlu1 %v10420_v9, %s9924_s30  ;;  %742 = vrot.lane.b32.xlu0 %v10410_v7, %s9924_s30 }
 0x27d   :  { %765 = vrot.lane.b32.xlu1 %v10423_v10, %s9925_s11  ;;  %763 = vrot.lane.b32.xlu0 %v10413_v8, %s9925_s11 }
 0x281   :  { %769 = vrot.lane.b32.xlu1 %v10420_v9, %s9925_s11  ;;  %767 = vrot.lane.b32.xlu0 %v10410_v7, %s9925_s11 }
 0x285   :  { %895 = vperm.xlu0 %8919, %v892_v12  }
 0x2b7   :  { %v614_v13 = vpop.permute.xlu1 %613  ;;  %v610_v14 = vpop.permute.xlu0 %609 }
 0x2bb   :  { %v616_v15 = vpop.permute.xlu1 %615  ;;  %v612_v16 = vpop.permute.xlu0 %611 }
 0x2bc   :  { %v620_v45 = vsel %vm617_vm1, %v610_v14, %v612_v16  ;;  %v621_v55 = vsel %vm617_vm1, %v616_v15, %v610_v14  ;;  %v618_v59 = vsel %vm617_vm1, %v614_v13, %v616_v15  ;;  %v619_v60 = vsel %vm617_vm1, %v612_v16, %v614_v13 }
 0x2bd   :  { %v635_v61 = vmul.f32 %v627_v34, %v620_v45  ;;  %v634_v14 = vmul.f32 %v626_v32, %v621_v55  ;;  %v637_v45 = vmul.f32 %v629_v33, %v618_v59  ;;  %v636_v11 = vmul.f32 %v628_v35, %v619_v60 }
 0x2bf   :  { %v10490_v17 = vpop.permute.xlu1 %640  ;;  %v10492_v18 = vpop.permute.xlu0 %638  ;;  %v785_v12 = vrot.slane %v635_v61, 7 }
 0x2c0   :  { %v649_v56 = vsel %vm646_vm2, %v10492_v18, %v10490_v17 }
 0x2c1   :  { %v660_v13 = vmul.f32 %v652_v38, %v649_v56 }
 0x2c3   :  { %v10494_v19 = vpop.permute.xlu1 %644  ;;  %v10496_v20 = vpop.permute.xlu0 %642 }
 0x2c4   :  { %v650_v0 = vsel %vm646_vm2, %v10494_v19, %v10492_v18  ;;  %v647_v18 = vsel %vm646_vm2, %v10496_v20, %v10494_v19 }
 0x2c7   :  { %v10498_v21 = vpop.permute.xlu1 %592  ;;  %v10500_v22 = vpop.permute.xlu0 %590 }
 0x2c8   :  { %v603_v57 = vsel %vm600_vm0, %v10500_v22, %v10498_v21 }
 0x2c9   :  { %v606_v15 = vmul.f32 %v603_v57, %v10520_v30 }
 0x2cb   :  { %v10502_v23 = vpop.permute.xlu1 %596  ;;  %v10504_v24 = vpop.permute.xlu0 %594 }
 0x2cc   :  { %v604_v32 = vsel %vm600_vm0, %v10502_v23, %v10500_v22  ;;  %v601_v33 = vsel %vm600_vm0, %v10504_v24, %v10502_v23  ;;  %v602_v35 = vsel %vm600_vm0, %v10498_v21, %v10504_v24  ;;  %v648_v22 = vsel %vm646_vm2, %v10490_v17, %v10496_v20 }
 0x2cd   :  { %v797_v21 = vrot.slane %v660_v13, 6  ;;  %v659_v24 = vmul.f32 %v651_v39, %v650_v0  ;;  %v605_v17 = vmul.f32 %v604_v32, %v10510_v26  ;;  %v607_v20 = vmul.f32 %v602_v35, %v10523_v31 }
 0x2ce   :  { %v661_v59 = vmul.f32 %v653_v40, %v648_v22  ;;  %v787_v39 = vrot.slane %v637_v45, 7  ;;  %v786_v0 = vrot.slane %v636_v11, 7  ;;  %v753_v32 = vrot.slane %v10523_v31, 7 }
 0x2cf   :  { %v10512_v27 = vpop.permute.xlu1 %665  ;;  %v10514_v28 = vpop.permute.xlu0 %663  ;;  %v796_v13 = vrot.slane %v659_v24, 6  ;;  %v10619_v35 = vsel %vm867_vm7, 4294967295, %v9927_v6 }
 0x2d0   :  { %v674_v62 = vsel %vm671_vm3, %v10514_v28, %v10512_v27 }
 0x2d1   :  { %v685_v63 = vmul.f32 %v677_v42, %v674_v62  ;;  %v854_v42 = vsel %vm852_vm4, %v606_v15, %v785_v12  ;;  %v784_v62 = vrot.slane %v634_v14, 7 }
 0x2d3   :  { %v670_v36 = vpop.permute.xlu1 %669  ;;  %v668_v37 = vpop.permute.xlu0 %667  ;;  %v809_v57 = vrot.slane %v685_v63, 5  ;;  %v853_v40 = vsel %vm852_vm4, %v605_v17, %v784_v62 }
 0x2d4   :  { %v675_v38 = vsel %vm671_vm3, %v670_v36, %v10514_v28  ;;  %v673_v23 = vsel %vm671_vm3, %v10512_v27, %v668_v37  ;;  %v672_v19 = vsel %vm671_vm3, %v668_v37, %v670_v36  ;;  %v608_v28 = vmul.f32 %v601_v33, %v10517_v29 }
 0x2d5   :  { %v662_v27 = vmul.f32 %v654_v41, %v647_v18  ;;  %v684_v60 = vmul.f32 %v676_v43, %v675_v38  ;;  %v686_v61 = vmul.f32 %v678_v44, %v673_v23  ;;  %v687_v12 = vmul.f32 %v679_v46, %v672_v19 }
 0x2d6   :  { %v859_v36 = vsel %vm857_vm5, %v854_v42, %v797_v21  ;;  %v855_v41 = vsel %vm852_vm4, %v607_v20, %v786_v0  ;;  %v856_v43 = vsel %vm852_vm4, %v608_v28, %v787_v39  ;;  %v798_v44 = vrot.slane %v661_v59, 6 }
 0x2d7   :  { %v10545_v49 = vpop.permute.xlu1 %690  ;;  %v10547_v50 = vpop.permute.xlu0 %688  ;;  %v864_v11 = vsel %vm862_vm6, %v859_v36, %v809_v57  ;;  %v799_v46 = vrot.slane %v662_v27, 6  ;;  %v808_v63 = vrot.slane %v684_v60, 5  ;;  %v810_v14 = vrot.slane %v686_v61, 5 }
 0x2d8   :  { %v811_v45 = vrot.slane %v687_v12, 5  ;;  %v699_v6 = vsel %vm696_vm8, %v10547_v50, %v10545_v49  ;;  %v858_v22 = vsel %vm857_vm5, %v853_v40, %v796_v13  ;;  %v860_v38 = vsel %vm857_vm5, %v855_v41, %v798_v44 }
 0x2d9   :  { %v861_v23 = vsel %vm857_vm5, %v856_v43, %v799_v46  ;;  %v869_v42 = vsel %vm867_vm7, %v864_v11, %v10423_v10  ;;  %v709_v20 = vmul.f32 %v701_v47, %v699_v6  ;;  %v13380_v61 = vrot.slane %v10523_v31, 6 }
 0x2da   :  { %v866_v57 = vsel %vm862_vm6, %v861_v23, %v811_v45  ;;  %v13382_v36 = vrot.slane %v10517_v29, 7  ;;  %v10687_v45 = vld [vmem:[%s13379_s25 + $0x20] sm:$0x1]  ;;  %v10699_v23 = vld [vmem:[%s13379_s25 + $0x28] sm:$0x1] }
 0x2db   :  { %v695_v16 = vpop.permute.xlu1 %694  ;;  %v693_v34 = vpop.permute.xlu0 %692  ;;  %v820_v0 = vrot.slane %v709_v20, 3  ;;  %v871_v43 = vsel %vm867_vm7, %v866_v57, %v10420_v9 }
 0x2dc   :  { %v700_v33 = vsel %vm696_vm8, %v695_v16, %v10547_v50  ;;  %v698_v18 = vsel %vm696_vm8, %v10545_v49, %v693_v34  ;;  %v697_v19 = vsel %vm696_vm8, %v693_v34, %v695_v16  ;;  %v863_v34 = vsel %vm862_vm6, %v858_v22, %v808_v63 }
 0x2dd   :  { %v712_v28 = vmul.f32 %v704_v48, %v700_v33  ;;  %v710_v10 = vmul.f32 %v702_v51, %v698_v18  ;;  %v711_v47 = vmul.f32 %v703_v52, %v697_v19  ;;  %v868_v22 = vsel %vm867_vm7, %v863_v34, %v10413_v8  ;;  %v10706_v8 = vld [vmem:[%s13379_s25 + $0x38] sm:$0x1] }
 0x2de   :  { %v873_v19 = vsel %vm872_vm12, %v868_v22, %v820_v0 }
 0x2df   :  { %v716_v55 = vpop.permute.xlu1 %715  ;;  %v714_v56 = vpop.permute.xlu0 %713  ;;  %v821_v12 = vrot.slane %v710_v10, 3  ;;  %v822_v11 = vrot.slane %v711_v47, 3 }
 0x2e0   :  { %v724_v50 = vsel %vm721_vm9, %v714_v56, %v716_v55 }
 0x2e1   :  { %v734_v48 = vmul.f32 %v726_v53, %v724_v50 }
 0x2e3   :  { %v720_v37 = vpop.permute.xlu1 %719  ;;  %v718_v15 = vpop.permute.xlu0 %717  ;;  %v832_v44 = vrot.slane %v734_v48, 2 }
 0x2e4   :  { %v725_v49 = vsel %vm721_vm9, %v720_v37, %v714_v56  ;;  %v723_v17 = vsel %vm721_vm9, %v716_v55, %v718_v15  ;;  %v722_v16 = vsel %vm721_vm9, %v718_v15, %v720_v37  ;;  %v865_v56 = vsel %vm862_vm6, %v860_v38, %v810_v14  ;;  %v10696_v38 = vld [vmem:[%s13379_s25 + $0x30] sm:$0x1]  ;;  %s13424_s25 = sld [smem:[#allocation64_spill]] }
 0x2e5   :  { %v737_v51 = vmul.f32 %v729_v54, %v725_v49  ;;  %v735_v59 = vmul.f32 %v727_v58, %v723_v17  ;;  %v736_v62 = vmul.f32 %v13380_v61, %v722_v16  ;;  %v823_v54 = vrot.slane %v712_v28, 3 }
 0x2e6   :  { %v13381_v58 = vrot.slane %v10510_v26, 7  ;;  %v13383_v15 = vrot.slane %v10520_v30, 7  ;;  %v878_v34 = vsel %vm877_vm13, %v873_v19, %v832_v44  ;;  %v1279_v19 = vld [vmem:[%s13385_s28] sm:$0xff]  ;;  %vm13276_vm6 = vcmask 588800   ;;  %s13425_s28 = sld [smem:[#allocation65_spill]] }
 0x2e7   :  { %v741_v21 = vpop.permute.xlu1 %740  ;;  %v739_v24 = vpop.permute.xlu0 %738  ;;  %v835_v46 = vrot.slane %v737_v51, 2  ;;  %v833_v63 = vrot.slane %v735_v59, 2  ;;  %v834_v33 = vrot.slane %v736_v62, 2 }
 0x2e8   :  { %v749_v55 = vsel %vm746_vm10, %v739_v24, %v741_v21 }
 0x2e9   :  { %v759_v13 = vmul.f32 %v13381_v58, %v749_v55 }
 0x2eb   :  { %v745_v27 = vpop.permute.xlu1 %744  ;;  %v743_v60 = vpop.permute.xlu0 %742  ;;  %v844_v9 = vrot.slane %v759_v13, 1 }
 0x2ec   :  { %v750_v39 = vsel %vm746_vm10, %v745_v27, %v739_v24  ;;  %v747_v52 = vsel %vm746_vm10, %v743_v60, %v745_v27  ;;  %v748_v53 = vsel %vm746_vm10, %v741_v21, %v743_v60  ;;  %v874_v21 = vsel %vm872_vm12, %v869_v42, %v821_v12 }
 0x2ed   :  { %v762_v37 = vmul.f32 %v13382_v36, %v750_v39  ;;  %v760_v40 = vmul.f32 %v13383_v15, %v748_v53  ;;  %v761_v41 = vmul.f32 %v753_v32, %v747_v52  ;;  %v870_v32 = vsel %vm867_vm7, %v865_v56, %v10410_v7 }
 0x2ee   :  { %v876_v24 = vsel %vm872_vm12, %v871_v43, %v823_v54  ;;  %v879_v10 = vsel %vm877_vm13, %v874_v21, %v833_v63  ;;  %v875_v42 = vsel %vm872_vm12, %v870_v32, %v822_v11  ;;  %v883_v27 = vsel %vm882_vm14, %v878_v34, %v844_v9 }
 0x2ef   :  { %v766_v14 = vpop.permute.xlu1 %765  ;;  %v764_v6 = vpop.permute.xlu0 %763  ;;  %v847_v50 = vrot.slane %v762_v37, 1  ;;  %v845_v49 = vrot.slane %v760_v40, 1  ;;  %v846_v17 = vrot.slane %v761_v41, 1  ;;  %v881_v16 = vsel %vm877_vm13, %v876_v24, %v835_v46  ;;  %v891_v37 = vld [vmem:[#allocation13] sm:$0xf] }
 0x2f0   :  { %v774_v18 = vsel %vm13273_vm11, %v764_v6, %v766_v14  ;;  %v880_v47 = vsel %vm877_vm13, %v875_v42, %v834_v33  ;;  %v903_v53 = vsel %vm872_vm12, %v10619_v35, 0  ;;  %v13384_v15 = vmov 0  }
 0x2f1   :  { %v776_v20 = vmul.f32 %v774_v18, %v10687_v45  ;;  %v884_v60 = vsel %vm882_vm14, %v879_v10, %v845_v49  ;;  %v886_v61 = vsel %vm882_vm14, %v881_v16, %v847_v50  ;;  %v885_v39 = vsel %vm882_vm14, %v880_v47, %v846_v17  ;;  %v1785_v50 = vld [vmem:[%s13386_s3] sm:$0xff]  ;;  %s13427_s3 = sld [smem:[#allocation66_spill]] }
 0x2f2   :  { %v10806_v16 = vrot.slane %v10520_v30, %v10400_v3  ;;  %v10810_v34 = vrot.slane %v10520_v30, %v10406_v5  ;;  %v10820_v47 = vrot.slane %v10517_v29, %v10400_v3  ;;  %vm9929_vm12 = vmmov 0  }
 0x2f3   :  { %v770_v28 = vpop.permute.xlu1 %769  ;;  %v768_v7 = vpop.permute.xlu0 %767  ;;  %v887_v62 = vpack.c.bf16 %v776_v20, %v883_v27  ;;  %vm1735_vm13 = vcmask 64512   ;;  %vm1791_vm14 = vcmask 15360  }
 0x2f4   :  { %v775_v56 = vsel %vm13273_vm11, %v770_v28, %v764_v6  ;;  %v772_v57 = vsel %vm13273_vm11, %v768_v7, %v770_v28  ;;  %v773_v55 = vsel %vm13273_vm11, %v766_v14, %v768_v7  ;;  %13387 = vst [vmem:[#allocation100_spill] sm:$0xff] %v10806_v16 }
 0x2f5   :  { %v778_v48 = vmul.f32 %v772_v57, %v10696_v38  ;;  %v777_v51 = vmul.f32 %v773_v55, %v10699_v23  ;;  %v779_v59 = vmul.f32 %v775_v56, %v10706_v8  ;;  %v905_v36 = vand.u32 %v903_v53, %v887_v62 }
 0x2f6   :  { %v10816_v56 = vrot.slane %v10510_v26, %v10400_v3  ;;  %v10838_v62 = vrot.slane %v10517_v29, %v10406_v5 }
 0x2f7   :  { %v888_v52 = vpack.c.bf16 %v777_v51, %v884_v60  ;;  %v890_v0 = vpack.c.bf16 %v779_v59, %v886_v61  ;;  %v889_v54 = vpack.c.bf16 %v778_v48, %v885_v39  ;;  %v10824_v48 = vrot.slane %v10523_v31, %v10406_v5 }
 0x2f8   :  { %v10830_v59 = vrot.slane %v10510_v26, %v10406_v5  ;;  %v10842_v39 = vrot.slane %v10523_v31, %v10400_v3 }
 0x2f9   :  { %v908_v12 = vand.u32 %v903_v53, %v888_v52  ;;  %v914_v58 = vand.u32 %v903_v53, %v890_v0  ;;  %v911_v13 = vand.u32 %v903_v53, %v889_v54 }
 0x2fb   :  { %916 = vmatprep.subr.bf16.mxu0 %v908_v12  ;;  %957 = vmatprep.subr.bf16.mxu1 %v914_v58 }
 0x2fc   :  { %917 = vmatpush1.bf16.msra.mxu0 %v905_v36  ;;  %958 = vmatpush1.bf16.msra.mxu1 %v911_v13 }
 0x2ff   :  { %7800 = vmatmul.mubr.msk.bf16.vlgmr.msra.gmra.mrb[0].mxu0 %vm898_vm15, %v891_v37  ;;  %7801 = vmatmul.mubr.msk.bf16.vlgmr.msra.gmra.mrb[0].mxu1 %vm898_vm15, %v891_v37  ;;  %vm2555_vm15 = vcmask 130048  }
 0x300   :  { %1333 = vmatprep.mubr.bf16.mxu0 %v13384_v15  ;;  %1374 = vmatprep.mubr.bf16.mxu1 %v13384_v15 }
 0x304   :  { %v896_v40 = vpop.permute.xlu0 %895 }
 0x3d2   :  { %v950_v35 = vpop.f32.mrb[0].mxu0  ;;  %v991_v41 = vpop.f32.mrb[0].mxu1 }
 0x3d3   :  { %v951_v43 = vadd.f32 %v950_v35, %v896_v40  ;;  %v992_v11 = vadd.f32 %v991_v41, %v896_v40  ;;  %v952_v44 = vpop.f32.mrb[1].mxu0  ;;  %v993_v46 = vpop.f32.mrb[1].mxu1 }
 0x3d4   :  { %v954_v63 = vpop.f32.mrb[2].mxu0  ;;  %v995_v14 = vpop.f32.mrb[2].mxu1  ;;  %v953_v18 = vadd.f32 %v952_v44, %v896_v40  ;;  %v994_v21 = vadd.f32 %v993_v46, %v896_v40 }
 0x3d5   :  { %v10730_v6 = vmax.f32 %v951_v43, 0.0  ;;  %v10732_v33 = vmax.f32 %v992_v11, 0.0  ;;  %v955_v22 = vpop.f32.mrb[3].mxu0  ;;  %v996_v32 = vpop.f32.mrb[3].mxu1 }
 0x3d6   :  { %v10738_v9 = vmax.f32 %v953_v18, 0.0  ;;  %v10744_v24 = vmax.f32 %v994_v21, 0.0  ;;  %v10862_v21 = vrot.slane %v10520_v30, %v10397_v2 }
 0x3d7   :  { %1007 = vrot.lane.b32.xlu0 %v10732_v33, %s9920_s20  ;;  %1003 = vrot.lane.b32.xlu1 %v10730_v6, %s9920_s20 }
 0x3db   :  { %1035 = vrot.lane.b32.xlu0 %v10730_v6, %s9918_s21  ;;  %1005 = vrot.lane.b32.xlu1 %v10738_v9, %s9920_s20 }
 0x3df   :  { %1039 = vrot.lane.b32.xlu0 %v10732_v33, %s9918_s21  ;;  %1009 = vrot.lane.b32.xlu1 %v10744_v24, %s9920_s20 }
 0x3e3   :  { %1067 = vrot.lane.b32.xlu0 %v10730_v6, %s9919_s29  ;;  %1037 = vrot.lane.b32.xlu1 %v10738_v9, %s9918_s21 }
 0x3e7   :  { %1071 = vrot.lane.b32.xlu0 %v10732_v33, %s9919_s29  ;;  %1041 = vrot.lane.b32.xlu1 %v10744_v24, %s9918_s21 }
 0x3eb   :  { %1099 = vrot.lane.b32.xlu0 %v10730_v6, %s9921_s26  ;;  %1069 = vrot.lane.b32.xlu1 %v10738_v9, %s9919_s29 }
 0x3ef   :  { %1103 = vrot.lane.b32.xlu0 %v10732_v33, %s9921_s26  ;;  %1073 = vrot.lane.b32.xlu1 %v10744_v24, %s9919_s29 }
 0x3f3   :  { %1131 = vrot.lane.b32.xlu0 %v10730_v6, %s9922_s8  ;;  %1101 = vrot.lane.b32.xlu1 %v10738_v9, %s9921_s26 }
 0x3f7   :  { %1135 = vrot.lane.b32.xlu0 %v10732_v33, %s9922_s8  ;;  %1105 = vrot.lane.b32.xlu1 %v10744_v24, %s9921_s26 }
 0x3fb   :  { %1163 = vrot.lane.b32.xlu0 %v10730_v6, %s9923_s13  ;;  %1133 = vrot.lane.b32.xlu1 %v10738_v9, %s9922_s8 }
 0x3ff   :  { %1167 = vrot.lane.b32.xlu0 %v10732_v33, %s9923_s13  ;;  %1137 = vrot.lane.b32.xlu1 %v10744_v24, %s9922_s8 }
 0x403   :  { %1195 = vrot.lane.b32.xlu0 %v10730_v6, %s9924_s30  ;;  %1165 = vrot.lane.b32.xlu1 %v10738_v9, %s9923_s13 }
 0x407   :  { %1199 = vrot.lane.b32.xlu0 %v10732_v33, %s9924_s30  ;;  %1169 = vrot.lane.b32.xlu1 %v10744_v24, %s9923_s13 }
 0x40b   :  { %1227 = vrot.lane.b32.xlu0 %v10730_v6, %s9925_s11  ;;  %1197 = vrot.lane.b32.xlu1 %v10738_v9, %s9924_s30 }
 0x40f   :  { %1231 = vrot.lane.b32.xlu0 %v10732_v33, %s9925_s11  ;;  %1201 = vrot.lane.b32.xlu1 %v10744_v24, %s9924_s30 }
 0x413   :  { %1282 = vperm.xlu0 %8919, %v1279_v19   ;;  %1229 = vrot.lane.b32.xlu1 %v10738_v9, %s9925_s11  ;;  %v10866_v19 = vrot.slane %v10520_v30, %v10403_v4 }
 0x417   :  { %1788 = vperm.xlu0 %8919, %v1785_v50   ;;  %1233 = vrot.lane.b32.xlu1 %v10744_v24, %s9925_s11 }
 0x449   :  { %v1008_v49 = vpop.permute.xlu0 %1007  ;;  %v1004_v17 = vpop.permute.xlu1 %1003 }
 0x44d   :  { %v1036_v20 = vpop.permute.xlu0 %1035  ;;  %v1006_v28 = vpop.permute.xlu1 %1005 }
 0x44e   :  { %v1013_v42 = vsel %vm600_vm0, %v1004_v17, %v1006_v28  ;;  %v1012_v0 = vsel %vm600_vm0, %v1006_v28, %v1008_v49  ;;  %v10875_v28 = vsub.s32 5, %v10394_v1 }
 0x44f   :  { %v1032_v27 = vmul.f32 %v10806_v16, %v1013_v42  ;;  %v1033_v11 = vmul.f32 %v10842_v39, %v1012_v0 }
 0x451   :  { %v1040_v7 = vpop.permute.xlu0 %1039  ;;  %v1010_v10 = vpop.permute.xlu1 %1009 }
 0x452   :  { %v1011_v52 = vsel %vm600_vm0, %v1008_v49, %v1010_v10  ;;  %v1014_v53 = vsel %vm600_vm0, %v1010_v10, %v1004_v17  ;;  %v10872_v49 = vrot.slane %v10510_v26, %v10397_v2  ;;  %v10883_v10 = vrot.slane %v10523_v31, %v10403_v4 }
 0x453   :  { %v1031_v40 = vmul.f32 %v10816_v56, %v1014_v53  ;;  %v1034_v35 = vmul.f32 %v10820_v47, %v1011_v52  ;;  %v10901_v52 = vrot.slane %v10523_v31, %v10397_v2 }
 0x455   :  { %v1068_v57 = vpop.permute.xlu0 %1067  ;;  %v1038_v55 = vpop.permute.xlu1 %1037 }
 0x456   :  { %v1045_v51 = vsel %vm617_vm1, %v1036_v20, %v1038_v55  ;;  %v1044_v60 = vsel %vm617_vm1, %v1038_v55, %v1040_v7  ;;  %v10889_v55 = vrot.slane %v10510_v26, %v10403_v4 }
 0x457   :  { %v1064_v61 = vmul.f32 %v10810_v34, %v1045_v51  ;;  %v1065_v13 = vmul.f32 %v10824_v48, %v1044_v60 }
 0x459   :  { %v1072_v54 = vpop.permute.xlu0 %1071  ;;  %v1042_v12 = vpop.permute.xlu1 %1041  ;;  %v1260_v58 = vpack.c.bf16 %v1064_v61, %v1032_v27  ;;  %v1261_v18 = vpack.c.bf16 %v1065_v13, %v1033_v11  ;;  %v10897_v61 = vrot.slane %v10517_v29, %v10403_v4 }
 0x45a   :  { %v1043_v36 = vsel %vm617_vm1, %v1040_v7, %v1042_v12  ;;  %v1046_v37 = vsel %vm617_vm1, %v1042_v12, %v1036_v20  ;;  %v10879_v7 = vrot.slane %v10517_v29, %v10397_v2 }
 0x45b   :  { %v1063_v41 = vmul.f32 %v10830_v59, %v1046_v37  ;;  %v1066_v43 = vmul.f32 %v10838_v62, %v1043_v36  ;;  %1301 = vmatprep.subr.bf16.mxu0 %v1260_v58  ;;  %v10911_v37 = vrot.slane %v10510_v26, %v10875_v28 }
 0x45d   :  { %v1259_v44 = vpack.c.bf16 %v1063_v41, %v1031_v40  ;;  %v1100_v46 = vpop.permute.xlu0 %1099  ;;  %v1070_v63 = vpop.permute.xlu1 %1069  ;;  %v1262_v14 = vpack.c.bf16 %v1066_v43, %v1034_v35  ;;  %13388 = vst [vmem:[#allocation101_spill] sm:$0xff] %v10911_v37 }
 0x45e   :  { %v1077_v50 = vsel %vm646_vm2, %v1068_v57, %v1070_v63  ;;  %v1076_v12 = vsel %vm646_vm2, %v1070_v63, %v1072_v54 }
 0x45f   :  { %1302 = vmatpush1.bf16.msra.mxu0 %v1259_v44  ;;  %1342 = vmatprep.subr.bf16.mxu1 %v1262_v14  ;;  %v1096_v51 = vmul.f32 %v10862_v21, %v1077_v50  ;;  %v1097_v63 = vmul.f32 %v10901_v52, %v1076_v12 }
 0x460   :  { %1343 = vmatpush1.bf16.msra.mxu1 %v1261_v18 }
 0x461   :  { %v1104_v22 = vpop.permute.xlu0 %1103  ;;  %v1074_v32 = vpop.permute.xlu1 %1073 }
 0x462   :  { %v1075_v53 = vsel %vm646_vm2, %v1072_v54, %v1074_v32  ;;  %v1078_v0 = vsel %vm646_vm2, %v1074_v32, %v1068_v57  ;;  %v10920_v57 = vrot.slane %v10520_v30, %v10875_v28 }
 0x463   :  { %v1095_v54 = vmul.f32 %v10872_v49, %v1078_v0  ;;  %v1098_v43 = vmul.f32 %v10879_v7, %v1075_v53 }
 0x464   :  { %13389 = vst [vmem:[#allocation102_spill] sm:$0xff] %v10920_v57 }
 0x465   :  { %v1132_v17 = vpop.permute.xlu0 %1131  ;;  %v1102_v20 = vpop.permute.xlu1 %1101 }
 0x466   :  { %v1109_v42 = vsel %vm671_vm3, %v1100_v46, %v1102_v20  ;;  %v1108_v27 = vsel %vm671_vm3, %v1102_v20, %v1104_v22 }
 0x467   :  { %v1128_v60 = vmul.f32 %v10866_v19, %v1109_v42  ;;  %v1129_v40 = vmul.f32 %v10883_v10, %v1108_v27  ;;  %v10933_v42 = vrot.slane %v10523_v31, %v10875_v28 }
 0x469   :  { %v1136_v58 = vpop.permute.xlu0 %1135  ;;  %v1106_v13 = vpop.permute.xlu1 %1105  ;;  %v1264_v36 = vpack.c.bf16 %v1128_v60, %v1096_v51  ;;  %13390 = vst [vmem:[#allocation103_spill] sm:$0xff] %v10933_v42  ;;  %v10939_v60 = vrot.slane %v10517_v29, %v10875_v28 }
 0x46a   :  { %v1107_v35 = vsel %vm671_vm3, %v1104_v22, %v1106_v13  ;;  %v1110_v41 = vsel %vm671_vm3, %v1106_v13, %v1100_v46  ;;  %v1265_v46 = vpack.c.bf16 %v1129_v40, %v1097_v63 }
 0x46b   :  { %v1127_v11 = vmul.f32 %v10889_v55, %v1110_v41  ;;  %v1130_v44 = vmul.f32 %v10897_v61, %v1107_v35  ;;  %1303 = vmatprep.subr.bf16.mxu0 %v1264_v36  ;;  %13391 = vst [vmem:[#allocation104_spill] sm:$0xff] %v10939_v60 }
 0x46d   :  { %v1263_v14 = vpack.c.bf16 %v1127_v11, %v1095_v54  ;;  %v1164_v18 = vpop.permute.xlu0 %1163  ;;  %v1134_v22 = vpop.permute.xlu1 %1133  ;;  %v1266_v32 = vpack.c.bf16 %v1130_v44, %v1098_v43 }
 0x46e   :  { %v1140_v50 = vsel %vm696_vm8, %v1134_v22, %v1136_v58  ;;  %v1141_v20 = vsel %vm696_vm8, %v1132_v17, %v1134_v22 }
 0x46f   :  { %v1159_v51 = vmul.f32 %v10911_v37, %v1141_v20  ;;  %v1160_v27 = vmul.f32 %v10920_v57, %v1140_v50  ;;  %1304 = vmatpush1.bf16.msra.mxu0 %v1263_v14  ;;  %1344 = vmatprep.subr.bf16.mxu1 %v1266_v32 }
 0x470   :  { %1345 = vmatpush1.bf16.msra.mxu1 %v1265_v46 }
 0x471   :  { %v1267_v53 = vpack.c.bf16 %v1159_v51, %v10730_v6  ;;  %v1168_v0 = vpop.permute.xlu0 %1167  ;;  %v1138_v12 = vpop.permute.xlu1 %1137  ;;  %v1268_v13 = vpack.c.bf16 %v1160_v27, %v10738_v9  ;;  %v10952_v9 = vsub.s32 6, %v10394_v1 }
 0x472   :  { %v1139_v36 = vsel %vm696_vm8, %v1136_v58, %v1138_v12  ;;  %v1142_v40 = vsel %vm696_vm8, %v1138_v12, %v1132_v17  ;;  %v10955_v58 = vsub.s32 7, %v10394_v1 }
 0x473   :  { %v1161_v35 = vmul.f32 %v10933_v42, %v1139_v36  ;;  %v1162_v41 = vmul.f32 %v10939_v60, %v1142_v40  ;;  %1305 = vmatprep.subr.bf16.mxu0 %v1268_v13  ;;  %v10959_v63 = vrot.slane %v10510_v26, %v10952_v9  ;;  %v10979_v46 = vrot.slane %v10523_v31, %v10952_v9 }
 0x474   :  { %1306 = vmatpush1.bf16.msra.mxu0 %v1267_v53  ;;  %v10971_v14 = vrot.slane %v10520_v30, %v10955_v58  ;;  %v10983_v50 = vrot.slane %v10517_v29, %v10952_v9  ;;  %v10991_v51 = vrot.slane %v10523_v31, %v10955_v58  ;;  %v10995_v27 = vrot.slane %v10517_v29, %v10955_v58 }
 0x475   :  { %v1269_v54 = vpack.c.bf16 %v1161_v35, %v10732_v33  ;;  %v1196_v43 = vpop.permute.xlu0 %1195  ;;  %v1166_v6 = vpop.permute.xlu1 %1165  ;;  %v1270_v11 = vpack.c.bf16 %v1162_v41, %v10744_v24  ;;  %13392 = vst [vmem:[#allocation105_spill] sm:$0xff] %v10959_v63  ;;  %v10963_v33 = vrot.slane %v10520_v30, %v10952_v9  ;;  %v10967_v24 = vrot.slane %v10510_v26, %v10955_v58 }
 0x476   :  { %13395 = vst [vmem:[#allocation108_spill] sm:$0xff] %v10971_v14  ;;  %v1172_v22 = vsel %vm721_vm9, %v1166_v6, %v1168_v0  ;;  %v1173_v32 = vsel %vm721_vm9, %v1164_v18, %v1166_v6  ;;  %13396 = vst [vmem:[#allocation109_spill] sm:$0xff] %v10979_v46  ;;  %v11007_v29 = vrot.slane %v10687_v45, %v10400_v3 }
 0x477   :  { %1346 = vmatprep.subr.bf16.mxu1 %v1270_v11  ;;  %13393 = vst [vmem:[#allocation106_spill] sm:$0xff] %v10963_v33  ;;  %13394 = vst [vmem:[#allocation107_spill] sm:$0xff] %v10967_v24  ;;  %v1191_v53 = vmul.f32 %v10959_v63, %v1173_v32  ;;  %v1192_v12 = vmul.f32 %v10963_v33, %v1172_v22  ;;  %v11011_v11 = vrot.slane %v10699_v23, %v10400_v3 }
 0x478   :  { %1347 = vmatpush1.bf16.msra.mxu1 %v1269_v54  ;;  %13397 = vst [vmem:[#allocation110_spill] sm:$0xff] %v10983_v50  ;;  %13398 = vst [vmem:[#allocation111_spill] sm:$0xff] %v10991_v51 }
 0x479   :  { %v1200_v17 = vpop.permute.xlu0 %1199  ;;  %v1170_v44 = vpop.permute.xlu1 %1169  ;;  %13399 = vst [vmem:[#allocation112_spill] sm:$0xff] %v10995_v27  ;;  %13400 = vst [vmem:[#allocation113_spill] sm:$0xff] %v11007_v29 }
 0x47a   :  { %v1171_v35 = vsel %vm721_vm9, %v1168_v0, %v1170_v44  ;;  %v1174_v31 = vsel %vm721_vm9, %v1170_v44, %v1164_v18  ;;  %13401 = vst [vmem:[#allocation114_spill] sm:$0xff] %v11011_v11 }
 0x47b   :  { %v1193_v32 = vmul.f32 %v10979_v46, %v1171_v35  ;;  %v1194_v18 = vmul.f32 %v10983_v50, %v1174_v31 }
 0x47d   :  { %v1198_v26 = vpop.permute.xlu1 %1197  ;;  %v1228_v13 = vpop.permute.xlu0 %1227 }
 0x47e   :  { %v1204_v20 = vsel %vm746_vm10, %v1198_v26, %v1200_v17  ;;  %v1205_v30 = vsel %vm746_vm10, %v1196_v43, %v1198_v26 }
 0x47f   :  { %v1223_v36 = vmul.f32 %v10967_v24, %v1205_v30  ;;  %v1224_v40 = vmul.f32 %v10971_v14, %v1204_v20 }
 0x481   :  { %v1271_v41 = vpack.c.bf16 %v1223_v36, %v1191_v53  ;;  %v1202_v54 = vpop.permute.xlu1 %1201  ;;  %v1272_v6 = vpack.c.bf16 %v1224_v40, %v1192_v12  ;;  %v1232_v45 = vpop.permute.xlu0 %1231  ;;  %v11027_v53 = vrot.slane %v10696_v38, %v10400_v3  ;;  %v11031_v12 = vrot.slane %v10706_v8, %v10400_v3 }
 0x482   :  { %v1203_v22 = vsel %vm746_vm10, %v1200_v17, %v1202_v54  ;;  %v1206_v0 = vsel %vm746_vm10, %v1202_v54, %v1196_v43  ;;  %v8951_v54 = vld [vmem:[%s13402_s1 + $0x40] sm:$0xff]  }
 0x483   :  { %v1225_v44 = vmul.f32 %v10991_v51, %v1203_v22  ;;  %v1226_v26 = vmul.f32 %v10995_v27, %v1206_v0  ;;  %1307 = vmatprep.subr.bf16.mxu0 %v1272_v6  ;;  %13403 = vst [vmem:[#allocation115_spill] sm:$0xff] %v11027_v53  ;;  %13404 = vst [vmem:[#allocation116_spill] sm:$0xff] %v11031_v12 }
 0x484   :  { %1308 = vmatpush1.bf16.msra.mxu0 %v1271_v41 }
 0x485   :  { %v1273_v23 = vpack.c.bf16 %v1225_v44, %v1193_v32  ;;  %v1230_v20 = vpop.permute.xlu1 %1229  ;;  %v1274_v30 = vpack.c.bf16 %v1226_v26, %v1194_v18  ;;  %v1002_v32 = vld [vmem:[#allocation15] sm:$0xf]  ;;  %v8952_v18 = vld [vmem:[%s13402_s1] sm:$0xff]  }
 0x486   :  { %v1236_v17 = vsel %vm13273_vm11, %v1230_v20, %v1232_v45  ;;  %v1237_v43 = vsel %vm13273_vm11, %v1228_v13, %v1230_v20  ;;  %v8955_v20 = vld [vmem:[%s13402_s1 + $0x8] sm:$0xff]  }
 0x487   :  { %v1255_v36 = vmul.f32 %v11007_v29, %v1237_v43  ;;  %v1256_v40 = vmul.f32 %v11011_v11, %v1236_v17  ;;  %1348 = vmatprep.subr.bf16.mxu1 %v1274_v30  ;;  %v8956_v30 = vld [vmem:[%s13402_s1 + $0x80] sm:$0xff]   ;;  %v8957_v17 = vld [vmem:[%s13402_s1 + $0x50] sm:$0xff]   ;;  %v8958_v43 = vld [vmem:[%s13402_s1 + $0xc8] sm:$0xff]  }
 0x488   :  { %1349 = vmatpush1.bf16.msra.mxu1 %v1273_v23 }
 0x489   :  { %v1275_v35 = vpack.c.bf16 %v1255_v36, %v1255_v36  ;;  %v1276_v31 = vpack.c.bf16 %v1256_v40, %v1256_v40  ;;  %v1234_v41 = vpop.permute.xlu1 %1233  ;;  %v8959_v36 = vld [vmem:[%s13402_s1 + $0x10] sm:$0xff]   ;;  %v8960_v40 = vld [vmem:[%s13402_s1 + $0x88] sm:$0xff]  }
 0x48a   :  { %v1235_v38 = vsel %vm13273_vm11, %v1232_v45, %v1234_v41  ;;  %v1238_v8 = vsel %vm13273_vm11, %v1234_v41, %v1228_v13  ;;  %v8953_v13 = vld [vmem:[%s13402_s1 + $0x48] sm:$0xff]   ;;  %v8954_v45 = vld [vmem:[%s13402_s1 + $0xc0] sm:$0xff]   ;;  %v8963_v41 = vld [vmem:[%s13402_s1 + $0x18] sm:$0xff]   ;;  %vm2780_vm11 = vcmask 31744  }
 0x48b   :  { %v1257_v6 = vmul.f32 %v11027_v53, %v1235_v38  ;;  %v1258_v22 = vmul.f32 %v11031_v12, %v1238_v8  ;;  %7802 = vmatprep.subr.msk.bf16.mxu0 %vm867_vm7, %v1276_v31  ;;  %v1290_v0 = vsel %vm867_vm7, %v1275_v35, 0  ;;  %v8961_v35 = vld [vmem:[%s13402_s1 + $0x58] sm:$0xff]   ;;  %v8962_v31 = vld [vmem:[%s13402_s1 + $0xd0] sm:$0xff]   ;;  %v8965_v38 = vld [vmem:[%s13402_s1 + $0x60] sm:$0xff]  }
 0x48c   :  { %1310 = vmatpush1.bf16.msra.mxu0 %v1290_v0  ;;  %v8966_v8 = vld [vmem:[%s13402_s1 + $0xd8] sm:$0xff]   ;;  %v8969_v0 = vld [vmem:[%s13402_s1 + $0x68] sm:$0xff]  }
 0x48d   :  { %v1277_v44 = vpack.c.bf16 %v1257_v6, %v1257_v6  ;;  %v1278_v26 = vpack.c.bf16 %v1258_v22, %v1258_v22  ;;  %8121 = vmatprep.subr.bf16.mxu0 %v8951_v54  ;;  %v8964_v54 = vld [vmem:[%s13402_s1 + $0x90] sm:$0xff]   ;;  %v8967_v6 = vld [vmem:[%s13402_s1 + $0x20] sm:$0xff]   ;;  %v8968_v22 = vld [vmem:[%s13402_s1 + $0x98] sm:$0xff]  }
 0x48f   :  { %7803 = vmatmul.mubr.msk.bf16.vlgmr.msra.gmra.mrb[4].mxu0 %vm13276_vm6, %v1002_v32  ;;  %7804 = vmatprep.subr.msk.bf16.mxu1 %vm867_vm7, %v1278_v26  ;;  %v1296_v23 = vsel %vm867_vm7, %v1277_v44, 0  ;;  %v8972_v44 = vld [vmem:[%s13402_s1 + $0xa0] sm:$0xff]   ;;  %v8973_v26 = vld [vmem:[%s13402_s1 + $0x70] sm:$0xff]  }
 0x490   :  { %1351 = vmatpush1.bf16.msra.mxu1 %v1296_v23  ;;  %8122 = vmatpush3.bf16.msra.mxu0 %v8952_v18  ;;  %v8971_v18 = vld [vmem:[%s13402_s1 + $0x28] sm:$0xff]  }
 0x491   :  { %8123 = vmatprep.subr.bf16.mxu0 %v8953_v13  ;;  %8143 = vmatprep.subr.bf16.mxu1 %v8954_v45  ;;  %v8974_v13 = vld [vmem:[%s13402_s1 + $0xe8] sm:$0xff]   ;;  %v8975_v45 = vld [vmem:[%s13402_s1 + $0x30] sm:$0xff]  }
 0x492   :  { %v8976_v23 = vld [vmem:[%s13402_s1 + $0xa8] sm:$0xff]  }
 0x493   :  { %7805 = vmatmul.mubr.msk.bf16.vlgmr.msra.gmra.mrb[4].mxu1 %vm13276_vm6, %v1002_v32  ;;  %v8970_v32 = vld [vmem:[%s13402_s1 + $0xe0] sm:$0xff]  }
 0x494   :  { %8124 = vmatpush3.bf16.msra.mxu0 %v8955_v20  ;;  %8144 = vmatpush3.bf16.msra.mxu1 %v8956_v30  ;;  %v8977_v20 = vld [vmem:[%s13402_s1 + $0x78] sm:$0xff]   ;;  %v8978_v30 = vld [vmem:[%s13402_s1 + $0xf0] sm:$0xff]  }
 0x495   :  { %8125 = vmatprep.subr.bf16.mxu0 %v8957_v17  ;;  %8145 = vmatprep.subr.bf16.mxu1 %v8958_v43  ;;  %v8979_v17 = vld [vmem:[%s13402_s1 + $0x38] sm:$0xff]   ;;  %v8980_v43 = vld [vmem:[%s13402_s1 + $0xb0] sm:$0xff]  }
 0x498   :  { %8126 = vmatpush3.bf16.msra.mxu0 %v8959_v36  ;;  %8146 = vmatpush3.bf16.msra.mxu1 %v8960_v40  ;;  %v8981_v36 = vld [vmem:[%s13402_s1 + $0xf8] sm:$0xff]  }
 0x499   :  { %8127 = vmatprep.subr.bf16.mxu0 %v8961_v35  ;;  %8147 = vmatprep.subr.bf16.mxu1 %v8962_v31  ;;  %v8982_v40 = vld [vmem:[%s13402_s1 + $0xb8] sm:$0xff]   ;;  %v1283_v35 = vpop.permute.xlu0 %1282 }
 0x49c   :  { %8128 = vmatpush3.bf16.msra.mxu0 %v8963_v41  ;;  %8148 = vmatpush3.bf16.msra.mxu1 %v8964_v54 }
 0x49d   :  { %8129 = vmatprep.subr.bf16.mxu0 %v8965_v38  ;;  %8149 = vmatprep.subr.bf16.mxu1 %v8966_v8 }
 0x4a0   :  { %8130 = vmatpush3.bf16.msra.mxu0 %v8967_v6  ;;  %8150 = vmatpush3.bf16.msra.mxu1 %v8968_v22 }
 0x4a1   :  { %8131 = vmatprep.subr.bf16.mxu0 %v8969_v0  ;;  %8151 = vmatprep.subr.bf16.mxu1 %v8970_v32 }
 0x4a4   :  { %8132 = vmatpush3.bf16.msra.mxu0 %v8971_v18  ;;  %8152 = vmatpush3.bf16.msra.mxu1 %v8972_v44 }
 0x4a5   :  { %8133 = vmatprep.subr.bf16.mxu0 %v8973_v26  ;;  %8153 = vmatprep.subr.bf16.mxu1 %v8974_v13 }
 0x4a8   :  { %8134 = vmatpush3.bf16.msra.mxu0 %v8975_v45  ;;  %8154 = vmatpush3.bf16.msra.mxu1 %v8976_v23 }
 0x4a9   :  { %8135 = vmatprep.subr.bf16.mxu0 %v8977_v20  ;;  %8155 = vmatprep.subr.bf16.mxu1 %v8978_v30 }
 0x4ac   :  { %8136 = vmatpush3.bf16.msra.mxu0 %v8979_v17  ;;  %8156 = vmatpush3.bf16.msra.mxu1 %v8980_v43 }
 0x4ad   :  { %8157 = vmatprep.subr.bf16.mxu1 %v8981_v36 }
 0x4b0   :  { %8158 = vmatpush3.bf16.msra.mxu1 %v8982_v40  ;;  %v13265_v40 = vmov 0.0  }
 0x4b1   :  { %8452 = vmatprep.subr.bf16.mxu0 %v13265_v40  ;;  %8458 = vmatprep.subr.bf16.mxu1 %v13265_v40 }
 0x562   :  { %v1335_v31 = vpop.f32.mrb[4].mxu0 }
 0x563   :  { %v1336_v41 = vadd.f32 %v1335_v31, %v1283_v35  ;;  %v1337_v54 = vpop.f32.mrb[5].mxu0 }
 0x564   :  { %v1338_v38 = vadd.f32 %v1337_v54, %v1283_v35  ;;  %v1339_v8 = vpop.f32.mrb[6].mxu0 }
 0x565   :  { %v11079_v6 = vmax.f32 %v1336_v41, 0.0  ;;  %v1340_v22 = vpop.f32.mrb[7].mxu0 }
 0x566   :  { %v11081_v0 = vmax.f32 %v1338_v38, 0.0  ;;  %v1376_v32 = vpop.f32.mrb[4].mxu1 }
 0x567   :  { %v1377_v18 = vadd.f32 %v1376_v32, %v1283_v35  ;;  %v1378_v44 = vpop.f32.mrb[5].mxu1  ;;  %v1387_v23 = vpack.c.bf16 %v11079_v6, %v11079_v6 }
 0x568   :  { %v1388_v26 = vpack.c.bf16 %v11081_v0, %v11081_v0  ;;  %v1379_v13 = vadd.f32 %v1378_v44, %v1283_v35  ;;  %v1380_v45 = vpop.f32.mrb[6].mxu1  ;;  %v1729_v35 = vld [vmem:[%s13405_s0] sm:$0x3]  ;;  %s13429_s0 = sld [smem:[#allocation67_spill]] }
 0x569   :  { %v11087_v20 = vmax.f32 %v1377_v18, 0.0  ;;  %v1381_v30 = vpop.f32.mrb[7].mxu1  ;;  %1732 = vperm.xlu1 %8920, %v1729_v35  }
 0x56a   :  { %v11089_v17 = vmax.f32 %v1379_v13, 0.0  ;;  %1679 = vmatprep.mubr.bf16.mxu0 %v1388_v26  ;;  %v1727_v30 = vld [vmem:[#allocation12] sm:$0x1] }
 0x56b   :  { %1680 = vmatmul.mubr.bf16.vlgmr.msra.gmra.mrb[8].mxu0 %v1387_v23  ;;  %v1389_v36 = vpack.c.bf16 %v11087_v20, %v11087_v20 }
 0x56c   :  { %v1390_v43 = vpack.c.bf16 %v11089_v17, %v11089_v17  ;;  %8454 = vmatprep.mubr.msk.bf16.mxu0 %vm9929_vm12, %v13265_v40 }
 0x56e   :  { %1719 = vmatprep.mubr.bf16.mxu1 %v1390_v43 }
 0x56f   :  { %1720 = vmatmul.mubr.bf16.vlgmr.msra.gmra.mrb[8].mxu1 %v1389_v36 }
 0x570   :  { %8460 = vmatprep.mubr.msk.bf16.mxu1 %vm9929_vm12, %v13265_v40 }
 0x5e8   :  { %v1733_v43 = vpop.permute.xlu1 %1732 }
 0x63e   :  { %v8137_v31 = vpop.f32.mrb[8].mxu0 }
 0x63f   :  { %v8138_v41 = vpop.f32.mrb[9].mxu0 }
 0x640   :  { %v8139_v54 = vadd.f32 %v8138_v41, %v8137_v31  ;;  %v8140_v38 = vpop.f32.mrb[10].mxu0 }
 0x641   :  { %v8141_v8 = vpop.f32.mrb[11].mxu0 }
 0x642   :  { %v8159_v22 = vpop.f32.mrb[8].mxu1 }
 0x643   :  { %v8160_v32 = vpop.f32.mrb[9].mxu1 }
 0x644   :  { %v8161_v18 = vadd.f32 %v8160_v32, %v8159_v22  ;;  %v8162_v44 = vpop.f32.mrb[10].mxu1  ;;  %v1783_v32 = vld [vmem:[%s13406_s17] sm:$0xf]  ;;  %s13430_s17 = sld [smem:[#allocation57_spill]] }
 0x645   :  { %v8163_v26 = vpop.f32.mrb[11].mxu1 }
 0x646   :  { %v1722_v13 = vadd.f32 %v8161_v18, %v8139_v54  ;;  %v9930_v18 = vmov 1966171168  }
 0x647   :  { %v1856_v44 = vunpack.c.l.s4 %v9930_v18 }
 0x648   :  { %v1728_v45 = vpack.c.bf16 %v1722_v13, %v1722_v13  ;;  %v7840_v13 = vld.sshfl [vmem:[#allocation2] sm:$0x33 pattern:$0x75316420] }
 0x649   :  { %v1857_v26 = vunpack.c.0.s8 %v1856_v44 }
 0x64a   :  { %v1740_v23 = vsel %vm867_vm7, %v1728_v45, 0  ;;  %v1854_v45 = vcombine.high %v7840_v13, %v7840_v13 }
 0x64b   :  { %8453 = vmatpush3.bf16.msra.mxu0 %v1740_v23  ;;  %v1860_v23 = vsub.s32 %v1857_v26, %v10394_v1  ;;  %v8989_v1 = vld [vmem:[%s13411_s2 + $0x8] sm:$0xff]  }
 0x64e   :  { %8455 = vmatmul.mubr.msk.bf16.vlgmr.msra.gmra.mrb[12].mxu0 %vm1735_vm13, %v1727_v30  ;;  %v11110_v30 = vrot.slane %v1854_v45, %v1860_v23 }
 0x64f   :  { %1918 = vmatprep.mubr.bf16.mxu0 %v13384_v15 }
 0x650   :  { %13407 = vst [vmem:[#allocation117_spill] sm:$0xff] %v11110_v30  ;;  %7841 = vmatprep.subr.msk.bf16.mxu0 %vm852_vm4, %v11110_v30 }
 0x721   :  { %v1776_v36 = vpop.f32.mrb[12].mxu0 }
 0x722   :  { %v1777_v35 = vadd.f32 %v1776_v36, %v1733_v43  ;;  %v8456_v31 = vpop.f32.mrb[13].mxu0  ;;  %v1861_v43 = vrot.slane %v7840_v13, %v1860_v23  ;;  %v11116_v36 = vcombine.high %v11110_v30, %v11110_v30 }
 0x723   :  { %v1779_v41 = vpop.f32.mrb[14].mxu0 }
 0x724   :  { %v1782_v38 = vmax.f32 %v1777_v35, 0.0  ;;  %v8457_v8 = vpop.f32.mrb[15].mxu0  ;;  %13408 = vst [vmem:[#allocation118_spill] sm:$0xff] %v11116_v36  ;;  %v1869_v35 = vcombine.high %v1861_v43, %v1861_v43  ;;  %v11121_v31 = vsel %vm852_vm4, %v1861_v43, 0 }
 0x725   :  { %13409 = vst [vmem:[#allocation119_spill] sm:$0xff] %v11121_v31  ;;  %1887 = vmatpush1.bf16.msra.mxu0 %v11121_v31 }
 0x726   :  { %v1784_v22 = vpack.c.bf16 %v1782_v38, %v1782_v38  ;;  %v11124_v41 = vsel %vm852_vm4, %v1869_v35, 0  ;;  %v1789_v38 = vpop.permute.xlu0 %1788 }
 0x727   :  { %13410 = vst [vmem:[#allocation120_spill] sm:$0xff] %v11124_v41 }
 0x728   :  { %v1796_v54 = vsel %vm852_vm4, %v1784_v22, 0 }
 0x729   :  { %8459 = vmatpush3.bf16.msra.mxu1 %v1796_v54 }
 0x72a   :  { %7843 = vmatprep.subr.msk.bf16.mxu1 %vm852_vm4, %v11116_v36 }
 0x72c   :  { %8461 = vmatmul.mubr.msk.bf16.vlgmr.msra.gmra.mrb[12].mxu1 %vm1791_vm14, %v1783_v32 }
 0x72d   :  { %1959 = vmatprep.mubr.bf16.mxu1 %v13384_v15  ;;  %1928 = vmatpush1.bf16.msra.mxu1 %v11124_v41  ;;  %v8990_v41 = vld [vmem:[%s13411_s2 + $0x88] sm:$0xff]  }
 0x7ff   :  { %v1832_v8 = vpop.f32.mrb[12].mxu1 }
 0x800   :  { %v1833_v22 = vadd.f32 %v1832_v8, %v1789_v38  ;;  %v8462_v54 = vpop.f32.mrb[13].mxu1  ;;  %v8983_v8 = vld [vmem:[%s13411_s2 + $0x40] sm:$0xff]  }
 0x801   :  { %v1835_v32 = vpop.f32.mrb[14].mxu1  ;;  %v8984_v54 = vld [vmem:[%s13411_s2 + $0xc0] sm:$0xff]   ;;  %8169 = vmatprep.subr.bf16.mxu0 %v8983_v8  ;;  %v8991_v8 = vld [vmem:[%s13411_s2 + $0x50] sm:$0xff]  }
 0x802   :  { %v1838_v18 = vsub.f32 0.0, %v1833_v22  ;;  %v8463_v44 = vpop.f32.mrb[15].mxu1  ;;  %v8985_v22 = vld [vmem:[%s13411_s2] sm:$0xff]   ;;  %8191 = vmatprep.subr.bf16.mxu1 %v8984_v54  ;;  %v8992_v54 = vld [vmem:[%s13411_s2 + $0xd0] sm:$0xff]  }
 0x804   :  { %v1839_v26 = vmul.f32 1.442695, %v1838_v18 }
 0x806   :  { %9189 = vpow2.f32 %v1839_v26 }
 0x810   :  { %v9190_v13 = vpop.eup %9189 }
 0x811   :  { %v1841_v45 = vadd.f32 1.0, %v9190_v13  ;;  %v8986_v13 = vld [vmem:[%s13411_s2 + $0x80] sm:$0xff]  }
 0x813   :  { %9191 = vrcp.f32 %v1841_v45  ;;  %v8987_v45 = vld [vmem:[%s13411_s2 + $0x48] sm:$0xff]  }
 0x81d   :  { %v9192_v23 = vpop.eup %9191 }
 0x81e   :  { %v1844_v43 = vpack.c.bf16 %v9192_v23, %v9192_v23  ;;  %v8988_v23 = vld [vmem:[%s13411_s2 + $0xc8] sm:$0xff]  }
 0x820   :  { %7842 = vmatmul.mubr.msk.bf16.vlgmr.msra.gmra.mrb[16].mxu0 %vm1791_vm14, %v1844_v43  ;;  %7844 = vmatmul.mubr.msk.bf16.vlgmr.msra.gmra.mrb[16].mxu1 %vm1791_vm14, %v1844_v43 }
 0x821   :  { %8170 = vmatpush3.bf16.msra.mxu0 %v8985_v22  ;;  %8192 = vmatpush3.bf16.msra.mxu1 %v8986_v13  ;;  %v8993_v22 = vld [vmem:[%s13411_s2 + $0x10] sm:$0xff]   ;;  %v8996_v13 = vld [vmem:[%s13411_s2 + $0xd8] sm:$0xff]  }
 0x822   :  { %8171 = vmatprep.subr.bf16.mxu0 %v8987_v45  ;;  %8193 = vmatprep.subr.bf16.mxu1 %v8988_v23  ;;  %v8997_v45 = vld [vmem:[%s13411_s2 + $0x18] sm:$0xff]  }
 0x823   :  { %v8998_v23 = vld [vmem:[%s13411_s2 + $0x98] sm:$0xff]  }
 0x825   :  { %8172 = vmatpush3.bf16.msra.mxu0 %v8989_v1  ;;  %8194 = vmatpush3.bf16.msra.mxu1 %v8990_v41  ;;  %v8999_v1 = vld [vmem:[%s13411_s2 + $0x60] sm:$0xff]  }
 0x826   :  { %8173 = vmatprep.subr.bf16.mxu0 %v8991_v8  ;;  %8195 = vmatprep.subr.bf16.mxu1 %v8992_v54  ;;  %v9000_v41 = vld [vmem:[%s13411_s2 + $0xe0] sm:$0xff]   ;;  %v9007_v8 = vld [vmem:[%s13411_s2 + $0x70] sm:$0xff]  }
 0x827   :  { %v9008_v54 = vld [vmem:[%s13411_s2 + $0xf0] sm:$0xff]  }
 0x829   :  { %8174 = vmatpush3.bf16.msra.mxu0 %v8993_v22  ;;  %v9009_v22 = vld [vmem:[%s13411_s2 + $0x30] sm:$0xff]  }
 0x8f3   :  { %v1920_v35 = vpop.f32.mrb[16].mxu0  ;;  %v1961_v38 = vpop.f32.mrb[16].mxu1 }
 0x8f4   :  { %v11134_v32 = vmul.f32 %v1920_v35, %v11079_v6  ;;  %v11137_v18 = vmul.f32 %v1961_v38, %v11087_v20  ;;  %v1922_v44 = vpop.f32.mrb[17].mxu0  ;;  %v1963_v26 = vpop.f32.mrb[17].mxu1 }
 0x8f5   :  { %v11143_v43 = vmul.f32 %v1922_v44, %v11081_v0  ;;  %v11146_v40 = vmul.f32 %v1963_v26, %v11089_v17  ;;  %v1924_v6 = vpop.f32.mrb[18].mxu0  ;;  %v1965_v35 = vpop.f32.mrb[18].mxu1  ;;  %v8994_v44 = vld [vmem:[%s13411_s2 + $0x90] sm:$0xff]   ;;  %v8995_v26 = vld [vmem:[%s13411_s2 + $0x58] sm:$0xff]  }
 0x8f6   :  { %v1925_v20 = vpop.f32.mrb[19].mxu0  ;;  %v1966_v38 = vpop.f32.mrb[19].mxu1  ;;  %8196 = vmatpush3.bf16.msra.mxu1 %v8994_v44  ;;  %8175 = vmatprep.subr.bf16.mxu0 %v8995_v26  ;;  %v9001_v6 = vld [vmem:[%s13411_s2 + $0x20] sm:$0xff]   ;;  %v9010_v44 = vld [vmem:[%s13411_s2 + $0xb0] sm:$0xff]   ;;  %v9011_v26 = vld [vmem:[%s13411_s2 + $0x78] sm:$0xff]  }
 0x8f7   :  { %v8921_v0 = vpack.i.bf16 %v11143_v43, %v11134_v32  ;;  %v8926_v17 = vpack.i.bf16 %v11146_v40, %v11137_v18  ;;  %8197 = vmatprep.subr.bf16.mxu1 %v8996_v13  ;;  %8176 = vmatpush3.bf16.msra.mxu0 %v8997_v45  ;;  %v9002_v35 = vld [vmem:[%s13411_s2 + $0xa0] sm:$0xff]   ;;  %v9003_v20 = vld [vmem:[%s13411_s2 + $0x68] sm:$0xff]   ;;  %v9012_v13 = vld [vmem:[%s13411_s2 + $0xf8] sm:$0xff]  }
 0x8f8   :  { %8177 = vmatprep.subr.bf16.mxu0 %v8999_v1  ;;  %v9004_v38 = vld [vmem:[%s13411_s2 + $0xe8] sm:$0xff]   ;;  %v9013_v45 = vld [vmem:[%s13411_s2 + $0x38] sm:$0xff]  }
 0x8f9   :  { %8922 = vrot.lane.b32.xlu1 %v8921_v0, %s9922_s8  ;;  %8927 = vrot.lane.b32.xlu0 %v8926_v17, %s9922_s8  ;;  %v9005_v0 = vld [vmem:[%s13411_s2 + $0x28] sm:$0xff]  }
 0x8fa   :  { %8198 = vmatpush3.bf16.msra.mxu1 %v8998_v23  ;;  %v9006_v17 = vld [vmem:[%s13411_s2 + $0xa8] sm:$0xff]   ;;  %v9014_v23 = vld [vmem:[%s13411_s2 + $0xb8] sm:$0xff]   ;;  %s13431_s2 = sld [smem:[#allocation61_spill]] }
 0x8fb   :  { %8199 = vmatprep.subr.bf16.mxu1 %v9000_v41  ;;  %8178 = vmatpush3.bf16.msra.mxu0 %v9001_v6 }
 0x8fc   :  { %8179 = vmatprep.subr.bf16.mxu0 %v9003_v20 }
 0x8fe   :  { %8200 = vmatpush3.bf16.msra.mxu1 %v9002_v35 }
 0x8ff   :  { %8201 = vmatprep.subr.bf16.mxu1 %v9004_v38  ;;  %8180 = vmatpush3.bf16.msra.mxu0 %v9005_v0  ;;  %v13412_v0 = vmov 0.0  }
 0x900   :  { %8181 = vmatprep.subr.bf16.mxu0 %v9007_v8 }
 0x902   :  { %8202 = vmatpush3.bf16.msra.mxu1 %v9006_v17 }
 0x903   :  { %8203 = vmatprep.subr.bf16.mxu1 %v9008_v54  ;;  %8182 = vmatpush3.bf16.msra.mxu0 %v9009_v22 }
 0x904   :  { %8183 = vmatprep.subr.bf16.mxu0 %v9011_v26 }
 0x906   :  { %8204 = vmatpush3.bf16.msra.mxu1 %v9010_v44 }
 0x907   :  { %8205 = vmatprep.subr.bf16.mxu1 %v9012_v13  ;;  %8184 = vmatpush3.bf16.msra.mxu0 %v9013_v45 }
 0x908   :  { %8464 = vmatprep.subr.bf16.mxu0 %v13412_v0 }
 0x90a   :  { %8206 = vmatpush3.bf16.msra.mxu1 %v9014_v23 }
 0x90b   :  { %2559 = vmatprep.subr.bf16.mxu1 %v13384_v15 }
 0x96b   :  { %v8923_v1 = vpop.permute.xlu1 %8922  ;;  %v8928_v41 = vpop.permute.xlu0 %8927 }
 0x96c   :  { %v8925_v6 = vunpack.i.h.bf16 %v8923_v1  ;;  %v8924_v35 = vunpack.i.l.bf16 %v8923_v1  ;;  %v8930_v20 = vunpack.i.h.bf16 %v8928_v41  ;;  %v8929_v38 = vunpack.i.l.bf16 %v8928_v41 }
 0x96e   :  { %v1981_v17 = vsel %vm696_vm8, %v8925_v6, %v8929_v38  ;;  %v1982_v8 = vsel %vm696_vm8, %v8924_v35, %v8925_v6  ;;  %v1980_v54 = vsel %vm696_vm8, %v8929_v38, %v8930_v20  ;;  %v1983_v22 = vsel %vm696_vm8, %v8930_v20, %v8924_v35 }
 0x96f   :  { %v1984_v44 = vmax.f32 %v11134_v32, %v1982_v8  ;;  %v1985_v26 = vmax.f32 %v11143_v43, %v1981_v17  ;;  %v1986_v13 = vmax.f32 %v11137_v18, %v1980_v54  ;;  %v1987_v45 = vmax.f32 %v11146_v40, %v1983_v22 }
 0x971   :  { %v8931_v23 = vpack.i.bf16 %v1985_v26, %v1984_v44  ;;  %v8936_v1 = vpack.i.bf16 %v1987_v45, %v1986_v13 }
 0x973   :  { %8932 = vrot.lane.b32.xlu1 %v8931_v23, %s9924_s30  ;;  %8937 = vrot.lane.b32.xlu0 %v8936_v1, %s9924_s30 }
 0x9e5   :  { %v8933_v41 = vpop.permute.xlu1 %8932  ;;  %v8938_v6 = vpop.permute.xlu0 %8937 }
 0x9e6   :  { %v8935_v38 = vunpack.i.h.bf16 %v8933_v41  ;;  %v8934_v36 = vunpack.i.l.bf16 %v8933_v41  ;;  %v8940_v31 = vunpack.i.h.bf16 %v8938_v6  ;;  %v8939_v35 = vunpack.i.l.bf16 %v8938_v6 }
 0x9e8   :  { %v1998_v32 = vsel %vm746_vm10, %v8934_v36, %v8935_v38  ;;  %v1996_v18 = vsel %vm746_vm10, %v8939_v35, %v8940_v31  ;;  %v1997_v40 = vsel %vm746_vm10, %v8935_v38, %v8939_v35  ;;  %v1999_v43 = vsel %vm746_vm10, %v8940_v31, %v8934_v36 }
 0x9e9   :  { %v2001_v20 = vmax.f32 %v1985_v26, %v1997_v40  ;;  %v2003_v17 = vmax.f32 %v1987_v45, %v1999_v43  ;;  %v2000_v8 = vmax.f32 %v1984_v44, %v1998_v32  ;;  %v2002_v54 = vmax.f32 %v1986_v13, %v1996_v18  ;;  %v2409_v18 = vld [vmem:[%s13413_s7] sm:$0xff] }
 0x9ea   :  { %v2344_v40 = vld [vmem:[%s13415_s10] sm:$0xff] }
 0x9eb   :  { %v2005_v22 = vpack.c.bf16 %v2001_v20, %v2001_v20  ;;  %v2007_v23 = vpack.c.bf16 %v2003_v17, %v2003_v17  ;;  %v2004_v1 = vpack.c.bf16 %v2000_v8, %v2000_v8  ;;  %v2006_v41 = vpack.c.bf16 %v2002_v54, %v2002_v54 }
 0x9ec   :  { %v11228_v43 = vrot.slane %v2344_v40, %v10400_v3  ;;  %v11231_v20 = vrot.slane %v2344_v40, %v10406_v5  ;;  %v11234_v54 = vrot.slane %v2344_v40, %v10397_v2  ;;  %v11244_v5 = vrot.slane %v2344_v40, %v10875_v28 }
 0x9ed   :  { %2296 = vmatprep.mubr.bf16.mxu0 %v2005_v22  ;;  %2336 = vmatprep.mubr.bf16.mxu1 %v2007_v23  ;;  %v11237_v22 = vrot.slane %v2344_v40, %v10403_v4 }
 0x9ee   :  { %2297 = vmatmul.mubr.bf16.vlgmr.msra.gmra.mrb[20].mxu0 %v2004_v1  ;;  %2337 = vmatmul.mubr.bf16.vlgmr.msra.gmra.mrb[20].mxu1 %v2006_v41 }
 0x9ef   :  { %8474 = vmatprep.mubr.msk.bf16.mxu0 %vm9929_vm12, %v13412_v0 }
 0xac1   :  { %v8185_v6 = vpop.f32.mrb[20].mxu0  ;;  %v8207_v38 = vpop.f32.mrb[20].mxu1 }
 0xac2   :  { %v8186_v35 = vpop.f32.mrb[21].mxu0  ;;  %v8208_v30 = vpop.f32.mrb[21].mxu1 }
 0xac3   :  { %v8187_v36 = vadd.f32 %v8186_v35, %v8185_v6  ;;  %v8209_v31 = vadd.f32 %v8208_v30, %v8207_v38  ;;  %v8188_v26 = vpop.f32.mrb[22].mxu0  ;;  %v8210_v44 = vpop.f32.mrb[22].mxu1  ;;  %v2410_v30 = vld [vmem:[%s13413_s7 + $0x8] sm:$0xff]  ;;  %s13432_s7 = sld [smem:[#allocation55_spill]] }
 0xac4   :  { %v8189_v13 = vpop.f32.mrb[23].mxu0  ;;  %v8211_v45 = vpop.f32.mrb[23].mxu1  ;;  %v11256_v26 = vrot.slane %v2344_v40, %v10955_v58  ;;  %v11261_v44 = vld [vmem:[%s13415_s10 + $0x8] ss:$0 sm:$0xff] }
 0xac5   :  { %v11206_v32 = vadd.f32 %v8209_v31, %v8187_v36  ;;  %v11253_v31 = vrot.slane %v2344_v40, %v10952_v9 }
 0xac7   :  { %13414 = vst [vmem:[#allocation121_spill] sm:$0xff] %v11206_v32  ;;  %2353 = vrot.lane.b32.xlu0 %v11206_v32, %s9898_s6  ;;  %2346 = vrot.lane.b32.xlu1 %v11206_v32, %s9931_s19 }
 0xacb   :  { %2367 = vrot.lane.b32.xlu0 %v11206_v32, %s9921_s26  ;;  %2360 = vrot.lane.b32.xlu1 %v11206_v32, %s9932_s5 }
 0xacf   :  { %2381 = vrot.lane.b32.xlu0 %v11206_v32, %s9933_s12  ;;  %2374 = vrot.lane.b32.xlu1 %v11206_v32, %s9922_s8 }
 0xad3   :  { %2395 = vrot.lane.b32.xlu0 %v11206_v32, %s9934_s15  ;;  %2388 = vrot.lane.b32.xlu1 %v11206_v32, %s9935_s9 }
 0xad7   :  { %2418 = vperm.xlu0 %8919, %v2410_v30   ;;  %2413 = vperm.xlu1 %8920, %v2409_v18  }
 0xb39   :  { %v2354_v17 = vpop.permute.xlu0 %2353  ;;  %v2347_v8 = vpop.permute.xlu1 %2346 }
 0xb3a   :  { %v2359_v23 = vmul.f32 %v11231_v20, %v2354_v17  ;;  %v2352_v1 = vmul.f32 %v11228_v43, %v2347_v8 }
 0xb3c   :  { %v11241_v41 = vpack.c.bf16 %v2359_v23, %v2352_v1  ;;  %v9015_v23 = vld [vmem:[#allocation18] sm:$0xff]  }
 0xb3d   :  { %v2368_v3 = vpop.permute.xlu0 %2367  ;;  %v2361_v6 = vpop.permute.xlu1 %2360 }
 0xb3e   :  { %v2373_v38 = vmul.f32 %v11237_v22, %v2368_v3  ;;  %v2366_v2 = vmul.f32 %v11234_v54, %v2361_v6  ;;  %8465 = vmatpush3.bf16.msra.mxu0 %v11241_v41 }
 0xb3f   :  { %8466 = vmatprep.subr.bf16.mxu0 %v13412_v0 }
 0xb40   :  { %v11250_v4 = vpack.c.bf16 %v2373_v38, %v2366_v2 }
 0xb41   :  { %v2382_v35 = vpop.permute.xlu0 %2381  ;;  %v2375_v36 = vpop.permute.xlu1 %2374 }
 0xb42   :  { %v2380_v28 = vmul.f32 %v11244_v5, %v2375_v36  ;;  %8467 = vmatpush3.bf16.msra.mxu0 %v11250_v4  ;;  %v2387_v18 = vmul.f32 %v11253_v31, %v2382_v35 }
 0xb43   :  { %8468 = vmatprep.subr.bf16.mxu0 %v13412_v0 }
 0xb44   :  { %v11265_v13 = vpack.c.bf16 %v2380_v28, %v11206_v32 }
 0xb45   :  { %v2396_v45 = vpop.permute.xlu0 %2395  ;;  %v2389_v30 = vpop.permute.xlu1 %2388 }
 0xb46   :  { %v2401_v9 = vmul.f32 %v11261_v44, %v2396_v45  ;;  %v2394_v58 = vmul.f32 %v11256_v26, %v2389_v30  ;;  %8469 = vmatpush3.bf16.msra.mxu0 %v11265_v13 }
 0xb47   :  { %8470 = vmatprep.subr.bf16.mxu0 %v13412_v0 }
 0xb48   :  { %v11272_v40 = vpack.c.bf16 %v2394_v58, %v2387_v18  ;;  %v2406_v17 = vpack.c.bf16 %v2401_v9, %v2401_v9  ;;  %v9016_v9 = vld [vmem:[#allocation19 + $0x4] ss:$8 sps:$4 sm:$0xff]  }
 0xb49   :  { %7882 = vmatprep.mubr.msk.bf16.mxu1 %vm2555_vm15, %v9016_v9  ;;  %v2534_v58 = vld [vmem:[%s13416_s27] sm:$0xff] }
 0xb4a   :  { %8471 = vmatpush3.bf16.msra.mxu0 %v11272_v40  ;;  %v11277_v8 = vsel %vm867_vm7, %v2406_v17, 0  ;;  %v2535_v17 = vld [vmem:[%s13416_s27 + $0x8] sm:$0xff]  ;;  %v9023_v9 = vld [vmem:[%s13420_s18 + $0x20] sm:$0xff]   ;;  %s13433_s27 = sld [smem:[#allocation68_spill]] }
 0xb4b   :  { %8472 = vmatprep.subr.bf16.mxu0 %v13412_v0 }
 0xb4e   :  { %8473 = vmatpush3.bf16.msra.mxu0 %v11277_v8 }
 0xb4f   :  { %8478 = vmatprep.subr.bf16.mxu0 %v13412_v0 }
 0xb51   :  { %8475 = vmatmul.mubr.msk.bf16.vlgmr.msra.gmra.mrb[24].mxu0 %vm13276_vm6, %v9015_v23  ;;  %v2710_v23 = vld [vmem:[%s13417_s16] sm:$0xf]  ;;  %s13434_s16 = sld [smem:[#allocation63_spill]] }
 0xb52   :  { %8494 = vmatprep.mubr.msk.bf16.mxu0 %vm9929_vm12, %v13412_v0 }
 0xb56   :  { %v2414_v1 = vpop.permute.xlu1 %2413  ;;  %v2419_v2 = vpop.permute.xlu0 %2418 }
 0xc24   :  { %v2466_v3 = vpop.f32.mrb[24].mxu0 }
 0xc25   :  { %v2467_v6 = vadd.f32 %v2466_v3, %v2414_v1  ;;  %v8476_v38 = vpop.f32.mrb[25].mxu0  ;;  %v2763_v1 = vld [vmem:[%s13418_s14] sm:$0xff]  ;;  %v2764_v3 = vld [vmem:[%s13418_s14 + $0x8] sm:$0xff]  ;;  %s13436_s14 = sld [smem:[#allocation93_spill]] }
 0xc26   :  { %v2469_v35 = vpop.f32.mrb[26].mxu0  ;;  %v2894_v38 = vld [vmem:[%s13419_s23 + $0x8] sm:$0xff] }
 0xc27   :  { %v11284_v36 = vmax.f32 %v2467_v6, 0.0  ;;  %v2470_v28 = vadd.f32 %v2469_v35, %v2419_v2  ;;  %v8477_v45 = vpop.f32.mrb[27].mxu0  ;;  %v2893_v6 = vld [vmem:[%s13419_s23] sm:$0xff]  ;;  %v9020_v35 = vld [vmem:[%s13420_s18 + $0x8] sm:$0xff]   ;;  %s13438_s23 = sld [smem:[#allocation96_spill]] }
 0xc28   :  { %v9019_v2 = vld [vmem:[%s13420_s18] sm:$0xff]   ;;  %v9022_v45 = vld [vmem:[%s13420_s18 + $0x18] sm:$0xff]  }
 0xc29   :  { %v11286_v30 = vmax.f32 %v2470_v28, 0.0  ;;  %2477 = vrot.lane.b32.xlu1 %v11284_v36, %s9931_s19  ;;  %8479 = vmatpush3.bf16.msra.mxu0 %v9019_v2  ;;  %v9021_v28 = vld [vmem:[%s13420_s18 + $0x10] sm:$0xff]  }
 0xc2a   :  { %8480 = vmatprep.subr.bf16.mxu0 %v13412_v0 }
 0xc2b   :  { %2479 = vrot.lane.b32.xlu0 %v11286_v30, %s9931_s19 }
 0xc2d   :  { %2483 = vrot.lane.b32.xlu1 %v11284_v36, %s9898_s6  ;;  %8481 = vmatpush3.bf16.msra.mxu0 %v9020_v35 }
 0xc2e   :  { %8482 = vmatprep.subr.bf16.mxu0 %v13412_v0 }
 0xc2f   :  { %2485 = vrot.lane.b32.xlu0 %v11286_v30, %s9898_s6 }
 0xc31   :  { %2489 = vrot.lane.b32.xlu1 %v11284_v36, %s9932_s5  ;;  %8483 = vmatpush3.bf16.msra.mxu0 %v9021_v28 }
 0xc32   :  { %8484 = vmatprep.subr.bf16.mxu0 %v13412_v0 }
 0xc33   :  { %2491 = vrot.lane.b32.xlu0 %v11286_v30, %s9932_s5 }
 0xc35   :  { %2495 = vrot.lane.b32.xlu1 %v11284_v36, %s9921_s26  ;;  %8485 = vmatpush3.bf16.msra.mxu0 %v9022_v45 }
 0xc36   :  { %8486 = vmatprep.subr.bf16.mxu0 %v13412_v0 }
 0xc37   :  { %2497 = vrot.lane.b32.xlu0 %v11286_v30, %s9921_s26 }
 0xc39   :  { %2501 = vrot.lane.b32.xlu1 %v11284_v36, %s9922_s8  ;;  %8487 = vmatpush3.bf16.msra.mxu0 %v9023_v9 }
 0xc3a   :  { %8488 = vmatprep.subr.bf16.mxu0 %v13412_v0 }
 0xc3b   :  { %2503 = vrot.lane.b32.xlu0 %v11286_v30, %s9922_s8 }
 0xc3d   :  { %2507 = vrot.lane.b32.xlu1 %v11284_v36, %s9933_s12 }
 0xc3f   :  { %2509 = vrot.lane.b32.xlu0 %v11286_v30, %s9933_s12 }
 0xc41   :  { %2513 = vrot.lane.b32.xlu1 %v11284_v36, %s9935_s9 }
 0xc43   :  { %2515 = vrot.lane.b32.xlu0 %v11286_v30, %s9935_s9 }
 0xc45   :  { %2519 = vrot.lane.b32.xlu1 %v11284_v36, %s9934_s15 }
 0xc47   :  { %2521 = vrot.lane.b32.xlu0 %v11286_v30, %s9934_s15 }
 0xc49   :  { %2538 = vperm.xlu1 %8920, %v2534_v58   ;;  %v9024_v58 = vld [vmem:[%s13420_s18 + $0x28] sm:$0xff]  }
 0xc4a   :  { %8489 = vmatpush3.bf16.msra.mxu0 %v9024_v58 }
 0xc4b   :  { %2543 = vperm.xlu0 %8919, %v2535_v17   ;;  %8490 = vmatprep.subr.bf16.mxu0 %v13412_v0 }
 0xc4d   :  { %2713 = vperm.xlu1 %8920, %v2710_v23  }
 0xc4f   :  { %2767 = vperm.xlu0 %8919, %v2763_v1  }
 0xc51   :  { %2772 = vperm.xlu1 %8920, %v2764_v3  }
 0xc53   :  { %2897 = vperm.xlu0 %8919, %v2893_v6  }
 0xc55   :  { %2902 = vperm.xlu1 %8920, %v2894_v38  }
 0xc9b   :  { %v2478_v17 = vpop.permute.xlu1 %2477 }
 0xc9c   :  { %v2481_v1 = vmul.f32 %v2478_v17, %v11228_v43 }
 0xc9d   :  { %v2480_v23 = vpop.permute.xlu0 %2479 }
 0xc9e   :  { %v2482_v3 = vmul.f32 %v2480_v23, %v11228_v43 }
 0xc9f   :  { %v2484_v6 = vpop.permute.xlu1 %2483 }
 0xca0   :  { %v2525_v38 = vpack.c.bf16 %v2482_v3, %v2481_v1  ;;  %v2487_v35 = vmul.f32 %v2484_v6, %v11231_v20 }
 0xca1   :  { %v2486_v2 = vpop.permute.xlu0 %2485 }
 0xca2   :  { %v2488_v28 = vmul.f32 %v2486_v2, %v11231_v20  ;;  %2560 = vmatpush1.bf16.msra.mxu1 %v2525_v38 }
 0xca3   :  { %v2490_v45 = vpop.permute.xlu1 %2489  ;;  %2561 = vmatprep.subr.bf16.mxu1 %v13384_v15 }
 0xca4   :  { %v2526_v9 = vpack.c.bf16 %v2488_v28, %v2487_v35  ;;  %v2493_v18 = vmul.f32 %v2490_v45, %v11234_v54 }
 0xca5   :  { %v2492_v58 = vpop.permute.xlu0 %2491 }
 0xca6   :  { %v2494_v32 = vmul.f32 %v2492_v58, %v11234_v54  ;;  %2562 = vmatpush1.bf16.msra.mxu1 %v2526_v9 }
 0xca7   :  { %v2496_v17 = vpop.permute.xlu1 %2495  ;;  %2563 = vmatprep.subr.bf16.mxu1 %v13384_v15 }
 0xca8   :  { %v2527_v23 = vpack.c.bf16 %v2494_v32, %v2493_v18  ;;  %v2499_v3 = vmul.f32 %v2496_v17, %v11237_v22  ;;  %v13421_v18 = vpack.c.bf16 %v11286_v30, %v11284_v36 }
 0xca9   :  { %v2498_v1 = vpop.permute.xlu0 %2497 }
 0xcaa   :  { %v2500_v6 = vmul.f32 %v2498_v1, %v11237_v22  ;;  %2564 = vmatpush1.bf16.msra.mxu1 %v2527_v23 }
 0xcab   :  { %v2502_v38 = vpop.permute.xlu1 %2501  ;;  %2565 = vmatprep.subr.bf16.mxu1 %v13384_v15 }
 0xcac   :  { %v2528_v2 = vpack.c.bf16 %v2500_v6, %v2499_v3  ;;  %v2505_v32 = vmul.f32 %v2502_v38, %v11244_v5 }
 0xcad   :  { %v2504_v35 = vpop.permute.xlu0 %2503 }
 0xcae   :  { %2566 = vmatpush1.bf16.msra.mxu1 %v2528_v2  ;;  %v2506_v45 = vmul.f32 %v2504_v35, %v11244_v5 }
 0xcaf   :  { %v2508_v28 = vpop.permute.xlu1 %2507  ;;  %2567 = vmatprep.subr.bf16.mxu1 %v13384_v15 }
 0xcb0   :  { %v2530_v58 = vpack.c.bf16 %v2506_v45, %v2505_v32  ;;  %v2511_v3 = vmul.f32 %v2508_v28, %v11253_v31  ;;  %v9018_v32 = vld [vmem:[#allocation19] ss:$8 sps:$4 sm:$0xff]  }
 0xcb1   :  { %v2510_v9 = vpop.permute.xlu0 %2509 }
 0xcb2   :  { %2568 = vmatpush1.bf16.msra.mxu1 %v13421_v18  ;;  %v2512_v17 = vmul.f32 %v2510_v9, %v11253_v31  ;;  %v9025_v18 = vld [vmem:[%s13420_s18 + $0x30] sm:$0xff]  }
 0xcb3   :  { %2569 = vmatprep.subr.bf16.mxu1 %v13384_v15  ;;  %v2514_v23 = vpop.permute.xlu1 %2513  ;;  %8491 = vmatpush3.bf16.msra.mxu0 %v9025_v18 }
 0xcb4   :  { %v2531_v6 = vpack.c.bf16 %v2512_v17, %v2511_v3  ;;  %v2517_v36 = vmul.f32 %v2514_v23, %v11256_v26  ;;  %8492 = vmatprep.subr.bf16.mxu0 %v13412_v0 }
 0xcb5   :  { %v2516_v1 = vpop.permute.xlu0 %2515 }
 0xcb6   :  { %2570 = vmatpush1.bf16.msra.mxu1 %v2530_v58  ;;  %v2518_v2 = vmul.f32 %v2516_v1, %v11256_v26  ;;  %v9026_v58 = vld [vmem:[%s13420_s18 + $0x38] sm:$0xff]  }
 0xcb7   :  { %2571 = vmatprep.subr.bf16.mxu1 %v13384_v15  ;;  %v2520_v30 = vpop.permute.xlu1 %2519  ;;  %8493 = vmatpush3.bf16.msra.mxu0 %v9026_v58  ;;  %v2708_v58 = vld [vmem:[#allocation16] sm:$0x3] }
 0xcb8   :  { %v2532_v35 = vpack.c.bf16 %v2518_v2, %v2517_v36  ;;  %v2523_v28 = vmul.f32 %v11261_v44, %v2520_v30  ;;  %8510 = vmatprep.subr.bf16.mxu0 %v13412_v0 }
 0xcb9   :  { %v2522_v38 = vpop.permute.xlu0 %2521 }
 0xcba   :  { %2572 = vmatpush1.bf16.msra.mxu1 %v2531_v6  ;;  %v2524_v45 = vmul.f32 %v11261_v44, %v2522_v38 }
 0xcbb   :  { %2573 = vmatprep.subr.bf16.mxu1 %v13384_v15 }
 0xcbc   :  { %v2533_v9 = vpack.c.bf16 %v2524_v45, %v2523_v28 }
 0xcbe   :  { %2574 = vmatpush1.bf16.msra.mxu1 %v2532_v35 }
 0xcbf   :  { %2575 = vmatprep.subr.bf16.mxu1 %v13384_v15 }
 0xcc2   :  { %2576 = vmatpush1.bf16.msra.mxu1 %v2533_v9 }
 0xcc3   :  { %8498 = vmatprep.subr.bf16.mxu1 %v13412_v0 }
 0xcc5   :  { %2592 = vmatmul.mubr.bf16.vlgmr.msra.gmra.mrb[24].mxu1 %v9018_v32 }
 0xcc6   :  { %8500 = vmatprep.mubr.msk.bf16.mxu1 %vm9929_vm12, %v13412_v0 }
 0xcc8   :  { %v2539_v44 = vpop.permute.xlu1 %2538 }
 0xcca   :  { %v2544_v3 = vpop.permute.xlu0 %2543 }
 0xd98   :  { %v2593_v17 = vpop.f32.mrb[24].mxu1 }
 0xd99   :  { %v11376_v23 = vadd.f32 %v2593_v17, %v2539_v44  ;;  %v2595_v1 = vpop.f32.mrb[25].mxu1  ;;  %v2714_v44 = vpop.permute.xlu1 %2713 }
 0xd9a   :  { %v2596_v6 = vpop.f32.mrb[26].mxu1 }
 0xd9b   :  { %v11378_v2 = vadd.f32 %v2596_v6, %v2544_v3  ;;  %v2598_v38 = vpop.f32.mrb[27].mxu1  ;;  %v13275_v36 = vmax.f32 %v11376_v23, 0.0 }
 0xd9d   :  { %v13274_v30 = vmax.f32 %v11378_v2, 0.0 }
 0xd9f   :  { %v2602_v35 = vpack.c.bf16 %v13274_v30, %v13275_v36 }
 0xda1   :  { %8495 = vmatmul.mubr.bf16.vlgmr.msra.gmra.mrb[28].mxu0 %v2602_v35 }
 0xda2   :  { %8512 = vmatprep.mubr.msk.bf16.mxu0 %vm9929_vm12, %v13412_v0 }
 0xe74   :  { %v2701_v45 = vpop.f32.mrb[28].mxu0 }
 0xe75   :  { %v8496_v28 = vpop.f32.mrb[29].mxu0 }
 0xe76   :  { %v2704_v9 = vpop.f32.mrb[30].mxu0 }
 0xe77   :  { %v2709_v32 = vpack.c.bf16 %v2704_v9, %v2701_v45  ;;  %v8497_v18 = vpop.f32.mrb[31].mxu0  ;;  %v9027_v9 = vld [vmem:[%s13422_s22] sm:$0xff]  }
 0xe79   :  { %8499 = vmatpush3.bf16.msra.mxu1 %v2709_v32  ;;  %v9028_v32 = vld [vmem:[#allocation21] sm:$0xff]  }
 0xe7a   :  { %8504 = vmatprep.subr.bf16.mxu1 %v13412_v0 }
 0xe7c   :  { %8501 = vmatmul.mubr.msk.bf16.vlgmr.msra.gmra.mrb[28].mxu1 %vm2555_vm15, %v2708_v58 }
 0xe7d   :  { %8506 = vmatprep.mubr.msk.bf16.mxu1 %vm9929_vm12, %v13412_v0 }
 0xf4f   :  { %v2753_v17 = vpop.f32.mrb[28].mxu1 }
 0xf50   :  { %v2754_v1 = vadd.f32 %v2753_v17, %v2714_v44  ;;  %v8502_v3 = vpop.f32.mrb[29].mxu1 }
 0xf51   :  { %v2756_v6 = vpop.f32.mrb[30].mxu1 }
 0xf52   :  { %v2759_v38 = vmax.f32 %v2754_v1, 0.0  ;;  %v8503_v35 = vpop.f32.mrb[31].mxu1 }
 0xf54   :  { %v2762_v28 = vpack.c.bf16 %v2759_v38, %v2759_v38 }
 0xf56   :  { %v2785_v45 = vsel %vm857_vm5, %v2762_v28, 0 }
 0xf57   :  { %8505 = vmatpush3.bf16.msra.mxu1 %v2785_v45 }
 0xf58   :  { %8516 = vmatprep.subr.bf16.mxu1 %v13412_v0 }
 0xf5a   :  { %8507 = vmatmul.mubr.msk.bf16.vlgmr.msra.gmra.mrb[32].mxu1 %vm2780_vm11, %v9027_v9 }
 0xf5b   :  { %8517 = vmatpush3.bf16.msra.mxu1 %v11241_v41  ;;  %8526 = vmatprep.mubr.msk.bf16.mxu1 %vm9929_vm12, %v13412_v0  ;;  %v2841_v41 = vld [vmem:[%s13423_s24] sm:$0x1] }
 0xf5c   :  { %8518 = vmatprep.subr.bf16.mxu1 %v13412_v0 }
 0xf5f   :  { %8519 = vmatpush3.bf16.msra.mxu1 %v11250_v4  ;;  %v11413_v4 = vsel %vm852_vm4, %v2841_v41, 0 }
 0xf60   :  { %8520 = vmatprep.subr.bf16.mxu1 %v13412_v0  ;;  %8511 = vmatpush3.bf16.msra.mxu0 %v11413_v4 }
 0xf61   :  { %8530 = vmatprep.subr.bf16.mxu0 %v13412_v0 }
 0xf63   :  { %8521 = vmatpush3.bf16.msra.mxu1 %v11265_v13  ;;  %v2768_v13 = vpop.permute.xlu0 %2767 }
 0xf64   :  { %8522 = vmatprep.subr.bf16.mxu1 %v13412_v0 }
 0xf67   :  { %8523 = vmatpush3.bf16.msra.mxu1 %v11272_v40 }
 0xf68   :  { %8524 = vmatprep.subr.bf16.mxu1 %v13412_v0 }
 0xf6b   :  { %8525 = vmatpush3.bf16.msra.mxu1 %v11277_v8  ;;  %v2773_v8 = vpop.permute.xlu1 %2772 }
 0xf6c   :  { %8550 = vmatprep.subr.bf16.mxu1 %v13412_v0 }
 0xf6e   :  { %8527 = vmatmul.mubr.msk.bf16.vlgmr.msra.gmra.mrb[36].mxu1 %vm13276_vm6, %v9028_v32  ;;  %vm3093_vm6 = vcmask 261120  }
 0xf6f   :  { %8554 = vmatprep.mubr.msk.bf16.mxu1 %vm9929_vm12, %v13412_v0 }
0x102d   :  { %v2821_v40 = vpop.f32.mrb[32].mxu1 }
0x102e   :  { %v2822_v18 = vadd.f32 %v2821_v40, %v2768_v13  ;;  %v8508_v58 = vpop.f32.mrb[33].mxu1 }
0x102f   :  { %v2824_v44 = vpop.f32.mrb[34].mxu1 }
0x1030   :  { %v2828_v17 = vsub.f32 0.0, %v2822_v18  ;;  %v2825_v1 = vadd.f32 %v2824_v44, %v2773_v8  ;;  %v8509_v3 = vpop.f32.mrb[35].mxu1  ;;  %v2898_v8 = vpop.permute.xlu0 %2897 }
0x1032   :  { %v2830_v6 = vmul.f32 1.442695, %v2828_v17  ;;  %v2829_v38 = vsub.f32 0.0, %v2825_v1  ;;  %v2903_v17 = vpop.permute.xlu1 %2902 }
0x1034   :  { %9193 = vpow2.f32 %v2830_v6  ;;  %v2832_v35 = vmul.f32 1.442695, %v2829_v38  ;;  %v13426_v6 = vmax.f32 %v11376_v23, 0.0  ;;  %v3617_v23 = vld [vmem:[%s13424_s25 + $0x10] sm:$0xff] }
0x1036   :  { %9195 = vpow2.f32 %v2832_v35 }
0x103e   :  { %v9194_v28 = vpop.eup %9193 }
0x103f   :  { %v2834_v45 = vadd.f32 1.0, %v9194_v28 }
0x1040   :  { %v9196_v9 = vpop.eup %9195 }
0x1041   :  { %v2835_v32 = vadd.f32 1.0, %v9196_v9  ;;  %v2947_v41 = vpop.f32.mrb[36].mxu1  ;;  %9197 = vrcp.f32 %v2834_v45  ;;  %v13428_v9 = vmax.f32 %v11378_v2, 0.0  ;;  %v4429_v2 = vld [vmem:[%s13427_s3] sm:$0xff] }
0x1042   :  { %v8528_v30 = vpop.f32.mrb[37].mxu1  ;;  %v2948_v44 = vadd.f32 %v2947_v41, %v2898_v8  ;;  %v4193_v8 = vld [vmem:[%s13425_s28 + $0x10] sm:$0xff] }
0x1043   :  { %9199 = vrcp.f32 %v2835_v32  ;;  %v2950_v13 = vpop.f32.mrb[38].mxu1 }
0x1044   :  { %v8529_v40 = vpop.f32.mrb[39].mxu1  ;;  %v2951_v1 = vadd.f32 %v2950_v13, %v2903_v17  ;;  %v2954_v30 = vmax.f32 %v2948_v44, 0.0  ;;  %v4485_v44 = vld [vmem:[%s13429_s0 + $0x8] sm:$0xff]  ;;  %v4487_v17 = vld [vmem:[%s13429_s0 + $0x18] sm:$0xff] }
0x1046   :  { %v2955_v28 = vmax.f32 %v2951_v1, 0.0  ;;  %v9029_v1 = vld [vmem:[%s13430_s17] sm:$0xff]  }
0x104b   :  { %v9198_v58 = vpop.eup %9197 }
0x104d   :  { %v9200_v36 = vpop.eup %9199 }
0x104e   :  { %v2840_v18 = vpack.c.bf16 %v9200_v36, %v9198_v58  ;;  %v3615_v58 = vld [vmem:[%s13424_s25] sm:$0xff] }
0x1050   :  { %8513 = vmatmul.mubr.msk.bf16.vlgmr.msra.gmra.mrb[32].mxu0 %vm1791_vm14, %v2840_v18  ;;  %v4191_v18 = vld [vmem:[%s13425_s28] sm:$0xff] }
0x1051   :  { %8546 = vmatprep.mubr.msk.bf16.mxu0 %vm9929_vm12, %v13412_v0  ;;  %8531 = vmatpush3.bf16.msra.mxu0 %v9029_v1  ;;  %v4486_v1 = vld [vmem:[%s13429_s0 + $0x10] sm:$0xff] }
0x1052   :  { %8532 = vmatprep.subr.bf16.mxu0 %v13412_v0 }
0x1123   :  { %v2882_v3 = vpop.f32.mrb[32].mxu0 }
0x1124   :  { %v2889_v38 = vmul.f32 %v2882_v3, %v13426_v6  ;;  %v8514_v35 = vpop.f32.mrb[33].mxu0  ;;  %v9030_v3 = vld [vmem:[%s13430_s17 + $0x8] sm:$0xff]   ;;  %v9032_v6 = vld [vmem:[%s13430_s17 + $0x18] sm:$0xff]  }
0x1125   :  { %v2885_v36 = vpop.f32.mrb[34].mxu0  ;;  %8533 = vmatpush3.bf16.msra.mxu0 %v9030_v3  ;;  %v9034_v35 = vld [vmem:[%s13430_s17 + $0x28] sm:$0xff]   ;;  %v11456_v3 = vld [vmem:[%s13431_s2] sm:$0xff]  }
0x1126   :  { %v2956_v45 = vadd.f32 %v2954_v30, %v2889_v38  ;;  %v2890_v32 = vmul.f32 %v2885_v36, %v13428_v9  ;;  %v8515_v41 = vpop.f32.mrb[35].mxu0  ;;  %v9031_v30 = vld [vmem:[%s13430_s17 + $0x10] sm:$0xff]   ;;  %8534 = vmatprep.subr.bf16.mxu0 %v13412_v0  ;;  %v9033_v38 = vld [vmem:[%s13430_s17 + $0x20] sm:$0xff]   ;;  %8551 = vmatpush3.bf16.msra.mxu1 %v11456_v3 }
0x1127   :  { %v9035_v36 = vld [vmem:[%s13430_s17 + $0x30] sm:$0xff]   ;;  %8552 = vmatprep.subr.bf16.mxu1 %v13412_v0 }
0x1128   :  { %v2957_v40 = vadd.f32 %v2955_v28, %v2890_v32  ;;  %v9036_v28 = vld [vmem:[%s13430_s17 + $0x38] sm:$0xff]  }
0x1129   :  { %8535 = vmatpush3.bf16.msra.mxu0 %v9031_v30 }
0x112a   :  { %v8941_v13 = vpack.i.bf16 %v2957_v40, %v2956_v45  ;;  %8536 = vmatprep.subr.bf16.mxu0 %v13412_v0 }
0x112c   :  { %8942 = vrot.lane.b32.xlu0 %v8941_v13, %s9922_s8 }
0x112d   :  { %8537 = vmatpush3.bf16.msra.mxu0 %v9032_v6 }
0x112e   :  { %8538 = vmatprep.subr.bf16.mxu0 %v13412_v0 }
0x1130   :  { %3621 = vperm.xlu0 %8919, %v3615_v58  }
0x1131   :  { %8539 = vmatpush3.bf16.msra.mxu0 %v9033_v38 }
0x1132   :  { %8540 = vmatprep.subr.bf16.mxu0 %v13412_v0 }
0x1134   :  { %3631 = vperm.xlu0 %8919, %v3617_v23  }
0x1135   :  { %8541 = vmatpush3.bf16.msra.mxu0 %v9034_v35  ;;  %v11461_v35 = vld [vmem:[%s13431_s2 + $0x30] sm:$0xff]  }
0x1136   :  { %8542 = vmatprep.subr.bf16.mxu0 %v13412_v0 }
0x1138   :  { %4197 = vperm.xlu0 %8919, %v4191_v18   ;;  %v3616_v18 = vld [vmem:[%s13424_s25 + $0x8] sm:$0xff] }
0x1139   :  { %8543 = vmatpush3.bf16.msra.mxu0 %v9035_v36 }
0x113a   :  { %8544 = vmatprep.subr.bf16.mxu0 %v13412_v0 }
0x113c   :  { %4207 = vperm.xlu0 %8919, %v4193_v8   ;;  %v3618_v8 = vld [vmem:[%s13424_s25 + $0x18] sm:$0xff] }
0x113d   :  { %8545 = vmatpush3.bf16.msra.mxu0 %v9036_v28  ;;  %v11468_v28 = vld [vmem:[%s13431_s2 + $0x8] sm:$0xff]  }
0x113e   :  { %8574 = vmatprep.subr.bf16.mxu0 %v13412_v0  ;;  %8553 = vmatpush3.bf16.msra.mxu1 %v11468_v28 }
0x113f   :  { %8558 = vmatprep.subr.bf16.mxu1 %v13412_v0 }
0x1140   :  { %4432 = vperm.xlu0 %8919, %v4429_v2   ;;  %v4192_v2 = vld [vmem:[%s13425_s28 + $0x8] sm:$0xff] }
0x1144   :  { %4495 = vperm.xlu0 %8919, %v4485_v44   ;;  %v4194_v44 = vld [vmem:[%s13425_s28 + $0x18] sm:$0xff] }
0x1148   :  { %4505 = vperm.xlu0 %8919, %v4487_v17   ;;  %v4484_v17 = vld [vmem:[%s13429_s0] sm:$0xff] }
0x119e   :  { %v8943_v9 = vpop.permute.xlu0 %8942 }
0x119f   :  { %v8945_v32 = vunpack.i.h.bf16 %v8943_v9  ;;  %v8944_v41 = vunpack.i.l.bf16 %v8943_v9  ;;  %v11471_v9 = vld [vmem:[%s13431_s2 + $0x38] sm:$0xff]  }
0x11a1   :  { %v2963_v13 = vmax.f32 %v2957_v40, %v8945_v32  ;;  %v2962_v58 = vmax.f32 %v2956_v45, %v8944_v41 }
0x11a3   :  { %v8946_v23 = vpack.i.bf16 %v2963_v13, %v2962_v58 }
0x11a5   :  { %8947 = vrot.lane.b32.xlu1 %v8946_v23, %s9935_s9  ;;  %v11481_v23 = vld [vmem:[%s13431_s2 + $0x50] sm:$0xff]  }
0x11a9   :  { %3626 = vperm.xlu1 %8920, %v3616_v18  }
0x11ad   :  { %3636 = vperm.xlu1 %8920, %v3618_v8  }
0x11b1   :  { %4202 = vperm.xlu1 %8920, %v4192_v2   ;;  %v11492_v2 = vld [vmem:[%s13431_s2 + $0x18] sm:$0xff]  }
0x11b5   :  { %4212 = vperm.xlu1 %8920, %v4194_v44   ;;  %v11495_v44 = vld [vmem:[%s13431_s2 + $0x58] sm:$0xff]  }
0x11b9   :  { %4490 = vperm.xlu1 %8920, %v4484_v17   ;;  %v11506_v17 = vld [vmem:[%s13431_s2 + $0x20] sm:$0xff]  }
0x11bd   :  { %4500 = vperm.xlu1 %8920, %v4486_v1   ;;  %v11509_v1 = vld [vmem:[%s13431_s2 + $0x70] sm:$0xff]  }
0x1217   :  { %v8948_v45 = vpop.permute.xlu1 %8947 }
0x1218   :  { %v8950_v40 = vunpack.i.h.bf16 %v8948_v45  ;;  %v8949_v30 = vunpack.i.l.bf16 %v8948_v45  ;;  %v11520_v45 = vld [vmem:[%s13431_s2 + $0x28] sm:$0xff]  }
0x121a   :  { %v2969_v6 = vmax.f32 %v2963_v13, %v8950_v40  ;;  %v2968_v38 = vmax.f32 %v2962_v58, %v8949_v30  ;;  %v11478_v58 = vld [vmem:[%s13431_s2 + $0x10] sm:$0xff]   ;;  %v11523_v40 = vld [vmem:[%s13431_s2 + $0x78] sm:$0xff]   ;;  %v11534_v30 = vld [vmem:[%s13431_s2 + $0x40] sm:$0xff]  }
0x121c   :  { %v2970_v36 = vpack.c.bf16 %v2969_v6, %v2968_v38  ;;  %v11544_v6 = vld [vmem:[%s13431_s2 + $0x48] sm:$0xff]   ;;  %v11551_v38 = vld [vmem:[%s13431_s2 + $0x60] sm:$0xff]  }
0x121e   :  { %8547 = vmatmul.mubr.bf16.vlgmr.msra.gmra.mrb[36].mxu0 %v2970_v36  ;;  %v11558_v36 = vld [vmem:[%s13431_s2 + $0x68] sm:$0xff]  }
0x121f   :  { %8575 = vmatpush3.bf16.msra.mxu0 %v11461_v35  ;;  %8578 = vmatprep.mubr.msk.bf16.mxu0 %vm9929_vm12, %v13412_v0 }
0x1220   :  { %8576 = vmatprep.subr.bf16.mxu0 %v13412_v0 }
0x1223   :  { %8577 = vmatpush3.bf16.msra.mxu0 %v11471_v9 }
0x1224   :  { %8590 = vmatprep.subr.bf16.mxu0 %v13412_v0 }
0x12f1   :  { %v3069_v32 = vpop.f32.mrb[36].mxu0 }
0x12f2   :  { %v8548_v41 = vpop.f32.mrb[37].mxu0 }
0x12f3   :  { %v3072_v13 = vpop.f32.mrb[38].mxu0  ;;  %v11572_v41 = vld [vmem:[%s13431_s2 + $0x88] sm:$0xff]  }
0x12f4   :  { %v11483_v18 = vpack.c.bf16 %v3072_v13, %v3069_v32  ;;  %v8549_v8 = vpop.f32.mrb[39].mxu0  ;;  %v11565_v32 = vld [vmem:[%s13431_s2 + $0x80] sm:$0xff]  }
0x12f5   :  { %v9055_v13 = vld [vmem:[#allocation9 + $0x4] ss:$8 sps:$4 sm:$0xff]  }
0x12f6   :  { %8555 = vmatmul.mubr.msk.bf16.vlgmr.msra.gmra.mrb[40].mxu1 %vm3093_vm6, %v11483_v18  ;;  %8579 = vmatmul.mubr.msk.bf16.vlgmr.msra.gmra.mrb[40].mxu0 %vm3093_vm6, %v11483_v18 }
0x12f7   :  { %8559 = vmatpush3.bf16.msra.mxu1 %v11478_v58  ;;  %8591 = vmatpush3.bf16.msra.mxu0 %v11481_v23 }
0x12f8   :  { %8560 = vmatprep.subr.bf16.mxu1 %v13412_v0  ;;  %8592 = vmatprep.subr.bf16.mxu0 %v13412_v0 }
0x12f9   :  { %8562 = vmatprep.mubr.msk.bf16.mxu1 %vm9929_vm12, %v13412_v0  ;;  %8594 = vmatprep.mubr.msk.bf16.mxu0 %vm9929_vm12, %v13412_v0 }
0x12fb   :  { %8561 = vmatpush3.bf16.msra.mxu1 %v11492_v2  ;;  %8593 = vmatpush3.bf16.msra.mxu0 %v11495_v44 }
0x12fc   :  { %8566 = vmatprep.subr.bf16.mxu1 %v13412_v0  ;;  %8606 = vmatprep.subr.bf16.mxu0 %v13412_v0 }
0x12fe   :  { %8563 = vmatmul.mubr.msk.bf16.vlgmr.msra.gmra.mrb[44].mxu1 %vm3093_vm6, %v11483_v18  ;;  %8595 = vmatmul.mubr.msk.bf16.vlgmr.msra.gmra.mrb[44].mxu0 %vm3093_vm6, %v11483_v18 }
0x12ff   :  { %8567 = vmatpush3.bf16.msra.mxu1 %v11506_v17  ;;  %8607 = vmatpush3.bf16.msra.mxu0 %v11509_v1 }
0x1300   :  { %8568 = vmatprep.subr.bf16.mxu1 %v13412_v0  ;;  %8608 = vmatprep.subr.bf16.mxu0 %v13412_v0 }
0x1301   :  { %8570 = vmatprep.mubr.msk.bf16.mxu1 %vm9929_vm12, %v13412_v0  ;;  %8610 = vmatprep.mubr.msk.bf16.mxu0 %vm9929_vm12, %v13412_v0 }
0x1303   :  { %8569 = vmatpush3.bf16.msra.mxu1 %v11520_v45  ;;  %8609 = vmatpush3.bf16.msra.mxu0 %v11523_v40 }
0x1304   :  { %8582 = vmatprep.subr.bf16.mxu1 %v13412_v0  ;;  %3663 = vmatprep.subr.bf16.mxu0 %v13384_v15 }
0x1306   :  { %8571 = vmatmul.mubr.msk.bf16.vlgmr.msra.gmra.mrb[48].mxu1 %vm3093_vm6, %v11483_v18  ;;  %8611 = vmatmul.mubr.msk.bf16.vlgmr.msra.gmra.mrb[48].mxu0 %vm3093_vm6, %v11483_v18 }
0x1307   :  { %8583 = vmatpush3.bf16.msra.mxu1 %v11534_v30  ;;  %8586 = vmatprep.mubr.msk.bf16.mxu1 %vm9929_vm12, %v13412_v0 }
0x1308   :  { %8584 = vmatprep.subr.bf16.mxu1 %v13412_v0  ;;  %7968 = vmatprep.mubr.msk.bf16.mxu0 %vm2555_vm15, %v9055_v13 }
0x130b   :  { %8585 = vmatpush3.bf16.msra.mxu1 %v11544_v6 }
0x130c   :  { %8598 = vmatprep.subr.bf16.mxu1 %v13412_v0 }
0x130e   :  { %8587 = vmatmul.mubr.msk.bf16.vlgmr.msra.gmra.mrb[52].mxu1 %vm3093_vm6, %v11483_v18 }
0x130f   :  { %8599 = vmatpush3.bf16.msra.mxu1 %v11551_v38  ;;  %8602 = vmatprep.mubr.msk.bf16.mxu1 %vm9929_vm12, %v13412_v0 }
0x1310   :  { %8600 = vmatprep.subr.bf16.mxu1 %v13412_v0 }
0x1313   :  { %8601 = vmatpush3.bf16.msra.mxu1 %v11558_v36 }
0x1314   :  { %8614 = vmatprep.subr.bf16.mxu1 %v13412_v0 }
0x1316   :  { %8603 = vmatmul.mubr.msk.bf16.vlgmr.msra.gmra.mrb[56].mxu1 %vm3093_vm6, %v11483_v18 }
0x1317   :  { %8615 = vmatpush3.bf16.msra.mxu1 %v11565_v32  ;;  %8618 = vmatprep.mubr.msk.bf16.mxu1 %vm9929_vm12, %v13412_v0 }
0x1318   :  { %8616 = vmatprep.subr.bf16.mxu1 %v13412_v0 }
0x131b   :  { %8617 = vmatpush3.bf16.msra.mxu1 %v11572_v41 }
0x131c   :  { %8622 = vmatprep.subr.bf16.mxu1 %v11456_v3 }
0x131e   :  { %8619 = vmatmul.mubr.msk.bf16.vlgmr.msra.gmra.mrb[60].mxu1 %vm3093_vm6, %v11483_v18 }
0x131f   :  { %8623 = vmatpush3.bf16.msra.mxu1 %v11456_v3 }
0x1320   :  { %8624 = vmatprep.subr.bf16.mxu1 %v11468_v28 }
0x1323   :  { %8625 = vmatpush3.bf16.msra.mxu1 %v11468_v28 }
0x1324   :  { %8630 = vmatprep.subr.bf16.mxu1 %v11478_v58 }
0x13c9   :  { %v3131_v8 = vpop.f32.mrb[40].mxu1  ;;  %v3305_v12 = vpop.f32.mrb[40].mxu0 }
0x13ca   :  { %v8556_v53 = vpop.f32.mrb[41].mxu1  ;;  %v8580_v11 = vpop.f32.mrb[41].mxu0 }
0x13cb   :  { %v3134_v29 = vpop.f32.mrb[42].mxu1  ;;  %v3308_v27 = vpop.f32.mrb[42].mxu0 }
0x13cc   :  { %v3602_v51 = vpack.c.bf16 %v3134_v29, %v3131_v8  ;;  %v3605_v14 = vpack.c.bf16 %v3308_v27, %v3305_v12  ;;  %v8557_v24 = vpop.f32.mrb[43].mxu1  ;;  %v8581_v50 = vpop.f32.mrb[43].mxu0 }
0x13ce   :  { %3664 = vmatpush1.bf16.msra.mxu0 %v3602_v51 }
0x13cf   :  { %3665 = vmatprep.subr.bf16.mxu0 %v13384_v15 }
0x13d1   :  { %v3189_v3 = vpop.f32.mrb[44].mxu1  ;;  %v3421_v28 = vpop.f32.mrb[44].mxu0 }
0x13d2   :  { %v8564_v46 = vpop.f32.mrb[45].mxu1  ;;  %v8596_v33 = vpop.f32.mrb[45].mxu0 }
0x13d3   :  { %v3192_v63 = vpop.f32.mrb[46].mxu1  ;;  %v3424_v60 = vpop.f32.mrb[46].mxu0 }
0x13d4   :  { %v3603_v13 = vpack.c.bf16 %v3192_v63, %v3189_v3  ;;  %v3607_v42 = vpack.c.bf16 %v3424_v60, %v3421_v28  ;;  %v8565_v37 = vpop.f32.mrb[47].mxu1  ;;  %v8597_v53 = vpop.f32.mrb[47].mxu0 }
0x13d6   :  { %3666 = vmatpush1.bf16.msra.mxu0 %v3603_v13 }
0x13d7   :  { %3667 = vmatprep.subr.bf16.mxu0 %v13384_v15 }
0x13d9   :  { %v3247_v29 = vpop.f32.mrb[48].mxu1  ;;  %v3537_v27 = vpop.f32.mrb[48].mxu0 }
0x13da   :  { %v8572_v24 = vpop.f32.mrb[49].mxu1  ;;  %v8612_v50 = vpop.f32.mrb[49].mxu0 }
0x13db   :  { %v3250_v51 = vpop.f32.mrb[50].mxu1  ;;  %v3540_v11 = vpop.f32.mrb[50].mxu0 }
0x13dc   :  { %v3604_v12 = vpack.c.bf16 %v3250_v51, %v3247_v29  ;;  %v3609_v8 = vpack.c.bf16 %v3540_v11, %v3537_v27  ;;  %v8573_v57 = vpop.f32.mrb[51].mxu1  ;;  %v8613_v46 = vpop.f32.mrb[51].mxu0  ;;  %v9057_v11 = vld [vmem:[#allocation9] ss:$8 sps:$4 sm:$0xff]  }
0x13de   :  { %3668 = vmatpush1.bf16.msra.mxu0 %v3604_v12  ;;  %v9058_v12 = vld [vmem:[#allocation9 + $0x14] ss:$8 sps:$4 sm:$0xff]  }
0x13df   :  { %3669 = vmatprep.subr.bf16.mxu0 %v13384_v15 }
0x13e1   :  { %v3363_v63 = vpop.f32.mrb[52].mxu1 }
0x13e2   :  { %v8588_v60 = vpop.f32.mrb[53].mxu1  ;;  %3670 = vmatpush1.bf16.msra.mxu0 %v3605_v14 }
0x13e3   :  { %v3366_v37 = vpop.f32.mrb[54].mxu1  ;;  %3671 = vmatprep.subr.bf16.mxu0 %v13384_v15 }
0x13e4   :  { %v3606_v33 = vpack.c.bf16 %v3366_v37, %v3363_v63  ;;  %v8589_v3 = vpop.f32.mrb[55].mxu1  ;;  %v3627_v37 = vpop.permute.xlu1 %3626 }
0x13e6   :  { %3672 = vmatpush1.bf16.msra.mxu0 %v3606_v33 }
0x13e7   :  { %3673 = vmatprep.subr.bf16.mxu0 %v13384_v15 }
0x13e9   :  { %v3479_v28 = vpop.f32.mrb[56].mxu1 }
0x13ea   :  { %v8604_v13 = vpop.f32.mrb[57].mxu1  ;;  %3674 = vmatpush1.bf16.msra.mxu0 %v3607_v42  ;;  %v9060_v42 = vld [vmem:[#allocation9 + $0x10] ss:$8 sps:$4 sm:$0xff]  }
0x13eb   :  { %v3482_v53 = vpop.f32.mrb[58].mxu1  ;;  %3675 = vmatprep.subr.bf16.mxu0 %v13384_v15 }
0x13ec   :  { %v3608_v57 = vpack.c.bf16 %v3482_v53, %v3479_v28  ;;  %v8605_v29 = vpop.f32.mrb[59].mxu1 }
0x13ee   :  { %3676 = vmatpush1.bf16.msra.mxu0 %v3608_v57 }
0x13ef   :  { %3677 = vmatprep.subr.bf16.mxu0 %v13384_v15 }
0x13f1   :  { %v3595_v14 = vpop.f32.mrb[60].mxu1 }
0x13f2   :  { %v8620_v27 = vpop.f32.mrb[61].mxu1  ;;  %3678 = vmatpush1.bf16.msra.mxu0 %v3609_v8  ;;  %v3622_v8 = vpop.permute.xlu0 %3621 }
0x13f3   :  { %v3598_v24 = vpop.f32.mrb[62].mxu1  ;;  %3679 = vmatprep.subr.bf16.mxu0 %v13384_v15 }
0x13f4   :  { %v3610_v50 = vpack.c.bf16 %v3598_v24, %v3595_v14  ;;  %v8621_v51 = vpop.f32.mrb[63].mxu1 }
0x13f6   :  { %3680 = vmatpush1.bf16.msra.mxu0 %v3610_v50 }
0x13f7   :  { %8662 = vmatprep.subr.bf16.mxu0 %v11481_v23 }
0x13f9   :  { %3696 = vmatmul.mubr.bf16.vlgmr.msra.gmra.mrb[52].mxu0 %v9057_v11 }
0x13fa   :  { %7969 = vmatprep.mubr.msk.bf16.mxu0 %vm2555_vm15, %v9058_v12  ;;  %8663 = vmatpush3.bf16.msra.mxu0 %v11481_v23  ;;  %v3632_v23 = vpop.permute.xlu0 %3631 }
0x13fb   :  { %8664 = vmatprep.subr.bf16.mxu0 %v11495_v44 }
0x13fe   :  { %8665 = vmatpush3.bf16.msra.mxu0 %v11495_v44  ;;  %v3637_v44 = vpop.permute.xlu1 %3636 }
0x13ff   :  { %8678 = vmatprep.subr.bf16.mxu0 %v11509_v1 }
0x1401   :  { %3704 = vmatmul.mubr.bf16.gmra.mrb[56].mxu0 %v9060_v42 }
0x14cc   :  { %v3697_v46 = vpop.f32.mrb[52].mxu0 }
0x14cd   :  { %v3698_v63 = vadd.f32 %v3697_v46, %v3622_v8  ;;  %v3699_v60 = vpop.f32.mrb[53].mxu0 }
0x14ce   :  { %v3700_v33 = vpop.f32.mrb[54].mxu0 }
0x14cf   :  { %v3701_v3 = vadd.f32 %v3700_v33, %v3627_v37  ;;  %v3702_v28 = vpop.f32.mrb[55].mxu0  ;;  %v3712_v13 = vmax.f32 %v3698_v63, 0.0 }
0x14d1   :  { %v3713_v53 = vmax.f32 %v3701_v3, 0.0 }
0x14d3   :  { %v3724_v57 = vpack.c.bf16 %v3713_v53, %v3712_v13 }
0x14d4   :  { %v3705_v29 = vpop.f32.mrb[56].mxu0 }
0x14d5   :  { %v3706_v14 = vadd.f32 %v3705_v29, %v3632_v23  ;;  %v3707_v27 = vpop.f32.mrb[57].mxu0  ;;  %8626 = vmatprep.mubr.msk.bf16.mxu1 %vm3093_vm6, %v3724_v57  ;;  %8666 = vmatprep.mubr.msk.bf16.mxu0 %vm3093_vm6, %v3724_v57 }
0x14d6   :  { %v3708_v24 = vpop.f32.mrb[58].mxu0 }
0x14d7   :  { %v3709_v50 = vadd.f32 %v3708_v24, %v3637_v44  ;;  %v3710_v51 = vpop.f32.mrb[59].mxu0  ;;  %v3714_v11 = vmax.f32 %v3706_v14, 0.0 }
0x14d9   :  { %v3715_v12 = vmax.f32 %v3709_v50, 0.0 }
0x14db   :  { %v3725_v42 = vpack.c.bf16 %v3715_v12, %v3714_v11 }
0x14dd   :  { %8627 = vmatmul.mubr.msk.bf16.vlgmr.msra.gmra.mrb[64].mxu1 %vm3093_vm6, %v3725_v42  ;;  %8667 = vmatmul.mubr.msk.bf16.vlgmr.msra.gmra.mrb[60].mxu0 %vm3093_vm6, %v3725_v42 }
0x14de   :  { %8631 = vmatpush3.bf16.msra.mxu1 %v11478_v58  ;;  %8634 = vmatprep.mubr.msk.bf16.mxu1 %vm3093_vm6, %v3724_v57 }
0x14df   :  { %8679 = vmatpush3.bf16.msra.mxu0 %v11509_v1  ;;  %8682 = vmatprep.mubr.msk.bf16.mxu0 %vm3093_vm6, %v3724_v57 }
0x14e0   :  { %8632 = vmatprep.subr.bf16.mxu1 %v11492_v2  ;;  %8680 = vmatprep.subr.bf16.mxu0 %v11523_v40 }
0x14e2   :  { %8633 = vmatpush3.bf16.msra.mxu1 %v11492_v2 }
0x14e3   :  { %8681 = vmatpush3.bf16.msra.mxu0 %v11523_v40  ;;  %8638 = vmatprep.subr.bf16.mxu1 %v11506_v17 }
0x14e5   :  { %8635 = vmatmul.mubr.msk.bf16.vlgmr.msra.gmra.mrb[68].mxu1 %vm3093_vm6, %v3725_v42 }
0x14e6   :  { %8683 = vmatmul.mubr.msk.bf16.vlgmr.msra.gmra.mrb[64].mxu0 %vm3093_vm6, %v3725_v42  ;;  %8639 = vmatpush3.bf16.msra.mxu1 %v11506_v17 }
0x14e7   :  { %8642 = vmatprep.mubr.msk.bf16.mxu1 %vm3093_vm6, %v3724_v57  ;;  %8640 = vmatprep.subr.bf16.mxu1 %v11520_v45 }
0x14ea   :  { %8641 = vmatpush3.bf16.msra.mxu1 %v11520_v45 }
0x14eb   :  { %8646 = vmatprep.subr.bf16.mxu1 %v11461_v35 }
0x14ed   :  { %8643 = vmatmul.mubr.msk.bf16.vlgmr.msra.gmra.mrb[72].mxu1 %vm3093_vm6, %v3725_v42 }
0x14ee   :  { %8647 = vmatpush3.bf16.msra.mxu1 %v11461_v35  ;;  %8650 = vmatprep.mubr.msk.bf16.mxu1 %vm3093_vm6, %v3724_v57  ;;  %v9063_v35 = vld [vmem:[#allocation10 + $0x4] ss:$12 sps:$4 sm:$0xff]  }
0x14ef   :  { %8648 = vmatprep.subr.bf16.mxu1 %v11471_v9  ;;  %4283 = vmatprep.mubr.bf16.mxu0 %v9063_v35 }
0x14f2   :  { %8649 = vmatpush3.bf16.msra.mxu1 %v11471_v9  ;;  %v9064_v9 = vld [vmem:[#allocation10 + $0x8] ss:$12 sps:$4 sm:$0xff]  }
0x14f3   :  { %8654 = vmatprep.subr.bf16.mxu1 %v11534_v30 }
0x14f5   :  { %8651 = vmatmul.mubr.msk.bf16.vlgmr.msra.gmra.mrb[76].mxu1 %vm3093_vm6, %v3725_v42 }
0x14f6   :  { %8655 = vmatpush3.bf16.msra.mxu1 %v11534_v30  ;;  %8658 = vmatprep.mubr.msk.bf16.mxu1 %vm3093_vm6, %v3724_v57 }
0x14f7   :  { %8656 = vmatprep.subr.bf16.mxu1 %v11544_v6 }
0x14fa   :  { %8657 = vmatpush3.bf16.msra.mxu1 %v11544_v6 }
0x14fb   :  { %8670 = vmatprep.subr.bf16.mxu1 %v11551_v38 }
0x14fd   :  { %8659 = vmatmul.mubr.msk.bf16.vlgmr.msra.gmra.mrb[80].mxu1 %vm3093_vm6, %v3725_v42 }
0x14fe   :  { %8671 = vmatpush3.bf16.msra.mxu1 %v11551_v38  ;;  %8674 = vmatprep.mubr.msk.bf16.mxu1 %vm3093_vm6, %v3724_v57 }
0x14ff   :  { %8672 = vmatprep.subr.bf16.mxu1 %v11558_v36 }
0x1502   :  { %8673 = vmatpush3.bf16.msra.mxu1 %v11558_v36 }
0x1503   :  { %8686 = vmatprep.subr.bf16.mxu1 %v11565_v32 }
0x1505   :  { %8675 = vmatmul.mubr.msk.bf16.vlgmr.msra.gmra.mrb[84].mxu1 %vm3093_vm6, %v3725_v42 }
0x1506   :  { %8687 = vmatpush3.bf16.msra.mxu1 %v11565_v32  ;;  %8690 = vmatprep.mubr.msk.bf16.mxu1 %vm3093_vm6, %v3724_v57 }
0x1507   :  { %8688 = vmatprep.subr.bf16.mxu1 %v11572_v41 }
0x150a   :  { %8689 = vmatpush3.bf16.msra.mxu1 %v11572_v41 }
0x150d   :  { %8691 = vmatmul.mubr.msk.bf16.vlgmr.msra.gmra.mrb[88].mxu1 %vm3093_vm6, %v3725_v42 }
0x150e   :  { %8698 = vmatprep.mubr.msk.bf16.mxu1 %vm3093_vm6, %v9064_v9 }
0x15b0   :  { %v8628_v58 = vpop.f32.mrb[64].mxu1  ;;  %v8668_v2 = vpop.f32.mrb[60].mxu0 }
0x15b1   :  { %v3766_v17 = vpop.f32.mrb[65].mxu1  ;;  %v4011_v1 = vpop.f32.mrb[61].mxu0 }
0x15b2   :  { %v8629_v45 = vpop.f32.mrb[66].mxu1  ;;  %v8669_v40 = vpop.f32.mrb[62].mxu0 }
0x15b3   :  { %v4174_v30 = vpack.c.bf16 %v8629_v45, %v8628_v58  ;;  %v4184_v6 = vpack.c.bf16 %v8669_v40, %v8668_v2  ;;  %v3769_v38 = vpop.f32.mrb[67].mxu1  ;;  %v4014_v36 = vpop.f32.mrb[63].mxu0 }
0x15b4   :  { %v4173_v32 = vpack.c.bf16 %v3769_v38, %v3766_v17  ;;  %v4183_v8 = vpack.c.bf16 %v4014_v36, %v4011_v1 }
0x15b8   :  { %v8636_v41 = vpop.f32.mrb[68].mxu1 }
0x15b9   :  { %v8684_v46 = vpop.f32.mrb[64].mxu0  ;;  %v3815_v63 = vpop.f32.mrb[69].mxu1 }
0x15ba   :  { %v4109_v60 = vpop.f32.mrb[65].mxu0  ;;  %v8637_v37 = vpop.f32.mrb[70].mxu1 }
0x15bb   :  { %v4176_v33 = vpack.c.bf16 %v8637_v37, %v8636_v41  ;;  %v8685_v3 = vpop.f32.mrb[66].mxu0  ;;  %v3818_v28 = vpop.f32.mrb[71].mxu1 }
0x15bc   :  { %v4188_v13 = vpack.c.bf16 %v8685_v3, %v8684_v46  ;;  %v4175_v53 = vpack.c.bf16 %v3818_v28, %v3815_v63  ;;  %v4112_v57 = vpop.f32.mrb[67].mxu0 }
0x15bd   :  { %v4187_v23 = vpack.c.bf16 %v4112_v57, %v4109_v60 }
0x15c0   :  { %v8644_v29 = vpop.f32.mrb[72].mxu1 }
0x15c1   :  { %v3864_v14 = vpop.f32.mrb[73].mxu1 }
0x15c2   :  { %v8645_v27 = vpop.f32.mrb[74].mxu1 }
0x15c3   :  { %v4178_v44 = vpack.c.bf16 %v8645_v27, %v8644_v29  ;;  %v3867_v24 = vpop.f32.mrb[75].mxu1 }
0x15c4   :  { %v4177_v50 = vpack.c.bf16 %v3867_v24, %v3864_v14 }
0x15c8   :  { %v8652_v51 = vpop.f32.mrb[76].mxu1 }
0x15c9   :  { %v3913_v11 = vpop.f32.mrb[77].mxu1 }
0x15ca   :  { %v8653_v12 = vpop.f32.mrb[78].mxu1 }
0x15cb   :  { %v4180_v42 = vpack.c.bf16 %v8653_v12, %v8652_v51  ;;  %v3916_v35 = vpop.f32.mrb[79].mxu1  ;;  %v4198_v12 = vpop.permute.xlu0 %4197 }
0x15cc   :  { %v4179_v9 = vpack.c.bf16 %v3916_v35, %v3913_v11 }
0x15d0   :  { %v8660_v58 = vpop.f32.mrb[80].mxu1 }
0x15d1   :  { %v3962_v2 = vpop.f32.mrb[81].mxu1 }
0x15d2   :  { %v8661_v17 = vpop.f32.mrb[82].mxu1 }
0x15d3   :  { %v4182_v1 = vpack.c.bf16 %v8661_v17, %v8660_v58  ;;  %v3965_v45 = vpop.f32.mrb[83].mxu1  ;;  %v4203_v58 = vpop.permute.xlu1 %4202 }
0x15d4   :  { %v4181_v40 = vpack.c.bf16 %v3965_v45, %v3962_v2 }
0x15d6   :  { %8312 = vmatprep.subr.bf16.mxu0 %v4181_v40 }
0x15d7   :  { %8313 = vmatpush3.bf16.msra.mxu0 %v4173_v32  ;;  %v9065_v32 = vld [vmem:[#allocation10 + $0x20] ss:$12 sps:$4 sm:$0xff]  }
0x15d8   :  { %v8676_v38 = vpop.f32.mrb[84].mxu1  ;;  %8314 = vmatprep.subr.bf16.mxu0 %v4182_v1 }
0x15d9   :  { %v4060_v36 = vpop.f32.mrb[85].mxu1 }
0x15da   :  { %v8677_v41 = vpop.f32.mrb[86].mxu1 }
0x15db   :  { %v4186_v46 = vpack.c.bf16 %v8677_v41, %v8676_v38  ;;  %v4063_v63 = vpop.f32.mrb[87].mxu1  ;;  %8315 = vmatpush3.bf16.msra.mxu0 %v4174_v30  ;;  %v9061_v30 = vld [vmem:[#allocation10] ss:$12 sps:$4 sm:$0xff]  }
0x15dc   :  { %v4185_v60 = vpack.c.bf16 %v4063_v63, %v4060_v36  ;;  %8316 = vmatprep.subr.bf16.mxu0 %v4183_v8  ;;  %v9068_v8 = vld [vmem:[#allocation10 + $0x18] ss:$12 sps:$4 sm:$0xff]   ;;  %v4208_v63 = vpop.permute.xlu0 %4207 }
0x15df   :  { %8317 = vmatpush3.bf16.msra.mxu0 %v4175_v53  ;;  %v9070_v53 = vld [vmem:[%s13432_s7 + $0x8] sm:$0xff]  }
0x15e0   :  { %v8692_v37 = vpop.f32.mrb[88].mxu1  ;;  %8318 = vmatprep.subr.bf16.mxu0 %v4184_v6  ;;  %v9066_v6 = vld [vmem:[#allocation10 + $0x1c] ss:$12 sps:$4 sm:$0xff]  }
0x15e1   :  { %v4158_v3 = vpop.f32.mrb[89].mxu1 }
0x15e2   :  { %v8693_v28 = vpop.f32.mrb[90].mxu1 }
0x15e3   :  { %v4190_v57 = vpack.c.bf16 %v8693_v28, %v8692_v37  ;;  %v4161_v29 = vpop.f32.mrb[91].mxu1  ;;  %8319 = vmatpush3.bf16.msra.mxu0 %v4176_v33  ;;  %v9069_v33 = vld [vmem:[%s13432_s7] sm:$0xff]  }
0x15e4   :  { %v4189_v14 = vpack.c.bf16 %v4161_v29, %v4158_v3  ;;  %8320 = vmatprep.subr.bf16.mxu0 %v4185_v60 }
0x15e6   :  { %8694 = vmatprep.subr.bf16.mxu1 %v4189_v14 }
0x15e7   :  { %8321 = vmatpush3.bf16.msra.mxu0 %v4177_v50  ;;  %8695 = vmatpush3.bf16.msra.mxu1 %v4189_v14 }
0x15e8   :  { %8322 = vmatprep.subr.bf16.mxu0 %v4186_v46  ;;  %8696 = vmatprep.subr.bf16.mxu1 %v4190_v57 }
0x15eb   :  { %8323 = vmatpush3.bf16.msra.mxu0 %v4178_v44  ;;  %8697 = vmatpush3.bf16.msra.mxu1 %v4190_v57  ;;  %v4213_v57 = vpop.permute.xlu1 %4212 }
0x15ec   :  { %8324 = vmatprep.subr.bf16.mxu0 %v4187_v23  ;;  %8702 = vmatprep.subr.bf16.mxu1 %v9069_v33 }
0x15ee   :  { %8699 = vmatmul.mubr.msk.bf16.vlgmr.msra.gmra.mrb[92].mxu1 %vm3093_vm6, %v9065_v32 }
0x15ef   :  { %8325 = vmatpush3.bf16.msra.mxu0 %v4179_v9  ;;  %8703 = vmatpush3.bf16.msra.mxu1 %v9069_v33 }
0x15f0   :  { %8326 = vmatprep.subr.bf16.mxu0 %v4188_v13  ;;  %8704 = vmatprep.subr.bf16.mxu1 %v9070_v53 }
0x15f3   :  { %8327 = vmatpush3.bf16.msra.mxu0 %v4180_v42  ;;  %8705 = vmatpush3.bf16.msra.mxu1 %v9070_v53 }
0x15f4   :  { %8710 = vmatprep.subr.bf16.mxu1 %v13412_v0 }
0x15f6   :  { %4284 = vmatmul.mubr.bf16.vlgmr.msra.gmra.mrb[68].mxu0 %v9061_v30 }
0x15f7   :  { %4291 = vmatprep.mubr.bf16.mxu0 %v9066_v6 }
0x15fe   :  { %4292 = vmatmul.mubr.bf16.gmra.mrb[72].mxu0 %v9068_v8 }
0x16c1   :  { %v8700_v23 = vpop.f32.mrb[92].mxu1 }
0x16c2   :  { %v4334_v27 = vpop.f32.mrb[93].mxu1 }
0x16c3   :  { %v8701_v44 = vpop.f32.mrb[94].mxu1 }
0x16c4   :  { %v4337_v24 = vpop.f32.mrb[95].mxu1 }
0x16c9   :  { %v8328_v13 = vpop.f32.mrb[68].mxu0 }
0x16ca   :  { %v8329_v50 = vpop.f32.mrb[69].mxu0 }
0x16cb   :  { %v8330_v51 = vadd.f32 %v8329_v50, %v8328_v13  ;;  %v8331_v11 = vpop.f32.mrb[70].mxu0  ;;  %v4426_v13 = vld [vmem:[#allocation7] sm:$0xf]  ;;  %v9071_v50 = vld [vmem:[%s13433_s27] sm:$0xff]  }
0x16cc   :  { %v8332_v42 = vpop.f32.mrb[71].mxu0 }
0x16cd   :  { %v8333_v35 = vadd.f32 %v8332_v42, %v8331_v11  ;;  %v4286_v9 = vadd.f32 %v8330_v51, %v4198_v12  ;;  %v4433_v51 = vpop.permute.xlu0 %4432 }
0x16cf   :  { %v11649_v2 = vadd.f32 %v4334_v27, %v4286_v9  ;;  %v4289_v17 = vadd.f32 %v8333_v35, %v4203_v58 }
0x16d1   :  { %v11651_v1 = vadd.f32 %v4337_v24, %v4289_v17  ;;  %v8334_v45 = vpop.f32.mrb[72].mxu0  ;;  %v4349_v38 = vmax.f32 %v11649_v2, 0.0 }
0x16d2   :  { %v8335_v40 = vpop.f32.mrb[73].mxu0 }
0x16d3   :  { %v4350_v36 = vmax.f32 %v11651_v1, 0.0  ;;  %v8336_v41 = vadd.f32 %v8335_v40, %v8334_v45  ;;  %v8337_v46 = vpop.f32.mrb[74].mxu0  ;;  %v9072_v40 = vld [vmem:[%s13433_s27 + $0x8] sm:$0xff]  }
0x16d4   :  { %v8338_v60 = vpop.f32.mrb[75].mxu0 }
0x16d5   :  { %v4353_v37 = vpack.c.bf16 %v4350_v36, %v4349_v38  ;;  %v4294_v3 = vadd.f32 %v8336_v41, %v4208_v63  ;;  %v8339_v28 = vadd.f32 %v8338_v60, %v8337_v46  ;;  %v4602_v41 = vld [vmem:[#allocation4] sm:$0x1]  ;;  %v4491_v60 = vpop.permute.xlu1 %4490 }
0x16d6   :  { %v4610_v46 = vsel %vm852_vm4, %v4602_v41, 0  ;;  %v9073_v63 = vld [vmem:[%s13434_s16] sm:$0xff]  }
0x16d7   :  { %v11659_v29 = vadd.f32 %v8700_v23, %v4294_v3  ;;  %v4297_v14 = vadd.f32 %v8339_v28, %v4213_v57  ;;  %8706 = vmatprep.mubr.msk.bf16.mxu1 %vm3093_vm6, %v4353_v37  ;;  %8730 = vmatprep.subr.bf16.mxu0 %v9073_v63  ;;  %v4496_v37 = vpop.permute.xlu0 %4495 }
0x16d8   :  { %8731 = vmatpush3.bf16.msra.mxu0 %v9073_v63 }
0x16d9   :  { %v11662_v32 = vadd.f32 %v8701_v44, %v4297_v14  ;;  %v4351_v30 = vmax.f32 %v11659_v29, 0.0  ;;  %v4501_v3 = vpop.permute.xlu1 %4500 }
0x16db   :  { %v4352_v6 = vmax.f32 %v11662_v32, 0.0 }
0x16dd   :  { %v4354_v8 = vpack.c.bf16 %v4352_v6, %v4351_v30 }
0x16df   :  { %8707 = vmatmul.mubr.msk.bf16.vlgmr.msra.gmra.mrb[96].mxu1 %vm3093_vm6, %v4354_v8  ;;  %v4506_v8 = vpop.permute.xlu0 %4505 }
0x16e0   :  { %8714 = vmatprep.mubr.msk.bf16.mxu1 %vm9929_vm12, %v13412_v0 }
0x17b2   :  { %v8708_v33 = vpop.f32.mrb[96].mxu1 }
0x17b3   :  { %v4411_v53 = vpop.f32.mrb[97].mxu1 }
0x17b4   :  { %v8709_v23 = vpop.f32.mrb[98].mxu1 }
0x17b5   :  { %v4428_v27 = vpack.c.bf16 %v8709_v23, %v8708_v33  ;;  %v4414_v44 = vpop.f32.mrb[99].mxu1 }
0x17b6   :  { %v4427_v24 = vpack.c.bf16 %v4414_v44, %v4411_v53 }
0x17b8   :  { %8711 = vmatpush3.bf16.msra.mxu1 %v4427_v24 }
0x17b9   :  { %8712 = vmatprep.subr.bf16.mxu1 %v13412_v0 }
0x17bc   :  { %8713 = vmatpush3.bf16.msra.mxu1 %v4428_v27 }
0x17bf   :  { %8715 = vmatmul.mubr.msk.bf16.vlgmr.msra.gmra.mrb[100].mxu1 %vm3093_vm6, %v4426_v13 }
0x17c0   :  { %8720 = vmatprep.mubr.msk.bf16.mxu1 %vm1735_vm13, %v9071_v50 }
0x1892   :  { %v4472_v11 = vpop.f32.mrb[100].mxu1 }
0x1893   :  { %v4473_v12 = vadd.f32 %v4472_v11, %v4433_v51  ;;  %v8716_v42 = vpop.f32.mrb[101].mxu1 }
0x1894   :  { %v4475_v35 = vpop.f32.mrb[102].mxu1 }
0x1895   :  { %v4478_v9 = vmax.f32 %v4473_v12, 0.0  ;;  %v8717_v58 = vpop.f32.mrb[103].mxu1 }
0x1897   :  { %v4483_v17 = vpack.c.bf16 %v4478_v9, %v4478_v9 }
0x1899   :  { %8804 = vmatprep.subr.msk.bf16.mxu1 %vm867_vm7, %v4483_v17  ;;  %v4525_v45 = vsel %vm867_vm7, %v4483_v17, 0 }
0x189a   :  { %8719 = vmatpush3.bf16.msra.mxu1 %v4525_v45 }
0x189b   :  { %8805 = vmatprep.subr.msk.bf16.mxu1 %vm852_vm4, %v4602_v41 }
0x189d   :  { %8721 = vmatmul.mubr.msk.bf16.vlgmr.msra.gmra.mrb[104].mxu1 %vm1735_vm13, %v9072_v40 }
0x189e   :  { %8725 = vmatpush3.bf16.msra.mxu1 %v4610_v46 }
0x1970   :  { %v8722_v28 = vpop.f32.mrb[104].mxu1 }
0x1971   :  { %v4570_v57 = vadd.f32 %v8722_v28, %v4501_v3  ;;  %v4561_v14 = vpop.f32.mrb[105].mxu1 }
0x1972   :  { %v4562_v33 = vadd.f32 %v4561_v14, %v4491_v60  ;;  %v8723_v53 = vpop.f32.mrb[106].mxu1 }
0x1973   :  { %v4578_v23 = vsub.f32 0.0, %v4570_v57  ;;  %v4573_v27 = vadd.f32 %v8723_v53, %v4506_v8  ;;  %v4564_v44 = vpop.f32.mrb[107].mxu1  ;;  %v9074_v8 = vld [vmem:[%s13434_s16 + $0x8] sm:$0xff]  }
0x1974   :  { %v4576_v24 = vsub.f32 0.0, %v4562_v33  ;;  %v4565_v13 = vadd.f32 %v4564_v44, %v4496_v37  ;;  %8732 = vmatprep.subr.bf16.mxu0 %v9074_v8 }
0x1975   :  { %v4584_v50 = vmul.f32 1.442695, %v4578_v23  ;;  %v4579_v51 = vsub.f32 0.0, %v4573_v27  ;;  %8733 = vmatpush3.bf16.msra.mxu0 %v9074_v8 }
0x1976   :  { %v4580_v11 = vmul.f32 1.442695, %v4576_v24  ;;  %v4577_v12 = vsub.f32 0.0, %v4565_v13  ;;  %8738 = vmatprep.subr.bf16.mxu0 %v13412_v0 }
0x1977   :  { %9201 = vpow2.f32 %v4584_v50  ;;  %v4586_v42 = vmul.f32 1.442695, %v4579_v51 }
0x1978   :  { %9203 = vpow2.f32 %v4580_v11  ;;  %v4582_v35 = vmul.f32 1.442695, %v4577_v12 }
0x1979   :  { %9205 = vpow2.f32 %v4586_v42 }
0x197a   :  { %9207 = vpow2.f32 %v4582_v35 }
0x1981   :  { %v9202_v9 = vpop.eup %9201 }
0x1982   :  { %v9204_v58 = vpop.eup %9203  ;;  %v4590_v17 = vadd.f32 1.0, %v9202_v9 }
0x1983   :  { %v9206_v45 = vpop.eup %9205  ;;  %v4588_v40 = vadd.f32 1.0, %v9204_v58 }
0x1984   :  { %v9208_v41 = vpop.eup %9207  ;;  %9209 = vrcp.f32 %v4590_v17  ;;  %v4591_v46 = vadd.f32 1.0, %v9206_v45 }
0x1985   :  { %9211 = vrcp.f32 %v4588_v40  ;;  %v4589_v63 = vadd.f32 1.0, %v9208_v41 }
0x1986   :  { %9213 = vrcp.f32 %v4591_v46 }
0x1987   :  { %9215 = vrcp.f32 %v4589_v63 }
0x198e   :  { %v9210_v60 = vpop.eup %9209 }
0x198f   :  { %v9212_v37 = vpop.eup %9211 }
0x1990   :  { %v9214_v3 = vpop.eup %9213 }
0x1991   :  { %v9216_v28 = vpop.eup %9215  ;;  %v4601_v57 = vpack.c.bf16 %v9214_v3, %v9210_v60 }
0x1992   :  { %v4600_v14 = vpack.c.bf16 %v9216_v28, %v9212_v37 }
0x1994   :  { %8726 = vmatprep.mubr.msk.bf16.mxu1 %vm1791_vm14, %v4600_v14 }
0x1995   :  { %8727 = vmatmul.mubr.msk.bf16.vlgmr.msra.gmra.mrb[108].mxu1 %vm1791_vm14, %v4601_v57 }
0x1a68   :  { %v8728_v33 = vpop.f32.mrb[108].mxu1 }
0x1a69   :  { %v4646_v53 = vpop.f32.mrb[109].mxu1  ;;  %v4663_v27 = vmul.f32 %v8728_v33, %v4351_v30  ;;  %v9080_v30 = vld [vmem:[#allocation37 + $0x4] ss:$12 sps:$4 sm:$0xff]  }
0x1a6a   :  { %v8729_v23 = vpop.f32.mrb[110].mxu1  ;;  %v4661_v13 = vmul.f32 %v4646_v53, %v4349_v38  ;;  %4906 = vmatprep.mubr.bf16.mxu1 %v9080_v30 }
0x1a6b   :  { %v4664_v44 = vmul.f32 %v8729_v23, %v4352_v6  ;;  %v4649_v24 = vpop.f32.mrb[111].mxu1 }
0x1a6c   :  { %v4662_v50 = vmul.f32 %v4649_v24, %v4350_v36 }
0x1a6d   :  { %v4666_v51 = vpack.c.bf16 %v4664_v44, %v4663_v27 }
0x1a6e   :  { %v4665_v11 = vpack.c.bf16 %v4662_v50, %v4661_v13 }
0x1a70   :  { %8734 = vmatprep.mubr.msk.bf16.mxu0 %vm3093_vm6, %v4665_v11 }
0x1a71   :  { %8735 = vmatmul.mubr.msk.bf16.vlgmr.msra.gmra.mrb[76].mxu0 %vm3093_vm6, %v4666_v51 }
0x1a72   :  { %8742 = vmatprep.mubr.msk.bf16.mxu0 %vm9929_vm12, %v13412_v0 }
0x1b44   :  { %v11700_v29 = vpop.f32.mrb[76].mxu0 }
0x1b45   :  { %4746 = vrot.lane.b32.xlu1 %v11700_v29, %s9931_s19  ;;  %v4723_v32 = vpop.f32.mrb[77].mxu0 }
0x1b46   :  { %v11704_v2 = vpop.f32.mrb[78].mxu0 }
0x1b47   :  { %4748 = vrot.lane.b32.xlu0 %v11704_v2, %s9931_s19  ;;  %v4726_v1 = vpop.f32.mrb[79].mxu0  ;;  %v4847_v38 = vpack.c.bf16 %v11704_v2, %v11700_v29 }
0x1b48   :  { %v4846_v36 = vpack.c.bf16 %v4726_v1, %v4723_v32 }
0x1b49   :  { %4794 = vrot.lane.b32.xlu1 %v11700_v29, %s9922_s8 }
0x1b4a   :  { %8361 = vmatprep.subr.bf16.mxu1 %v4846_v36 }
0x1b4b   :  { %4796 = vrot.lane.b32.xlu0 %v11704_v2, %s9922_s8 }
0x1b4d   :  { %4758 = vrot.lane.b32.xlu1 %v11700_v29, %s9898_s6 }
0x1b4f   :  { %4760 = vrot.lane.b32.xlu0 %v11704_v2, %s9898_s6 }
0x1b51   :  { %4806 = vrot.lane.b32.xlu1 %v11700_v29, %s9933_s12 }
0x1b53   :  { %4808 = vrot.lane.b32.xlu0 %v11704_v2, %s9933_s12 }
0x1b55   :  { %4770 = vrot.lane.b32.xlu1 %v11700_v29, %s9932_s5 }
0x1b57   :  { %4772 = vrot.lane.b32.xlu0 %v11704_v2, %s9932_s5 }
0x1b59   :  { %4830 = vrot.lane.b32.xlu1 %v11700_v29, %s9934_s15 }
0x1b5b   :  { %4832 = vrot.lane.b32.xlu0 %v11704_v2, %s9934_s15 }
0x1b5d   :  { %4818 = vrot.lane.b32.xlu1 %v11700_v29, %s9935_s9 }
0x1b5f   :  { %4820 = vrot.lane.b32.xlu0 %v11704_v2, %s9935_s9 }
0x1b61   :  { %4742 = vrot.lane.b32.xlu1 %v4723_v32, %s9931_s19 }
0x1b63   :  { %4744 = vrot.lane.b32.xlu0 %v4726_v1, %s9931_s19 }
0x1b65   :  { %4790 = vrot.lane.b32.xlu1 %v4723_v32, %s9922_s8 }
0x1b67   :  { %4792 = vrot.lane.b32.xlu0 %v4726_v1, %s9922_s8 }
0x1b69   :  { %4754 = vrot.lane.b32.xlu1 %v4723_v32, %s9898_s6 }
0x1b6b   :  { %4756 = vrot.lane.b32.xlu0 %v4726_v1, %s9898_s6 }
0x1b6d   :  { %4802 = vrot.lane.b32.xlu1 %v4723_v32, %s9933_s12 }
0x1b6f   :  { %4804 = vrot.lane.b32.xlu0 %v4726_v1, %s9933_s12 }
0x1b71   :  { %4766 = vrot.lane.b32.xlu1 %v4723_v32, %s9932_s5 }
0x1b73   :  { %4768 = vrot.lane.b32.xlu0 %v4726_v1, %s9932_s5 }
0x1b75   :  { %4826 = vrot.lane.b32.xlu1 %v4723_v32, %s9934_s15 }
0x1b77   :  { %4828 = vrot.lane.b32.xlu0 %v4726_v1, %s9934_s15 }
0x1b79   :  { %4814 = vrot.lane.b32.xlu1 %v4723_v32, %s9935_s9 }
0x1b7b   :  { %4816 = vrot.lane.b32.xlu0 %v4726_v1, %s9935_s9 }
0x1b7d   :  { %4778 = vrot.lane.b32.xlu1 %v4723_v32, %s9921_s26 }
0x1b7f   :  { %4780 = vrot.lane.b32.xlu0 %v4726_v1, %s9921_s26 }
0x1b81   :  { %4782 = vrot.lane.b32.xlu1 %v11700_v29, %s9921_s26 }
0x1b83   :  { %4784 = vrot.lane.b32.xlu0 %v11704_v2, %s9921_s26 }
0x1bb7   :  { %v4747_v6 = vpop.permute.xlu1 %4746 }
0x1bb8   :  { %v4752_v27 = vmul.f32 %v4747_v6, %v11228_v43 }
0x1bb9   :  { %v4749_v12 = vpop.permute.xlu0 %4748 }
0x1bba   :  { %v4753_v33 = vmul.f32 %v4749_v12, %v11228_v43 }
0x1bbb   :  { %v4795_v42 = vpop.permute.xlu1 %4794 }
0x1bbc   :  { %v4839_v50 = vpack.c.bf16 %v4753_v33, %v4752_v27  ;;  %v4800_v1 = vmul.f32 %v4795_v42, %v11244_v5 }
0x1bbd   :  { %v4797_v35 = vpop.permute.xlu0 %4796 }
0x1bbe   :  { %v4801_v11 = vmul.f32 %v4797_v35, %v11244_v5 }
0x1bbf   :  { %v4759_v9 = vpop.permute.xlu1 %4758 }
0x1bc0   :  { %v4849_v12 = vpack.c.bf16 %v4801_v11, %v4800_v1 }
0x1bc1   :  { %v4761_v58 = vpop.permute.xlu0 %4760 }
0x1bc2   :  { %v4765_v30 = vmul.f32 %v4761_v58, %v11231_v20 }
0x1bc3   :  { %v4807_v17 = vpop.permute.xlu1 %4806 }
0x1bc5   :  { %v4809_v45 = vpop.permute.xlu0 %4808 }
0x1bc6   :  { %v4813_v42 = vmul.f32 %v4809_v45, %v11253_v31 }
0x1bc7   :  { %v4771_v40 = vpop.permute.xlu1 %4770 }
0x1bc9   :  { %v4773_v41 = vpop.permute.xlu0 %4772 }
0x1bca   :  { %v4777_v27 = vmul.f32 %v4773_v41, %v11234_v54 }
0x1bcb   :  { %v11754_v46 = vpop.permute.xlu1 %4830 }
0x1bcd   :  { %v4833_v63 = vpop.permute.xlu0 %4832 }
0x1bcf   :  { %v11756_v60 = vpop.permute.xlu1 %4818 }
0x1bd1   :  { %v11758_v37 = vpop.permute.xlu0 %4820 }
0x1bd3   :  { %v4743_v3 = vpop.permute.xlu1 %4742 }
0x1bd4   :  { %v4750_v57 = vmul.f32 %v4743_v3, %v11228_v43 }
0x1bd5   :  { %v4745_v28 = vpop.permute.xlu0 %4744 }
0x1bd6   :  { %v4751_v14 = vmul.f32 %v4745_v28, %v11228_v43 }
0x1bd7   :  { %v4791_v8 = vpop.permute.xlu1 %4790 }
0x1bd8   :  { %v4838_v53 = vpack.c.bf16 %v4751_v14, %v4750_v57  ;;  %v4798_v44 = vmul.f32 %v4791_v8, %v11244_v5 }
0x1bd9   :  { %v4793_v23 = vpop.permute.xlu0 %4792 }
0x1bda   :  { %v4799_v24 = vmul.f32 %v4793_v23, %v11244_v5  ;;  %8362 = vmatpush3.bf16.msra.mxu1 %v4838_v53 }
0x1bdb   :  { %v4755_v13 = vpop.permute.xlu1 %4754  ;;  %8363 = vmatprep.subr.bf16.mxu1 %v4847_v38  ;;  %v4764_v38 = vmul.f32 %v4759_v9, %v11231_v20  ;;  %v4812_v9 = vmul.f32 %v4807_v17, %v11253_v31 }
0x1bdc   :  { %v4848_v51 = vpack.c.bf16 %v4799_v24, %v4798_v44  ;;  %v4762_v32 = vmul.f32 %v4755_v13, %v11231_v20 }
0x1bdd   :  { %v4757_v29 = vpop.permute.xlu0 %4756  ;;  %v4841_v14 = vpack.c.bf16 %v4765_v30, %v4764_v38  ;;  %v4851_v24 = vpack.c.bf16 %v4813_v42, %v4812_v9  ;;  %v9075_v38 = vld [vmem:[#allocation37 + $0x8] ss:$12 sps:$4 sm:$0xff]  }
0x1bde   :  { %v4763_v2 = vmul.f32 %v4757_v29, %v11231_v20  ;;  %8364 = vmatpush3.bf16.msra.mxu1 %v4839_v50  ;;  %v4776_v50 = vmul.f32 %v4771_v40, %v11234_v54 }
0x1bdf   :  { %v4803_v36 = vpop.permute.xlu1 %4802  ;;  %8365 = vmatprep.subr.bf16.mxu1 %v4848_v51  ;;  %v11781_v51 = vld [vmem:[%s13415_s10 + $0x8] ss:$0 sm:$0xff]  ;;  %s13435_s10 = sld [smem:[#allocation92_spill]] }
0x1be0   :  { %v4840_v6 = vpack.c.bf16 %v4763_v2, %v4762_v32  ;;  %v4810_v28 = vmul.f32 %v4803_v36, %v11253_v31  ;;  %v4843_v32 = vpack.c.bf16 %v4777_v27, %v4776_v50  ;;  %v4837_v17 = vmul.f32 %v11781_v51, %v4833_v63 }
0x1be1   :  { %v4805_v3 = vpop.permute.xlu0 %4804  ;;  %v4836_v41 = vmul.f32 %v11781_v51, %v11754_v46 }
0x1be2   :  { %v4811_v35 = vmul.f32 %v4805_v3, %v11253_v31  ;;  %8366 = vmatpush3.bf16.msra.mxu1 %v4840_v6  ;;  %v4825_v3 = vmul.f32 %v11758_v37, %v11256_v26 }
0x1be3   :  { %v4767_v57 = vpop.permute.xlu1 %4766  ;;  %8367 = vmatprep.subr.bf16.mxu1 %v4849_v12  ;;  %v4855_v6 = vpack.c.bf16 %v4837_v17, %v4836_v41 }
0x1be4   :  { %v4850_v8 = vpack.c.bf16 %v4811_v35, %v4810_v28  ;;  %v4774_v58 = vmul.f32 %v4767_v57, %v11234_v54  ;;  %v9076_v35 = vld [vmem:[#allocation6] sm:$0xff]   ;;  %v4824_v57 = vmul.f32 %v11756_v60, %v11256_v26 }
0x1be5   :  { %v4769_v33 = vpop.permute.xlu0 %4768  ;;  %v9078_v60 = vld [vmem:[#allocation37] ss:$12 sps:$4 sm:$0xff]  }
0x1be6   :  { %v4775_v53 = vmul.f32 %v4769_v33, %v11234_v54  ;;  %8368 = vmatpush3.bf16.msra.mxu1 %v4841_v14  ;;  %v4853_v42 = vpack.c.bf16 %v4825_v3, %v4824_v57  ;;  %v5237_v3 = vld [vmem:[%s13435_s10] sm:$0xff] }
0x1be7   :  { %v4827_v23 = vpop.permute.xlu1 %4826  ;;  %8369 = vmatprep.subr.bf16.mxu1 %v4850_v8 }
0x1be8   :  { %v4842_v44 = vpack.c.bf16 %v4775_v53, %v4774_v58  ;;  %v4834_v45 = vmul.f32 %v11781_v51, %v4827_v23  ;;  %v9077_v53 = vld [vmem:[#allocation6 + $0x8] sm:$0xff]  }
0x1be9   :  { %v4829_v13 = vpop.permute.xlu0 %4828 }
0x1bea   :  { %v4835_v11 = vmul.f32 %v11781_v51, %v4829_v13  ;;  %8370 = vmatpush3.bf16.msra.mxu1 %v4842_v44 }
0x1beb   :  { %v4815_v29 = vpop.permute.xlu1 %4814  ;;  %8371 = vmatprep.subr.bf16.mxu1 %v4851_v24 }
0x1bec   :  { %v4854_v2 = vpack.c.bf16 %v4835_v11, %v4834_v45  ;;  %v4822_v36 = vmul.f32 %v4815_v29, %v11256_v26 }
0x1bed   :  { %v4817_v1 = vpop.permute.xlu0 %4816 }
0x1bee   :  { %v4823_v40 = vmul.f32 %v4817_v1, %v11256_v26  ;;  %8372 = vmatpush3.bf16.msra.mxu1 %v4843_v32  ;;  %8739 = vmatpush3.bf16.msra.mxu0 %v4854_v2 }
0x1bef   :  { %v4779_v30 = vpop.permute.xlu1 %4778  ;;  %8740 = vmatprep.subr.bf16.mxu0 %v13412_v0 }
0x1bf0   :  { %v4852_v12 = vpack.c.bf16 %v4823_v40, %v4822_v36  ;;  %v4786_v28 = vmul.f32 %v4779_v30, %v11237_v22 }
0x1bf1   :  { %v4781_v63 = vpop.permute.xlu0 %4780 }
0x1bf2   :  { %v4787_v46 = vmul.f32 %v4781_v63, %v11237_v22  ;;  %8373 = vmatprep.subr.bf16.mxu1 %v4852_v12  ;;  %8741 = vmatpush3.bf16.msra.mxu0 %v4855_v6  ;;  %v9081_v6 = vld [vmem:[#allocation31 + $0x4] ss:$8 sps:$4 sm:$0xff]   ;;  %v9084_v12 = vld [vmem:[#allocation33 + $0x4] ss:$8 sps:$4 sm:$0xff]  }
0x1bf3   :  { %v4783_v14 = vpop.permute.xlu1 %4782  ;;  %8746 = vmatprep.subr.bf16.mxu0 %v13412_v0  ;;  %v5238_v63 = vld [vmem:[%s13435_s10 + $0x8] sm:$0xff] }
0x1bf4   :  { %v4844_v8 = vpack.c.bf16 %v4787_v46, %v4786_v28  ;;  %v4788_v33 = vmul.f32 %v4783_v14, %v11237_v22 }
0x1bf5   :  { %8743 = vmatmul.mubr.msk.bf16.vlgmr.msra.gmra.mrb[80].mxu0 %vm3093_vm6, %v9075_v38  ;;  %v4785_v37 = vpop.permute.xlu0 %4784 }
0x1bf6   :  { %v4789_v58 = vmul.f32 %v4785_v37, %v11237_v22  ;;  %8374 = vmatpush3.bf16.msra.mxu1 %v4844_v8  ;;  %8747 = vmatpush3.bf16.msra.mxu0 %v9076_v35 }
0x1bf7   :  { %8375 = vmatprep.subr.bf16.mxu1 %v4853_v42  ;;  %8748 = vmatprep.subr.bf16.mxu0 %v13412_v0 }
0x1bf8   :  { %v4845_v9 = vpack.c.bf16 %v4789_v58, %v4788_v33  ;;  %8750 = vmatprep.mubr.msk.bf16.mxu0 %vm9929_vm12, %v13412_v0 }
0x1bfa   :  { %8376 = vmatpush3.bf16.msra.mxu1 %v4845_v9  ;;  %8749 = vmatpush3.bf16.msra.mxu0 %v9077_v53 }
0x1bfb   :  { %5196 = vmatprep.subr.bf16.mxu1 %v13384_v15  ;;  %5143 = vmatprep.subr.bf16.mxu0 %v13384_v15 }
0x1bfd   :  { %4907 = vmatmul.mubr.bf16.vlgmr.msra.gmra.mrb[112].mxu1 %v9078_v60  ;;  %8751 = vmatmul.mubr.msk.bf16.vlgmr.msra.gmra.mrb[84].mxu0 %vm3093_vm6, %v11483_v18 }
0x1bfe   :  { %8023 = vmatprep.mubr.msk.bf16.mxu1 %vm2555_vm15, %v9081_v6  ;;  %8020 = vmatprep.mubr.msk.bf16.mxu0 %vm2555_vm15, %v9084_v12 }
0x1cc8   :  { %v4949_v23 = vpop.f32.mrb[80].mxu0 }
0x1cc9   :  { %v8744_v27 = vpop.f32.mrb[81].mxu0 }
0x1cca   :  { %v4952_v44 = vpop.f32.mrb[82].mxu0 }
0x1ccb   :  { %v8745_v24 = vpop.f32.mrb[83].mxu0 }
0x1cd0   :  { %v8377_v13 = vpop.f32.mrb[112].mxu1  ;;  %v11808_v50 = vpop.f32.mrb[84].mxu0 }
0x1cd1   :  { %5013 = vrot.lane.b32.xlu1 %v11808_v50, %s9931_s19  ;;  %v8378_v45 = vpop.f32.mrb[113].mxu1  ;;  %v8752_v11 = vpop.f32.mrb[85].mxu0 }
0x1cd2   :  { %v8379_v29 = vadd.f32 %v8378_v45, %v8377_v13  ;;  %v8380_v32 = vpop.f32.mrb[114].mxu1  ;;  %v11812_v17 = vpop.f32.mrb[86].mxu0 }
0x1cd3   :  { %5015 = vrot.lane.b32.xlu0 %v11812_v17, %s9931_s19  ;;  %v8381_v18 = vpop.f32.mrb[115].mxu1  ;;  %v8753_v2 = vpop.f32.mrb[87].mxu0  ;;  %v5065_v1 = vpack.c.bf16 %v11812_v17, %v11808_v50 }
0x1cd4   :  { %v11818_v41 = vadd.f32 %v8379_v29, %v4949_v23  ;;  %v8382_v36 = vadd.f32 %v8381_v18, %v8380_v32 }
0x1cd5   :  { %5019 = vrot.lane.b32.xlu1 %v11808_v50, %s9898_s6 }
0x1cd6   :  { %v11822_v40 = vadd.f32 %v8382_v36, %v4952_v44 }
0x1cd7   :  { %5021 = vrot.lane.b32.xlu0 %v11812_v17, %s9898_s6 }
0x1cd8   :  { %v5122_v30 = vpack.c.bf16 %v11822_v40, %v11818_v41 }
0x1cd9   :  { %5025 = vrot.lane.b32.xlu1 %v11808_v50, %s9932_s5 }
0x1cdb   :  { %5027 = vrot.lane.b32.xlu0 %v11812_v17, %s9932_s5 }
0x1cdd   :  { %5031 = vrot.lane.b32.xlu1 %v11808_v50, %s9921_s26 }
0x1cdf   :  { %5033 = vrot.lane.b32.xlu0 %v11812_v17, %s9921_s26 }
0x1ce1   :  { %5037 = vrot.lane.b32.xlu1 %v11808_v50, %s9922_s8 }
0x1ce3   :  { %5039 = vrot.lane.b32.xlu0 %v11812_v17, %s9922_s8 }
0x1ce5   :  { %5043 = vrot.lane.b32.xlu1 %v11808_v50, %s9933_s12 }
0x1ce7   :  { %5045 = vrot.lane.b32.xlu0 %v11812_v17, %s9933_s12 }
0x1ce9   :  { %5049 = vrot.lane.b32.xlu1 %v11808_v50, %s9935_s9 }
0x1ceb   :  { %5051 = vrot.lane.b32.xlu0 %v11812_v17, %s9935_s9 }
0x1ced   :  { %5070 = vrot.lane.b32.xlu1 %v11818_v41, %s9931_s19 }
0x1cef   :  { %5072 = vrot.lane.b32.xlu0 %v11822_v40, %s9931_s19 }
0x1cf1   :  { %5076 = vrot.lane.b32.xlu1 %v11818_v41, %s9898_s6 }
0x1cf3   :  { %5078 = vrot.lane.b32.xlu0 %v11822_v40, %s9898_s6 }
0x1cf5   :  { %5082 = vrot.lane.b32.xlu1 %v11818_v41, %s9932_s5 }
0x1cf7   :  { %5084 = vrot.lane.b32.xlu0 %v11822_v40, %s9932_s5 }
0x1cf9   :  { %5088 = vrot.lane.b32.xlu1 %v11818_v41, %s9921_s26 }
0x1cfb   :  { %5090 = vrot.lane.b32.xlu0 %v11822_v40, %s9921_s26 }
0x1cfd   :  { %5055 = vrot.lane.b32.xlu1 %v11808_v50, %s9934_s15 }
0x1cff   :  { %5057 = vrot.lane.b32.xlu0 %v11812_v17, %s9934_s15 }
0x1d01   :  { %5094 = vrot.lane.b32.xlu1 %v11818_v41, %s9922_s8 }
0x1d03   :  { %5096 = vrot.lane.b32.xlu0 %v11822_v40, %s9922_s8 }
0x1d05   :  { %5100 = vrot.lane.b32.xlu1 %v11818_v41, %s9933_s12 }
0x1d07   :  { %5102 = vrot.lane.b32.xlu0 %v11822_v40, %s9933_s12 }
0x1d09   :  { %5106 = vrot.lane.b32.xlu1 %v11818_v41, %s9935_s9 }
0x1d0b   :  { %5108 = vrot.lane.b32.xlu0 %v11822_v40, %s9935_s9 }
0x1d0d   :  { %5112 = vrot.lane.b32.xlu1 %v11818_v41, %s9934_s15 }
0x1d0f   :  { %5114 = vrot.lane.b32.xlu0 %v11822_v40, %s9934_s15 }
0x1d11   :  { %5241 = vperm.xlu1 %8920, %v5237_v3  }
0x1d13   :  { %5246 = vperm.xlu0 %8919, %v5238_v63  }
0x1d43   :  { %v5014_v38 = vpop.permute.xlu1 %5013 }
0x1d44   :  { %v5017_v46 = vmul.f32 %v5014_v38, %v11228_v43 }
0x1d45   :  { %v5016_v28 = vpop.permute.xlu0 %5015 }
0x1d46   :  { %v5018_v35 = vmul.f32 %v5016_v28, %v11228_v43 }
0x1d47   :  { %v5020_v57 = vpop.permute.xlu1 %5019 }
0x1d48   :  { %v5061_v14 = vpack.c.bf16 %v5018_v35, %v5017_v46  ;;  %v5023_v42 = vmul.f32 %v5020_v57, %v11231_v20 }
0x1d49   :  { %v5022_v8 = vpop.permute.xlu0 %5021 }
0x1d4a   :  { %v5024_v37 = vmul.f32 %v5022_v8, %v11231_v20  ;;  %5197 = vmatpush1.bf16.msra.mxu1 %v5061_v14 }
0x1d4b   :  { %v5026_v33 = vpop.permute.xlu1 %5025  ;;  %5198 = vmatprep.subr.bf16.mxu1 %v13384_v15 }
0x1d4c   :  { %v5062_v58 = vpack.c.bf16 %v5024_v37, %v5023_v42  ;;  %v5029_v9 = vmul.f32 %v5026_v33, %v11234_v54 }
0x1d4d   :  { %v5028_v53 = vpop.permute.xlu0 %5027 }
0x1d4e   :  { %v5030_v60 = vmul.f32 %v5028_v53, %v11234_v54  ;;  %5199 = vmatpush1.bf16.msra.mxu1 %v5062_v58 }
0x1d4f   :  { %v5032_v23 = vpop.permute.xlu1 %5031  ;;  %5200 = vmatprep.subr.bf16.mxu1 %v13384_v15 }
0x1d50   :  { %v5063_v27 = vpack.c.bf16 %v5030_v60, %v5029_v9  ;;  %v5035_v24 = vmul.f32 %v5032_v23, %v11237_v22 }
0x1d51   :  { %v5034_v44 = vpop.permute.xlu0 %5033 }
0x1d52   :  { %v5036_v13 = vmul.f32 %v5034_v44, %v11237_v22  ;;  %5201 = vmatpush1.bf16.msra.mxu1 %v5063_v27 }
0x1d53   :  { %v5038_v45 = vpop.permute.xlu1 %5037  ;;  %5202 = vmatprep.subr.bf16.mxu1 %v13384_v15 }
0x1d54   :  { %v5064_v11 = vpack.c.bf16 %v5036_v13, %v5035_v24  ;;  %v5041_v36 = vmul.f32 %v5038_v45, %v11244_v5 }
0x1d55   :  { %v5040_v29 = vpop.permute.xlu0 %5039 }
0x1d56   :  { %5203 = vmatpush1.bf16.msra.mxu1 %v5064_v11  ;;  %v5042_v18 = vmul.f32 %v5040_v29, %v11244_v5 }
0x1d57   :  { %v5044_v32 = vpop.permute.xlu1 %5043  ;;  %5204 = vmatprep.subr.bf16.mxu1 %v13384_v15 }
0x1d58   :  { %v5066_v12 = vpack.c.bf16 %v5042_v18, %v5041_v36  ;;  %v5047_v38 = vmul.f32 %v5044_v32, %v11253_v31 }
0x1d59   :  { %v5046_v2 = vpop.permute.xlu0 %5045 }
0x1d5a   :  { %5205 = vmatpush1.bf16.msra.mxu1 %v5065_v1  ;;  %v5048_v3 = vmul.f32 %v5046_v2, %v11253_v31 }
0x1d5b   :  { %v5050_v6 = vpop.permute.xlu1 %5049  ;;  %5206 = vmatprep.subr.bf16.mxu1 %v13384_v15 }
0x1d5c   :  { %v5067_v46 = vpack.c.bf16 %v5048_v3, %v5047_v38  ;;  %v5053_v50 = vmul.f32 %v5050_v6, %v11256_v26 }
0x1d5d   :  { %v5052_v63 = vpop.permute.xlu0 %5051 }
0x1d5e   :  { %5207 = vmatpush1.bf16.msra.mxu1 %v5066_v12  ;;  %v5054_v35 = vmul.f32 %v5052_v63, %v11256_v26  ;;  %v9083_v63 = vld [vmem:[#allocation31] ss:$8 sps:$4 sm:$0xff]  }
0x1d5f   :  { %v5071_v28 = vpop.permute.xlu1 %5070  ;;  %5208 = vmatprep.subr.bf16.mxu1 %v13384_v15 }
0x1d60   :  { %v5074_v17 = vmul.f32 %v5071_v28, %v11228_v43  ;;  %v5068_v8 = vpack.c.bf16 %v5054_v35, %v5053_v50 }
0x1d61   :  { %v5073_v57 = vpop.permute.xlu0 %5072 }
0x1d62   :  { %v5075_v1 = vmul.f32 %v5073_v57, %v11228_v43  ;;  %5209 = vmatpush1.bf16.msra.mxu1 %v5067_v46 }
0x1d63   :  { %v5077_v14 = vpop.permute.xlu1 %5076  ;;  %5210 = vmatprep.subr.bf16.mxu1 %v13384_v15 }
0x1d64   :  { %v5118_v42 = vpack.c.bf16 %v5075_v1, %v5074_v17  ;;  %v5080_v33 = vmul.f32 %v5077_v14, %v11231_v20  ;;  %v9230_v1 = vld [vmem:[%s13420_s18] sm:$0xff]  }
0x1d65   :  { %v5079_v37 = vpop.permute.xlu0 %5078 }
0x1d66   :  { %v5081_v58 = vmul.f32 %v5079_v37, %v11231_v20  ;;  %5144 = vmatpush1.bf16.msra.mxu0 %v5118_v42  ;;  %5211 = vmatpush1.bf16.msra.mxu1 %v5068_v8  ;;  %v9231_v42 = vld [vmem:[%s13420_s18 + $0x8] sm:$0xff]  }
0x1d67   :  { %v5083_v53 = vpop.permute.xlu1 %5082  ;;  %5145 = vmatprep.subr.bf16.mxu0 %v13384_v15  ;;  %5212 = vmatprep.subr.bf16.mxu1 %v13384_v15 }
0x1d68   :  { %v5119_v9 = vpack.c.bf16 %v5081_v58, %v5080_v33  ;;  %v5086_v23 = vmul.f32 %v5083_v53, %v11234_v54 }
0x1d69   :  { %v5085_v60 = vpop.permute.xlu0 %5084 }
0x1d6a   :  { %v5087_v27 = vmul.f32 %v5085_v60, %v11234_v54  ;;  %5146 = vmatpush1.bf16.msra.mxu0 %v5119_v9  ;;  %v9232_v60 = vld [vmem:[%s13420_s18 + $0x10] sm:$0xff]  }
0x1d6b   :  { %v5089_v44 = vpop.permute.xlu1 %5088  ;;  %5147 = vmatprep.subr.bf16.mxu0 %v13384_v15 }
0x1d6c   :  { %v5120_v24 = vpack.c.bf16 %v5087_v27, %v5086_v23  ;;  %v5092_v45 = vmul.f32 %v5089_v44, %v11237_v22  ;;  %v9086_v27 = vld [vmem:[#allocation33] ss:$8 sps:$4 sm:$0xff]  }
0x1d6d   :  { %v5091_v13 = vpop.permute.xlu0 %5090  ;;  %v9233_v44 = vld [vmem:[%s13420_s18 + $0x18] sm:$0xff]  }
0x1d6e   :  { %v5093_v11 = vmul.f32 %v5091_v13, %v11237_v22  ;;  %5148 = vmatpush1.bf16.msra.mxu0 %v5120_v24  ;;  %v9234_v24 = vld [vmem:[%s13420_s18 + $0x20] sm:$0xff]   ;;  %v9235_v13 = vld [vmem:[%s13420_s18 + $0x28] sm:$0xff]  }
0x1d6f   :  { %v5056_v29 = vpop.permute.xlu1 %5055  ;;  %5149 = vmatprep.subr.bf16.mxu0 %v13384_v15 }
0x1d70   :  { %v5121_v32 = vpack.c.bf16 %v5093_v11, %v5092_v45  ;;  %v5059_v2 = vmul.f32 %v11781_v51, %v5056_v29  ;;  %v9236_v45 = vld [vmem:[%s13420_s18 + $0x30] sm:$0xff]   ;;  %v9237_v11 = vld [vmem:[%s13420_s18 + $0x38] sm:$0xff]  }
0x1d71   :  { %v5058_v18 = vpop.permute.xlu0 %5057 }
0x1d72   :  { %v5060_v36 = vmul.f32 %v11781_v51, %v5058_v18  ;;  %5150 = vmatpush1.bf16.msra.mxu0 %v5121_v32 }
0x1d73   :  { %v5095_v6 = vpop.permute.xlu1 %5094  ;;  %5151 = vmatprep.subr.bf16.mxu0 %v13384_v15 }
0x1d74   :  { %v5069_v12 = vpack.c.bf16 %v5060_v36, %v5059_v2  ;;  %v5098_v38 = vmul.f32 %v5095_v6, %v11244_v5 }
0x1d75   :  { %v5097_v3 = vpop.permute.xlu0 %5096 }
0x1d76   :  { %v5099_v28 = vmul.f32 %v5097_v3, %v11244_v5  ;;  %5152 = vmatpush1.bf16.msra.mxu0 %v5122_v30  ;;  %5213 = vmatpush1.bf16.msra.mxu1 %v5069_v12 }
0x1d77   :  { %v5101_v46 = vpop.permute.xlu1 %5100  ;;  %5153 = vmatprep.subr.bf16.mxu0 %v13384_v15  ;;  %8754 = vmatprep.subr.bf16.mxu1 %v13412_v0 }
0x1d78   :  { %v5123_v35 = vpack.c.bf16 %v5099_v28, %v5098_v38  ;;  %v5104_v50 = vmul.f32 %v5101_v46, %v11253_v31 }
0x1d79   :  { %v5103_v57 = vpop.permute.xlu0 %5102  ;;  %5229 = vmatmul.mubr.bf16.vlgmr.msra.gmra.mrb[116].mxu1 %v9083_v63 }
0x1d7a   :  { %v5105_v17 = vmul.f32 %v5103_v57, %v11253_v31  ;;  %5154 = vmatpush1.bf16.msra.mxu0 %v5123_v35  ;;  %8755 = vmatpush3.bf16.msra.mxu1 %v9230_v1 }
0x1d7b   :  { %v5107_v14 = vpop.permute.xlu1 %5106  ;;  %5155 = vmatprep.subr.bf16.mxu0 %v13384_v15  ;;  %8756 = vmatprep.subr.bf16.mxu1 %v13412_v0 }
0x1d7c   :  { %v5124_v41 = vpack.c.bf16 %v5105_v17, %v5104_v50  ;;  %8770 = vmatprep.mubr.msk.bf16.mxu1 %vm9929_vm12, %v13412_v0  ;;  %v5110_v30 = vmul.f32 %v5107_v14, %v11256_v26  ;;  %v9087_v14 = vld [vmem:[#allocation34 + $0x4] ss:$8 sps:$4 sm:$0xff]  }
0x1d7d   :  { %v5109_v40 = vpop.permute.xlu0 %5108 }
0x1d7e   :  { %v5111_v8 = vmul.f32 %v5109_v40, %v11256_v26  ;;  %5156 = vmatpush1.bf16.msra.mxu0 %v5124_v41  ;;  %8757 = vmatpush3.bf16.msra.mxu1 %v9231_v42  ;;  %v5312_v41 = vld [vmem:[%s13436_s14] sm:$0xff]  ;;  %v5313_v40 = vld [vmem:[%s13436_s14 + $0x8] sm:$0xff] }
0x1d7f   :  { %v5113_v37 = vpop.permute.xlu1 %5112  ;;  %5157 = vmatprep.subr.bf16.mxu0 %v13384_v15  ;;  %8758 = vmatprep.subr.bf16.mxu1 %v13412_v0  ;;  %v5477_v42 = vld [vmem:[%s13438_s23 + $0x8] sm:$0xff] }
0x1d80   :  { %v5125_v33 = vpack.c.bf16 %v5111_v8, %v5110_v30  ;;  %v5116_v53 = vmul.f32 %v11781_v51, %v5113_v37  ;;  %v5476_v8 = vld [vmem:[%s13438_s23] sm:$0xff] }
0x1d81   :  { %v5115_v58 = vpop.permute.xlu0 %5114 }
0x1d82   :  { %v5117_v9 = vmul.f32 %v11781_v51, %v5115_v58  ;;  %5158 = vmatpush1.bf16.msra.mxu0 %v5125_v33  ;;  %8759 = vmatpush3.bf16.msra.mxu1 %v9232_v60 }
0x1d83   :  { %5159 = vmatprep.subr.bf16.mxu0 %v13384_v15  ;;  %8760 = vmatprep.subr.bf16.mxu1 %v13412_v0 }
0x1d84   :  { %v5126_v23 = vpack.c.bf16 %v5117_v9, %v5116_v53 }
0x1d86   :  { %5160 = vmatpush1.bf16.msra.mxu0 %v5126_v23  ;;  %8761 = vmatpush3.bf16.msra.mxu1 %v9233_v44 }
0x1d87   :  { %5336 = vmatprep.subr.bf16.mxu0 %v13384_v15  ;;  %8762 = vmatprep.subr.bf16.mxu1 %v13412_v0 }
0x1d89   :  { %5176 = vmatmul.mubr.bf16.vlgmr.msra.gmra.mrb[88].mxu0 %v9086_v27 }
0x1d8a   :  { %8763 = vmatpush3.bf16.msra.mxu1 %v9234_v24  ;;  %8026 = vmatprep.mubr.msk.bf16.mxu0 %vm2555_vm15, %v9087_v14 }
0x1d8b   :  { %8764 = vmatprep.subr.bf16.mxu1 %v13412_v0 }
0x1d8e   :  { %8765 = vmatpush3.bf16.msra.mxu1 %v9235_v13 }
0x1d8f   :  { %8766 = vmatprep.subr.bf16.mxu1 %v13412_v0 }
0x1d90   :  { %v5242_v3 = vpop.permute.xlu1 %5241 }
0x1d92   :  { %8767 = vmatpush3.bf16.msra.mxu1 %v9236_v45  ;;  %v5247_v35 = vpop.permute.xlu0 %5246 }
0x1d93   :  { %8768 = vmatprep.subr.bf16.mxu1 %v13412_v0 }
0x1d96   :  { %8769 = vmatpush3.bf16.msra.mxu1 %v9237_v11 }
0x1d97   :  { %8780 = vmatprep.subr.bf16.mxu1 %v13412_v0 }
0x1e4c   :  { %v5230_v29 = vpop.f32.mrb[116].mxu1 }
0x1e4d   :  { %v5232_v32 = vpop.f32.mrb[117].mxu1 }
0x1e4e   :  { %v5233_v18 = vpop.f32.mrb[118].mxu1 }
0x1e4f   :  { %v5235_v2 = vpop.f32.mrb[119].mxu1 }
0x1e5c   :  { %v5177_v36 = vpop.f32.mrb[88].mxu0 }
0x1e5d   :  { %v5231_v6 = vadd.f32 %v5230_v29, %v5177_v36  ;;  %v5179_v12 = vpop.f32.mrb[89].mxu0 }
0x1e5e   :  { %v5180_v63 = vpop.f32.mrb[90].mxu0 }
0x1e5f   :  { %v5249_v38 = vadd.f32 %v5242_v3, %v5231_v6  ;;  %v5234_v28 = vadd.f32 %v5233_v18, %v5180_v63  ;;  %v5182_v46 = vpop.f32.mrb[91].mxu0 }
0x1e61   :  { %v11962_v57 = vmax.f32 %v5249_v38, 0.0  ;;  %v5250_v50 = vadd.f32 %v5247_v35, %v5234_v28 }
0x1e63   :  { %v11964_v17 = vmax.f32 %v5250_v50, 0.0  ;;  %5255 = vrot.lane.b32.xlu1 %v11962_v57, %s9931_s19 }
0x1e65   :  { %5257 = vrot.lane.b32.xlu0 %v11964_v17, %s9931_s19  ;;  %v5307_v1 = vpack.c.bf16 %v11964_v17, %v11962_v57  ;;  %s13437_s19 = sld [smem:[#allocation94_spill]] }
0x1e67   :  { %5261 = vrot.lane.b32.xlu1 %v11962_v57, %s9898_s6 }
0x1e69   :  { %5263 = vrot.lane.b32.xlu0 %v11964_v17, %s9898_s6  ;;  %s13439_s6 = sld [smem:[#allocation97_spill]] }
0x1e6b   :  { %5267 = vrot.lane.b32.xlu1 %v11962_v57, %s9932_s5  ;;  %v5423_v30 = vld [vmem:[%s13437_s19] sm:$0xf] }
0x1e6d   :  { %5269 = vrot.lane.b32.xlu0 %v11964_v17, %s9932_s5  ;;  %s13440_s5 = sld [smem:[#allocation62_spill]] }
0x1e6f   :  { %5273 = vrot.lane.b32.xlu1 %v11962_v57, %s9921_s26 }
0x1e71   :  { %5275 = vrot.lane.b32.xlu0 %v11964_v17, %s9921_s26 }
0x1e73   :  { %5279 = vrot.lane.b32.xlu1 %v11962_v57, %s9922_s8 }
0x1e75   :  { %5281 = vrot.lane.b32.xlu0 %v11964_v17, %s9922_s8 }
0x1e77   :  { %5285 = vrot.lane.b32.xlu1 %v11962_v57, %s9933_s12 }
0x1e79   :  { %5287 = vrot.lane.b32.xlu0 %v11964_v17, %s9933_s12  ;;  %s13474_s12 = sld [smem:[#allocation58_spill]] }
0x1e7b   :  { %5291 = vrot.lane.b32.xlu1 %v11962_v57, %s9935_s9 }
0x1e7d   :  { %5293 = vrot.lane.b32.xlu0 %v11964_v17, %s9935_s9 }
0x1e7f   :  { %5297 = vrot.lane.b32.xlu1 %v11962_v57, %s9934_s15 }
0x1e81   :  { %5299 = vrot.lane.b32.xlu0 %v11964_v17, %s9934_s15  ;;  %s13489_s15 = sld [smem:[#allocation85_spill]] }
0x1e83   :  { %5316 = vperm.xlu1 %8920, %v5312_v41  }
0x1e85   :  { %5321 = vperm.xlu0 %8919, %v5313_v40  }
0x1e87   :  { %5426 = vperm.xlu1 %8920, %v5423_v30  }
0x1e89   :  { %5480 = vperm.xlu0 %8919, %v5476_v8   ;;  %v9089_v8 = vld [vmem:[#allocation34] ss:$8 sps:$4 sm:$0xff]  }
0x1e8b   :  { %5485 = vperm.xlu1 %8920, %v5477_v42  }
0x1ed5   :  { %v5256_v37 = vpop.permute.xlu1 %5255 }
0x1ed6   :  { %v5259_v58 = vmul.f32 %v5256_v37, %v11228_v43 }
0x1ed7   :  { %v5258_v33 = vpop.permute.xlu0 %5257 }
0x1ed8   :  { %v5260_v53 = vmul.f32 %v5258_v33, %v11228_v43 }
0x1ed9   :  { %v5262_v9 = vpop.permute.xlu1 %5261 }
0x1eda   :  { %v5303_v60 = vpack.c.bf16 %v5260_v53, %v5259_v58  ;;  %v5265_v27 = vmul.f32 %v5262_v9, %v11231_v20 }
0x1edb   :  { %v5264_v23 = vpop.permute.xlu0 %5263 }
0x1edc   :  { %v5266_v44 = vmul.f32 %v5264_v23, %v11231_v20  ;;  %5337 = vmatpush1.bf16.msra.mxu0 %v5303_v60 }
0x1edd   :  { %v5268_v24 = vpop.permute.xlu1 %5267  ;;  %5338 = vmatprep.subr.bf16.mxu0 %v13384_v15 }
0x1ede   :  { %v5304_v13 = vpack.c.bf16 %v5266_v44, %v5265_v27  ;;  %v5271_v11 = vmul.f32 %v5268_v24, %v11234_v54 }
0x1edf   :  { %v5270_v45 = vpop.permute.xlu0 %5269 }
0x1ee0   :  { %v5272_v29 = vmul.f32 %v5270_v45, %v11234_v54  ;;  %5339 = vmatpush1.bf16.msra.mxu0 %v5304_v13 }
0x1ee1   :  { %v5274_v32 = vpop.permute.xlu1 %5273  ;;  %5340 = vmatprep.subr.bf16.mxu0 %v13384_v15 }
0x1ee2   :  { %v5305_v43 = vpack.c.bf16 %v5272_v29, %v5271_v11  ;;  %v5277_v2 = vmul.f32 %v5274_v32, %v11237_v22  ;;  %v5421_v29 = vld [vmem:[#allocation30] sm:$0x3] }
0x1ee3   :  { %v5276_v18 = vpop.permute.xlu0 %5275 }
0x1ee4   :  { %v5278_v20 = vmul.f32 %v5276_v18, %v11237_v22  ;;  %5341 = vmatpush1.bf16.msra.mxu0 %v5305_v43 }
0x1ee5   :  { %v5280_v36 = vpop.permute.xlu1 %5279  ;;  %5342 = vmatprep.subr.bf16.mxu0 %v13384_v15 }
0x1ee6   :  { %v5306_v6 = vpack.c.bf16 %v5278_v20, %v5277_v2  ;;  %v5283_v38 = vmul.f32 %v5280_v36, %v11244_v5 }
0x1ee7   :  { %v5282_v12 = vpop.permute.xlu0 %5281 }
0x1ee8   :  { %5343 = vmatpush1.bf16.msra.mxu0 %v5306_v6  ;;  %v5284_v54 = vmul.f32 %v5282_v12, %v11244_v5 }
0x1ee9   :  { %v5286_v3 = vpop.permute.xlu1 %5285  ;;  %5344 = vmatprep.subr.bf16.mxu0 %v13384_v15 }
0x1eea   :  { %v5308_v28 = vpack.c.bf16 %v5284_v54, %v5283_v38  ;;  %v5289_v57 = vmul.f32 %v5286_v3, %v11253_v31  ;;  %v9091_v54 = vld [vmem:[%s13440_s5] ss:$16 sps:$4 sm:$0xff]   ;;  %v9096_v38 = vld [vmem:[%s13440_s5 + $0xc] ss:$16 sps:$4 sm:$0xff]  }
0x1eeb   :  { %v5288_v63 = vpop.permute.xlu0 %5287 }
0x1eec   :  { %5345 = vmatpush1.bf16.msra.mxu0 %v5307_v1  ;;  %v5290_v22 = vmul.f32 %v5288_v63, %v11253_v31  ;;  %v9093_v63 = vld [vmem:[%s13440_s5 + $0x4] ss:$16 sps:$4 sm:$0xff]  }
0x1eed   :  { %5346 = vmatprep.subr.bf16.mxu0 %v13384_v15  ;;  %v5292_v46 = vpop.permute.xlu1 %5291 }
0x1eee   :  { %v5309_v50 = vpack.c.bf16 %v5290_v22, %v5289_v57  ;;  %v5295_v41 = vmul.f32 %v5292_v46, %v11256_v26  ;;  %v9097_v22 = vld [vmem:[%s13440_s5 + $0x20] ss:$16 sps:$4 sm:$0xff]   ;;  %v9105_v46 = vld [vmem:[%s13440_s5 + $0x44] ss:$16 sps:$4 sm:$0xff]  }
0x1eef   :  { %v5294_v35 = vpop.permute.xlu0 %5293  ;;  %v9111_v57 = vld [vmem:[%s13440_s5 + $0x64] ss:$16 sps:$4 sm:$0xff]  }
0x1ef0   :  { %5347 = vmatpush1.bf16.msra.mxu0 %v5308_v28  ;;  %v5296_v17 = vmul.f32 %v5294_v35, %v11256_v26  ;;  %v9099_v28 = vld [vmem:[%s13440_s5 + $0x24] ss:$16 sps:$4 sm:$0xff]   ;;  %v9103_v35 = vld [vmem:[%s13440_s5 + $0x40] ss:$16 sps:$4 sm:$0xff]  }
0x1ef1   :  { %5348 = vmatprep.subr.bf16.mxu0 %v13384_v15  ;;  %v5298_v5 = vpop.permute.xlu1 %5297 }
0x1ef2   :  { %v5310_v1 = vpack.c.bf16 %v5296_v17, %v5295_v41  ;;  %v5301_v30 = vmul.f32 %v11781_v51, %v5298_v5  ;;  %v9117_v17 = vld [vmem:[%s13440_s5 + $0x84] ss:$16 sps:$4 sm:$0xff]   ;;  %v9121_v5 = vld [vmem:[%s13440_s5 + $0xa0] ss:$16 sps:$4 sm:$0xff]  }
0x1ef3   :  { %v5300_v14 = vpop.permute.xlu0 %5299  ;;  %v9123_v41 = vld [vmem:[%s13440_s5 + $0xa4] ss:$16 sps:$4 sm:$0xff]  }
0x1ef4   :  { %5349 = vmatpush1.bf16.msra.mxu0 %v5309_v50  ;;  %v5302_v40 = vmul.f32 %v11781_v51, %v5300_v14  ;;  %v9109_v50 = vld [vmem:[%s13440_s5 + $0x60] ss:$16 sps:$4 sm:$0xff]  }
0x1ef5   :  { %5350 = vmatprep.subr.bf16.mxu0 %v13384_v15  ;;  %v9115_v14 = vld [vmem:[%s13440_s5 + $0x80] ss:$16 sps:$4 sm:$0xff]  }
0x1ef6   :  { %v5311_v31 = vpack.c.bf16 %v5302_v40, %v5301_v30  ;;  %v9127_v40 = vld [vmem:[%s13440_s5 + $0xc0] ss:$16 sps:$4 sm:$0xff]  }
0x1ef8   :  { %5351 = vmatpush1.bf16.msra.mxu0 %v5310_v1  ;;  %v9129_v1 = vld [vmem:[%s13440_s5 + $0xc4] ss:$16 sps:$4 sm:$0xff]  }
0x1ef9   :  { %5352 = vmatprep.subr.bf16.mxu0 %v13384_v15 }
0x1efc   :  { %5353 = vmatpush1.bf16.msra.mxu0 %v5311_v31 }
0x1efd   :  { %8774 = vmatprep.subr.bf16.mxu0 %v13412_v0 }
0x1eff   :  { %5369 = vmatmul.mubr.bf16.vlgmr.msra.gmra.mrb[92].mxu0 %v9089_v8 }
0x1f00   :  { %8776 = vmatprep.mubr.msk.bf16.mxu0 %vm9929_vm12, %v13412_v0 }
0x1f02   :  { %v5317_v26 = vpop.permute.xlu1 %5316 }
0x1f04   :  { %v5322_v58 = vpop.permute.xlu0 %5321 }
0x1f06   :  { %v5427_v32 = vpop.permute.xlu1 %5426 }
0x1f08   :  { %v5481_v30 = vpop.permute.xlu0 %5480 }
0x1fd2   :  { %v5370_v42 = vpop.f32.mrb[92].mxu0 }
0x1fd3   :  { %v12033_v37 = vadd.f32 %v5370_v42, %v5317_v26  ;;  %v5372_v33 = vpop.f32.mrb[93].mxu0  ;;  %v5486_v42 = vpop.permute.xlu1 %5485 }
0x1fd4   :  { %v5373_v53 = vpop.f32.mrb[94].mxu0 }
0x1fd5   :  { %v12035_v51 = vadd.f32 %v5373_v53, %v5322_v58  ;;  %v5375_v9 = vpop.f32.mrb[95].mxu0  ;;  %v5377_v60 = vmax.f32 %v12033_v37, 0.0 }
0x1fd7   :  { %v5378_v23 = vmax.f32 %v12035_v51, 0.0 }
0x1fd9   :  { %v5379_v27 = vpack.c.bf16 %v5378_v23, %v5377_v60 }
0x1fdb   :  { %8771 = vmatmul.mubr.bf16.vlgmr.msra.gmra.mrb[120].mxu1 %v5379_v27 }
0x1fdc   :  { %8782 = vmatprep.mubr.msk.bf16.mxu1 %vm9929_vm12, %v13412_v0 }
0x20ae   :  { %v5414_v44 = vpop.f32.mrb[120].mxu1 }
0x20af   :  { %v8772_v24 = vpop.f32.mrb[121].mxu1 }
0x20b0   :  { %v5417_v13 = vpop.f32.mrb[122].mxu1 }
0x20b1   :  { %v5422_v45 = vpack.c.bf16 %v5417_v13, %v5414_v44  ;;  %v8773_v11 = vpop.f32.mrb[123].mxu1 }
0x20b3   :  { %8775 = vmatpush3.bf16.msra.mxu0 %v5422_v45 }
0x20b4   :  { %8786 = vmatprep.subr.bf16.mxu0 %v13412_v0 }
0x20b6   :  { %8777 = vmatmul.mubr.msk.bf16.vlgmr.msra.gmra.mrb[96].mxu0 %vm2555_vm15, %v5421_v29 }
0x20b7   :  { %8787 = vmatpush3.bf16.msra.mxu0 %v11413_v4  ;;  %8788 = vmatprep.mubr.msk.bf16.mxu0 %vm9929_vm12, %v13412_v0  ;;  %v9090_v4 = vld [vmem:[%s13439_s6] sm:$0xff]  }
0x20b8   :  { %5835 = vmatprep.subr.bf16.mxu0 %v9096_v38  ;;  %v9126_v38 = vld [vmem:[%s13440_s5 + $0xac] ss:$16 sps:$4 sm:$0xff]  }
0x2189   :  { %v5466_v43 = vpop.f32.mrb[96].mxu0 }
0x218a   :  { %v5467_v18 = vadd.f32 %v5466_v43, %v5427_v32  ;;  %v8778_v2 = vpop.f32.mrb[97].mxu0 }
0x218b   :  { %v5469_v20 = vpop.f32.mrb[98].mxu0 }
0x218c   :  { %v5472_v36 = vmax.f32 %v5467_v18, 0.0  ;;  %v8779_v6 = vpop.f32.mrb[99].mxu0  ;;  %v9094_v18 = vld [vmem:[%s13440_s5 + $0x8] ss:$16 sps:$4 sm:$0xff]   ;;  %v9102_v20 = vld [vmem:[%s13440_s5 + $0x2c] ss:$16 sps:$4 sm:$0xff]  }
0x218d   :  { %v9108_v6 = vld [vmem:[%s13440_s5 + $0x4c] ss:$16 sps:$4 sm:$0xff]  }
0x218e   :  { %v5475_v12 = vpack.c.bf16 %v5472_v36, %v5472_v36  ;;  %v9100_v36 = vld [vmem:[%s13440_s5 + $0x28] ss:$16 sps:$4 sm:$0xff]  }
0x2190   :  { %v5497_v3 = vsel %vm857_vm5, %v5475_v12, 0  ;;  %v9106_v12 = vld [vmem:[%s13440_s5 + $0x48] ss:$16 sps:$4 sm:$0xff]   ;;  %vm13471_vm5 = vcmp.lt.s32.totalorder %v10507_v25, 111 }
0x2191   :  { %8781 = vmatpush3.bf16.msra.mxu1 %v5497_v3  ;;  %v9114_v3 = vld [vmem:[%s13440_s5 + $0x6c] ss:$16 sps:$4 sm:$0xff]   ;;  %vm13476_vm6 = vmmov %vm13471_vm5 }
0x2192   :  { %5792 = vmatprep.subr.bf16.mxu1 %v9093_v63  ;;  %v9118_v63 = vld [vmem:[%s13440_s5 + $0x88] ss:$16 sps:$4 sm:$0xff]  }
0x2194   :  { %8783 = vmatmul.mubr.msk.bf16.vlgmr.msra.gmra.mrb[124].mxu1 %vm2780_vm11, %v9090_v4  ;;  %v9112_v4 = vld [vmem:[%s13440_s5 + $0x68] ss:$16 sps:$4 sm:$0xff]   ;;  %vm13473_vm11 = vmmov %vm13471_vm5 }
0x2195   :  { %5824 = vmatprep.mubr.bf16.mxu1 %v13384_v15  ;;  %5793 = vmatpush1.bf16.msra.mxu1 %v9091_v54  ;;  %v9120_v54 = vld [vmem:[%s13440_s5 + $0x8c] ss:$16 sps:$4 sm:$0xff]  }
0x2196   :  { %5794 = vmatprep.subr.bf16.mxu1 %v9099_v28  ;;  %v9124_v28 = vld [vmem:[%s13440_s5 + $0xa8] ss:$16 sps:$4 sm:$0xff]  }
0x2199   :  { %5795 = vmatpush1.bf16.msra.mxu1 %v9097_v22  ;;  %v9132_v22 = vld [vmem:[%s13440_s5 + $0xcc] ss:$16 sps:$4 sm:$0xff]  }
0x219a   :  { %5796 = vmatprep.subr.bf16.mxu1 %v9105_v46  ;;  %v9130_v46 = vld [vmem:[%s13440_s5 + $0xc8] ss:$16 sps:$4 sm:$0xff]  }
0x219d   :  { %5797 = vmatpush1.bf16.msra.mxu1 %v9103_v35  ;;  %v9135_v35 = vld [vmem:[%s13440_s5 + $0xe4] ss:$16 sps:$4 sm:$0xff]  }
0x219e   :  { %5798 = vmatprep.subr.bf16.mxu1 %v9111_v57  ;;  %v9138_v57 = vld [vmem:[%s13440_s5 + $0xec] ss:$16 sps:$4 sm:$0xff]  }
0x21a1   :  { %5799 = vmatpush1.bf16.msra.mxu1 %v9109_v50  ;;  %v9133_v50 = vld [vmem:[%s13440_s5 + $0xe0] ss:$16 sps:$4 sm:$0xff]  }
0x21a2   :  { %5800 = vmatprep.subr.bf16.mxu1 %v9117_v17  ;;  %v9136_v17 = vld [vmem:[%s13440_s5 + $0xe8] ss:$16 sps:$4 sm:$0xff]  }
0x21a5   :  { %5801 = vmatpush1.bf16.msra.mxu1 %v9115_v14 }
0x21a6   :  { %5802 = vmatprep.subr.bf16.mxu1 %v9123_v41 }
0x21a9   :  { %5803 = vmatpush1.bf16.msra.mxu1 %v9121_v5 }
0x21aa   :  { %5804 = vmatprep.subr.bf16.mxu1 %v9129_v1 }
0x21ad   :  { %5805 = vmatpush1.bf16.msra.mxu1 %v9127_v40 }
0x21ae   :  { %5806 = vmatprep.subr.bf16.mxu1 %v9135_v35 }
0x21b1   :  { %5807 = vmatpush1.bf16.msra.mxu1 %v9133_v50 }
0x2267   :  { %v5533_v31 = vpop.f32.mrb[124].mxu1 }
0x2268   :  { %v5534_v8 = vadd.f32 %v5533_v31, %v5481_v30  ;;  %v8784_v26 = vpop.f32.mrb[125].mxu1 }
0x2269   :  { %v5536_v33 = vpop.f32.mrb[126].mxu1 }
0x226a   :  { %v5540_v58 = vsub.f32 0.0, %v5534_v8  ;;  %v5537_v53 = vadd.f32 %v5536_v33, %v5486_v42  ;;  %v8785_v9 = vpop.f32.mrb[127].mxu1 }
0x226c   :  { %v5542_v27 = vmul.f32 1.442695, %v5540_v58  ;;  %v5541_v44 = vsub.f32 0.0, %v5537_v53 }
0x226e   :  { %9217 = vpow2.f32 %v5542_v27  ;;  %v5544_v24 = vmul.f32 1.442695, %v5541_v44 }
0x2270   :  { %9219 = vpow2.f32 %v5544_v24  ;;  %v12232_v24 = vld [vmem:[#allocation36] sm:$0xff] }
0x2271   :  { %13441 = vst [vmem:[#allocation122_spill] sm:$0xff] %v12232_v24 }
0x2278   :  { %v9218_v13 = vpop.eup %9217 }
0x2279   :  { %v5546_v45 = vadd.f32 1.0, %v9218_v13 }
0x227a   :  { %v9220_v11 = vpop.eup %9219 }
0x227b   :  { %v5547_v29 = vadd.f32 1.0, %v9220_v11  ;;  %9221 = vrcp.f32 %v5546_v45  ;;  %v8064_v45 = vcombine.high %v12232_v24, %v12232_v24 }
0x227d   :  { %9223 = vrcp.f32 %v5547_v29 }
0x2285   :  { %v9222_v32 = vpop.eup %9221 }
0x2287   :  { %v9224_v43 = vpop.eup %9223 }
0x2288   :  { %v5552_v2 = vpack.c.bf16 %v9224_v43, %v9222_v32 }
0x228a   :  { %8789 = vmatmul.mubr.msk.bf16.vlgmr.msra.gmra.mrb[100].mxu0 %vm1791_vm14, %v5552_v2 }
0x228b   :  { %5836 = vmatpush1.bf16.msra.mxu0 %v9094_v18  ;;  %5867 = vmatprep.mubr.bf16.mxu0 %v13384_v15 }
0x228c   :  { %5837 = vmatprep.subr.bf16.mxu0 %v9102_v20 }
0x228f   :  { %5838 = vmatpush1.bf16.msra.mxu0 %v9100_v36 }
0x2290   :  { %5839 = vmatprep.subr.bf16.mxu0 %v9108_v6 }
0x2293   :  { %5840 = vmatpush1.bf16.msra.mxu0 %v9106_v12 }
0x2294   :  { %5841 = vmatprep.subr.bf16.mxu0 %v9114_v3 }
0x2297   :  { %5842 = vmatpush1.bf16.msra.mxu0 %v9112_v4 }
0x2298   :  { %5843 = vmatprep.subr.bf16.mxu0 %v9120_v54 }
0x229b   :  { %5844 = vmatpush1.bf16.msra.mxu0 %v9118_v63 }
0x229c   :  { %5845 = vmatprep.subr.bf16.mxu0 %v9126_v38 }
0x229f   :  { %5846 = vmatpush1.bf16.msra.mxu0 %v9124_v28 }
0x22a0   :  { %5847 = vmatprep.subr.bf16.mxu0 %v9132_v22 }
0x22a3   :  { %5848 = vmatpush1.bf16.msra.mxu0 %v9130_v46 }
0x22a4   :  { %5849 = vmatprep.subr.bf16.mxu0 %v9138_v57 }
0x22a7   :  { %5850 = vmatpush1.bf16.msra.mxu0 %v9136_v17 }
0x235d   :  { %v5590_v14 = vpop.f32.mrb[100].mxu0 }
0x235e   :  { %v8790_v41 = vpop.f32.mrb[101].mxu0  ;;  %v5597_v1 = vmul.f32 %v5590_v14, %v5377_v60 }
0x235f   :  { %v5593_v5 = vpop.f32.mrb[102].mxu0 }
0x2360   :  { %v5598_v40 = vmul.f32 %v5593_v5, %v5378_v23  ;;  %v8791_v30 = vpop.f32.mrb[103].mxu0 }
0x2362   :  { %v5599_v31 = vpack.c.bf16 %v5598_v40, %v5597_v1 }
0x2364   :  { %5825 = vmatmul.mubr.bf16.vlgmr.msra.gmra.mrb[128].mxu1 %v5599_v31  ;;  %5868 = vmatmul.mubr.bf16.vlgmr.msra.gmra.mrb[104].mxu0 %v5599_v31 }
0x2365   :  { %8065 = vmatprep.mubr.msk.bf16.mxu1 %vm2555_vm15, %v8064_v45  ;;  %8066 = vmatprep.mubr.msk.bf16.mxu0 %vm2555_vm15, %v8064_v45  ;;  %vm13478_vm15 = vmmov %vm13471_vm5 }
0x2437   :  { %v12092_v8 = vpop.f32.mrb[128].mxu1  ;;  %v12094_v26 = vpop.f32.mrb[104].mxu0 }
0x2438   :  { %v12096_v42 = vpop.f32.mrb[105].mxu0  ;;  %5879 = vrot.lane.b32.xlu0 %v12092_v8, %s9920_s20  ;;  %v12100_v33 = vpop.f32.mrb[129].mxu1 }
0x2439   :  { %v12102_v37 = vpop.f32.mrb[130].mxu1  ;;  %v12104_v60 = vpop.f32.mrb[106].mxu0 }
0x243a   :  { %v12106_v51 = vpop.f32.mrb[107].mxu0  ;;  %5881 = vrot.lane.b32.xlu1 %v12102_v37, %s9920_s20  ;;  %v12110_v23 = vpop.f32.mrb[131].mxu1 }
0x243c   :  { %5887 = vrot.lane.b32.xlu0 %v12094_v26, %s9920_s20 }
0x243e   :  { %5889 = vrot.lane.b32.xlu1 %v12104_v60, %s9920_s20 }
0x2440   :  { %5911 = vrot.lane.b32.xlu0 %v12092_v8, %s9918_s21 }
0x2442   :  { %5913 = vrot.lane.b32.xlu1 %v12102_v37, %s9918_s21 }
0x2444   :  { %5919 = vrot.lane.b32.xlu0 %v12094_v26, %s9918_s21 }
0x2446   :  { %5921 = vrot.lane.b32.xlu1 %v12104_v60, %s9918_s21 }
0x2448   :  { %5943 = vrot.lane.b32.xlu0 %v12092_v8, %s9919_s29 }
0x244a   :  { %5945 = vrot.lane.b32.xlu1 %v12102_v37, %s9919_s29 }
0x244c   :  { %5951 = vrot.lane.b32.xlu0 %v12094_v26, %s9919_s29 }
0x244e   :  { %5953 = vrot.lane.b32.xlu1 %v12104_v60, %s9919_s29 }
0x2450   :  { %5975 = vrot.lane.b32.xlu0 %v12092_v8, %s9921_s26 }
0x2452   :  { %5977 = vrot.lane.b32.xlu1 %v12102_v37, %s9921_s26 }
0x2454   :  { %5983 = vrot.lane.b32.xlu0 %v12094_v26, %s9921_s26 }
0x2456   :  { %5985 = vrot.lane.b32.xlu1 %v12104_v60, %s9921_s26 }
0x2458   :  { %6007 = vrot.lane.b32.xlu0 %v12092_v8, %s9922_s8 }
0x245a   :  { %6009 = vrot.lane.b32.xlu1 %v12102_v37, %s9922_s8 }
0x245c   :  { %6015 = vrot.lane.b32.xlu0 %v12094_v26, %s9922_s8 }
0x245e   :  { %6017 = vrot.lane.b32.xlu1 %v12104_v60, %s9922_s8 }
0x2460   :  { %6039 = vrot.lane.b32.xlu0 %v12092_v8, %s9923_s13 }
0x2462   :  { %6041 = vrot.lane.b32.xlu1 %v12102_v37, %s9923_s13 }
0x2464   :  { %6047 = vrot.lane.b32.xlu0 %v12094_v26, %s9923_s13 }
0x2466   :  { %6049 = vrot.lane.b32.xlu1 %v12104_v60, %s9923_s13 }
0x2468   :  { %6071 = vrot.lane.b32.xlu0 %v12092_v8, %s9924_s30 }
0x246a   :  { %6073 = vrot.lane.b32.xlu1 %v12102_v37, %s9924_s30 }
0x246c   :  { %6079 = vrot.lane.b32.xlu0 %v12094_v26, %s9924_s30 }
0x246e   :  { %6081 = vrot.lane.b32.xlu1 %v12104_v60, %s9924_s30 }
0x2470   :  { %6103 = vrot.lane.b32.xlu0 %v12092_v8, %s9925_s11 }
0x2472   :  { %6105 = vrot.lane.b32.xlu1 %v12102_v37, %s9925_s11 }
0x2474   :  { %6111 = vrot.lane.b32.xlu0 %v12094_v26, %s9925_s11 }
0x2476   :  { %6113 = vrot.lane.b32.xlu1 %v12104_v60, %s9925_s11 }
0x2478   :  { %5883 = vrot.lane.b32.xlu0 %v12100_v33, %s9920_s20 }
0x247a   :  { %5885 = vrot.lane.b32.xlu1 %v12110_v23, %s9920_s20 }
0x247c   :  { %5891 = vrot.lane.b32.xlu0 %v12096_v42, %s9920_s20 }
0x247e   :  { %5893 = vrot.lane.b32.xlu1 %v12106_v51, %s9920_s20 }
0x2480   :  { %5915 = vrot.lane.b32.xlu0 %v12100_v33, %s9918_s21 }
0x2482   :  { %5917 = vrot.lane.b32.xlu1 %v12110_v23, %s9918_s21 }
0x2484   :  { %5923 = vrot.lane.b32.xlu0 %v12096_v42, %s9918_s21 }
0x2486   :  { %5925 = vrot.lane.b32.xlu1 %v12106_v51, %s9918_s21 }
0x2488   :  { %5947 = vrot.lane.b32.xlu0 %v12100_v33, %s9919_s29 }
0x248a   :  { %5949 = vrot.lane.b32.xlu1 %v12110_v23, %s9919_s29 }
0x248c   :  { %5955 = vrot.lane.b32.xlu0 %v12096_v42, %s9919_s29 }
0x248e   :  { %5957 = vrot.lane.b32.xlu1 %v12106_v51, %s9919_s29 }
0x2490   :  { %5979 = vrot.lane.b32.xlu0 %v12100_v33, %s9921_s26 }
0x2492   :  { %5981 = vrot.lane.b32.xlu1 %v12110_v23, %s9921_s26 }
0x2494   :  { %5987 = vrot.lane.b32.xlu0 %v12096_v42, %s9921_s26 }
0x2496   :  { %5989 = vrot.lane.b32.xlu1 %v12106_v51, %s9921_s26 }
0x2498   :  { %6011 = vrot.lane.b32.xlu0 %v12100_v33, %s9922_s8 }
0x249a   :  { %6013 = vrot.lane.b32.xlu1 %v12110_v23, %s9922_s8 }
0x249c   :  { %6019 = vrot.lane.b32.xlu0 %v12096_v42, %s9922_s8 }
0x249e   :  { %6021 = vrot.lane.b32.xlu1 %v12106_v51, %s9922_s8 }
0x24a0   :  { %6043 = vrot.lane.b32.xlu0 %v12100_v33, %s9923_s13 }
0x24a2   :  { %6045 = vrot.lane.b32.xlu1 %v12110_v23, %s9923_s13 }
0x24a4   :  { %6051 = vrot.lane.b32.xlu0 %v12096_v42, %s9923_s13 }
0x24a6   :  { %6053 = vrot.lane.b32.xlu1 %v12106_v51, %s9923_s13 }
0x24a8   :  { %6075 = vrot.lane.b32.xlu0 %v12100_v33, %s9924_s30 }
0x24aa   :  { %v5880_v44 = vpop.permute.xlu0 %5879  ;;  %6077 = vrot.lane.b32.xlu1 %v12110_v23, %s9924_s30 }
0x24ac   :  { %6083 = vrot.lane.b32.xlu0 %v12096_v42, %s9924_s30  ;;  %v5882_v13 = vpop.permute.xlu1 %5881 }
0x24ae   :  { %v5888_v11 = vpop.permute.xlu0 %5887  ;;  %6085 = vrot.lane.b32.xlu1 %v12106_v51, %s9924_s30 }
0x24b0   :  { %6107 = vrot.lane.b32.xlu0 %v12100_v33, %s9925_s11  ;;  %v5890_v29 = vpop.permute.xlu1 %5889 }
0x24b2   :  { %v12244_v32 = vpop.permute.xlu0 %5911  ;;  %6109 = vrot.lane.b32.xlu1 %v12110_v23, %s9925_s11 }
0x24b4   :  { %6115 = vrot.lane.b32.xlu0 %v12096_v42, %s9925_s11  ;;  %v12250_v43 = vpop.permute.xlu1 %5913 }
0x24b6   :  { %v12252_v18 = vpop.permute.xlu0 %5919  ;;  %6117 = vrot.lane.b32.xlu1 %v12106_v51, %s9925_s11 }
0x24b8   :  { %v12256_v2 = vpop.permute.xlu1 %5921 }
0x24ba   :  { %v12258_v20 = vpop.permute.xlu0 %5943 }
0x24bc   :  { %v12260_v36 = vpop.permute.xlu1 %5945 }
0x24be   :  { %v12262_v6 = vpop.permute.xlu0 %5951 }
0x24c0   :  { %v12264_v12 = vpop.permute.xlu1 %5953 }
0x24c2   :  { %v12266_v3 = vpop.permute.xlu0 %5975 }
0x24c4   :  { %v12268_v4 = vpop.permute.xlu1 %5977 }
0x24c6   :  { %v12270_v54 = vpop.permute.xlu0 %5983 }
0x24c8   :  { %v12272_v63 = vpop.permute.xlu1 %5985 }
0x24ca   :  { %v12274_v38 = vpop.permute.xlu0 %6007 }
0x24cc   :  { %v12276_v28 = vpop.permute.xlu1 %6009 }
0x24ce   :  { %v12278_v22 = vpop.permute.xlu0 %6015 }
0x24d0   :  { %v12280_v46 = vpop.permute.xlu1 %6017 }
0x24d2   :  { %v12282_v35 = vpop.permute.xlu0 %6039 }
0x24d4   :  { %v12284_v57 = vpop.permute.xlu1 %6041 }
0x24d6   :  { %v12286_v50 = vpop.permute.xlu0 %6047 }
0x24d8   :  { %v12288_v17 = vpop.permute.xlu1 %6049 }
0x24da   :  { %v12290_v14 = vpop.permute.xlu0 %6071 }
0x24db   :  { %13442 = vst [vmem:[#allocation123_spill] sm:$0xff] %v12290_v14 }
0x24dc   :  { %v12292_v41 = vpop.permute.xlu1 %6073 }
0x24dd   :  { %13443 = vst [vmem:[#allocation124_spill] sm:$0xff] %v12292_v41 }
0x24de   :  { %v12294_v5 = vpop.permute.xlu0 %6079 }
0x24df   :  { %13444 = vst [vmem:[#allocation125_spill] sm:$0xff] %v12294_v5 }
0x24e0   :  { %v12296_v1 = vpop.permute.xlu1 %6081 }
0x24e1   :  { %13445 = vst [vmem:[#allocation126_spill] sm:$0xff] %v12296_v1 }
0x24e2   :  { %v12298_v40 = vpop.permute.xlu0 %6103 }
0x24e3   :  { %13446 = vst [vmem:[#allocation127_spill] sm:$0xff] %v12298_v40 }
0x24e4   :  { %v12300_v30 = vpop.permute.xlu1 %6105 }
0x24e5   :  { %13447 = vst [vmem:[#allocation128_spill] sm:$0xff] %v12300_v30 }
0x24e6   :  { %v12302_v31 = vpop.permute.xlu0 %6111 }
0x24e7   :  { %13448 = vst [vmem:[#allocation129_spill] sm:$0xff] %v12302_v31 }
0x24e8   :  { %v12304_v45 = vpop.permute.xlu1 %6113 }
0x24e9   :  { %13449 = vst [vmem:[#allocation130_spill] sm:$0xff] %v12304_v45 }
0x24ea   :  { %v5884_v53 = vpop.permute.xlu0 %5883 }
0x24eb   :  { %v5899_v58 = vsel %vm600_vm0, %v5880_v44, %v5884_v53  ;;  %v5897_v31 = vsel %vm600_vm0, %v5884_v53, %v5888_v11 }
0x24ec   :  { %v5886_v27 = vpop.permute.xlu1 %5885  ;;  %v5904_v0 = vmul.f32 %v5899_v58, %v10806_v16 }
0x24ed   :  { %v5900_v9 = vsel %vm600_vm0, %v5882_v13, %v5886_v27  ;;  %v5898_v15 = vsel %vm600_vm0, %v5886_v27, %v5890_v29 }
0x24ee   :  { %v5908_v24 = vmul.f32 %v5900_v9, %v10806_v16  ;;  %v5892_v30 = vpop.permute.xlu0 %5891  ;;  %v5909_v14 = vmul.f32 %v5898_v15, %v10842_v39 }
0x24ef   :  { %v5895_v40 = vsel %vm600_vm0, %v5888_v11, %v5892_v30  ;;  %v5901_v45 = vsel %vm600_vm0, %v5892_v30, %v5880_v44 }
0x24f0   :  { %v5894_v41 = vpop.permute.xlu1 %5893  ;;  %v6136_v1 = vpack.c.bf16 %v5908_v24, %v5904_v0  ;;  %v5903_v27 = vmul.f32 %v5901_v45, %v10816_v56  ;;  %v5906_v16 = vmul.f32 %v5895_v40, %v10820_v47  ;;  %v5905_v0 = vmul.f32 %v5897_v31, %v10842_v39 }
0x24f1   :  { %v5896_v58 = vsel %vm600_vm0, %v5890_v29, %v5894_v41  ;;  %v5902_v9 = vsel %vm600_vm0, %v5894_v41, %v5882_v13 }
0x24f2   :  { %v5907_v5 = vmul.f32 %v5902_v9, %v10816_v56  ;;  %v5910_v44 = vmul.f32 %v5896_v58, %v10820_v47  ;;  %v5916_v30 = vpop.permute.xlu0 %5915  ;;  %6180 = vmatprep.subr.bf16.mxu1 %v6136_v1  ;;  %v6137_v13 = vpack.c.bf16 %v5909_v14, %v5905_v0 }
0x24f3   :  { %v5931_v15 = vsel %vm617_vm1, %v12244_v32, %v5916_v30 }
0x24f4   :  { %v6135_v53 = vpack.c.bf16 %v5907_v5, %v5903_v27  ;;  %v5918_v24 = vpop.permute.xlu1 %5917  ;;  %v6138_v11 = vpack.c.bf16 %v5910_v44, %v5906_v16  ;;  %v5936_v41 = vmul.f32 %v5931_v15, %v10810_v34  ;;  %v5929_v5 = vsel %vm617_vm1, %v5916_v30, %v12252_v18 }
0x24f5   :  { %v5932_v29 = vsel %vm617_vm1, %v12250_v43, %v5918_v24  ;;  %v5930_v1 = vsel %vm617_vm1, %v5918_v24, %v12256_v2 }
0x24f6   :  { %v5940_v40 = vmul.f32 %v5932_v29, %v10810_v34  ;;  %v5924_v31 = vpop.permute.xlu0 %5923  ;;  %6181 = vmatpush1.bf16.msra.mxu1 %v6135_v53  ;;  %6221 = vmatprep.subr.bf16.mxu0 %v6138_v11  ;;  %v5941_v9 = vmul.f32 %v5930_v1, %v10824_v48  ;;  %v5937_v53 = vmul.f32 %v5929_v5, %v10824_v48 }
0x24f7   :  { %v5927_v16 = vsel %vm617_vm1, %v12252_v18, %v5924_v31  ;;  %v5933_v14 = vsel %vm617_vm1, %v5924_v31, %v12244_v32  ;;  %6222 = vmatpush1.bf16.msra.mxu0 %v6137_v13 }
0x24f8   :  { %v5926_v45 = vpop.permute.xlu1 %5925  ;;  %v6140_v58 = vpack.c.bf16 %v5940_v40, %v5936_v41  ;;  %v5935_v0 = vmul.f32 %v5933_v14, %v10830_v59  ;;  %v5938_v32 = vmul.f32 %v5927_v16, %v10838_v62 }
0x24f9   :  { %v5928_v27 = vsel %vm617_vm1, %v12256_v2, %v5926_v45  ;;  %v5934_v44 = vsel %vm617_vm1, %v5926_v45, %v12250_v43  ;;  %v6141_v43 = vpack.c.bf16 %v5941_v9, %v5937_v53 }
0x24fa   :  { %v5939_v15 = vmul.f32 %v5934_v44, %v10830_v59  ;;  %v5942_v18 = vmul.f32 %v5928_v27, %v10838_v62  ;;  %v5948_v30 = vpop.permute.xlu0 %5947  ;;  %6182 = vmatprep.subr.bf16.mxu1 %v6140_v58 }
0x24fb   :  { %v5963_v2 = vsel %vm646_vm2, %v12258_v20, %v5948_v30  ;;  %v5961_v5 = vsel %vm646_vm2, %v5948_v30, %v12262_v6 }
0x24fc   :  { %v6139_v24 = vpack.c.bf16 %v5939_v15, %v5935_v0  ;;  %v5950_v11 = vpop.permute.xlu1 %5949  ;;  %v6142_v13 = vpack.c.bf16 %v5942_v18, %v5938_v32  ;;  %v5968_v41 = vmul.f32 %v5963_v2, %v10862_v21  ;;  %v5969_v18 = vmul.f32 %v5961_v5, %v10901_v52 }
0x24fd   :  { %v5964_v29 = vsel %vm646_vm2, %v12260_v36, %v5950_v11  ;;  %v5962_v1 = vsel %vm646_vm2, %v5950_v11, %v12264_v12 }
0x24fe   :  { %v5972_v40 = vmul.f32 %v5964_v29, %v10862_v21  ;;  %v5956_v31 = vpop.permute.xlu0 %5955  ;;  %6183 = vmatpush1.bf16.msra.mxu1 %v6139_v24  ;;  %6223 = vmatprep.subr.bf16.mxu0 %v6142_v13  ;;  %v5973_v9 = vmul.f32 %v5962_v1, %v10901_v52 }
0x24ff   :  { %v5959_v16 = vsel %vm646_vm2, %v12262_v6, %v5956_v31  ;;  %v5965_v14 = vsel %vm646_vm2, %v5956_v31, %v12258_v20  ;;  %6224 = vmatpush1.bf16.msra.mxu0 %v6141_v43 }
0x2500   :  { %v5958_v45 = vpop.permute.xlu1 %5957  ;;  %v6144_v58 = vpack.c.bf16 %v5972_v40, %v5968_v41  ;;  %v5967_v0 = vmul.f32 %v5965_v14, %v10872_v49  ;;  %v5970_v20 = vmul.f32 %v5959_v16, %v10879_v7 }
0x2501   :  { %v5960_v27 = vsel %vm646_vm2, %v12264_v12, %v5958_v45  ;;  %v5966_v44 = vsel %vm646_vm2, %v5958_v45, %v12260_v36  ;;  %v6145_v36 = vpack.c.bf16 %v5973_v9, %v5969_v18 }
0x2502   :  { %v5971_v32 = vmul.f32 %v5966_v44, %v10872_v49  ;;  %v5974_v6 = vmul.f32 %v5960_v27, %v10879_v7  ;;  %v5980_v15 = vpop.permute.xlu0 %5979  ;;  %6184 = vmatprep.subr.bf16.mxu1 %v6144_v58 }
0x2503   :  { %v5995_v12 = vsel %vm671_vm3, %v12266_v3, %v5980_v15  ;;  %v5993_v40 = vsel %vm671_vm3, %v5980_v15, %v12270_v54 }
0x2504   :  { %v6143_v30 = vpack.c.bf16 %v5971_v32, %v5967_v0  ;;  %v5982_v53 = vpop.permute.xlu1 %5981  ;;  %v6146_v2 = vpack.c.bf16 %v5974_v6, %v5970_v20  ;;  %v6000_v11 = vmul.f32 %v5995_v12, %v10866_v19  ;;  %v6001_v44 = vmul.f32 %v5993_v40, %v10883_v10  ;;  %v13450_v12 = vld [vmem:[#allocation102_spill] sm:$0xff] }
0x2505   :  { %v5996_v24 = vsel %vm671_vm3, %v12268_v4, %v5982_v53  ;;  %v5994_v13 = vsel %vm671_vm3, %v5982_v53, %v12272_v63 }
0x2506   :  { %v6004_v43 = vmul.f32 %v5996_v24, %v10866_v19  ;;  %v5988_v29 = vpop.permute.xlu0 %5987  ;;  %6185 = vmatpush1.bf16.msra.mxu1 %v6143_v30  ;;  %6225 = vmatprep.subr.bf16.mxu0 %v6146_v2  ;;  %v6005_v14 = vmul.f32 %v5994_v13, %v10883_v10  ;;  %v13452_v13 = vld [vmem:[#allocation101_spill] sm:$0xff] }
0x2507   :  { %v5991_v41 = vsel %vm671_vm3, %v12270_v54, %v5988_v29  ;;  %v5997_v1 = vsel %vm671_vm3, %v5988_v29, %v12266_v3  ;;  %6226 = vmatpush1.bf16.msra.mxu0 %v6145_v36  ;;  %v13453_v29 = vpack.c.bf16 %v12106_v51, %v12096_v42 }
0x2508   :  { %v5990_v31 = vpop.permute.xlu1 %5989  ;;  %v6148_v16 = vpack.c.bf16 %v6004_v43, %v6000_v11  ;;  %v5999_v58 = vmul.f32 %v5997_v1, %v10889_v55  ;;  %v6002_v3 = vmul.f32 %v5991_v41, %v10897_v61  ;;  %v13451_v11 = vpack.c.bf16 %v12110_v23, %v12100_v33  ;;  %v13454_v23 = vld [vmem:[#allocation103_spill] sm:$0xff] }
0x2509   :  { %v5992_v5 = vsel %vm671_vm3, %v12272_v63, %v5990_v31  ;;  %v5998_v45 = vsel %vm671_vm3, %v5990_v31, %v12268_v4  ;;  %v6149_v4 = vpack.c.bf16 %v6005_v14, %v6001_v44  ;;  %v13455_v31 = vld [vmem:[#allocation104_spill] sm:$0xff] }
0x250a   :  { %v6003_v9 = vmul.f32 %v5998_v45, %v10889_v55  ;;  %v6006_v54 = vmul.f32 %v5992_v5, %v10897_v61  ;;  %v6012_v27 = vpop.permute.xlu0 %6011  ;;  %6186 = vmatprep.subr.bf16.mxu1 %v6148_v16  ;;  %v13456_v5 = vpack.c.bf16 %v12102_v37, %v12092_v8  ;;  %v13457_v45 = vpack.c.bf16 %v12104_v60, %v12094_v26 }
0x250b   :  { %v6025_v63 = vsel %vm696_vm8, %v6012_v27, %v12278_v22  ;;  %v6027_v18 = vsel %vm696_vm8, %v12274_v38, %v6012_v27  ;;  %v13458_v27 = vld [vmem:[#allocation105_spill] sm:$0xff] }
0x250c   :  { %v6147_v0 = vpack.c.bf16 %v6003_v9, %v5999_v58  ;;  %v6014_v20 = vpop.permute.xlu1 %6013  ;;  %v6150_v32 = vpack.c.bf16 %v6006_v54, %v6002_v3  ;;  %v6032_v30 = vmul.f32 %v6025_v63, %v13450_v12  ;;  %v6031_v40 = vmul.f32 %v6027_v18, %v13452_v13  ;;  %v13459_v63 = vld [vmem:[#allocation106_spill] sm:$0xff] }
0x250d   :  { %v6026_v6 = vsel %vm696_vm8, %v6014_v20, %v12280_v46  ;;  %v6028_v15 = vsel %vm696_vm8, %v12276_v28, %v6014_v20 }
0x250e   :  { %v6036_v53 = vmul.f32 %v6026_v6, %v13450_v12  ;;  %v6020_v2 = vpop.permute.xlu0 %6019  ;;  %6187 = vmatpush1.bf16.msra.mxu1 %v6147_v0  ;;  %6227 = vmatprep.subr.bf16.mxu0 %v6150_v32  ;;  %v6035_v43 = vmul.f32 %v6028_v15, %v13452_v13 }
0x250f   :  { %v6023_v36 = vsel %vm696_vm8, %v12278_v22, %v6020_v2  ;;  %v6029_v24 = vsel %vm696_vm8, %v6020_v2, %v12274_v38  ;;  %6188 = vmatprep.subr.bf16.mxu1 %v13451_v11  ;;  %6228 = vmatpush1.bf16.msra.mxu0 %v6149_v4  ;;  %v13460_v2 = vld [vmem:[#allocation109_spill] sm:$0xff] }
0x2510   :  { %6229 = vmatprep.subr.bf16.mxu0 %v13453_v29  ;;  %v6022_v41 = vpop.permute.xlu1 %6021  ;;  %v6156_v1 = vpack.c.bf16 %v6036_v53, %v6032_v30  ;;  %v6033_v38 = vmul.f32 %v6023_v36, %v13454_v23  ;;  %v6034_v16 = vmul.f32 %v6029_v24, %v13455_v31  ;;  %v6155_v58 = vpack.c.bf16 %v6035_v43, %v6031_v40  ;;  %v13461_v24 = vld [vmem:[#allocation110_spill] sm:$0xff]  ;;  %v13462_v29 = vld [vmem:[#allocation125_spill] sm:$0xff] }
0x2511   :  { %v6024_v22 = vsel %vm696_vm8, %v12280_v46, %v6022_v41  ;;  %v6030_v33 = vsel %vm696_vm8, %v6022_v41, %v12276_v28 }
0x2512   :  { %v6037_v14 = vmul.f32 %v6024_v22, %v13454_v23  ;;  %v6038_v42 = vmul.f32 %v6030_v33, %v13455_v31  ;;  %v6044_v51 = vpop.permute.xlu0 %6043  ;;  %6189 = vmatpush1.bf16.msra.mxu1 %v13456_v5  ;;  %v13464_v33 = vld [vmem:[#allocation126_spill] sm:$0xff]  ;;  %v13467_v5 = vld [vmem:[#allocation108_spill] sm:$0xff] }
0x2513   :  { %v6057_v46 = vsel %vm721_vm9, %v6044_v51, %v12286_v50  ;;  %v6059_v28 = vsel %vm721_vm9, %v12282_v35, %v6044_v51  ;;  %6190 = vmatprep.subr.bf16.mxu1 %v6156_v1  ;;  %6230 = vmatpush1.bf16.msra.mxu0 %v13457_v45  ;;  %v13463_v1 = vld [vmem:[#allocation123_spill] sm:$0xff] }
0x2514   :  { %v6157_v3 = vpack.c.bf16 %v6037_v14, %v6033_v38  ;;  %v6046_v9 = vpop.permute.xlu1 %6045  ;;  %v6158_v54 = vpack.c.bf16 %v6038_v42, %v6034_v16  ;;  %v6063_v8 = vmul.f32 %v6059_v28, %v13458_v27  ;;  %v6064_v0 = vmul.f32 %v6057_v46, %v13459_v63  ;;  %v13465_v16 = vld [vmem:[#allocation124_spill] sm:$0xff]  ;;  %v13466_v42 = vld [vmem:[#allocation107_spill] sm:$0xff] }
0x2515   :  { %v6058_v37 = vsel %vm721_vm9, %v6046_v9, %v12288_v17  ;;  %v6060_v44 = vsel %vm721_vm9, %v12284_v57, %v6046_v9 }
0x2516   :  { %v6067_v20 = vmul.f32 %v6060_v44, %v13458_v27  ;;  %v6068_v26 = vmul.f32 %v6058_v37, %v13459_v63  ;;  %v6052_v60 = vpop.permute.xlu0 %6051  ;;  %6191 = vmatpush1.bf16.msra.mxu1 %v6155_v58  ;;  %6231 = vmatprep.subr.bf16.mxu0 %v6158_v54 }
0x2517   :  { %v6055_v32 = vsel %vm721_vm9, %v12286_v50, %v6052_v60  ;;  %v6061_v4 = vsel %vm721_vm9, %v6052_v60, %v12282_v35  ;;  %6232 = vmatpush1.bf16.msra.mxu0 %v6157_v3  ;;  %v13469_v60 = vld [vmem:[#allocation112_spill] sm:$0xff] }
0x2518   :  { %v6159_v6 = vpack.c.bf16 %v6067_v20, %v6063_v8  ;;  %v6054_v15 = vpop.permute.xlu1 %6053  ;;  %v6160_v18 = vpack.c.bf16 %v6068_v26, %v6064_v0  ;;  %v6065_v36 = vmul.f32 %v6055_v32, %v13460_v2  ;;  %v6066_v50 = vmul.f32 %v6061_v4, %v13461_v24  ;;  %v13468_v20 = vld [vmem:[#allocation111_spill] sm:$0xff] }
0x2519   :  { %v6056_v30 = vsel %vm721_vm9, %v12288_v17, %v6054_v15  ;;  %v6062_v53 = vsel %vm721_vm9, %v6054_v15, %v12284_v57 }
0x251a   :  { %v6069_v11 = vmul.f32 %v6056_v30, %v13460_v2  ;;  %v6070_v35 = vmul.f32 %v6062_v53, %v13461_v24  ;;  %v6076_v43 = vpop.permute.xlu0 %6075  ;;  %6192 = vmatprep.subr.bf16.mxu1 %v6160_v18  ;;  %v13470_v18 = vld [vmem:[#allocation129_spill] sm:$0xff]  ;;  %v13472_v53 = vld [vmem:[#allocation127_spill] sm:$0xff] }
0x251b   :  { %v6089_v41 = vsel %vm746_vm10, %v6076_v43, %v13462_v29  ;;  %v6091_v17 = vsel %vm746_vm10, %v13463_v1, %v6076_v43  ;;  %6193 = vmatpush1.bf16.msra.mxu1 %v6159_v6  ;;  %v13475_v43 = vld [vmem:[#allocation130_spill] sm:$0xff] }
0x251c   :  { %v6161_v57 = vpack.c.bf16 %v6069_v11, %v6065_v36  ;;  %v6078_v40 = vpop.permute.xlu1 %6077  ;;  %v6162_v22 = vpack.c.bf16 %v6070_v35, %v6066_v50  ;;  %v6095_v51 = vmul.f32 %v6091_v17, %v13466_v42  ;;  %v6096_v46 = vmul.f32 %v6089_v41, %v13467_v5  ;;  %v13477_v41 = vld [vmem:[#allocation128_spill] sm:$0xff]  ;;  %v13479_v17 = vld [vmem:[#allocation113_spill] sm:$0xff] }
0x251d   :  { %v6090_v38 = vsel %vm746_vm10, %v6078_v40, %v13464_v33  ;;  %v6092_v14 = vsel %vm746_vm10, %v13465_v16, %v6078_v40  ;;  %v13480_v40 = vld [vmem:[#allocation114_spill] sm:$0xff] }
0x251e   :  { %v6099_v28 = vmul.f32 %v6092_v14, %v13466_v42  ;;  %v6100_v45 = vmul.f32 %v6090_v38, %v13467_v5  ;;  %v6084_v58 = vpop.permute.xlu0 %6083  ;;  %6233 = vmatprep.subr.bf16.mxu0 %v6162_v22 }
0x251f   :  { %v6087_v3 = vsel %vm746_vm10, %v13462_v29, %v6084_v58  ;;  %v6093_v9 = vsel %vm746_vm10, %v6084_v58, %v13463_v1  ;;  %6234 = vmatpush1.bf16.msra.mxu0 %v6161_v57  ;;  %v9143_v58 = vld [vmem:[%s13474_s12 + $0x4] ss:$16 sps:$4 sm:$0xff]  }
0x2520   :  { %v6163_v54 = vpack.c.bf16 %v6099_v28, %v6095_v51  ;;  %v6086_v8 = vpop.permute.xlu1 %6085  ;;  %v6164_v37 = vpack.c.bf16 %v6100_v45, %v6096_v46  ;;  %v6097_v26 = vmul.f32 %v6087_v3, %v13468_v20  ;;  %v6098_v32 = vmul.f32 %v6093_v9, %v13469_v60 }
0x2521   :  { %v6088_v44 = vsel %vm746_vm10, %v13464_v33, %v6086_v8  ;;  %v6094_v0 = vsel %vm746_vm10, %v6086_v8, %v13465_v16 }
0x2522   :  { %v6101_v4 = vmul.f32 %v6088_v44, %v13468_v20  ;;  %v6102_v6 = vmul.f32 %v6094_v0, %v13469_v60  ;;  %v6108_v15 = vpop.permute.xlu0 %6107  ;;  %6194 = vmatprep.subr.bf16.mxu1 %v6164_v37  ;;  %v13485_v37 = vld [vmem:[#allocation115_spill] sm:$0xff]  ;;  %v13486_v0 = vld [vmem:[#allocation116_spill] sm:$0xff] }
0x2523   :  { %v6121_v30 = vsel %vm13471_vm5, %v6108_v15, %v13470_v18  ;;  %v6123_v36 = vsel %vm13473_vm11, %v13472_v53, %v6108_v15  ;;  %6195 = vmatpush1.bf16.msra.mxu1 %v6163_v54  ;;  %vm13481_vm11 = vmmov %vm13471_vm5  ;;  %v13484_v54 = vld [vmem:[#allocation122_spill] sm:$0xff] }
0x2524   :  { %v6165_v50 = vpack.c.bf16 %v6101_v4, %v6097_v26  ;;  %v6110_v11 = vpop.permute.xlu1 %6109  ;;  %v6166_v35 = vpack.c.bf16 %v6102_v6, %v6098_v32  ;;  %v6127_v57 = vmul.f32 %v6123_v36, %v13479_v17  ;;  %v6128_v22 = vmul.f32 %v6121_v30, %v13480_v40  ;;  %v9141_v6 = vld [vmem:[%s13474_s12] ss:$16 sps:$4 sm:$0xff]   ;;  %v9146_v30 = vld [vmem:[%s13474_s12 + $0x24] ss:$16 sps:$4 sm:$0xff]  }
0x2525   :  { %v6122_v29 = vsel %vm13476_vm6, %v6110_v11, %v13475_v43  ;;  %v6124_v1 = vsel %vm13478_vm15, %v13477_v41, %v6110_v11  ;;  %vm13482_vm6 = vmmov %vm13471_vm5  ;;  %v8063_v8 = vcombine.low %v13484_v54, %v13484_v54  ;;  %v9144_v36 = vld [vmem:[%s13474_s12 + $0x20] ss:$16 sps:$4 sm:$0xff]   ;;  %v9152_v11 = vld [vmem:[%s13474_s12 + $0x44] ss:$16 sps:$4 sm:$0xff]  }
0x2526   :  { %v6131_v33 = vmul.f32 %v6124_v1, %v13479_v17  ;;  %v6132_v38 = vmul.f32 %v6122_v29, %v13480_v40  ;;  %v6116_v16 = vpop.permute.xlu0 %6115  ;;  %6235 = vmatprep.subr.bf16.mxu0 %v6166_v35  ;;  %vm13483_vm15 = vmmov %vm13471_vm5  ;;  %v9155_v35 = vld [vmem:[%s13474_s12 + $0x2c] ss:$16 sps:$4 sm:$0xff]   ;;  %v9150_v29 = vld [vmem:[%s13474_s12 + $0x40] ss:$16 sps:$4 sm:$0xff]  }
0x2527   :  { %v6119_v14 = vsel %vm13471_vm5, %v13470_v18, %v6116_v16  ;;  %v6125_v51 = vsel %vm13481_vm11, %v6116_v16, %v13472_v53  ;;  %6236 = vmatpush1.bf16.msra.mxu0 %v6165_v50  ;;  %v9149_v53 = vld [vmem:[%s13474_s12 + $0xc] ss:$16 sps:$4 sm:$0xff]   ;;  %v9147_v50 = vld [vmem:[%s13474_s12 + $0x8] ss:$16 sps:$4 sm:$0xff]   ;;  %v9158_v1 = vld [vmem:[%s13474_s12 + $0x64] ss:$16 sps:$4 sm:$0xff]  }
0x2528   :  { %v6167_v46 = vpack.c.bf16 %v6131_v33, %v6127_v57  ;;  %v6118_v28 = vpop.permute.xlu1 %6117  ;;  %v6168_v45 = vpack.c.bf16 %v6132_v38, %v6128_v22  ;;  %v6129_v44 = vmul.f32 %v6119_v14, %v13485_v37  ;;  %v6130_v26 = vmul.f32 %v6125_v51, %v13486_v0  ;;  %v9161_v57 = vld [vmem:[%s13474_s12 + $0x4c] ss:$16 sps:$4 sm:$0xff]   ;;  %v9156_v22 = vld [vmem:[%s13474_s12 + $0x60] ss:$16 sps:$4 sm:$0xff]   ;;  %v9159_v33 = vld [vmem:[%s13474_s12 + $0x48] ss:$16 sps:$4 sm:$0xff]  }
0x2529   :  { %v6120_v3 = vsel %vm13482_vm6, %v13475_v43, %v6118_v28  ;;  %v6126_v9 = vsel %vm13483_vm15, %v6118_v28, %v13477_v41  ;;  %v13487_v43 = vmov 0   ;;  %v9153_v41 = vld [vmem:[%s13474_s12 + $0x28] ss:$16 sps:$4 sm:$0xff]   ;;  %v9164_v38 = vld [vmem:[%s13474_s12 + $0x84] ss:$16 sps:$4 sm:$0xff]   ;;  %vm13491_vm11 = vmmov %vm13471_vm5 }
0x252a   :  { %v6133_v32 = vmul.f32 %v6120_v3, %v13485_v37  ;;  %v6134_v4 = vmul.f32 %v6126_v9, %v13486_v0  ;;  %6196 = vmatprep.subr.bf16.mxu1 %v6168_v45  ;;  %v9167_v16 = vld [vmem:[%s13474_s12 + $0x6c] ss:$16 sps:$4 sm:$0xff]   ;;  %v9162_v14 = vld [vmem:[%s13474_s12 + $0x80] ss:$16 sps:$4 sm:$0xff]   ;;  %v9165_v51 = vld [vmem:[%s13474_s12 + $0x68] ss:$16 sps:$4 sm:$0xff]  }
0x252b   :  { %6197 = vmatpush1.bf16.msra.mxu1 %v6167_v46  ;;  %v9170_v46 = vld [vmem:[%s13474_s12 + $0xa4] ss:$16 sps:$4 sm:$0xff]   ;;  %v9173_v28 = vld [vmem:[%s13474_s12 + $0x8c] ss:$16 sps:$4 sm:$0xff]   ;;  %v9168_v45 = vld [vmem:[%s13474_s12 + $0xa0] ss:$16 sps:$4 sm:$0xff]  }
0x252c   :  { %v6169_v15 = vpack.c.bf16 %v6133_v32, %v6129_v44  ;;  %v6170_v18 = vpack.c.bf16 %v6134_v4, %v6130_v26  ;;  %6455 = vmatprep.subr.bf16.mxu1 %v9143_v58  ;;  %v9171_v58 = vld [vmem:[%s13474_s12 + $0x88] ss:$16 sps:$4 sm:$0xff]   ;;  %v9176_v3 = vld [vmem:[%s13474_s12 + $0xc4] ss:$16 sps:$4 sm:$0xff]   ;;  %v9179_v9 = vld [vmem:[%s13474_s12 + $0xac] ss:$16 sps:$4 sm:$0xff]  }
0x252d   :  { %v9174_v54 = vld [vmem:[%s13474_s12 + $0xc0] ss:$16 sps:$4 sm:$0xff]   ;;  %v9182_v44 = vld [vmem:[%s13474_s12 + $0xe4] ss:$16 sps:$4 sm:$0xff]   ;;  %v9185_v26 = vld [vmem:[%s13474_s12 + $0xcc] ss:$16 sps:$4 sm:$0xff]  }
0x252e   :  { %6213 = vmatmul.mubr.bf16.vlgmr.msra.gmra.mrb[132].mxu1 %v8063_v8  ;;  %6237 = vmatprep.subr.bf16.mxu0 %v6170_v18  ;;  %v9180_v32 = vld [vmem:[%s13474_s12 + $0xe0] ss:$16 sps:$4 sm:$0xff]   ;;  %v9183_v4 = vld [vmem:[%s13474_s12 + $0xc8] ss:$16 sps:$4 sm:$0xff]   ;;  %vm13492_vm6 = vmmov %vm13471_vm5 }
0x252f   :  { %6238 = vmatpush1.bf16.msra.mxu0 %v6169_v15  ;;  %6456 = vmatpush1.bf16.msra.mxu1 %v9141_v6  ;;  %v9188_v6 = vld [vmem:[%s13474_s12 + $0xec] ss:$16 sps:$4 sm:$0xff]   ;;  %v9186_v15 = vld [vmem:[%s13474_s12 + $0xe8] ss:$16 sps:$4 sm:$0xff]   ;;  %vm13493_vm15 = vmmov %vm13471_vm5 }
0x2530   :  { %6457 = vmatprep.subr.bf16.mxu1 %v9146_v30  ;;  %6496 = vmatprep.subr.bf16.mxu0 %v9149_v53  ;;  %v13488_v18 = vld [vmem:[#allocation121_spill] sm:$0xff] }
0x2531   :  { %6487 = vmatprep.mubr.bf16.mxu1 %v13487_v43  ;;  %v6262_v30 = vpack.c.bf16 %v13488_v18, %v13488_v18 }
0x2532   :  { %6254 = vmatmul.mubr.bf16.vlgmr.msra.gmra.mrb[108].mxu0 %v8063_v8  ;;  %v9177_v8 = vld [vmem:[%s13474_s12 + $0xa8] ss:$16 sps:$4 sm:$0xff]  }
0x2533   :  { %6458 = vmatpush1.bf16.msra.mxu1 %v9144_v36  ;;  %6497 = vmatpush1.bf16.msra.mxu0 %v9147_v50 }
0x2534   :  { %6459 = vmatprep.subr.bf16.mxu1 %v9152_v11  ;;  %6498 = vmatprep.subr.bf16.mxu0 %v9155_v35 }
0x2535   :  { %6528 = vmatprep.mubr.bf16.mxu0 %v13487_v43 }
0x2537   :  { %6460 = vmatpush1.bf16.msra.mxu1 %v9150_v29  ;;  %6499 = vmatpush1.bf16.msra.mxu0 %v9153_v41 }
0x2538   :  { %6461 = vmatprep.subr.bf16.mxu1 %v9158_v1  ;;  %6500 = vmatprep.subr.bf16.mxu0 %v9161_v57 }
0x253b   :  { %6462 = vmatpush1.bf16.msra.mxu1 %v9156_v22  ;;  %6501 = vmatpush1.bf16.msra.mxu0 %v9159_v33 }
0x253c   :  { %6463 = vmatprep.subr.bf16.mxu1 %v9164_v38  ;;  %6502 = vmatprep.subr.bf16.mxu0 %v9167_v16 }
0x253f   :  { %6464 = vmatpush1.bf16.msra.mxu1 %v9162_v14  ;;  %6503 = vmatpush1.bf16.msra.mxu0 %v9165_v51 }
0x2540   :  { %6465 = vmatprep.subr.bf16.mxu1 %v9170_v46  ;;  %6504 = vmatprep.subr.bf16.mxu0 %v9173_v28 }
0x2543   :  { %6466 = vmatpush1.bf16.msra.mxu1 %v9168_v45  ;;  %6505 = vmatpush1.bf16.msra.mxu0 %v9171_v58 }
0x2544   :  { %6467 = vmatprep.subr.bf16.mxu1 %v9176_v3  ;;  %6506 = vmatprep.subr.bf16.mxu0 %v9179_v9 }
0x2547   :  { %6468 = vmatpush1.bf16.msra.mxu1 %v9174_v54  ;;  %6507 = vmatpush1.bf16.msra.mxu0 %v9177_v8 }
0x2548   :  { %6469 = vmatprep.subr.bf16.mxu1 %v9182_v44  ;;  %6508 = vmatprep.subr.bf16.mxu0 %v9185_v26  ;;  %v13490_v26 = vld [vmem:[#allocation100_spill] sm:$0xff] }
0x254b   :  { %6470 = vmatpush1.bf16.msra.mxu1 %v9180_v32  ;;  %6509 = vmatpush1.bf16.msra.mxu0 %v9183_v4 }
0x254c   :  { %6510 = vmatprep.subr.bf16.mxu0 %v9188_v6  ;;  %v7029_v6 = vld [vmem:[%s13489_s15] sm:$0xff] }
0x254e   :  { %6488 = vmatmul.mubr.bf16.vlgmr.msra.gmra.mrb[136].mxu1 %v6262_v30 }
0x254f   :  { %6511 = vmatpush1.bf16.msra.mxu0 %v9186_v15  ;;  %6882 = vmatprep.mubr.bf16.mxu1 %v13487_v43 }
0x2552   :  { %6529 = vmatmul.mubr.bf16.vlgmr.msra.gmra.mrb[112].mxu0 %v6262_v30 }
0x2553   :  { %6923 = vmatprep.mubr.bf16.mxu0 %v13487_v43 }
0x2601   :  { %v12606_v53 = vpop.f32.mrb[132].mxu1 }
0x2602   :  { %6685 = vrot.lane.b32.xlu0 %v12606_v53, %s9920_s20  ;;  %v12610_v36 = vpop.f32.mrb[133].mxu1 }
0x2603   :  { %6687 = vrot.lane.b32.xlu1 %v12610_v36, %s9920_s20  ;;  %v6218_v50 = vpop.f32.mrb[134].mxu1 }
0x2604   :  { %v6219_v11 = vpop.f32.mrb[135].mxu1 }
0x2605   :  { %v12614_v35 = vpop.f32.mrb[108].mxu0 }
0x2606   :  { %v12616_v29 = vpop.f32.mrb[109].mxu0  ;;  %6689 = vrot.lane.b32.xlu0 %v12614_v35, %s9920_s20 }
0x2607   :  { %v6259_v41 = vpop.f32.mrb[110].mxu0  ;;  %6691 = vrot.lane.b32.xlu1 %v12616_v29, %s9920_s20 }
0x2608   :  { %v6260_v1 = vpop.f32.mrb[111].mxu0 }
0x260a   :  { %6701 = vrot.lane.b32.xlu0 %v12606_v53, %s9918_s21 }
0x260b   :  { %6703 = vrot.lane.b32.xlu1 %v12610_v36, %s9918_s21 }
0x260e   :  { %6705 = vrot.lane.b32.xlu0 %v12614_v35, %s9918_s21 }
0x260f   :  { %6707 = vrot.lane.b32.xlu1 %v12616_v29, %s9918_s21 }
0x2612   :  { %6717 = vrot.lane.b32.xlu0 %v12606_v53, %s9919_s29 }
0x2613   :  { %6719 = vrot.lane.b32.xlu1 %v12610_v36, %s9919_s29 }
0x2616   :  { %6721 = vrot.lane.b32.xlu0 %v12614_v35, %s9919_s29 }
0x2617   :  { %6723 = vrot.lane.b32.xlu1 %v12616_v29, %s9919_s29 }
0x261a   :  { %6733 = vrot.lane.b32.xlu0 %v12606_v53, %s9921_s26 }
0x261b   :  { %6735 = vrot.lane.b32.xlu1 %v12610_v36, %s9921_s26 }
0x261e   :  { %6737 = vrot.lane.b32.xlu0 %v12614_v35, %s9921_s26 }
0x261f   :  { %6739 = vrot.lane.b32.xlu1 %v12616_v29, %s9921_s26 }
0x2621   :  { %v12646_v57 = vpop.f32.mrb[136].mxu1 }
0x2622   :  { %6749 = vrot.lane.b32.xlu0 %v12606_v53, %s9922_s8  ;;  %v12650_v22 = vpop.f32.mrb[137].mxu1 }
0x2623   :  { %6751 = vrot.lane.b32.xlu1 %v12610_v36, %s9922_s8  ;;  %v6493_v33 = vpop.f32.mrb[138].mxu1 }
0x2624   :  { %v6494_v38 = vpop.f32.mrb[139].mxu1 }
0x2625   :  { %v12654_v16 = vpop.f32.mrb[112].mxu0 }
0x2626   :  { %6753 = vrot.lane.b32.xlu0 %v12614_v35, %s9922_s8  ;;  %v12658_v14 = vpop.f32.mrb[113].mxu0 }
0x2627   :  { %6755 = vrot.lane.b32.xlu1 %v12616_v29, %s9922_s8  ;;  %v6534_v51 = vpop.f32.mrb[114].mxu0 }
0x2628   :  { %v6535_v46 = vpop.f32.mrb[115].mxu0 }
0x262a   :  { %6765 = vrot.lane.b32.xlu0 %v12606_v53, %s9923_s13 }
0x262b   :  { %6767 = vrot.lane.b32.xlu1 %v12610_v36, %s9923_s13 }
0x262e   :  { %6769 = vrot.lane.b32.xlu0 %v12614_v35, %s9923_s13 }
0x262f   :  { %6771 = vrot.lane.b32.xlu1 %v12616_v29, %s9923_s13 }
0x2632   :  { %6781 = vrot.lane.b32.xlu0 %v12606_v53, %s9924_s30 }
0x2633   :  { %6783 = vrot.lane.b32.xlu1 %v12610_v36, %s9924_s30 }
0x2636   :  { %6785 = vrot.lane.b32.xlu0 %v12614_v35, %s9924_s30 }
0x2637   :  { %6787 = vrot.lane.b32.xlu1 %v12616_v29, %s9924_s30 }
0x263a   :  { %6797 = vrot.lane.b32.xlu0 %v12606_v53, %s9925_s11 }
0x263b   :  { %6799 = vrot.lane.b32.xlu1 %v12610_v36, %s9925_s11 }
0x263e   :  { %6801 = vrot.lane.b32.xlu0 %v12614_v35, %s9925_s11 }
0x263f   :  { %6803 = vrot.lane.b32.xlu1 %v12616_v29, %s9925_s11 }
0x2642   :  { %6537 = vrot.lane.b32.xlu0 %v12646_v57, %s9920_s20 }
0x2643   :  { %6539 = vrot.lane.b32.xlu1 %v12650_v22, %s9920_s20 }
0x2646   :  { %6541 = vrot.lane.b32.xlu0 %v12654_v16, %s9920_s20 }
0x2647   :  { %6543 = vrot.lane.b32.xlu1 %v12658_v14, %s9920_s20 }
0x264a   :  { %6553 = vrot.lane.b32.xlu0 %v12646_v57, %s9918_s21 }
0x264b   :  { %6555 = vrot.lane.b32.xlu1 %v12650_v22, %s9918_s21 }
0x264e   :  { %6557 = vrot.lane.b32.xlu0 %v12654_v16, %s9918_s21 }
0x264f   :  { %6559 = vrot.lane.b32.xlu1 %v12658_v14, %s9918_s21 }
0x2652   :  { %6569 = vrot.lane.b32.xlu0 %v12646_v57, %s9919_s29 }
0x2653   :  { %6571 = vrot.lane.b32.xlu1 %v12650_v22, %s9919_s29 }
0x2656   :  { %6573 = vrot.lane.b32.xlu0 %v12654_v16, %s9919_s29 }
0x2657   :  { %6575 = vrot.lane.b32.xlu1 %v12658_v14, %s9919_s29 }
0x265a   :  { %6585 = vrot.lane.b32.xlu0 %v12646_v57, %s9921_s26 }
0x265b   :  { %6587 = vrot.lane.b32.xlu1 %v12650_v22, %s9921_s26 }
0x265e   :  { %6589 = vrot.lane.b32.xlu0 %v12654_v16, %s9921_s26 }
0x265f   :  { %6591 = vrot.lane.b32.xlu1 %v12658_v14, %s9921_s26 }
0x2662   :  { %6601 = vrot.lane.b32.xlu0 %v12646_v57, %s9922_s8 }
0x2663   :  { %6603 = vrot.lane.b32.xlu1 %v12650_v22, %s9922_s8 }
0x2666   :  { %6605 = vrot.lane.b32.xlu0 %v12654_v16, %s9922_s8 }
0x2667   :  { %6607 = vrot.lane.b32.xlu1 %v12658_v14, %s9922_s8 }
0x266a   :  { %6617 = vrot.lane.b32.xlu0 %v12646_v57, %s9923_s13 }
0x266b   :  { %6619 = vrot.lane.b32.xlu1 %v12650_v22, %s9923_s13 }
0x266e   :  { %6621 = vrot.lane.b32.xlu0 %v12654_v16, %s9923_s13 }
0x266f   :  { %6623 = vrot.lane.b32.xlu1 %v12658_v14, %s9923_s13 }
0x2672   :  { %6633 = vrot.lane.b32.xlu0 %v12646_v57, %s9924_s30 }
0x2673   :  { %6635 = vrot.lane.b32.xlu1 %v12650_v22, %s9924_s30 }
0x2674   :  { %v6686_v28 = vpop.permute.xlu0 %6685 }
0x2675   :  { %v6688_v45 = vpop.permute.xlu1 %6687 }
0x2676   :  { %6637 = vrot.lane.b32.xlu0 %v12654_v16, %s9924_s30  ;;  %v6695_v9 = vsel %vm600_vm0, %v6686_v28, %v6688_v45 }
0x2677   :  { %6639 = vrot.lane.b32.xlu1 %v12658_v14, %s9924_s30  ;;  %v6698_v32 = vmul.f32 %v6695_v9, %v13490_v26 }
0x2678   :  { %v6690_v58 = vpop.permute.xlu0 %6689 }
0x2679   :  { %v6692_v3 = vpop.permute.xlu1 %6691  ;;  %v6694_v50 = vsel %vm600_vm0, %v6688_v45, %v6690_v58 }
0x267a   :  { %6649 = vrot.lane.b32.xlu0 %v12646_v57, %s9925_s11  ;;  %v6693_v15 = vsel %vm600_vm0, %v6690_v58, %v6692_v3  ;;  %v6696_v18 = vsel %vm600_vm0, %v6692_v3, %v6686_v28  ;;  %v6699_v3 = vmul.f32 %v6694_v50, %v10842_v39 }
0x267b   :  { %6651 = vrot.lane.b32.xlu1 %v12650_v22, %s9925_s11  ;;  %v6697_v46 = vmul.f32 %v6696_v18, %v10816_v56  ;;  %v6700_v28 = vmul.f32 %v6693_v15, %v10820_v47 }
0x267c   :  { %v6702_v54 = vpop.permute.xlu0 %6701 }
0x267d   :  { %v6704_v8 = vpop.permute.xlu1 %6703 }
0x267e   :  { %v6711_v44 = vsel %vm617_vm1, %v6702_v54, %v6704_v8  ;;  %6653 = vrot.lane.b32.xlu0 %v12654_v16, %s9925_s11 }
0x267f   :  { %v6714_v4 = vmul.f32 %v6711_v44, %v10810_v34  ;;  %6655 = vrot.lane.b32.xlu1 %v12658_v14, %s9925_s11 }
0x2680   :  { %v6706_v30 = vpop.permute.xlu0 %6705 }
0x2681   :  { %v6710_v11 = vsel %vm617_vm1, %v6704_v8, %v6706_v30  ;;  %v6708_v41 = vpop.permute.xlu1 %6707  ;;  %v6814_v1 = vpack.c.bf16 %v6714_v4, %v6698_v32 }
0x2682   :  { %v6715_v33 = vmul.f32 %v6710_v11, %v10824_v48  ;;  %v6709_v38 = vsel %vm617_vm1, %v6706_v30, %v6708_v41  ;;  %v6712_v51 = vsel %vm617_vm1, %v6708_v41, %v6702_v54  ;;  %7032 = vperm.xlu0 %8919, %v7029_v6  }
0x2683   :  { %v6713_v45 = vmul.f32 %v6712_v51, %v10830_v59  ;;  %v6716_v58 = vmul.f32 %v6709_v38, %v10838_v62  ;;  %6850 = vmatprep.subr.bf16.mxu1 %v6814_v1 }
0x2684   :  { %v6718_v9 = vpop.permute.xlu0 %6717  ;;  %v6815_v4 = vpack.c.bf16 %v6715_v33, %v6699_v3 }
0x2685   :  { %v6813_v8 = vpack.c.bf16 %v6713_v45, %v6697_v46  ;;  %v6720_v44 = vpop.permute.xlu1 %6719  ;;  %v6816_v32 = vpack.c.bf16 %v6716_v58, %v6700_v28 }
0x2686   :  { %v6727_v15 = vsel %vm646_vm2, %v6718_v9, %v6720_v44 }
0x2687   :  { %6851 = vmatpush1.bf16.msra.mxu1 %v6813_v8  ;;  %6891 = vmatprep.subr.bf16.mxu0 %v6816_v32  ;;  %v6730_v50 = vmul.f32 %v6727_v15, %v10862_v21 }
0x2688   :  { %v6722_v54 = vpop.permute.xlu0 %6721  ;;  %6892 = vmatpush1.bf16.msra.mxu0 %v6815_v4 }
0x2689   :  { %v6724_v6 = vpop.permute.xlu1 %6723  ;;  %v6726_v51 = vsel %vm646_vm2, %v6720_v44, %v6722_v54 }
0x268a   :  { %v6725_v1 = vsel %vm646_vm2, %v6722_v54, %v6724_v6  ;;  %v6728_v33 = vsel %vm646_vm2, %v6724_v6, %v6718_v9  ;;  %v6731_v54 = vmul.f32 %v6726_v51, %v10901_v52 }
0x268b   :  { %v6729_v32 = vmul.f32 %v6728_v33, %v10872_v49  ;;  %v6732_v9 = vmul.f32 %v6725_v1, %v10879_v7 }
0x268c   :  { %v6734_v18 = vpop.permute.xlu0 %6733 }
0x268d   :  { %v6736_v30 = vpop.permute.xlu1 %6735 }
0x268e   :  { %v6743_v11 = vsel %vm671_vm3, %v6734_v18, %v6736_v30 }
0x268f   :  { %v6746_v41 = vmul.f32 %v6743_v11, %v10866_v19 }
0x2690   :  { %v6738_v38 = vpop.permute.xlu0 %6737 }
0x2691   :  { %v6742_v46 = vsel %vm671_vm3, %v6736_v30, %v6738_v38  ;;  %v6740_v28 = vpop.permute.xlu1 %6739  ;;  %v6818_v45 = vpack.c.bf16 %v6746_v41, %v6730_v50 }
0x2692   :  { %v6747_v58 = vmul.f32 %v6742_v46, %v10883_v10  ;;  %v6741_v3 = vsel %vm671_vm3, %v6738_v38, %v6740_v28  ;;  %v6744_v8 = vsel %vm671_vm3, %v6740_v28, %v6734_v18 }
0x2693   :  { %v6745_v4 = vmul.f32 %v6744_v8, %v10889_v55  ;;  %v6748_v44 = vmul.f32 %v6741_v3, %v10897_v61  ;;  %6852 = vmatprep.subr.bf16.mxu1 %v6818_v45 }
0x2694   :  { %v6750_v6 = vpop.permute.xlu0 %6749  ;;  %v6819_v50 = vpack.c.bf16 %v6747_v58, %v6731_v54 }
0x2695   :  { %v6817_v15 = vpack.c.bf16 %v6745_v4, %v6729_v32  ;;  %v6752_v30 = vpop.permute.xlu1 %6751  ;;  %v6820_v11 = vpack.c.bf16 %v6748_v44, %v6732_v9 }
0x2696   :  { %v6759_v41 = vsel %vm696_vm8, %v6750_v6, %v6752_v30 }
0x2697   :  { %6853 = vmatpush1.bf16.msra.mxu1 %v6817_v15  ;;  %6893 = vmatprep.subr.bf16.mxu0 %v6820_v11  ;;  %v6761_v1 = vmul.f32 %v6759_v41, %v13452_v13 }
0x2698   :  { %v6754_v18 = vpop.permute.xlu0 %6753  ;;  %6894 = vmatpush1.bf16.msra.mxu0 %v6819_v50 }
0x2699   :  { %v6758_v33 = vsel %vm696_vm8, %v6752_v30, %v6754_v18  ;;  %v6756_v38 = vpop.permute.xlu1 %6755  ;;  %v6821_v32 = vpack.c.bf16 %v6761_v1, %v12606_v53 }
0x269a   :  { %v6762_v51 = vmul.f32 %v6758_v33, %v13450_v12  ;;  %v6757_v46 = vsel %vm696_vm8, %v6754_v18, %v6756_v38  ;;  %v6760_v28 = vsel %vm696_vm8, %v6756_v38, %v6750_v6 }
0x269b   :  { %v6763_v45 = vmul.f32 %v6757_v46, %v13454_v23  ;;  %v6764_v58 = vmul.f32 %v6760_v28, %v13455_v31 }
0x269c   :  { %v6766_v3 = vpop.permute.xlu0 %6765  ;;  %v6822_v8 = vpack.c.bf16 %v6762_v51, %v12610_v36 }
0x269d   :  { %v6823_v9 = vpack.c.bf16 %v6763_v45, %v12614_v35  ;;  %v6768_v4 = vpop.permute.xlu1 %6767  ;;  %v6824_v44 = vpack.c.bf16 %v6764_v58, %v12616_v29 }
0x269e   :  { %6854 = vmatprep.subr.bf16.mxu1 %v6822_v8  ;;  %v6775_v11 = vsel %vm721_vm9, %v6766_v3, %v6768_v4 }
0x269f   :  { %6855 = vmatpush1.bf16.msra.mxu1 %v6821_v32  ;;  %6895 = vmatprep.subr.bf16.mxu0 %v6824_v44  ;;  %v6777_v41 = vmul.f32 %v6775_v11, %v13458_v27 }
0x26a0   :  { %v6770_v54 = vpop.permute.xlu0 %6769  ;;  %6896 = vmatpush1.bf16.msra.mxu0 %v6823_v9 }
0x26a1   :  { %v6772_v6 = vpop.permute.xlu1 %6771  ;;  %v6774_v53 = vsel %vm721_vm9, %v6768_v4, %v6770_v54 }
0x26a2   :  { %v6773_v35 = vsel %vm721_vm9, %v6770_v54, %v6772_v6  ;;  %v6776_v29 = vsel %vm721_vm9, %v6772_v6, %v6766_v3  ;;  %v6778_v38 = vmul.f32 %v6774_v53, %v13459_v63 }
0x26a3   :  { %v6779_v45 = vmul.f32 %v6773_v35, %v13460_v2  ;;  %v6780_v58 = vmul.f32 %v6776_v29, %v13461_v24 }
0x26a4   :  { %v6782_v15 = vpop.permute.xlu0 %6781 }
0x26a5   :  { %v6784_v30 = vpop.permute.xlu1 %6783 }
0x26a6   :  { %v6791_v36 = vsel %vm746_vm10, %v6782_v15, %v6784_v30 }
0x26a7   :  { %v6793_v18 = vmul.f32 %v6791_v36, %v13466_v42 }
0x26a8   :  { %v6786_v50 = vpop.permute.xlu0 %6785 }
0x26a9   :  { %v6790_v1 = vsel %vm746_vm10, %v6784_v30, %v6786_v50  ;;  %v6788_v33 = vpop.permute.xlu1 %6787  ;;  %v6825_v4 = vpack.c.bf16 %v6793_v18, %v6777_v41 }
0x26aa   :  { %v6794_v51 = vmul.f32 %v6790_v1, %v13467_v5  ;;  %v6789_v46 = vsel %vm746_vm10, %v6786_v50, %v6788_v33  ;;  %v6792_v28 = vsel %vm746_vm10, %v6788_v33, %v6782_v15 }
0x26ab   :  { %v6795_v3 = vmul.f32 %v6789_v46, %v13468_v20  ;;  %v6796_v8 = vmul.f32 %v6792_v28, %v13469_v60 }
0x26ac   :  { %v6798_v32 = vpop.permute.xlu0 %6797  ;;  %v6826_v9 = vpack.c.bf16 %v6794_v51, %v6778_v38 }
0x26ad   :  { %v6827_v44 = vpack.c.bf16 %v6795_v3, %v6779_v45  ;;  %v6800_v54 = vpop.permute.xlu1 %6799  ;;  %v6828_v6 = vpack.c.bf16 %v6796_v8, %v6780_v58  ;;  %v6834_v3 = vld [vmem:[#allocation27] sm:$0xf] }
0x26ae   :  { %v6807_v30 = vsel %vm13471_vm5, %v6798_v32, %v6800_v54  ;;  %6856 = vmatprep.subr.bf16.mxu1 %v6826_v9  ;;  %vm13494_vm5 = vcmask 588800  }
0x26af   :  { %v6809_v15 = vmul.f32 %v6807_v30, %v13479_v17  ;;  %6857 = vmatpush1.bf16.msra.mxu1 %v6825_v4  ;;  %6897 = vmatprep.subr.bf16.mxu0 %v6828_v6 }
0x26b0   :  { %v6802_v11 = vpop.permute.xlu0 %6801  ;;  %6898 = vmatpush1.bf16.msra.mxu0 %v6827_v44 }
0x26b1   :  { %v6806_v36 = vsel %vm13491_vm11, %v6800_v54, %v6802_v11  ;;  %v6804_v53 = vpop.permute.xlu1 %6803  ;;  %v6829_v35 = vpack.c.bf16 %v6809_v15, %v6809_v15  ;;  %vm13495_vm11 = vmmov %vm13494_vm5 }
0x26b2   :  { %v6810_v29 = vmul.f32 %v6806_v36, %v13480_v40  ;;  %v6805_v50 = vsel %vm13492_vm6, %v6802_v11, %v6804_v53  ;;  %v6808_v41 = vsel %vm13493_vm15, %v6804_v53, %v6798_v32  ;;  %vm13496_vm15 = vmmov %vm13492_vm6 }
0x26b3   :  { %v6811_v18 = vmul.f32 %v6805_v50, %v13485_v37  ;;  %v6812_v1 = vmul.f32 %v6808_v41, %v13486_v0  ;;  %v6839_v45 = vsel %vm867_vm7, %v6829_v35, 0 }
0x26b4   :  { %v6830_v33 = vpack.c.bf16 %v6810_v29, %v6810_v29  ;;  %v6538_v38 = vpop.permute.xlu0 %6537 }
0x26b5   :  { %v6831_v51 = vpack.c.bf16 %v6811_v18, %v6811_v18  ;;  %v6832_v46 = vpack.c.bf16 %v6812_v1, %v6812_v1  ;;  %v6540_v28 = vpop.permute.xlu1 %6539 }
0x26b6   :  { %8099 = vmatprep.subr.msk.bf16.mxu1 %vm867_vm7, %v6830_v33  ;;  %v6547_v9 = vsel %vm600_vm0, %v6538_v38, %v6540_v28 }
0x26b7   :  { %6859 = vmatpush1.bf16.msra.mxu1 %v6839_v45  ;;  %8101 = vmatprep.subr.msk.bf16.mxu0 %vm867_vm7, %v6832_v46  ;;  %v6845_v58 = vsel %vm867_vm7, %v6831_v51, 0  ;;  %v6550_v6 = vmul.f32 %v6547_v9, %v13490_v26 }
0x26b8   :  { %6900 = vmatpush1.bf16.msra.mxu0 %v6845_v58  ;;  %v6542_v8 = vpop.permute.xlu0 %6541 }
0x26b9   :  { %v6544_v32 = vpop.permute.xlu1 %6543  ;;  %v6546_v53 = vsel %vm600_vm0, %v6540_v28, %v6542_v8 }
0x26ba   :  { %8100 = vmatmul.mubr.msk.bf16.vlgmr.msra.gmra.mrb[140].mxu1 %vm13494_vm5, %v6834_v3  ;;  %v6545_v15 = vsel %vm600_vm0, %v6542_v8, %v6544_v32  ;;  %v6548_v11 = vsel %vm600_vm0, %v6544_v32, %v6538_v38  ;;  %v6551_v28 = vmul.f32 %v6546_v53, %v10842_v39  ;;  %vm13497_vm5 = vmmov %vm13492_vm6 }
0x26bb   :  { %8102 = vmatmul.mubr.msk.bf16.vlgmr.msra.gmra.mrb[116].mxu0 %vm13495_vm11, %v6834_v3  ;;  %6979 = vmatprep.mubr.bf16.mxu1 %v13487_v43  ;;  %v6549_v33 = vmul.f32 %v6548_v11, %v10816_v56  ;;  %v6552_v38 = vmul.f32 %v6545_v15, %v10820_v47  ;;  %vm13498_vm11 = vmmov %vm13497_vm5 }
0x26bc   :  { %v6554_v4 = vpop.permute.xlu0 %6553  ;;  %7020 = vmatprep.mubr.bf16.mxu0 %v13487_v43 }
0x26bd   :  { %v6556_v44 = vpop.permute.xlu1 %6555 }
0x26be   :  { %v6563_v54 = vsel %vm617_vm1, %v6554_v4, %v6556_v44 }
0x26bf   :  { %v6566_v30 = vmul.f32 %v6563_v54, %v10810_v34 }
0x26c0   :  { %v6558_v36 = vpop.permute.xlu0 %6557 }
0x26c1   :  { %v6562_v35 = vsel %vm617_vm1, %v6556_v44, %v6558_v36  ;;  %v6560_v29 = vpop.permute.xlu1 %6559  ;;  %v6666_v50 = vpack.c.bf16 %v6566_v30, %v6550_v6 }
0x26c2   :  { %v6567_v41 = vmul.f32 %v6562_v35, %v10824_v48  ;;  %v6561_v18 = vsel %vm617_vm1, %v6558_v36, %v6560_v29  ;;  %v6564_v1 = vsel %vm617_vm1, %v6560_v29, %v6554_v4 }
0x26c3   :  { %v6565_v51 = vmul.f32 %v6564_v1, %v10830_v59  ;;  %v6568_v46 = vmul.f32 %v6561_v18, %v10838_v62  ;;  %6947 = vmatprep.subr.bf16.mxu1 %v6666_v50 }
0x26c4   :  { %v6570_v45 = vpop.permute.xlu0 %6569  ;;  %v6667_v32 = vpack.c.bf16 %v6567_v41, %v6551_v28 }
0x26c5   :  { %v6665_v58 = vpack.c.bf16 %v6565_v51, %v6549_v33  ;;  %v6572_v3 = vpop.permute.xlu1 %6571  ;;  %v6668_v8 = vpack.c.bf16 %v6568_v46, %v6552_v38 }
0x26c6   :  { %v6579_v44 = vsel %vm646_vm2, %v6570_v45, %v6572_v3 }
0x26c7   :  { %6948 = vmatpush1.bf16.msra.mxu1 %v6665_v58  ;;  %6988 = vmatprep.subr.bf16.mxu0 %v6668_v8  ;;  %v6582_v15 = vmul.f32 %v6579_v44, %v10862_v21 }
0x26c8   :  { %v6574_v9 = vpop.permute.xlu0 %6573  ;;  %6989 = vmatpush1.bf16.msra.mxu0 %v6667_v32 }
0x26c9   :  { %v6576_v4 = vpop.permute.xlu1 %6575  ;;  %v6578_v29 = vsel %vm646_vm2, %v6572_v3, %v6574_v9 }
0x26ca   :  { %v6577_v36 = vsel %vm646_vm2, %v6574_v9, %v6576_v4  ;;  %v6580_v53 = vsel %vm646_vm2, %v6576_v4, %v6570_v45  ;;  %v6583_v58 = vmul.f32 %v6578_v29, %v10901_v52 }
0x26cb   :  { %v6581_v51 = vmul.f32 %v6580_v53, %v10872_v49  ;;  %v6584_v46 = vmul.f32 %v6577_v36, %v10879_v7 }
0x26cc   :  { %v6586_v54 = vpop.permute.xlu0 %6585 }
0x26cd   :  { %v6588_v6 = vpop.permute.xlu1 %6587 }
0x26ce   :  { %v6595_v30 = vsel %vm671_vm3, %v6586_v54, %v6588_v6 }
0x26cf   :  { %v6598_v11 = vmul.f32 %v6595_v30, %v10866_v19 }
0x26d0   :  { %v6590_v35 = vpop.permute.xlu0 %6589 }
0x26d1   :  { %v6594_v50 = vsel %vm671_vm3, %v6588_v6, %v6590_v35  ;;  %v6592_v41 = vpop.permute.xlu1 %6591  ;;  %v6670_v18 = vpack.c.bf16 %v6598_v11, %v6582_v15 }
0x26d2   :  { %v6599_v1 = vmul.f32 %v6594_v50, %v10883_v10  ;;  %v6593_v33 = vsel %vm671_vm3, %v6590_v35, %v6592_v41  ;;  %v6596_v38 = vsel %vm671_vm3, %v6592_v41, %v6586_v54 }
0x26d3   :  { %v6597_v28 = vmul.f32 %v6596_v38, %v10889_v55  ;;  %v6600_v45 = vmul.f32 %v6593_v33, %v10897_v61  ;;  %6949 = vmatprep.subr.bf16.mxu1 %v6670_v18 }
0x26d4   :  { %v6602_v3 = vpop.permute.xlu0 %6601  ;;  %v6671_v4 = vpack.c.bf16 %v6599_v1, %v6583_v58 }
0x26d5   :  { %v6669_v8 = vpack.c.bf16 %v6597_v28, %v6581_v51  ;;  %v6604_v32 = vpop.permute.xlu1 %6603  ;;  %v6672_v9 = vpack.c.bf16 %v6600_v45, %v6584_v46 }
0x26d6   :  { %v6611_v44 = vsel %vm696_vm8, %v6602_v3, %v6604_v32 }
0x26d7   :  { %6950 = vmatpush1.bf16.msra.mxu1 %v6669_v8  ;;  %6990 = vmatprep.subr.bf16.mxu0 %v6672_v9  ;;  %v6613_v6 = vmul.f32 %v6611_v44, %v13452_v13 }
0x26d8   :  { %v6606_v54 = vpop.permute.xlu0 %6605  ;;  %6991 = vmatpush1.bf16.msra.mxu0 %v6671_v4 }
0x26d9   :  { %v6610_v30 = vsel %vm696_vm8, %v6604_v32, %v6606_v54  ;;  %v6608_v15 = vpop.permute.xlu1 %6607  ;;  %v6673_v18 = vpack.c.bf16 %v6613_v6, %v12646_v57 }
0x26da   :  { %v6614_v11 = vmul.f32 %v6610_v30, %v13450_v12  ;;  %v6609_v36 = vsel %vm696_vm8, %v6606_v54, %v6608_v15  ;;  %v6612_v53 = vsel %vm696_vm8, %v6608_v15, %v6602_v3 }
0x26db   :  { %v6615_v35 = vmul.f32 %v6609_v36, %v13454_v23  ;;  %v6616_v29 = vmul.f32 %v6612_v53, %v13455_v31 }
0x26dc   :  { %v6618_v50 = vpop.permute.xlu0 %6617  ;;  %v6674_v41 = vpack.c.bf16 %v6614_v11, %v12650_v22 }
0x26dd   :  { %v6675_v1 = vpack.c.bf16 %v6615_v35, %v12654_v16  ;;  %v6620_v33 = vpop.permute.xlu1 %6619  ;;  %v6676_v38 = vpack.c.bf16 %v6616_v29, %v12658_v14 }
0x26de   :  { %6951 = vmatprep.subr.bf16.mxu1 %v6674_v41  ;;  %v6627_v58 = vsel %vm721_vm9, %v6618_v50, %v6620_v33 }
0x26df   :  { %6952 = vmatpush1.bf16.msra.mxu1 %v6673_v18  ;;  %6992 = vmatprep.subr.bf16.mxu0 %v6676_v38  ;;  %v6629_v8 = vmul.f32 %v6627_v58, %v13458_v27 }
0x26e0   :  { %v6622_v51 = vpop.permute.xlu0 %6621  ;;  %6993 = vmatpush1.bf16.msra.mxu0 %v6675_v1 }
0x26e1   :  { %v6624_v46 = vpop.permute.xlu1 %6623  ;;  %v6626_v57 = vsel %vm721_vm9, %v6620_v33, %v6622_v51 }
0x26e2   :  { %v6625_v16 = vsel %vm721_vm9, %v6622_v51, %v6624_v46  ;;  %v6628_v14 = vsel %vm721_vm9, %v6624_v46, %v6618_v50  ;;  %v6630_v44 = vmul.f32 %v6626_v57, %v13459_v63 }
0x26e3   :  { %v6631_v15 = vmul.f32 %v6625_v16, %v13460_v2  ;;  %v6632_v11 = vmul.f32 %v6628_v14, %v13461_v24 }
0x26e4   :  { %v6634_v28 = vpop.permute.xlu0 %6633 }
0x26e5   :  { %v6636_v45 = vpop.permute.xlu1 %6635 }
0x26e6   :  { %v6643_v22 = vsel %vm746_vm10, %v6634_v28, %v6636_v45 }
0x26e7   :  { %v6645_v32 = vmul.f32 %v6643_v22, %v13466_v42 }
0x26e8   :  { %v6638_v3 = vpop.permute.xlu0 %6637 }
0x26e9   :  { %v6642_v9 = vsel %vm746_vm10, %v6636_v45, %v6638_v3  ;;  %v6640_v4 = vpop.permute.xlu1 %6639  ;;  %v6677_v50 = vpack.c.bf16 %v6645_v32, %v6629_v8 }
0x26ea   :  { %v6646_v54 = vmul.f32 %v6642_v9, %v13467_v5  ;;  %v6641_v6 = vsel %vm746_vm10, %v6638_v3, %v6640_v4  ;;  %v6644_v30 = vsel %vm746_vm10, %v6640_v4, %v6634_v28 }
0x26eb   :  { %v6647_v36 = vmul.f32 %v6641_v6, %v13468_v20  ;;  %v6648_v53 = vmul.f32 %v6644_v30, %v13469_v60 }
0x26ec   :  { %v6650_v35 = vpop.permute.xlu0 %6649  ;;  %v6678_v29 = vpack.c.bf16 %v6646_v54, %v6630_v44  ;;  %v6833_v44 = vld [vmem:[#allocation25] sm:$0xf] }
0x26ed   :  { %v6679_v41 = vpack.c.bf16 %v6647_v36, %v6631_v15  ;;  %v6652_v18 = vpop.permute.xlu1 %6651  ;;  %v6680_v1 = vpack.c.bf16 %v6648_v53, %v6632_v11 }
0x26ee   :  { %v6659_v33 = vsel %vm13492_vm6, %v6650_v35, %v6652_v18  ;;  %6953 = vmatprep.subr.bf16.mxu1 %v6678_v29  ;;  %vm13499_vm6 = vcmask 588800  }
0x26ef   :  { %v6661_v38 = vmul.f32 %v6659_v33, %v13479_v17  ;;  %6954 = vmatpush1.bf16.msra.mxu1 %v6677_v50  ;;  %6994 = vmatprep.subr.bf16.mxu0 %v6680_v1 }
0x26f0   :  { %v6654_v51 = vpop.permute.xlu0 %6653  ;;  %6995 = vmatpush1.bf16.msra.mxu0 %v6679_v41 }
0x26f1   :  { %v6658_v46 = vsel %vm13496_vm15, %v6652_v18, %v6654_v51  ;;  %v6656_v28 = vpop.permute.xlu1 %6655  ;;  %v6681_v45 = vpack.c.bf16 %v6661_v38, %v6661_v38  ;;  %vm13500_vm15 = vmmov %vm13499_vm6 }
0x26f2   :  { %v6662_v58 = vmul.f32 %v6658_v46, %v13480_v40  ;;  %v6657_v22 = vsel %vm13497_vm5, %v6654_v51, %v6656_v28  ;;  %v6660_v57 = vsel %vm13498_vm11, %v6656_v28, %v6650_v35 }
0x26f3   :  { %v6663_v16 = vmul.f32 %v6657_v22, %v13485_v37  ;;  %v6664_v14 = vmul.f32 %v6660_v57, %v13486_v0  ;;  %v6936_v9 = vsel %vm867_vm7, %v6681_v45, 0 }
0x26f4   :  { %v6682_v3 = vpack.c.bf16 %v6662_v58, %v6662_v58 }
0x26f5   :  { %v6683_v8 = vpack.c.bf16 %v6663_v16, %v6663_v16  ;;  %v6684_v32 = vpack.c.bf16 %v6664_v14, %v6664_v14 }
0x26f6   :  { %8103 = vmatprep.subr.msk.bf16.mxu1 %vm867_vm7, %v6682_v3 }
0x26f7   :  { %6956 = vmatpush1.bf16.msra.mxu1 %v6936_v9  ;;  %8105 = vmatprep.subr.msk.bf16.mxu0 %vm867_vm7, %v6684_v32  ;;  %v6942_v4 = vsel %vm867_vm7, %v6683_v8, 0 }
0x26f8   :  { %6997 = vmatpush1.bf16.msra.mxu0 %v6942_v4 }
0x26fa   :  { %8104 = vmatmul.mubr.msk.bf16.vlgmr.msra.gmra.mrb[144].mxu1 %vm13499_vm6, %v6833_v44 }
0x26fb   :  { %8106 = vmatmul.mubr.msk.bf16.vlgmr.msra.gmra.mrb[120].mxu0 %vm13500_vm15, %v6833_v44  ;;  %7245 = vmatprep.mubr.bf16.mxu1 %v13487_v43 }
0x26fc   :  { %7286 = vmatprep.mubr.bf16.mxu0 %v13487_v43 }
0x2701   :  { %v7033_v29 = vpop.permute.xlu0 %7032 }
0x278d   :  { %v6884_v54 = vpop.f32.mrb[140].mxu1 }
0x278e   :  { %v6886_v6 = vpop.f32.mrb[141].mxu1  ;;  %v6925_v30 = vpop.f32.mrb[116].mxu0 }
0x278f   :  { %v6888_v15 = vpop.f32.mrb[142].mxu1  ;;  %v6927_v11 = vpop.f32.mrb[117].mxu0 }
0x2790   :  { %v6889_v36 = vpop.f32.mrb[143].mxu1  ;;  %v6929_v53 = vpop.f32.mrb[118].mxu0 }
0x2791   :  { %v6930_v35 = vpop.f32.mrb[119].mxu0 }
0x27cd   :  { %v6981_v50 = vpop.f32.mrb[144].mxu1 }
0x27ce   :  { %v6982_v41 = vadd.f32 %v6981_v50, %v6884_v54  ;;  %v6983_v18 = vpop.f32.mrb[145].mxu1  ;;  %v7022_v1 = vpop.f32.mrb[120].mxu0 }
0x27cf   :  { %v6984_v33 = vadd.f32 %v6983_v18, %v6886_v6  ;;  %v7023_v38 = vadd.f32 %v7022_v1, %v6925_v30  ;;  %v6985_v51 = vpop.f32.mrb[146].mxu1  ;;  %v7024_v46 = vpop.f32.mrb[121].mxu0 }
0x27d0   :  { %v7035_v28 = vadd.f32 %v7033_v29, %v6982_v41  ;;  %v7025_v45 = vadd.f32 %v7024_v46, %v6927_v11  ;;  %v6986_v58 = vpop.f32.mrb[147].mxu1  ;;  %v7026_v22 = vpop.f32.mrb[122].mxu0 }
0x27d1   :  { %v7036_v57 = vadd.f32 %v7033_v29, %v6984_v33  ;;  %v7027_v16 = vpop.f32.mrb[123].mxu0  ;;  %v7037_v3 = vadd.f32 %v7033_v29, %v7023_v38 }
0x27d2   :  { %v12967_v14 = vmax.f32 %v7035_v28, 0.0  ;;  %v7038_v32 = vadd.f32 %v7033_v29, %v7025_v45 }
0x27d3   :  { %v12969_v8 = vmax.f32 %v7036_v57, 0.0  ;;  %v12975_v9 = vmax.f32 %v7037_v3, 0.0 }
0x27d4   :  { %7044 = vrot.lane.b32.xlu1 %v12967_v14, %s9920_s20  ;;  %v12977_v4 = vmax.f32 %v7038_v32, 0.0 }
0x27d5   :  { %7046 = vrot.lane.b32.xlu0 %v12969_v8, %s9920_s20 }
0x27d8   :  { %7048 = vrot.lane.b32.xlu1 %v12975_v9, %s9920_s20 }
0x27d9   :  { %7050 = vrot.lane.b32.xlu0 %v12977_v4, %s9920_s20  ;;  %s13503_s20 = sld [smem:[#allocation89_spill]] }
0x27dc   :  { %7060 = vrot.lane.b32.xlu1 %v12967_v14, %s9918_s21 }
0x27dd   :  { %7062 = vrot.lane.b32.xlu0 %v12969_v8, %s9918_s21 }
0x27df   :  { %v7440_v6 = vld [vmem:[%s13503_s20] sm:$0xff] }
0x27e0   :  { %7064 = vrot.lane.b32.xlu1 %v12975_v9, %s9918_s21 }
0x27e1   :  { %7066 = vrot.lane.b32.xlu0 %v12977_v4, %s9918_s21  ;;  %s13501_s21 = sld [smem:[#allocation86_spill]] }
0x27e4   :  { %7076 = vrot.lane.b32.xlu1 %v12967_v14, %s9919_s29 }
0x27e5   :  { %7078 = vrot.lane.b32.xlu0 %v12969_v8, %s9919_s29 }
0x27e7   :  { %v7192_v44 = vld [vmem:[%s13501_s21] sm:$0xff] }
0x27e8   :  { %7080 = vrot.lane.b32.xlu1 %v12975_v9, %s9919_s29 }
0x27e9   :  { %7082 = vrot.lane.b32.xlu0 %v12977_v4, %s9919_s29  ;;  %s13502_s29 = sld [smem:[#allocation87_spill]] }
0x27ec   :  { %7092 = vrot.lane.b32.xlu1 %v12967_v14, %s9921_s26 }
0x27ed   :  { %7094 = vrot.lane.b32.xlu0 %v12969_v8, %s9921_s26 }
0x27ef   :  { %v7385_v54 = vld [vmem:[%s13502_s29] sm:$0x3] }
0x27f0   :  { %7096 = vrot.lane.b32.xlu1 %v12975_v9, %s9921_s26 }
0x27f1   :  { %7098 = vrot.lane.b32.xlu0 %v12977_v4, %s9921_s26  ;;  %s13504_s26 = sld [smem:[#allocation84_spill]] }
0x27f4   :  { %7108 = vrot.lane.b32.xlu1 %v12967_v14, %s9922_s8 }
0x27f5   :  { %7110 = vrot.lane.b32.xlu0 %v12969_v8, %s9922_s8 }
0x27f7   :  { %v7593_v30 = vld [vmem:[%s13504_s26] sm:$0x3] }
0x27f8   :  { %7112 = vrot.lane.b32.xlu1 %v12975_v9, %s9922_s8 }
0x27f9   :  { %7114 = vrot.lane.b32.xlu0 %v12977_v4, %s9922_s8  ;;  %s13512_s8 = sld [smem:[#allocation90_spill]] }
0x27fc   :  { %7124 = vrot.lane.b32.xlu1 %v12967_v14, %s9923_s13 }
0x27fd   :  { %7126 = vrot.lane.b32.xlu0 %v12969_v8, %s9923_s13 }
0x2800   :  { %7128 = vrot.lane.b32.xlu1 %v12975_v9, %s9923_s13 }
0x2801   :  { %7130 = vrot.lane.b32.xlu0 %v12977_v4, %s9923_s13 }
0x2804   :  { %7140 = vrot.lane.b32.xlu1 %v12967_v14, %s9924_s30 }
0x2805   :  { %7142 = vrot.lane.b32.xlu0 %v12969_v8, %s9924_s30 }
0x2808   :  { %7144 = vrot.lane.b32.xlu1 %v12975_v9, %s9924_s30 }
0x2809   :  { %7146 = vrot.lane.b32.xlu0 %v12977_v4, %s9924_s30 }
0x280c   :  { %7156 = vrot.lane.b32.xlu1 %v12967_v14, %s9925_s11 }
0x280d   :  { %7158 = vrot.lane.b32.xlu0 %v12969_v8, %s9925_s11 }
0x2810   :  { %7160 = vrot.lane.b32.xlu1 %v12975_v9, %s9925_s11 }
0x2811   :  { %7162 = vrot.lane.b32.xlu0 %v12977_v4, %s9925_s11 }
0x2814   :  { %7195 = vperm.xlu1 %8920, %v7192_v44  }
0x2815   :  { %7388 = vperm.xlu0 %8919, %v7385_v54  }
0x2818   :  { %7443 = vperm.xlu1 %8920, %v7440_v6  }
0x2819   :  { %7596 = vperm.xlu0 %8919, %v7593_v30  }
0x2846   :  { %v7045_v15 = vpop.permute.xlu1 %7044 }
0x2847   :  { %v7047_v11 = vpop.permute.xlu0 %7046 }
0x2848   :  { %v7054_v35 = vsel %vm600_vm0, %v7045_v15, %v7047_v11 }
0x2849   :  { %v7057_v18 = vmul.f32 %v7054_v35, %v13490_v26 }
0x284a   :  { %v7049_v36 = vpop.permute.xlu1 %7048 }
0x284b   :  { %v7051_v53 = vpop.permute.xlu0 %7050  ;;  %v7053_v46 = vsel %vm600_vm0, %v7047_v11, %v7049_v36 }
0x284c   :  { %v7052_v33 = vsel %vm600_vm0, %v7049_v36, %v7051_v53  ;;  %v7055_v38 = vsel %vm600_vm0, %v7051_v53, %v7045_v15  ;;  %v7058_v44 = vmul.f32 %v7053_v46, %v10842_v39  ;;  %vm13505_vm0 = vmmov %vm13497_vm5 }
0x284d   :  { %v7056_v57 = vmul.f32 %v7055_v38, %v10816_v56  ;;  %v7059_v16 = vmul.f32 %v7052_v33, %v10820_v47 }
0x284e   :  { %v7061_v29 = vpop.permute.xlu1 %7060 }
0x284f   :  { %v7063_v50 = vpop.permute.xlu0 %7062 }
0x2850   :  { %v7070_v41 = vsel %vm617_vm1, %v7061_v29, %v7063_v50 }
0x2851   :  { %v7073_v1 = vmul.f32 %v7070_v41, %v10810_v34 }
0x2852   :  { %v7065_v51 = vpop.permute.xlu1 %7064 }
0x2853   :  { %v7069_v28 = vsel %vm617_vm1, %v7063_v50, %v7065_v51  ;;  %v7067_v45 = vpop.permute.xlu0 %7066  ;;  %v7173_v58 = vpack.c.bf16 %v7073_v1, %v7057_v18 }
0x2854   :  { %v7074_v22 = vmul.f32 %v7069_v28, %v10824_v48  ;;  %v7068_v34 = vsel %vm617_vm1, %v7065_v51, %v7067_v45  ;;  %v7071_v26 = vsel %vm617_vm1, %v7067_v45, %v7061_v29  ;;  %vm13506_vm1 = vmmov %vm13505_vm0 }
0x2855   :  { %v7072_v3 = vmul.f32 %v7071_v26, %v10830_v59  ;;  %v7075_v32 = vmul.f32 %v7068_v34, %v10838_v62  ;;  %7213 = vmatprep.subr.bf16.mxu1 %v7173_v58 }
0x2856   :  { %v7077_v54 = vpop.permute.xlu1 %7076  ;;  %v7174_v15 = vpack.c.bf16 %v7074_v22, %v7058_v44 }
0x2857   :  { %v7172_v6 = vpack.c.bf16 %v7072_v3, %v7056_v57  ;;  %v7079_v48 = vpop.permute.xlu0 %7078  ;;  %v7175_v30 = vpack.c.bf16 %v7075_v32, %v7059_v16 }
0x2858   :  { %v7086_v56 = vsel %vm646_vm2, %v7077_v54, %v7079_v48 }
0x2859   :  { %7214 = vmatpush1.bf16.msra.mxu1 %v7172_v6  ;;  %7254 = vmatprep.subr.bf16.mxu0 %v7175_v30  ;;  %v7089_v39 = vmul.f32 %v7086_v56, %v10862_v21 }
0x285a   :  { %7255 = vmatpush1.bf16.msra.mxu0 %v7174_v15  ;;  %v7081_v11 = vpop.permute.xlu1 %7080 }
0x285b   :  { %v7083_v36 = vpop.permute.xlu0 %7082  ;;  %v7085_v41 = vsel %vm646_vm2, %v7079_v48, %v7081_v11 }
0x285c   :  { %v7084_v35 = vsel %vm646_vm2, %v7081_v11, %v7083_v36  ;;  %v7087_v29 = vsel %vm646_vm2, %v7083_v36, %v7077_v54  ;;  %v7090_v58 = vmul.f32 %v7085_v41, %v10901_v52  ;;  %vm13507_vm2 = vmmov %vm13505_vm0 }
0x285d   :  { %v7088_v51 = vmul.f32 %v7087_v29, %v10872_v49  ;;  %v7091_v46 = vmul.f32 %v7084_v35, %v10879_v7 }
0x285e   :  { %v7093_v47 = vpop.permute.xlu1 %7092 }
0x285f   :  { %v7095_v59 = vpop.permute.xlu0 %7094 }
0x2860   :  { %v7102_v62 = vsel %vm671_vm3, %v7093_v47, %v7095_v59 }
0x2861   :  { %v7105_v53 = vmul.f32 %v7102_v62, %v10866_v19 }
0x2862   :  { %v7097_v50 = vpop.permute.xlu1 %7096 }
0x2863   :  { %v7101_v18 = vsel %vm671_vm3, %v7095_v59, %v7097_v50  ;;  %v7099_v1 = vpop.permute.xlu0 %7098  ;;  %v7177_v33 = vpack.c.bf16 %v7105_v53, %v7089_v39 }
0x2864   :  { %v7106_v38 = vmul.f32 %v7101_v18, %v10883_v10  ;;  %v7100_v21 = vsel %vm671_vm3, %v7097_v50, %v7099_v1  ;;  %v7103_v19 = vsel %vm671_vm3, %v7099_v1, %v7093_v47  ;;  %vm13508_vm3 = vmmov %vm13505_vm0 }
0x2865   :  { %v7104_v28 = vmul.f32 %v7103_v19, %v10889_v55  ;;  %v7107_v45 = vmul.f32 %v7100_v21, %v10897_v61  ;;  %7215 = vmatprep.subr.bf16.mxu1 %v7177_v33 }
0x2866   :  { %v7109_v22 = vpop.permute.xlu1 %7108  ;;  %v7178_v57 = vpack.c.bf16 %v7106_v38, %v7090_v58 }
0x2867   :  { %v7176_v34 = vpack.c.bf16 %v7104_v28, %v7088_v51  ;;  %v7111_v10 = vpop.permute.xlu0 %7110  ;;  %v7179_v26 = vpack.c.bf16 %v7107_v45, %v7091_v46 }
0x2868   :  { %v7118_v16 = vsel %vm696_vm8, %v7109_v22, %v7111_v10 }
0x2869   :  { %7216 = vmatpush1.bf16.msra.mxu1 %v7176_v34  ;;  %7256 = vmatprep.subr.bf16.mxu0 %v7179_v26  ;;  %v7120_v7 = vmul.f32 %v7118_v16, %v13452_v13  ;;  %v9240_v16 = vld [vmem:[%s13402_s1] sm:$0xff]  }
0x286a   :  { %7257 = vmatpush1.bf16.msra.mxu0 %v7178_v57  ;;  %v7113_v49 = vpop.permute.xlu1 %7112  ;;  %v7043_v57 = vld [vmem:[#allocation28] sm:$0xf] }
0x286b   :  { %v7117_v55 = vsel %vm696_vm8, %v7111_v10, %v7113_v49  ;;  %v7115_v61 = vpop.permute.xlu0 %7114  ;;  %v7180_v13 = vpack.c.bf16 %v7120_v7, %v12967_v14  ;;  %v9242_v7 = vld [vmem:[%s13402_s1 + $0x48] sm:$0xff]  }
0x286c   :  { %v7121_v52 = vmul.f32 %v7117_v55, %v13450_v12  ;;  %v7116_v3 = vsel %vm696_vm8, %v7113_v49, %v7115_v61  ;;  %v7119_v32 = vsel %vm696_vm8, %v7115_v61, %v7109_v22  ;;  %vm13509_vm8 = vmmov %vm13499_vm6  ;;  %v9241_v49 = vld [vmem:[%s13402_s1 + $0x80] sm:$0xff]   ;;  %v9243_v55 = vld [vmem:[%s13402_s1 + $0xc8] sm:$0xff]  }
0x286d   :  { %v7122_v44 = vmul.f32 %v7116_v3, %v13454_v23  ;;  %v7123_v54 = vmul.f32 %v7119_v32, %v13455_v31  ;;  %v9244_v61 = vld [vmem:[%s13402_s1 + $0x8] sm:$0xff]   ;;  %v9246_v3 = vld [vmem:[%s13402_s1 + $0x50] sm:$0xff]  }
0x286e   :  { %v7125_v6 = vpop.permute.xlu1 %7124  ;;  %v7181_v48 = vpack.c.bf16 %v7121_v52, %v12969_v8  ;;  %v9245_v52 = vld [vmem:[%s13402_s1 + $0x88] sm:$0xff]   ;;  %v9247_v32 = vld [vmem:[%s13402_s1 + $0xd0] sm:$0xff]  }
0x286f   :  { %v7182_v30 = vpack.c.bf16 %v7122_v44, %v12975_v9  ;;  %v7127_v15 = vpop.permute.xlu0 %7126  ;;  %v7183_v12 = vpack.c.bf16 %v7123_v54, %v12977_v4  ;;  %v9248_v44 = vld [vmem:[%s13402_s1 + $0x10] sm:$0xff]  }
0x2870   :  { %7217 = vmatprep.subr.bf16.mxu1 %v7181_v48  ;;  %v7134_v31 = vsel %vm721_vm9, %v7125_v6, %v7127_v15  ;;  %v9249_v54 = vld [vmem:[%s13402_s1 + $0x90] sm:$0xff]   ;;  %v9251_v48 = vld [vmem:[%s13402_s1 + $0xd8] sm:$0xff]  }
0x2871   :  { %7218 = vmatpush1.bf16.msra.mxu1 %v7180_v13  ;;  %7258 = vmatprep.subr.bf16.mxu0 %v7183_v12  ;;  %v7136_v59 = vmul.f32 %v7134_v31, %v13458_v27  ;;  %v9252_v13 = vld [vmem:[%s13402_s1 + $0x18] sm:$0xff]   ;;  %v9255_v12 = vld [vmem:[%s13402_s1 + $0xe0] sm:$0xff]   ;;  %v9260_v31 = vld [vmem:[%s13402_s1 + $0x28] sm:$0xff]  }
0x2872   :  { %7259 = vmatpush1.bf16.msra.mxu0 %v7182_v30  ;;  %v7129_v11 = vpop.permute.xlu1 %7128  ;;  %v9253_v30 = vld [vmem:[%s13402_s1 + $0x98] sm:$0xff]  }
0x2873   :  { %v7131_v36 = vpop.permute.xlu0 %7130  ;;  %v7133_v14 = vsel %vm721_vm9, %v7127_v15, %v7129_v11  ;;  %v9254_v15 = vld [vmem:[%s13402_s1 + $0x60] sm:$0xff]  }
0x2874   :  { %v7132_v9 = vsel %vm721_vm9, %v7129_v11, %v7131_v36  ;;  %v7135_v4 = vsel %vm721_vm9, %v7131_v36, %v7125_v6  ;;  %v7137_v35 = vmul.f32 %v7133_v14, %v13459_v63  ;;  %vm13510_vm9 = vmmov %vm13499_vm6  ;;  %v9250_v6 = vld [vmem:[%s13402_s1 + $0x58] sm:$0xff]   ;;  %v9256_v11 = vld [vmem:[%s13402_s1 + $0x20] sm:$0xff]  }
0x2875   :  { %v7138_v18 = vmul.f32 %v7132_v9, %v13460_v2  ;;  %v7139_v27 = vmul.f32 %v7135_v4, %v13461_v24  ;;  %v9257_v36 = vld [vmem:[%s13402_s1 + $0xa0] sm:$0xff]   ;;  %v9262_v14 = vld [vmem:[%s13402_s1 + $0x70] sm:$0xff]  }
0x2876   :  { %v7141_v56 = vpop.permute.xlu1 %7140  ;;  %v9263_v9 = vld [vmem:[%s13402_s1 + $0xf0] sm:$0xff]  }
0x2877   :  { %v7143_v23 = vpop.permute.xlu0 %7142  ;;  %v9264_v4 = vld [vmem:[%s13402_s1 + $0x30] sm:$0xff]  }
0x2878   :  { %v7150_v8 = vsel %vm746_vm10, %v7141_v56, %v7143_v23 }
0x2879   :  { %v7152_v62 = vmul.f32 %v7150_v8, %v13466_v42  ;;  %v9261_v8 = vld [vmem:[%s13402_s1 + $0xa8] sm:$0xff]  }
0x287a   :  { %v7145_v47 = vpop.permute.xlu1 %7144 }
0x287b   :  { %v7149_v39 = vsel %vm746_vm10, %v7143_v23, %v7145_v47  ;;  %v7147_v53 = vpop.permute.xlu0 %7146  ;;  %v7184_v21 = vpack.c.bf16 %v7152_v62, %v7136_v59  ;;  %v9259_v23 = vld [vmem:[%s13402_s1 + $0xe8] sm:$0xff]   ;;  %v9266_v59 = vld [vmem:[%s13402_s1 + $0x78] sm:$0xff]  }
0x287c   :  { %v7153_v29 = vmul.f32 %v7149_v39, %v13467_v5  ;;  %v7148_v50 = vsel %vm746_vm10, %v7145_v47, %v7147_v53  ;;  %v7151_v41 = vsel %vm746_vm10, %v7147_v53, %v7141_v56  ;;  %v9258_v56 = vld [vmem:[%s13402_s1 + $0x68] sm:$0xff]   ;;  %v9265_v47 = vld [vmem:[%s13402_s1 + $0xb0] sm:$0xff]   ;;  %v9267_v62 = vld [vmem:[%s13402_s1 + $0xf8] sm:$0xff]  }
0x287d   :  { %v7154_v42 = vmul.f32 %v7148_v50, %v13468_v20  ;;  %v7155_v1 = vmul.f32 %v7151_v41, %v13469_v60  ;;  %v9268_v39 = vld [vmem:[%s13402_s1 + $0x38] sm:$0xff]  }
0x287e   :  { %v7157_v33 = vpop.permute.xlu1 %7156  ;;  %v7185_v38 = vpack.c.bf16 %v7153_v29, %v7137_v35  ;;  %v9269_v53 = vld [vmem:[%s13402_s1 + $0xb8] sm:$0xff]   ;;  %v13511_v35 = vmov 0.0  }
0x287f   :  { %v7186_v63 = vpack.c.bf16 %v7154_v42, %v7138_v18  ;;  %v7159_v19 = vpop.permute.xlu0 %7158  ;;  %v7187_v5 = vpack.c.bf16 %v7155_v1, %v7139_v27 }
0x2880   :  { %v7166_v51 = vsel %vm13505_vm0, %v7157_v33, %v7159_v19  ;;  %7219 = vmatprep.subr.bf16.mxu1 %v7185_v38 }
0x2881   :  { %v7168_v46 = vmul.f32 %v7166_v51, %v13479_v17  ;;  %7220 = vmatpush1.bf16.msra.mxu1 %v7184_v21  ;;  %7260 = vmatprep.subr.bf16.mxu0 %v7187_v5 }
0x2882   :  { %7261 = vmatpush1.bf16.msra.mxu0 %v7186_v63  ;;  %v7161_v2 = vpop.permute.xlu1 %7160 }
0x2883   :  { %v7165_v24 = vsel %vm13506_vm1, %v7159_v19, %v7161_v2  ;;  %v7163_v20 = vpop.permute.xlu0 %7162  ;;  %v7188_v60 = vpack.c.bf16 %v7168_v46, %v7168_v46 }
0x2884   :  { %v7169_v28 = vmul.f32 %v7165_v24, %v13480_v40  ;;  %v7164_v45 = vsel %vm13507_vm2, %v7161_v2, %v7163_v20  ;;  %v7167_v58 = vsel %vm13508_vm3, %v7163_v20, %v7157_v33 }
0x2885   :  { %v7170_v17 = vmul.f32 %v7164_v45, %v13485_v37  ;;  %v7171_v22 = vmul.f32 %v7167_v58, %v13486_v0  ;;  %v7202_v40 = vsel %vm867_vm7, %v7188_v60, 0  ;;  %v9238_v37 = vld [vmem:[%s13402_s1 + $0x40] sm:$0xff]  }
0x2886   :  { %v7189_v34 = vpack.c.bf16 %v7169_v28, %v7169_v28  ;;  %v9239_v0 = vld [vmem:[%s13402_s1 + $0xc0] sm:$0xff]  }
0x2887   :  { %v7190_v10 = vpack.c.bf16 %v7170_v17, %v7170_v17  ;;  %v7191_v26 = vpack.c.bf16 %v7171_v22, %v7171_v22 }
0x2888   :  { %8107 = vmatprep.subr.msk.bf16.mxu1 %vm867_vm7, %v7189_v34 }
0x2889   :  { %7222 = vmatpush1.bf16.msra.mxu1 %v7202_v40  ;;  %8109 = vmatprep.subr.msk.bf16.mxu0 %vm867_vm7, %v7191_v26  ;;  %v7208_v25 = vsel %vm867_vm7, %v7190_v10, 0 }
0x288a   :  { %7263 = vmatpush1.bf16.msra.mxu0 %v7208_v25  ;;  %8404 = vmatprep.subr.bf16.mxu1 %v9238_v37 }
0x288b   :  { %8426 = vmatprep.subr.bf16.mxu0 %v9239_v0 }
0x288c   :  { %8108 = vmatmul.mubr.msk.bf16.vlgmr.msra.gmra.mrb[148].mxu1 %vm13509_vm8, %v7043_v57 }
0x288d   :  { %8110 = vmatmul.mubr.msk.bf16.vlgmr.msra.gmra.mrb[124].mxu0 %vm13510_vm9, %v7043_v57  ;;  %8405 = vmatpush3.bf16.msra.mxu1 %v9240_v16 }
0x288e   :  { %8427 = vmatpush3.bf16.msra.mxu0 %v9241_v49  ;;  %8406 = vmatprep.subr.bf16.mxu1 %v9242_v7  ;;  %v7383_v7 = vld [vmem:[#allocation24] sm:$0x1] }
0x288f   :  { %8428 = vmatprep.subr.bf16.mxu0 %v9243_v55  ;;  %v13513_v55 = vld [vmem:[#allocation117_spill] sm:$0xff] }
0x2891   :  { %8407 = vmatpush3.bf16.msra.mxu1 %v9244_v61  ;;  %v13514_v61 = vld [vmem:[#allocation119_spill] sm:$0xff] }
0x2892   :  { %8429 = vmatpush3.bf16.msra.mxu0 %v9245_v52  ;;  %8408 = vmatprep.subr.bf16.mxu1 %v9246_v3 }
0x2893   :  { %8430 = vmatprep.subr.bf16.mxu0 %v9247_v32  ;;  %v7196_v29 = vpop.permute.xlu1 %7195 }
0x2894   :  { %v7389_v52 = vpop.permute.xlu0 %7388 }
0x2895   :  { %8409 = vmatpush3.bf16.msra.mxu1 %v9248_v44 }
0x2896   :  { %8431 = vmatpush3.bf16.msra.mxu0 %v9249_v54  ;;  %8410 = vmatprep.subr.bf16.mxu1 %v9250_v6 }
0x2897   :  { %8432 = vmatprep.subr.bf16.mxu0 %v9251_v48 }
0x2899   :  { %8411 = vmatpush3.bf16.msra.mxu1 %v9252_v13 }
0x289a   :  { %8433 = vmatpush3.bf16.msra.mxu0 %v9253_v30  ;;  %8412 = vmatprep.subr.bf16.mxu1 %v9254_v15  ;;  %v7438_v15 = vld [vmem:[%s13512_s8] sm:$0xf] }
0x289b   :  { %8434 = vmatprep.subr.bf16.mxu0 %v9255_v12  ;;  %v13515_v12 = vld [vmem:[#allocation118_spill] sm:$0xff] }
0x289d   :  { %8413 = vmatpush3.bf16.msra.mxu1 %v9256_v11  ;;  %v13516_v11 = vld [vmem:[#allocation120_spill] sm:$0xff] }
0x289e   :  { %8435 = vmatpush3.bf16.msra.mxu0 %v9257_v36  ;;  %8414 = vmatprep.subr.bf16.mxu1 %v9258_v56  ;;  %v7444_v36 = vpop.permute.xlu1 %7443 }
0x289f   :  { %8436 = vmatprep.subr.bf16.mxu0 %v9259_v23 }
0x28a1   :  { %8415 = vmatpush3.bf16.msra.mxu1 %v9260_v31 }
0x28a2   :  { %8437 = vmatpush3.bf16.msra.mxu0 %v9261_v8  ;;  %8416 = vmatprep.subr.bf16.mxu1 %v9262_v14 }
0x28a3   :  { %8438 = vmatprep.subr.bf16.mxu0 %v9263_v9 }
0x28a5   :  { %8417 = vmatpush3.bf16.msra.mxu1 %v9264_v4 }
0x28a6   :  { %8439 = vmatpush3.bf16.msra.mxu0 %v9265_v47  ;;  %8418 = vmatprep.subr.bf16.mxu1 %v9266_v59 }
0x28a7   :  { %8440 = vmatprep.subr.bf16.mxu0 %v9267_v62 }
0x28a9   :  { %8419 = vmatpush3.bf16.msra.mxu1 %v9268_v39 }
0x28aa   :  { %8441 = vmatpush3.bf16.msra.mxu0 %v9269_v53  ;;  %8792 = vmatprep.subr.bf16.mxu1 %v13511_v35 }
0x28ab   :  { %8798 = vmatprep.subr.bf16.mxu0 %v13511_v35 }
0x295f   :  { %v7247_v50 = vpop.f32.mrb[148].mxu1 }
0x2960   :  { %v7248_v41 = vadd.f32 %v7247_v50, %v7196_v29  ;;  %v7249_v18 = vpop.f32.mrb[149].mxu1  ;;  %v7288_v27 = vpop.f32.mrb[124].mxu0 }
0x2961   :  { %v7250_v42 = vadd.f32 %v7249_v18, %v7196_v29  ;;  %v7289_v1 = vadd.f32 %v7288_v27, %v7196_v29  ;;  %v7251_v33 = vpop.f32.mrb[150].mxu1  ;;  %v7290_v38 = vpop.f32.mrb[125].mxu0 }
0x2962   :  { %v13183_v21 = vmax.f32 %v7248_v41, 0.0  ;;  %v7291_v63 = vadd.f32 %v7290_v38, %v7196_v29  ;;  %v7252_v19 = vpop.f32.mrb[151].mxu1  ;;  %v7292_v5 = vpop.f32.mrb[126].mxu0 }
0x2963   :  { %v13185_v51 = vmax.f32 %v7250_v42, 0.0  ;;  %v13187_v46 = vmax.f32 %v7289_v1, 0.0  ;;  %v7293_v2 = vpop.f32.mrb[127].mxu0 }
0x2964   :  { %v13189_v24 = vmax.f32 %v7291_v63, 0.0  ;;  %v7299_v60 = vpack.c.bf16 %v13183_v21, %v13183_v21 }
0x2965   :  { %v7300_v20 = vpack.c.bf16 %v13185_v51, %v13185_v51  ;;  %v7301_v45 = vpack.c.bf16 %v13187_v46, %v13187_v46 }
0x2966   :  { %v7302_v28 = vpack.c.bf16 %v13189_v24, %v13189_v24 }
0x2967   :  { %7335 = vmatprep.mubr.bf16.mxu1 %v7300_v20 }
0x2968   :  { %7336 = vmatmul.mubr.bf16.vlgmr.msra.gmra.mrb[152].mxu1 %v7299_v60  ;;  %7375 = vmatprep.mubr.bf16.mxu0 %v7302_v28  ;;  %v7597_v28 = vpop.permute.xlu0 %7596 }
0x2969   :  { %7376 = vmatmul.mubr.bf16.vlgmr.msra.gmra.mrb[128].mxu0 %v7301_v45  ;;  %8794 = vmatprep.mubr.msk.bf16.mxu1 %vm9929_vm12, %v13511_v35 }
0x296a   :  { %8800 = vmatprep.mubr.msk.bf16.mxu0 %vm9929_vm12, %v13511_v35 }
0x2a3b   :  { %v8420_v58 = vpop.f32.mrb[152].mxu1 }
0x2a3c   :  { %v8421_v17 = vpop.f32.mrb[153].mxu1  ;;  %v8442_v22 = vpop.f32.mrb[128].mxu0 }
0x2a3d   :  { %v8422_v34 = vadd.f32 %v8421_v17, %v8420_v58  ;;  %v8423_v10 = vpop.f32.mrb[154].mxu1  ;;  %v8443_v26 = vpop.f32.mrb[129].mxu0 }
0x2a3e   :  { %v8444_v40 = vadd.f32 %v8443_v26, %v8442_v22  ;;  %v8424_v25 = vpop.f32.mrb[155].mxu1  ;;  %v8445_v57 = vpop.f32.mrb[130].mxu0 }
0x2a3f   :  { %v8446_v37 = vpop.f32.mrb[131].mxu0 }
0x2a40   :  { %v7378_v0 = vadd.f32 %v8444_v40, %v8422_v34  ;;  %v13517_v40 = vld [vmem:[#allocation99_spill] sm:$0xff] }
0x2a42   :  { %v7384_v16 = vpack.c.bf16 %v7378_v0, %v7378_v0 }
0x2a44   :  { %v7395_v49 = vsel %vm867_vm7, %v7384_v16, 0 }
0x2a45   :  { %8793 = vmatpush3.bf16.msra.mxu1 %v7395_v49 }
0x2a46   :  { %8113 = vmatprep.subr.msk.bf16.mxu1 %vm852_vm4, %v13513_v55 }
0x2a48   :  { %8795 = vmatmul.mubr.msk.bf16.vlgmr.msra.gmra.mrb[156].mxu1 %vm1735_vm13, %v7383_v7 }
0x2a49   :  { %7503 = vmatpush1.bf16.msra.mxu1 %v13514_v61  ;;  %7534 = vmatprep.mubr.bf16.mxu1 %v13487_v43 }
0x2b1b   :  { %v7431_v3 = vpop.f32.mrb[156].mxu1 }
0x2b1c   :  { %v7432_v32 = vadd.f32 %v7431_v3, %v7389_v52  ;;  %v8796_v44 = vpop.f32.mrb[157].mxu1 }
0x2b1d   :  { %v7434_v54 = vpop.f32.mrb[158].mxu1 }
0x2b1e   :  { %v7437_v6 = vmax.f32 %v7432_v32, 0.0  ;;  %v8797_v48 = vpop.f32.mrb[159].mxu1 }
0x2b20   :  { %v7439_v13 = vpack.c.bf16 %v7437_v6, %v7437_v6 }
0x2b22   :  { %v7450_v30 = vsel %vm852_vm4, %v7439_v13, 0 }
0x2b23   :  { %8799 = vmatpush3.bf16.msra.mxu0 %v7450_v30 }
0x2b24   :  { %8115 = vmatprep.subr.msk.bf16.mxu0 %vm852_vm4, %v13515_v12 }
0x2b26   :  { %8801 = vmatmul.mubr.msk.bf16.vlgmr.msra.gmra.mrb[132].mxu0 %vm1791_vm14, %v7438_v15 }
0x2b27   :  { %7544 = vmatpush1.bf16.msra.mxu0 %v13516_v11  ;;  %7575 = vmatprep.mubr.bf16.mxu0 %v13487_v43 }
0x2bf9   :  { %v7486_v56 = vpop.f32.mrb[132].mxu0 }
0x2bfa   :  { %v7487_v23 = vadd.f32 %v7486_v56, %v7444_v36  ;;  %v8802_v31 = vpop.f32.mrb[133].mxu0 }
0x2bfb   :  { %v7489_v8 = vpop.f32.mrb[134].mxu0 }
0x2bfc   :  { %v7492_v14 = vsub.f32 0.0, %v7487_v23  ;;  %v8803_v9 = vpop.f32.mrb[135].mxu0 }
0x2bfe   :  { %v7493_v4 = vmul.f32 1.442695, %v7492_v14 }
0x2c00   :  { %9225 = vpow2.f32 %v7493_v4 }
0x2c0a   :  { %v9226_v47 = vpop.eup %9225 }
0x2c0b   :  { %v7495_v59 = vadd.f32 1.0, %v9226_v47 }
0x2c0d   :  { %9227 = vrcp.f32 %v7495_v59 }
0x2c17   :  { %v9228_v62 = vpop.eup %9227 }
0x2c18   :  { %v7498_v39 = vpack.c.bf16 %v9228_v62, %v9228_v62 }
0x2c1a   :  { %8114 = vmatmul.mubr.msk.bf16.vlgmr.msra.gmra.mrb[160].mxu1 %vm1791_vm14, %v7498_v39  ;;  %8116 = vmatmul.mubr.msk.bf16.vlgmr.msra.gmra.mrb[136].mxu0 %vm1791_vm14, %v7498_v39 }
0x2c1b   :  { %7646 = vmatprep.mubr.bf16.mxu1 %v13487_v43  ;;  %7687 = vmatprep.mubr.bf16.mxu0 %v13487_v43 }
0x2ced   :  { %v7536_v53 = vpop.f32.mrb[160].mxu1  ;;  %v7577_v35 = vpop.f32.mrb[136].mxu0 }
0x2cee   :  { %v7584_v29 = vmul.f32 %v7536_v53, %v13183_v21  ;;  %v7586_v50 = vmul.f32 %v7577_v35, %v13187_v46  ;;  %v7538_v41 = vpop.f32.mrb[161].mxu1  ;;  %v7579_v18 = vpop.f32.mrb[137].mxu0  ;;  %v9936_v46 = vmov 1983009808  }
0x2cef   :  { %v7585_v27 = vmul.f32 %v7538_v41, %v13185_v51  ;;  %v7587_v42 = vmul.f32 %v7579_v18, %v13189_v24  ;;  %v7540_v1 = vpop.f32.mrb[162].mxu1  ;;  %v7581_v33 = vpop.f32.mrb[138].mxu0  ;;  %v7588_v51 = vld [vmem:[#allocation22] sm:$0x1]  ;;  %v7703_v24 = vunpack.c.l.s4 %v9936_v46 }
0x2cf0   :  { %v7589_v38 = vpack.c.bf16 %v7584_v29, %v7584_v29  ;;  %v7591_v63 = vpack.c.bf16 %v7586_v50, %v7586_v50  ;;  %v7541_v19 = vpop.f32.mrb[163].mxu1  ;;  %v7582_v5 = vpop.f32.mrb[139].mxu0 }
0x2cf1   :  { %v7590_v2 = vpack.c.bf16 %v7585_v27, %v7585_v27  ;;  %v7592_v43 = vpack.c.bf16 %v7587_v42, %v7587_v42  ;;  %v7704_v60 = vunpack.c.0.s8 %v7703_v24 }
0x2cf2   :  { %v7603_v20 = vsel %vm867_vm7, %v7589_v38, 0  ;;  %v7609_v21 = vsel %vm867_vm7, %v7591_v63, 0 }
0x2cf3   :  { %8117 = vmatprep.subr.msk.bf16.mxu1 %vm867_vm7, %v7590_v2  ;;  %8119 = vmatprep.subr.msk.bf16.mxu0 %vm867_vm7, %v7592_v43  ;;  %v7707_v25 = vsub.s32 %v7704_v60, %v13517_v40 }
0x2cf4   :  { %7615 = vmatpush1.bf16.msra.mxu1 %v7603_v20  ;;  %7656 = vmatpush1.bf16.msra.mxu0 %v7609_v21 }
0x2cf7   :  { %8118 = vmatmul.mubr.msk.bf16.vlgmr.msra.gmra.mrb[164].mxu1 %vm1735_vm13, %v7588_v51  ;;  %8120 = vmatmul.mubr.msk.bf16.vlgmr.msra.gmra.mrb[140].mxu0 %vm1735_vm13, %v7588_v51 }
0x2dca   :  { %v7648_v45 = vpop.f32.mrb[164].mxu1  ;;  %v7689_v58 = vpop.f32.mrb[140].mxu0 }
0x2dcb   :  { %v7649_v17 = vadd.f32 %v7648_v45, %v7597_v28  ;;  %v7690_v22 = vadd.f32 %v7689_v58, %v7597_v28  ;;  %v7650_v34 = vpop.f32.mrb[165].mxu1  ;;  %v7691_v10 = vpop.f32.mrb[141].mxu0 }
0x2dcc   :  { %v7651_v26 = vadd.f32 %v7650_v34, %v7597_v28  ;;  %v7692_v57 = vadd.f32 %v7691_v10, %v7597_v28  ;;  %v7652_v37 = vpop.f32.mrb[166].mxu1  ;;  %v7693_v0 = vpop.f32.mrb[142].mxu0 }
0x2dcd   :  { %v7653_v16 = vpop.f32.mrb[167].mxu1  ;;  %v7694_v49 = vpop.f32.mrb[143].mxu0 }
0x2dce   :  { %v7700_v7 = vcombine.low %v7649_v17, %v7651_v26  ;;  %v7701_v55 = vcombine.low %v7690_v22, %v7692_v57 }
0x2dd0   :  { %v7708_v61 = vrot.slane %v7700_v7, %v7707_v25  ;;  %v7715_v52 = vrot.slane %v7701_v55, %v7707_v25 }
0x2dd2   :  { %v7716_v3 = vcombine.low %v7708_v61, %v7715_v52 }
0x2dd4   :  { %7718 = vst [vmem:[%s10265_s4] sm:$0xff] %v7716_v3 }
0x2dd5   :  { %7723 = vsyncpa [#allocation3], 1 }
0x2dd6   :  { %7724 = vsyncpa [#allocation5], 1 }
0x2dd7   :  { %7725 = vsyncpa [#allocation8], 1 }
0x2dd8   :  { %7726 = vsyncpa [#allocation11], 1 }
0x2dd9   :  { %7727 = vsyncpa [#allocation14], 1 }
0x2dda   :  { %7728 = vsyncpa [#allocation17], 1 }
0x2ddb   :  { %7729 = vsyncpa [#allocation20], 1 }
0x2ddc   :  { %7730 = vsyncpa [#allocation23], 1 }
0x2ddd   :  { %7731 = vsyncpa [#allocation26], 1 }
0x2dde   :  { %7732 = vsyncpa [#allocation29], 1 }
0x2ddf   :  { %7733 = vsyncpa [#allocation32], 1 }
0x2de0   :  { %7734 = vsyncpa [#allocation35], 1 }
0x2de1   :  { %7735 = vsyncpa [#allocation38], 1 }

</bundles_post_ra>
